<compile_context>
chip_gen: v5e
topology: v5e:2x2
jax: 0.10.0
libtpu: 0.0.40
codegen_flags: <defaults>
</compile_context>

<pallas_src>
import functools

import numpy as np
import jax
import jax.numpy as jnp
from jax import lax
from jax.experimental import pallas as pl
from jax.experimental.pallas import tpu as pltpu

VMEM_LIMIT = 32 * 1024 * 1024  # safe on v5e/v6e (128 MiB) and v7x (64 MiB) VMEM


# ----------------------------------------------------------------------------
# Conv layer kernel: out(Cout, pblk) = W(Cout, 9*Cin) @ cols^T(9*Cin, pblk)
# fused with bias + ReLU.  Lane dim everywhere = pixel dim (dense).
# ----------------------------------------------------------------------------
def _conv_matmul_kernel(x_ref, w_ref, b_ref, o_ref):
    # x_ref: (1, K, pblk) bf16 im2col^T block for one batch element.
    # w_ref: (Cout, K) bf16.  b_ref: (Cout, 1) f32.  o_ref: (1, Cout, pblk) bf16.
    acc = jnp.dot(w_ref[...], x_ref[0], preferred_element_type=jnp.float32)
    o_ref[0] = jnp.maximum(acc + b_ref[...], 0.0).astype(o_ref.dtype)


def conv3x3_matmul(colsT, w, b, *, pblk):
    """One 3x3 conv (padding 1) as a transposed matmul.
    colsT: (B, 9*Cin, Ho*Wo) bf16 im2col^T, w: (Cout, 9*Cin) bf16,
    b: (Cout, 1) f32.  Returns (B, Cout, Ho*Wo) bf16 (lane-dense)."""
    B, K, P = colsT.shape
    Cout = w.shape[0]
    assert P % pblk == 0 and pblk % 128 == 0
    nblk = P // pblk
    flops = 2 * B * P * K * Cout
    bytes_accessed = (colsT.size + w.size + B * Cout * P) * 2 + b.size * 4
    return pl.pallas_call(
        _conv_matmul_kernel,
        out_shape=jax.ShapeDtypeStruct((B, Cout, P), jnp.bfloat16),
        grid=(B, nblk),
        in_specs=[
            pl.BlockSpec((1, K, pblk), lambda i, j: (i, 0, j)),
            pl.BlockSpec((Cout, K), lambda i, j: (0, 0)),
            pl.BlockSpec((Cout, 1), lambda i, j: (0, 0)),
        ],
        out_specs=pl.BlockSpec((1, Cout, pblk), lambda i, j: (i, 0, j)),
        compiler_params=pltpu.CompilerParams(
            dimension_semantics=("parallel", "parallel"),
            vmem_limit_bytes=VMEM_LIMIT),
        cost_estimate=pl.CostEstimate(
            flops=flops, transcendentals=0, bytes_accessed=bytes_accessed),
    )(colsT, w, b)


def im2col_T(x_nchw, stride):
    """XLA glue: (B, C, H, W) -> im2col^T (B, 9*C, Ho*Wo) with row index
    (kh*3 + kw)*C + c and lane-dense pixel columns (Ho*Wo multiple of 128)."""
    B, C, H, W = x_nchw.shape
    Ho, Wo = H // stride, W // stride
    xp = jnp.pad(x_nchw, ((0, 0), (0, 0), (1, 1), (1, 1)))
    slabs = [
        xp[:, :, kh:kh + stride * (Ho - 1) + 1:stride,
               kw:kw + stride * (Wo - 1) + 1:stride]
        for kh in range(3) for kw in range(3)
    ]
    cols = jnp.stack(slabs, axis=1)               # (B, 9, C, Ho, Wo)
    return cols.reshape(B, 9 * C, Ho * Wo)


# ----------------------------------------------------------------------------
# Fused head kernel: [mu | std] matmul (K streamed, lane-dense transposed
# weight), sigmoid, reparameterized sample, linear2+ReLU, linear3+sigmoid.
# ----------------------------------------------------------------------------
def _head_kernel(flat_ref, wh_ref, bh_ref, eps_ref, w2_ref, b2_ref,
                 w3_ref, b3_ref, mu_ref, std_ref, out_ref, acc_ref, *, nl):
    k = pl.program_id(0)

    @pl.when(k == 0)
    def _():
        acc_ref[...] = jnp.zeros_like(acc_ref)

    # NT contraction: flat (B, kb) x wh (H2, kb) -> (B, H2).  The weight stays
    # lane-dense in HBM/VMEM; the transpose rides the otherwise-idle XLU.
    acc_ref[...] += lax.dot_general(
        flat_ref[...], wh_ref[...],
        dimension_numbers=(((1,), (1,)), ((), ())),
        preferred_element_type=jnp.float32)

    @pl.when(k == pl.num_programs(0) - 1)
    def _():
        # Manual sigmoid (same formula as the reference; f32, saturates safely).
        y = acc_ref[...] + bh_ref[...]
        y = 1.0 / (1.0 + jnp.exp(-y))
        mu = y[:, :nl]
        std = y[:, nl:]
        z = mu + std * eps_ref[...]                      # reparameterized sample
        # linear2 + ReLU, linear3 + sigmoid with bf16 MXU operands, f32 accum.
        h = jnp.dot(z.astype(jnp.bfloat16), w2_ref[...],
                    preferred_element_type=jnp.float32) + b2_ref[...]
        h = jnp.maximum(h, 0.0)
        o = jnp.dot(h.astype(jnp.bfloat16), w3_ref[...],
                    preferred_element_type=jnp.float32) + b3_ref[...]
        o = 1.0 / (1.0 + jnp.exp(-o))
        mu_ref[...] = mu
        std_ref[...] = std
        out_ref[...] = o


def fused_head(flat, wh, bh, eps, w2, b2, w3, b3, *, k_split=4):
    B, K = flat.shape
    H2, Kw = wh.shape
    assert Kw == K and K % k_split == 0
    nl = H2 // 2
    no = w2.shape[1]
    kb = K // k_split
    kernel = functools.partial(_head_kernel, nl=nl)
    flops = 2 * B * K * H2 + 2 * B * nl * no + 2 * B * no * no
    bytes_accessed = (flat.size + wh.size + w2.size + w3.size) * 2 \
        + (eps.size + bh.size + b2.size + b3.size + B * (2 * nl + no)) * 4
    return pl.pallas_call(
        kernel,
        out_shape=(jax.ShapeDtypeStruct((B, nl), jnp.float32),
                   jax.ShapeDtypeStruct((B, nl), jnp.float32),
                   jax.ShapeDtypeStruct((B, no), jnp.float32)),
        grid=(k_split,),
        in_specs=[
            pl.BlockSpec((B, kb), lambda k: (0, k)),       # flat (streamed over K)
            pl.BlockSpec((H2, kb), lambda k: (0, k)),      # [w_mu; w_std]^T stream
            pl.BlockSpec((1, H2), lambda k: (0, 0)),       # [b_mu | b_std]
            pl.BlockSpec((B, nl), lambda k: (0, 0)),       # eps
            pl.BlockSpec((nl, no), lambda k: (0, 0)),      # linear2 weight
            pl.BlockSpec((1, no), lambda k: (0, 0)),       # linear2 bias
            pl.BlockSpec((no, no), lambda k: (0, 0)),      # linear3 weight
            pl.BlockSpec((1, no), lambda k: (0, 0)),       # linear3 bias
        ],
        out_specs=(pl.BlockSpec((B, nl), lambda k: (0, 0)),
                   pl.BlockSpec((B, nl), lambda k: (0, 0)),
                   pl.BlockSpec((B, no), lambda k: (0, 0))),
        scratch_shapes=[pltpu.VMEM((B, H2), jnp.float32)],
        compiler_params=pltpu.CompilerParams(
            dimension_semantics=("arbitrary",),
            vmem_limit_bytes=VMEM_LIMIT),
        cost_estimate=pl.CostEstimate(
            flops=flops, transcendentals=B * (H2 + no),
            bytes_accessed=bytes_accessed),
    )(flat, wh, bh, eps, w2, b2, w3, b3)


# ----------------------------------------------------------------------------
# Parameters (PyTorch layout) + one-time conversion to kernel layout
# ----------------------------------------------------------------------------
def init_params(key, num_latents, num_outputs):
    """PyTorch-convention params: Conv2d (Cout, Cin, 3, 3); Linear (out, in)."""
    ks = jax.random.split(key, 14)

    def u(k, shape, fan_in):
        bound = 1.0 / np.sqrt(fan_in)
        return jax.random.uniform(k, shape, jnp.float32, -bound, bound)

    p = {}
    p["conv1_w"] = u(ks[0], (32, 3, 3, 3), 3 * 9)
    p["conv1_b"] = u(ks[1], (32,), 3 * 9)
    p["conv2_w"] = u(ks[2], (64, 32, 3, 3), 32 * 9)
    p["conv2_b"] = u(ks[3], (64,), 32 * 9)
    p["conv3_w"] = u(ks[4], (128, 64, 3, 3), 64 * 9)
    p["conv3_b"] = u(ks[5], (128,), 64 * 9)
    fin = 128 * 16 * 16
    p["lin_mu_w"] = u(ks[6], (num_latents, fin), fin)
    p["lin_mu_b"] = u(ks[7], (num_latents,), fin)
    p["lin_std_w"] = u(ks[8], (num_latents, fin), fin)
    p["lin_std_b"] = u(ks[9], (num_latents,), fin)
    p["lin2_w"] = u(ks[10], (num_outputs, num_latents), num_latents)
    p["lin2_b"] = u(ks[11], (num_outputs,), num_latents)
    p["lin3_w"] = u(ks[12], (num_outputs, num_outputs), num_outputs)
    p["lin3_b"] = u(ks[13], (num_outputs,), num_outputs)
    return p


def prepare_kernel_params(p):
    """One-time conversion: conv weights (Cout, 9*Cin) with column index
    (kh*3+kw)*Cin+ci; head weight transposed (2*nl, 32768) lane-dense (the
    conv output is already in NCHW-flatten order so torch rows are used
    as-is); matmul weights bf16, biases f32."""
    def conv_w(w):                       # (Cout, Cin, 3, 3) -> (Cout, 9*Cin)
        cout = w.shape[0]
        return jnp.transpose(w, (0, 2, 3, 1)).reshape(cout, -1).astype(jnp.bfloat16)

    q = {}
    q["w1"], q["b1"] = conv_w(p["conv1_w"]), p["conv1_b"].reshape(-1, 1)
    q["w2"], q["b2"] = conv_w(p["conv2_w"]), p["conv2_b"].reshape(-1, 1)
    q["w3"], q["b3"] = conv_w(p["conv3_w"]), p["conv3_b"].reshape(-1, 1)
    q["w_head"] = jnp.concatenate(
        [p["lin_mu_w"], p["lin_std_w"]], axis=0).astype(jnp.bfloat16)   # (64, 32768)
    q["b_head"] = jnp.concatenate([p["lin_mu_b"], p["lin_std_b"]]).reshape(1, -1)
    q["w2l"] = p["lin2_w"].T.astype(jnp.bfloat16)
    q["b2l"] = p["lin2_b"].reshape(1, -1)
    q["w3l"] = p["lin3_w"].T.astype(jnp.bfloat16)
    q["b3l"] = p["lin3_b"].reshape(1, -1)
    return q


# ----------------------------------------------------------------------------
# Policy forward path using the Pallas kernels
# ----------------------------------------------------------------------------
def policy_forward(x_nchw, q, eps):
    B = x_nchw.shape[0]
    x = x_nchw.astype(jnp.bfloat16)

    h = conv3x3_matmul(im2col_T(x, 1), q["w1"], q["b1"], pblk=1024)   # (B, 32, 4096)
    h = conv3x3_matmul(im2col_T(h.reshape(B, 32, 64, 64), 2),
                       q["w2"], q["b2"], pblk=512)                    # (B, 64, 1024)
    h = conv3x3_matmul(im2col_T(h.reshape(B, 64, 32, 32), 2),
                       q["w3"], q["b3"], pblk=128)                    # (B, 128, 256)

    flat = h.reshape(B, 128 * 256)   # == PyTorch x.view(-1, 128*16*16) (NCHW order)
    return fused_head(flat, q["w_head"], q["b_head"], eps,
                      q["w2l"], q["b2l"], q["w3l"], q["b3l"])


# ----------------------------------------------------------------------------
# Reference: faithful PyTorch-convention path (NCHW conv, NCHW flatten),
# evaluated at the same bf16 storage/operand precision as the Pallas path.
# ----------------------------------------------------------------------------
def _bf16(v):
    return v.astype(jnp.bfloat16).astype(jnp.float32)


def policy_reference(x_nchw, p, eps):
    HI = lax.Precision.HIGHEST

    def conv(x, w, b, stride):
        y = lax.conv_general_dilated(
            x, _bf16(w), (stride, stride), ((1, 1), (1, 1)),
            dimension_numbers=("NCHW", "OIHW", "NCHW"), precision=HI)
        return _bf16(jnp.maximum(y + b[None, :, None, None], 0.0))

    sig = lambda v: 1.0 / (1.0 + jnp.exp(-v))
    x = _bf16(x_nchw)
    h = conv(x, p["conv1_w"], p["conv1_b"], 1)
    h = conv(h, p["conv2_w"], p["conv2_b"], 2)
    h = conv(h, p["conv3_w"], p["conv3_b"], 2)
    flat = h.reshape(x.shape[0], 128 * 16 * 16)          # PyTorch .view (NCHW flatten)
    mu = sig(jnp.dot(flat, _bf16(p["lin_mu_w"]).T, precision=HI) + p["lin_mu_b"])
    std = sig(jnp.dot(flat, _bf16(p["lin_std_w"]).T, precision=HI) + p["lin_std_b"])
    z = mu + std * eps
    h2 = jnp.maximum(jnp.dot(_bf16(z), _bf16(p["lin2_w"]).T, precision=HI)
                     + p["lin2_b"], 0.0)
    out = sig(jnp.dot(_bf16(h2), _bf16(p["lin3_w"]).T, precision=HI) + p["lin3_b"])
    return mu, std, out


if __name__ == "__main__":
    num_latents, num_outputs = 32, 8
    batch = 2
    # 64x64 input is required by the architecture (conv3 output must be 128x16x16
    # to match linear1's 128*16*16 input).
    key = jax.random.PRNGKey(0)
    k_x, k_p, k_eps = jax.random.split(key, 3)
    x = jax.random.uniform(k_x, (batch, 3, 64, 64), jnp.float32)
    params = init_params(k_p, num_latents, num_outputs)
    eps = jax.random.normal(k_eps, (batch, num_latents), jnp.float32)

    kparams = prepare_kernel_params(params)
    fwd = jax.jit(policy_forward)
    mu, std, out = fwd(x, kparams, eps)
    jax.block_until_ready((mu, std, out))

    mu_r, std_r, out_r = policy_reference(x, params, eps)
    np.testing.assert_allclose(np.array(mu), np.array(mu_r), rtol=2e-3, atol=2e-3)
    np.testing.assert_allclose(np.array(std), np.array(std_r), rtol=2e-3, atol=2e-3)
    np.testing.assert_allclose(np.array(out), np.array(out_r), rtol=2e-3, atol=2e-3)

    print("KERNEL_OK")
</pallas_src>

<mosaic_0001>
module attributes {stable_mosaic.version = 11 : i64} {
  func.func @_conv_matmul_kernel(%arg0: i32, %arg1: i32, %arg2: memref<1x27x1024xbf16, #tpu.memory_space<vmem>>, %arg3: memref<32x27xbf16, #tpu.memory_space<vmem>>, %arg4: memref<32x1xf32, #tpu.memory_space<vmem>>, %arg5: memref<1x32x1024xbf16, #tpu.memory_space<vmem>>) attributes {dimension_semantics = [#tpu.dimension_semantics<parallel>, #tpu.dimension_semantics<parallel>], iteration_bounds = array<i64: 2, 4>, scalar_prefetch = 0 : i64, scratch_operands = 0 : i64, tpu.core_type = #tpu.core_type<tc>, window_params = [{transform_indices = @transform_0, window_bounds = array<i64: 1, 27, 1024>}, {pipeline_mode = #tpu.pipeline_mode<synchronous>, transform_indices = @transform_1, window_bounds = array<i64: 32, 27>}, {pipeline_mode = #tpu.pipeline_mode<synchronous>, transform_indices = @transform_2, window_bounds = array<i64: 32, 1>}, {transform_indices = @transform_3, window_bounds = array<i64: 1, 32, 1024>}]} {
    %c0 = arith.constant 0 : index
    %c0_0 = arith.constant 0 : index
    %0 = vector.load %arg3[%c0, %c0_0] : memref<32x27xbf16, #tpu.memory_space<vmem>>, vector<32x27xbf16>
    %c0_1 = arith.constant 0 : index
    %c0_2 = arith.constant 0 : index
    %c0_3 = arith.constant 0 : index
    %1 = vector.load %arg2[%c0_1, %c0_2, %c0_3] : memref<1x27x1024xbf16, #tpu.memory_space<vmem>>, vector<1x27x1024xbf16>
    %2 = vector.shape_cast %1 : vector<1x27x1024xbf16> to vector<27x1024xbf16>
    %cst = arith.constant dense<0.000000e+00> : vector<32x1024xf32>
    %3 = tpu.matmul %0, %2, %cst {dimension_numbers = #tpu.dot_dimension_numbers<[1], [0], [0], [1], [0, 0, 1, 1], [], []>} : vector<32x27xbf16>, vector<27x1024xbf16>, vector<32x1024xf32> -> vector<32x1024xf32>
    %c0_4 = arith.constant 0 : index
    %c0_5 = arith.constant 0 : index
    %4 = vector.load %arg4[%c0_4, %c0_5] : memref<32x1xf32, #tpu.memory_space<vmem>>, vector<32x1xf32>
    %5 = vector.broadcast %4 : vector<32x1xf32> to vector<32x1024xf32>
    %6 = arith.addf %3, %5 : vector<32x1024xf32>
    %cst_6 = arith.constant 0.000000e+00 : f32
    %7 = vector.broadcast %cst_6 : f32 to vector<32x1024xf32>
    %8 = arith.maximumf %6, %7 : vector<32x1024xf32>
    %9 = arith.truncf %8 : vector<32x1024xf32> to vector<32x1024xbf16>
    %c0_7 = arith.constant 0 : index
    %c0_8 = arith.constant 0 : index
    %c0_9 = arith.constant 0 : index
    %10 = vector.load %arg5[%c0_7, %c0_8, %c0_9] : memref<1x32x1024xbf16, #tpu.memory_space<vmem>>, vector<1x32x1024xbf16>
    %11 = vector.shape_cast %10 : vector<1x32x1024xbf16> to vector<32x1024xbf16>
    %12 = vector.shape_cast %9 : vector<32x1024xbf16> to vector<1x32x1024xbf16>
    tpu.vector_store %arg5[%c0_7, %c0_8, %c0_9], %12 {strides = array<i32>} : memref<1x32x1024xbf16, #tpu.memory_space<vmem>>, vector<1x32x1024xbf16>,
    return
  }
  func.func @transform_0(%arg0: i32, %arg1: i32) -> (i32, i32, i32) {
    %c0_i32 = arith.constant 0 : i32
    %c0_i32_0 = arith.constant 0 : i32
    return %arg0, %c0_i32, %arg1 : i32, i32, i32
  }
  func.func @transform_1(%arg0: i32, %arg1: i32) -> (i32, i32) {
    %c0_i32 = arith.constant 0 : i32
    %c0_i32_0 = arith.constant 0 : i32
    %c0_i32_1 = arith.constant 0 : i32
    return %c0_i32, %c0_i32_0 : i32, i32
  }
  func.func @transform_2(%arg0: i32, %arg1: i32) -> (i32, i32) {
    %c0_i32 = arith.constant 0 : i32
    %c0_i32_0 = arith.constant 0 : i32
    %c0_i32_1 = arith.constant 0 : i32
    return %c0_i32, %c0_i32_0 : i32, i32
  }
  func.func @transform_3(%arg0: i32, %arg1: i32) -> (i32, i32, i32) {
    %c0_i32 = arith.constant 0 : i32
    %c0_i32_0 = arith.constant 0 : i32
    return %arg0, %c0_i32, %arg1 : i32, i32, i32
  }
}

module attributes {stable_mosaic.version = 11 : i64} {
  func.func @_conv_matmul_kernel(%arg0: i32, %arg1: i32, %arg2: memref<1x288x512xbf16, #tpu.memory_space<vmem>>, %arg3: memref<64x288xbf16, #tpu.memory_space<vmem>>, %arg4: memref<64x1xf32, #tpu.memory_space<vmem>>, %arg5: memref<1x64x512xbf16, #tpu.memory_space<vmem>>) attributes {dimension_semantics = [#tpu.dimension_semantics<parallel>, #tpu.dimension_semantics<parallel>], iteration_bounds = array<i64: 2, 2>, scalar_prefetch = 0 : i64, scratch_operands = 0 : i64, tpu.core_type = #tpu.core_type<tc>, window_params = [{transform_indices = @transform_0, window_bounds = array<i64: 1, 288, 512>}, {pipeline_mode = #tpu.pipeline_mode<synchronous>, transform_indices = @transform_1, window_bounds = array<i64: 64, 288>}, {pipeline_mode = #tpu.pipeline_mode<synchronous>, transform_indices = @transform_2, window_bounds = array<i64: 64, 1>}, {transform_indices = @transform_3, window_bounds = array<i64: 1, 64, 512>}]} {
    %c0 = arith.constant 0 : index
    %c0_0 = arith.constant 0 : index
    %0 = vector.load %arg3[%c0, %c0_0] : memref<64x288xbf16, #tpu.memory_space<vmem>>, vector<64x288xbf16>
    %c0_1 = arith.constant 0 : index
    %c0_2 = arith.constant 0 : index
    %c0_3 = arith.constant 0 : index
    %1 = vector.load %arg2[%c0_1, %c0_2, %c0_3] : memref<1x288x512xbf16, #tpu.memory_space<vmem>>, vector<1x288x512xbf16>
    %2 = vector.shape_cast %1 : vector<1x288x512xbf16> to vector<288x512xbf16>
    %cst = arith.constant dense<0.000000e+00> : vector<64x512xf32>
    %3 = tpu.matmul %0, %2, %cst {dimension_numbers = #tpu.dot_dimension_numbers<[1], [0], [0], [1], [0, 0, 1, 1], [], []>} : vector<64x288xbf16>, vector<288x512xbf16>, vector<64x512xf32> -> vector<64x512xf32>
    %c0_4 = arith.constant 0 : index
    %c0_5 = arith.constant 0 : index
    %4 = vector.load %arg4[%c0_4, %c0_5] : memref<64x1xf32, #tpu.memory_space<vmem>>, vector<64x1xf32>
    %5 = vector.broadcast %4 : vector<64x1xf32> to vector<64x512xf32>
    %6 = arith.addf %3, %5 : vector<64x512xf32>
    %cst_6 = arith.constant 0.000000e+00 : f32
    %7 = vector.broadcast %cst_6 : f32 to vector<64x512xf32>
    %8 = arith.maximumf %6, %7 : vector<64x512xf32>
    %9 = arith.truncf %8 : vector<64x512xf32> to vector<64x512xbf16>
    %c0_7 = arith.constant 0 : index
    %c0_8 = arith.constant 0 : index
    %c0_9 = arith.constant 0 : index
    %10 = vector.load %arg5[%c0_7, %c0_8, %c0_9] : memref<1x64x512xbf16, #tpu.memory_space<vmem>>, vector<1x64x512xbf16>
    %11 = vector.shape_cast %10 : vector<1x64x512xbf16> to vector<64x512xbf16>
    %12 = vector.shape_cast %9 : vector<64x512xbf16> to vector<1x64x512xbf16>
    tpu.vector_store %arg5[%c0_7, %c0_8, %c0_9], %12 {strides = array<i32>} : memref<1x64x512xbf16, #tpu.memory_space<vmem>>, vector<1x64x512xbf16>,
    return
  }
  func.func @transform_0(%arg0: i32, %arg1: i32) -> (i32, i32, i32) {
    %c0_i32 = arith.constant 0 : i32
    %c0_i32_0 = arith.constant 0 : i32
    return %arg0, %c0_i32, %arg1 : i32, i32, i32
  }
  func.func @transform_1(%arg0: i32, %arg1: i32) -> (i32, i32) {
    %c0_i32 = arith.constant 0 : i32
    %c0_i32_0 = arith.constant 0 : i32
    %c0_i32_1 = arith.constant 0 : i32
    return %c0_i32, %c0_i32_0 : i32, i32
  }
  func.func @transform_2(%arg0: i32, %arg1: i32) -> (i32, i32) {
    %c0_i32 = arith.constant 0 : i32
    %c0_i32_0 = arith.constant 0 : i32
    %c0_i32_1 = arith.constant 0 : i32
    return %c0_i32, %c0_i32_0 : i32, i32
  }
  func.func @transform_3(%arg0: i32, %arg1: i32) -> (i32, i32, i32) {
    %c0_i32 = arith.constant 0 : i32
    %c0_i32_0 = arith.constant 0 : i32
    return %arg0, %c0_i32, %arg1 : i32, i32, i32
  }
}

module attributes {stable_mosaic.version = 11 : i64} {
  func.func @_conv_matmul_kernel(%arg0: i32, %arg1: i32, %arg2: memref<1x576x128xbf16, #tpu.memory_space<vmem>>, %arg3: memref<128x576xbf16, #tpu.memory_space<vmem>>, %arg4: memref<128x1xf32, #tpu.memory_space<vmem>>, %arg5: memref<1x128x128xbf16, #tpu.memory_space<vmem>>) attributes {dimension_semantics = [#tpu.dimension_semantics<parallel>, #tpu.dimension_semantics<parallel>], iteration_bounds = array<i64: 2, 2>, scalar_prefetch = 0 : i64, scratch_operands = 0 : i64, tpu.core_type = #tpu.core_type<tc>, window_params = [{transform_indices = @transform_0, window_bounds = array<i64: 1, 576, 128>}, {pipeline_mode = #tpu.pipeline_mode<synchronous>, transform_indices = @transform_1, window_bounds = array<i64: 128, 576>}, {pipeline_mode = #tpu.pipeline_mode<synchronous>, transform_indices = @transform_2, window_bounds = array<i64: 128, 1>}, {transform_indices = @transform_3, window_bounds = array<i64: 1, 128, 128>}]} {
    %c0 = arith.constant 0 : index
    %c0_0 = arith.constant 0 : index
    %0 = vector.load %arg3[%c0, %c0_0] : memref<128x576xbf16, #tpu.memory_space<vmem>>, vector<128x576xbf16>
    %c0_1 = arith.constant 0 : index
    %c0_2 = arith.constant 0 : index
    %c0_3 = arith.constant 0 : index
    %1 = vector.load %arg2[%c0_1, %c0_2, %c0_3] : memref<1x576x128xbf16, #tpu.memory_space<vmem>>, vector<1x576x128xbf16>
    %2 = vector.shape_cast %1 : vector<1x576x128xbf16> to vector<576x128xbf16>
    %cst = arith.constant dense<0.000000e+00> : vector<128x128xf32>
    %3 = tpu.matmul %0, %2, %cst {dimension_numbers = #tpu.dot_dimension_numbers<[1], [0], [0], [1], [0, 0, 1, 1], [], []>} : vector<128x576xbf16>, vector<576x128xbf16>, vector<128x128xf32> -> vector<128x128xf32>
    %c0_4 = arith.constant 0 : index
    %c0_5 = arith.constant 0 : index
    %4 = vector.load %arg4[%c0_4, %c0_5] : memref<128x1xf32, #tpu.memory_space<vmem>>, vector<128x1xf32>
    %5 = vector.broadcast %4 : vector<128x1xf32> to vector<128x128xf32>
    %6 = arith.addf %3, %5 : vector<128x128xf32>
    %cst_6 = arith.constant 0.000000e+00 : f32
    %7 = vector.broadcast %cst_6 : f32 to vector<128x128xf32>
    %8 = arith.maximumf %6, %7 : vector<128x128xf32>
    %9 = arith.truncf %8 : vector<128x128xf32> to vector<128x128xbf16>
    %c0_7 = arith.constant 0 : index
    %c0_8 = arith.constant 0 : index
    %c0_9 = arith.constant 0 : index
    %10 = vector.load %arg5[%c0_7, %c0_8, %c0_9] : memref<1x128x128xbf16, #tpu.memory_space<vmem>>, vector<1x128x128xbf16>
    %11 = vector.shape_cast %10 : vector<1x128x128xbf16> to vector<128x128xbf16>
    %12 = vector.shape_cast %9 : vector<128x128xbf16> to vector<1x128x128xbf16>
    tpu.vector_store %arg5[%c0_7, %c0_8, %c0_9], %12 {strides = array<i32>} : memref<1x128x128xbf16, #tpu.memory_space<vmem>>, vector<1x128x128xbf16>,
    return
  }
  func.func @transform_0(%arg0: i32, %arg1: i32) -> (i32, i32, i32) {
    %c0_i32 = arith.constant 0 : i32
    %c0_i32_0 = arith.constant 0 : i32
    return %arg0, %c0_i32, %arg1 : i32, i32, i32
  }
  func.func @transform_1(%arg0: i32, %arg1: i32) -> (i32, i32) {
    %c0_i32 = arith.constant 0 : i32
    %c0_i32_0 = arith.constant 0 : i32
    %c0_i32_1 = arith.constant 0 : i32
    return %c0_i32, %c0_i32_0 : i32, i32
  }
  func.func @transform_2(%arg0: i32, %arg1: i32) -> (i32, i32) {
    %c0_i32 = arith.constant 0 : i32
    %c0_i32_0 = arith.constant 0 : i32
    %c0_i32_1 = arith.constant 0 : i32
    return %c0_i32, %c0_i32_0 : i32, i32
  }
  func.func @transform_3(%arg0: i32, %arg1: i32) -> (i32, i32, i32) {
    %c0_i32 = arith.constant 0 : i32
    %c0_i32_0 = arith.constant 0 : i32
    return %arg0, %c0_i32, %arg1 : i32, i32, i32
  }
}

module attributes {stable_mosaic.version = 11 : i64} {
  func.func @_head_kernel(%arg0: i32, %arg1: memref<2x8192xbf16, #tpu.memory_space<vmem>>, %arg2: memref<64x8192xbf16, #tpu.memory_space<vmem>>, %arg3: memref<1x64xf32, #tpu.memory_space<vmem>>, %arg4: memref<2x32xf32, #tpu.memory_space<vmem>>, %arg5: memref<32x8xbf16, #tpu.memory_space<vmem>>, %arg6: memref<1x8xf32, #tpu.memory_space<vmem>>, %arg7: memref<8x8xbf16, #tpu.memory_space<vmem>>, %arg8: memref<1x8xf32, #tpu.memory_space<vmem>>, %arg9: memref<2x32xf32, #tpu.memory_space<vmem>>, %arg10: memref<2x32xf32, #tpu.memory_space<vmem>>, %arg11: memref<2x8xf32, #tpu.memory_space<vmem>>, %arg12: memref<2x64xf32, #tpu.memory_space<vmem>>) attributes {dimension_semantics = [#tpu.dimension_semantics<arbitrary>], iteration_bounds = array<i64: 4>, scalar_prefetch = 0 : i64, scratch_operands = 1 : i64, tpu.core_type = #tpu.core_type<tc>, window_params = [{transform_indices = @transform_0, window_bounds = array<i64: 2, 8192>}, {transform_indices = @transform_1, window_bounds = array<i64: 64, 8192>}, {pipeline_mode = #tpu.pipeline_mode<synchronous>, transform_indices = @transform_2, window_bounds = array<i64: 1, 64>}, {pipeline_mode = #tpu.pipeline_mode<synchronous>, transform_indices = @transform_3, window_bounds = array<i64: 2, 32>}, {pipeline_mode = #tpu.pipeline_mode<synchronous>, transform_indices = @transform_4, window_bounds = array<i64: 32, 8>}, {pipeline_mode = #tpu.pipeline_mode<synchronous>, transform_indices = @transform_5, window_bounds = array<i64: 1, 8>}, {pipeline_mode = #tpu.pipeline_mode<synchronous>, transform_indices = @transform_6, window_bounds = array<i64: 8, 8>}, {pipeline_mode = #tpu.pipeline_mode<synchronous>, transform_indices = @transform_7, window_bounds = array<i64: 1, 8>}, {pipeline_mode = #tpu.pipeline_mode<synchronous>, transform_indices = @transform_8, window_bounds = array<i64: 2, 32>}, {pipeline_mode = #tpu.pipeline_mode<synchronous>, transform_indices = @transform_9, window_bounds = array<i64: 2, 32>}, {pipeline_mode = #tpu.pipeline_mode<synchronous>, transform_indices = @transform_10, window_bounds = array<i64: 2, 8>}]} {
    %c0_i32 = arith.constant 0 : i32
    %0 = arith.cmpi eq, %arg0, %c0_i32 : i32
    %1 = arith.extui %0 : i1 to i32
    %c0_i32_0 = arith.constant 0 : i32
    %2 = arith.cmpi ne, %1, %c0_i32_0 : i32
    scf.if %2 {
      %cst_9 = arith.constant 0.000000e+00 : f32
      %12 = vector.broadcast %cst_9 : f32 to vector<2x64xf32>
      %c0_10 = arith.constant 0 : index
      %c0_11 = arith.constant 0 : index
      %13 = vector.load %arg12[%c0_10, %c0_11] : memref<2x64xf32, #tpu.memory_space<vmem>>, vector<2x64xf32>
      tpu.vector_store %arg12[%c0_10, %c0_11], %12 {strides = array<i32>} : memref<2x64xf32, #tpu.memory_space<vmem>>, vector<2x64xf32>,
    } else {
    }
    %c0 = arith.constant 0 : index
    %c0_1 = arith.constant 0 : index
    %3 = vector.load %arg12[%c0, %c0_1] : memref<2x64xf32, #tpu.memory_space<vmem>>, vector<2x64xf32>
    %c0_2 = arith.constant 0 : index
    %c0_3 = arith.constant 0 : index
    %4 = vector.load %arg1[%c0_2, %c0_3] : memref<2x8192xbf16, #tpu.memory_space<vmem>>, vector<2x8192xbf16>
    %c0_4 = arith.constant 0 : index
    %c0_5 = arith.constant 0 : index
    %5 = vector.load %arg2[%c0_4, %c0_5] : memref<64x8192xbf16, #tpu.memory_space<vmem>>, vector<64x8192xbf16>
    %cst = arith.constant dense<0.000000e+00> : vector<2x64xf32>
    %6 = tpu.matmul %4, %5, %cst {dimension_numbers = #tpu.dot_dimension_numbers<[1], [1], [0], [0], [0, 0, 1, 0], [], []>} : vector<2x8192xbf16>, vector<64x8192xbf16>, vector<2x64xf32> -> vector<2x64xf32>
    %7 = arith.addf %3, %6 : vector<2x64xf32>
    %c0_6 = arith.constant 0 : index
    %c0_7 = arith.constant 0 : index
    %8 = vector.load %arg12[%c0_6, %c0_7] : memref<2x64xf32, #tpu.memory_space<vmem>>, vector<2x64xf32>
    tpu.vector_store %arg12[%c0_6, %c0_7], %7 {strides = array<i32>} : memref<2x64xf32, #tpu.memory_space<vmem>>, vector<2x64xf32>,
    %c3_i32 = arith.constant 3 : i32
    %9 = arith.cmpi eq, %arg0, %c3_i32 : i32
    %10 = arith.extui %9 : i1 to i32
    %c0_i32_8 = arith.constant 0 : i32
    %11 = arith.cmpi ne, %10, %c0_i32_8 : i32
    scf.if %11 {
      %c0_9 = arith.constant 0 : index
      %c0_10 = arith.constant 0 : index
      %12 = vector.load %arg12[%c0_9, %c0_10] : memref<2x64xf32, #tpu.memory_space<vmem>>, vector<2x64xf32>
      %c0_11 = arith.constant 0 : index
      %c0_12 = arith.constant 0 : index
      %13 = vector.load %arg3[%c0_11, %c0_12] : memref<1x64xf32, #tpu.memory_space<vmem>>, vector<1x64xf32>
      %14 = vector.broadcast %13 : vector<1x64xf32> to vector<2x64xf32>
      %15 = arith.addf %12, %14 : vector<2x64xf32>
      %cst_13 = arith.constant 0.000000e+00 : f32
      %16 = vector.broadcast %cst_13 : f32 to vector<2x64xf32>
      %17 = arith.subf %16, %15 : vector<2x64xf32>
      %18 = math.exp %17 : vector<2x64xf32>
      %cst_14 = arith.constant 1.000000e+00 : f32
      %19 = vector.broadcast %cst_14 : f32 to vector<2x64xf32>
      %20 = arith.addf %19, %18 : vector<2x64xf32>
      %cst_15 = arith.constant 1.000000e+00 : f32
      %21 = vector.broadcast %cst_15 : f32 to vector<2x64xf32>
      %22 = arith.divf %21, %20 : vector<2x64xf32>
      %23 = vector.extract_strided_slice %22 {offsets = [0, 0], sizes = [2, 32], strides = [1, 1]} : vector<2x64xf32> to vector<2x32xf32>
      %24 = vector.extract_strided_slice %22 {offsets = [0, 32], sizes = [2, 32], strides = [1, 1]} : vector<2x64xf32> to vector<2x32xf32>
      %c0_16 = arith.constant 0 : index
      %c0_17 = arith.constant 0 : index
      %25 = vector.load %arg4[%c0_16, %c0_17] : memref<2x32xf32, #tpu.memory_space<vmem>>, vector<2x32xf32>
      %26 = arith.mulf %24, %25 : vector<2x32xf32>
      %27 = arith.addf %23, %26 : vector<2x32xf32>
      %28 = arith.truncf %27 : vector<2x32xf32> to vector<2x32xbf16>
      %c0_18 = arith.constant 0 : index
      %c0_19 = arith.constant 0 : index
      %29 = vector.load %arg5[%c0_18, %c0_19] : memref<32x8xbf16, #tpu.memory_space<vmem>>, vector<32x8xbf16>
      %cst_20 = arith.constant dense<0.000000e+00> : vector<2x8xf32>
      %30 = tpu.matmul %28, %29, %cst_20 {dimension_numbers = #tpu.dot_dimension_numbers<[1], [0], [0], [1], [0, 0, 1, 1], [], []>} : vector<2x32xbf16>, vector<32x8xbf16>, vector<2x8xf32> -> vector<2x8xf32>
      %c0_21 = arith.constant 0 : index
      %c0_22 = arith.constant 0 : index
      %31 = vector.load %arg6[%c0_21, %c0_22] : memref<1x8xf32, #tpu.memory_space<vmem>>, vector<1x8xf32>
      %32 = vector.broadcast %31 : vector<1x8xf32> to vector<2x8xf32>
      %33 = arith.addf %30, %32 : vector<2x8xf32>
      %cst_23 = arith.constant 0.000000e+00 : f32
      %34 = vector.broadcast %cst_23 : f32 to vector<2x8xf32>
      %35 = arith.maximumf %33, %34 : vector<2x8xf32>
      %36 = arith.truncf %35 : vector<2x8xf32> to vector<2x8xbf16>
      %c0_24 = arith.constant 0 : index
      %c0_25 = arith.constant 0 : index
      %37 = vector.load %arg7[%c0_24, %c0_25] : memref<8x8xbf16, #tpu.memory_space<vmem>>, vector<8x8xbf16>
      %cst_26 = arith.constant dense<0.000000e+00> : vector<2x8xf32>
      %38 = tpu.matmul %36, %37, %cst_26 {dimension_numbers = #tpu.dot_dimension_numbers<[1], [0], [0], [1], [0, 0, 1, 1], [], []>} : vector<2x8xbf16>, vector<8x8xbf16>, vector<2x8xf32> -> vector<2x8xf32>
      %c0_27 = arith.constant 0 : index
      %c0_28 = arith.constant 0 : index
      %39 = vector.load %arg8[%c0_27, %c0_28] : memref<1x8xf32, #tpu.memory_space<vmem>>, vector<1x8xf32>
      %40 = vector.broadcast %39 : vector<1x8xf32> to vector<2x8xf32>
      %41 = arith.addf %38, %40 : vector<2x8xf32>
      %cst_29 = arith.constant 0.000000e+00 : f32
      %42 = vector.broadcast %cst_29 : f32 to vector<2x8xf32>
      %43 = arith.subf %42, %41 : vector<2x8xf32>
      %44 = math.exp %43 : vector<2x8xf32>
      %cst_30 = arith.constant 1.000000e+00 : f32
      %45 = vector.broadcast %cst_30 : f32 to vector<2x8xf32>
      %46 = arith.addf %45, %44 : vector<2x8xf32>
      %cst_31 = arith.constant 1.000000e+00 : f32
      %47 = vector.broadcast %cst_31 : f32 to vector<2x8xf32>
      %48 = arith.divf %47, %46 : vector<2x8xf32>
      %c0_32 = arith.constant 0 : index
      %c0_33 = arith.constant 0 : index
      %49 = vector.load %arg9[%c0_32, %c0_33] : memref<2x32xf32, #tpu.memory_space<vmem>>, vector<2x32xf32>
      tpu.vector_store %arg9[%c0_32, %c0_33], %23 {strides = array<i32>} : memref<2x32xf32, #tpu.memory_space<vmem>>, vector<2x32xf32>,
      %c0_34 = arith.constant 0 : index
      %c0_35 = arith.constant 0 : index
      %50 = vector.load %arg10[%c0_34, %c0_35] : memref<2x32xf32, #tpu.memory_space<vmem>>, vector<2x32xf32>
      tpu.vector_store %arg10[%c0_34, %c0_35], %24 {strides = array<i32>} : memref<2x32xf32, #tpu.memory_space<vmem>>, vector<2x32xf32>,
      %c0_36 = arith.constant 0 : index
      %c0_37 = arith.constant 0 : index
      %51 = vector.load %arg11[%c0_36, %c0_37] : memref<2x8xf32, #tpu.memory_space<vmem>>, vector<2x8xf32>
      tpu.vector_store %arg11[%c0_36, %c0_37], %48 {strides = array<i32>} : memref<2x8xf32, #tpu.memory_space<vmem>>, vector<2x8xf32>,
    } else {
    }
    return
  }
  func.func @transform_0(%arg0: i32) -> (i32, i32) {
    %c0_i32 = arith.constant 0 : i32
    %c0_i32_0 = arith.constant 0 : i32
    return %c0_i32, %arg0 : i32, i32
  }
  func.func @transform_1(%arg0: i32) -> (i32, i32) {
    %c0_i32 = arith.constant 0 : i32
    %c0_i32_0 = arith.constant 0 : i32
    return %c0_i32, %arg0 : i32, i32
  }
  func.func @transform_2(%arg0: i32) -> (i32, i32) {
    %c0_i32 = arith.constant 0 : i32
    %c0_i32_0 = arith.constant 0 : i32
    %c0_i32_1 = arith.constant 0 : i32
    return %c0_i32, %c0_i32_0 : i32, i32
  }
  func.func @transform_3(%arg0: i32) -> (i32, i32) {
    %c0_i32 = arith.constant 0 : i32
    %c0_i32_0 = arith.constant 0 : i32
    %c0_i32_1 = arith.constant 0 : i32
    return %c0_i32, %c0_i32_0 : i32, i32
  }
  func.func @transform_4(%arg0: i32) -> (i32, i32) {
    %c0_i32 = arith.constant 0 : i32
    %c0_i32_0 = arith.constant 0 : i32
    %c0_i32_1 = arith.constant 0 : i32
    return %c0_i32, %c0_i32_0 : i32, i32
  }
  func.func @transform_5(%arg0: i32) -> (i32, i32) {
    %c0_i32 = arith.constant 0 : i32
    %c0_i32_0 = arith.constant 0 : i32
    %c0_i32_1 = arith.constant 0 : i32
    return %c0_i32, %c0_i32_0 : i32, i32
  }
  func.func @transform_6(%arg0: i32) -> (i32, i32) {
    %c0_i32 = arith.constant 0 : i32
    %c0_i32_0 = arith.constant 0 : i32
    %c0_i32_1 = arith.constant 0 : i32
    return %c0_i32, %c0_i32_0 : i32, i32
  }
  func.func @transform_7(%arg0: i32) -> (i32, i32) {
    %c0_i32 = arith.constant 0 : i32
    %c0_i32_0 = arith.constant 0 : i32
    %c0_i32_1 = arith.constant 0 : i32
    return %c0_i32, %c0_i32_0 : i32, i32
  }
  func.func @transform_8(%arg0: i32) -> (i32, i32) {
    %c0_i32 = arith.constant 0 : i32
    %c0_i32_0 = arith.constant 0 : i32
    %c0_i32_1 = arith.constant 0 : i32
    return %c0_i32, %c0_i32_0 : i32, i32
  }
  func.func @transform_9(%arg0: i32) -> (i32, i32) {
    %c0_i32 = arith.constant 0 : i32
    %c0_i32_0 = arith.constant 0 : i32
    %c0_i32_1 = arith.constant 0 : i32
    return %c0_i32, %c0_i32_0 : i32, i32
  }
  func.func @transform_10(%arg0: i32) -> (i32, i32) {
    %c0_i32 = arith.constant 0 : i32
    %c0_i32_0 = arith.constant 0 : i32
    %c0_i32_1 = arith.constant 0 : i32
    return %c0_i32, %c0_i32_0 : i32, i32
  }
}

</mosaic_0001>

<bundles_post_ra>
// kernel: policy_forward.4
= control target key start
LH: loop header
LB: loop body
LE: loop exit
PB: predicated region body
PF: predicated region fallthrough
CT: control target
= control target key end

     0   :  { %s1007_s12 = smov 0   ;;  %s1009_s13 = smov 0   ;;  %s1277_s0 = inlined_call_operand.vmem [shape: bf16[2,27,4096], index: 0, kind: input, shape index: {}]   ;;  %s1278_s1 = inlined_call_operand.vmem [shape: bf16[32,27], index: 1, kind: input, shape index: {}]   ;;  %s1279_s2 = inlined_call_operand.vmem [shape: f32[32,1], index: 2, kind: input, shape index: {}]   ;;  %s1280_s3 = inlined_call_operand.vmem [shape: bf16[2,32,4096], index: 3, kind: output, shape index: {}]  }
   0x1   :  { %s1011_s14 = smov 0   ;;  %s1013_s15 = smov 0  }
   0x2   :  { %s1015_s16 = smov 0   ;;  %s1017_s17 = smov 0  }
   0x3   :  { %s1019_s18 = smov 0  }
   0x4 LB: > { %s22_s19 = sadd.s32 1, %s975_s16  ;;  %s25_s20 = sadd.s32 1, %s979_s17  ;;  %s983_s18 = sphi %s1019_s18, %s13_s18   ;;  %s979_s17 = sphi %s1017_s17, %s1287_s17   ;;  %s975_s16 = sphi %s1015_s16, %s1286_s16   ;;  %s971_s15 = sphi %s1013_s15, %s1285_s15   ;;  %s967_s14 = sphi %s1011_s14, %s1284_s14   ;;  %s963_s13 = sphi %s1009_s13, %s1283_s13   ;;  %s959_s12 = sphi %s1007_s12, %s1282_s12  }
   0x5   : > { %p23_p0 = scmp.ge.s32.totalorder %s22_s19, 4  ;;  %s746_s21 = sadd.s32 4294967295, %s983_s18  }
   0x6   : > { %p41_p1 = scmp.ne.s32.totalorder %s963_s13, %s959_s12  ;;  %p42_p2 = scmp.eq.s32.totalorder %s983_s18, 0 }
   0x7   : > { %s1289_s19 = smov (%p23_p0, %s22_s19), 0  ;;  %s1291_s20 = smov (!%p23_p0, %s25_s20), %s979_s17 }
   0x8   : > { %p27_p3 = scmp.ge.s32.totalorder %s1291_s20, 2  ;;  %p115_p4 = scmp.eq.s32.totalorder %s746_s21, 7 }
   0x9   : > { %s30_s22 = ssub.s32 %s975_s16, %s1289_s19  ;;  %p43_p5 = por %p42_p2, %p41_p1 }
   0xa   : > { %s1293_s20 = smov (%p27_p3, %s1291_s20), 0  ;;  %p1055_p6 = por %p115_p4, %p41_p1 }
   0xb   : > { %s29_s24 = ssub.s32 %s979_s17, %s1293_s20  ;;  %s34_s26 = sadd.s32 1, %s963_s13 }
   0xc   : > { %s31_s25 = sor.u32 %s30_s22, %s29_s24  ;;  %p749_p8 = scmp.ge.s32.totalorder %s983_s18, 8 }
   0xd   : > { %p32_p7 = scmp.eq.s32.totalorder %s31_s25, 0 }
   0xe   : > { %143 = sbr.rel (%p749_p8) target bundleno = 42 (0x2a), region = 24 }
   0xf   : > { %s1063_s27 = scalar_select %p32_p7, %s963_s13, %s34_s26  }
  0x13   : > { %146 = sbr.rel (!%p43_p5) target bundleno = 42 (0x2a), region = 28  ;;  %s148_s28 = sand.u32 (%p43_p5), 1, %s963_s13  }
  0x14   : > { %s751_s29 = sshll.u32 (%p43_p5), %s975_s16, 3  ;;  %s750_s30 = sshll.u32 (%p43_p5), %s148_s28, 7 }
  0x15   : > { %s752_s4 = sshll.u32 (%p43_p5), %s979_s17, 7  ;;  %s150_s10 = scalar_lea.vmem (%p43_p5), [#allocation2], %s750_s30 }
  0x16   : > { %s153_s5 = sadd.s32 (%p43_p5), %s752_s4, %s751_s29 }
  0x17   : > { %s753_s6 = sshll.u32 (%p43_p5), %s153_s5, 2 }
  0x18   : > { %s1072_s9 = scalar_lea.vmem %s1277_s0, %s753_s6 }
  0x19   : > { %v168_v0 = vld [vmem:[%s1072_s9] sm:$0xff]  ;;  %v170_v1 = vld [vmem:[%s1072_s9 + $0x8] sm:$0xff]  ;;  %v172_v2 = vld [vmem:[%s1072_s9 + $0x10] sm:$0xff] }
  0x1a   : > { %169 = vst [vmem:[%s150_s10] sm:$0xff] %v168_v0  ;;  %v174_v3 = vld [vmem:[%s1072_s9 + $0x18] sm:$0xff]  ;;  %v176_v4 = vld [vmem:[%s1072_s9 + $0x80] sm:$0xff]  ;;  %v178_v5 = vld [vmem:[%s1072_s9 + $0x88] sm:$0xff] }
  0x1b   : > { %171 = vst [vmem:[%s150_s10 + $0x8] sm:$0xff] %v170_v1  ;;  %v180_v6 = vld [vmem:[%s1072_s9 + $0x90] sm:$0xff]  ;;  %v182_v7 = vld [vmem:[%s1072_s9 + $0x98] sm:$0xff]  ;;  %v184_v8 = vld [vmem:[%s1072_s9 + $0x100] sm:$0xff] }
  0x1c   : > { %173 = vst [vmem:[%s150_s10 + $0x10] sm:$0xff] %v172_v2  ;;  %v186_v9 = vld [vmem:[%s1072_s9 + $0x108] sm:$0xff]  ;;  %v188_v10 = vld [vmem:[%s1072_s9 + $0x110] sm:$0xff]  ;;  %v190_v11 = vld [vmem:[%s1072_s9 + $0x118] sm:$0xff] }
  0x1d   : > { %175 = vst [vmem:[%s150_s10 + $0x18] sm:$0xff] %v174_v3  ;;  %v192_v12 = vld [vmem:[%s1072_s9 + $0x180] sm:$0xff]  ;;  %v194_v13 = vld [vmem:[%s1072_s9 + $0x188] sm:$0xff]  ;;  %v196_v14 = vld [vmem:[%s1072_s9 + $0x190] sm:$0xff] }
  0x1e   : > { %177 = vst [vmem:[%s150_s10 + $0x20] sm:$0xff] %v176_v4  ;;  %v198_v15 = vld [vmem:[%s1072_s9 + $0x198] sm:$0xff] }
  0x1f   : > { %179 = vst [vmem:[%s150_s10 + $0x28] sm:$0xff] %v178_v5 }
  0x20   : > { %181 = vst [vmem:[%s150_s10 + $0x30] sm:$0xff] %v180_v6 }
  0x21   : > { %183 = vst [vmem:[%s150_s10 + $0x38] sm:$0xff] %v182_v7 }
  0x22   : > { %185 = vst [vmem:[%s150_s10 + $0x40] sm:$0xff] %v184_v8 }
  0x23   : > { %187 = vst [vmem:[%s150_s10 + $0x48] sm:$0xff] %v186_v9 }
  0x24   : > { %189 = vst [vmem:[%s150_s10 + $0x50] sm:$0xff] %v188_v10 }
  0x25   : > { %191 = vst [vmem:[%s150_s10 + $0x58] sm:$0xff] %v190_v11 }
  0x26   : > { %193 = vst [vmem:[%s150_s10 + $0x60] sm:$0xff] %v192_v12 }
  0x27   : > { %195 = vst [vmem:[%s150_s10 + $0x68] sm:$0xff] %v194_v13 }
  0x28   : > { %197 = vst [vmem:[%s150_s10 + $0x70] sm:$0xff] %v196_v14 }
  0x29   : > { %199 = vst [vmem:[%s150_s10 + $0x78] sm:$0xff] %v198_v15 }
  0x2a PF: > { %p754_p9 = scmp.ge.s32.totalorder %s983_s18, 1  ;;  %p204_p10 = scmp.lt.s32.totalorder %s983_s18, 9 }
  0x2c   : > { %p205_p11 = pnand %p754_p9, %p204_p10 }
  0x2d   : > { %s211_s11 = sand.u32 (!%p205_p11), 1, %s959_s12  }
  0x2e   : > { %208 = sbr.rel (%p205_p11) target bundleno = 270 (0x10e), region = 51  ;;  %s1093_s21 = sshll.u32 (!%p205_p11), %s211_s11, 7 }
  0x2f   : > { %s1104_s12 = scalar_lea.vmem (!%p205_p11), [#allocation2], %s1093_s21  ;;  %s1181_s9 = scalar_lea.vmem (!%p205_p11), [#allocation3], %s1093_s21 }
  0x33   : > { %vm369_vm0 = vcmask 1044480   ;;  %vm370_vm1 = vcmask 1045504   ;;  %v985_v16 = vmov 65535   ;;  %v256_v18 = vld [vmem:[%s1279_s2] sm:$0xff]  ;;  %v986_v20 = vmov 0   ;;  %v258_v21 = vld [vmem:[%s1279_s2 + $0x10] sm:$0xff] }
  0x34   : > { %v371_v17 = vsel %vm369_vm0, 4294967295, %v985_v16  ;;  %927 = vset.pattern.permute.xlu0 %v986_v20  ;;  %928 = vset.pattern.permute.xlu1 %v986_v20  ;;  %v799_v22 = vld [vmem:[%s1104_s12 + $0x40] sm:$0xf]  ;;  %v861_v24 = vld [vmem:[%s1104_s12 + $0x44] sm:$0xf]  ;;  %v257_v39 = vld [vmem:[%s1279_s2 + $0x8] sm:$0xff] }
  0x35   : > { %v1098_v19 = vsel %vm370_vm1, %v371_v17, 0  ;;  %v865_v23 = vld [vmem:[%s1104_s12 + $0x5c] sm:$0x30]  ;;  %262 = vperm.xlu0 %927, %v256_v18   ;;  %272 = vperm.xlu1 %928, %v258_v21   ;;  %v801_v26 = vld [vmem:[%s1104_s12 + $0x60] sm:$0x30]  ;;  %vm362_vm2 = vcmask 220160  }
  0x36   : > { %v800_v25 = vor.u32 %v865_v23, %v799_v22  ;;  %v807_v27 = vld [vmem:[%s1104_s12 + $0x48] sm:$0xf]  ;;  %v804_v29 = vor.u32 %v861_v24, %v801_v26  ;;  %v862_v31 = vld [vmem:[%s1104_s12 + $0x4c] sm:$0xf]  ;;  %v767_v33 = vld [vmem:[%s1104_s12] sm:$0xf] }
  0x37   : > { %v866_v28 = vld [vmem:[%s1104_s12 + $0x64] sm:$0x30]  ;;  %v809_v32 = vld [vmem:[%s1104_s12 + $0x68] sm:$0x30]  ;;  %v857_v36 = vld [vmem:[%s1104_s12 + $0x1c] sm:$0xf0] }
  0x38   : > { %v808_v30 = vor.u32 %v866_v28, %v807_v27  ;;  %v374_v34 = vand.u32 %v800_v25, %v1098_v19  ;;  %v812_v35 = vor.u32 %v862_v31, %v809_v32  ;;  %v853_v37 = vld [vmem:[%s1104_s12 + $0x4] sm:$0xf]  ;;  %v377_v40 = vand.u32 %v804_v29, %v1098_v19  ;;  %v775_v42 = vld [vmem:[%s1104_s12 + $0x8] sm:$0xf]  ;;  %v854_v44 = vld [vmem:[%s1104_s12 + $0xc] sm:$0xf] }
  0x39   : > { %v769_v38 = vld [vmem:[%s1104_s12 + $0x20] sm:$0xf0]  ;;  %v858_v43 = vld [vmem:[%s1104_s12 + $0x24] sm:$0xf0]  ;;  %v768_v46 = vor.u32 %v857_v36, %v767_v33  ;;  %v777_v47 = vld [vmem:[%s1104_s12 + $0x28] sm:$0xf0] }
  0x3a   : > { %v380_v41 = vand.u32 %v808_v30, %v1098_v19  ;;  %403 = vmatpush.bf16.msra.mxu0 %v374_v34  ;;  %v383_v45 = vand.u32 %v812_v35, %v1098_v19  ;;  %v823_v48 = vld [vmem:[%s1104_s12 + $0x58] sm:$0xf]  ;;  %422 = vmatpush.bf16.msra.mxu1 %v377_v40  ;;  %v772_v50 = vor.u32 %v853_v37, %v769_v38  ;;  %v864_v53 = vld [vmem:[%s1104_s12 + $0x5c] sm:$0xf]  ;;  %v815_v55 = vld [vmem:[%s1104_s12 + $0x50] sm:$0xf] }
  0x3b   : > { %v868_v49 = vld [vmem:[%s1104_s12 + $0x74] sm:$0x30]  ;;  %v776_v51 = vor.u32 %v858_v43, %v775_v42  ;;  %v825_v54 = vld [vmem:[%s1104_s12 + $0x78] sm:$0x30]  ;;  %v780_v56 = vor.u32 %v854_v44, %v777_v47  ;;  %v867_v58 = vld [vmem:[%s1104_s12 + $0x6c] sm:$0x30] }
  0x3c   : > { %441 = vmatpush.bf16.msra.mxu2 %v380_v41  ;;  %v824_v52 = vor.u32 %v868_v49, %v823_v48  ;;  %460 = vmatpush.bf16.msra.mxu3 %v383_v45  ;;  %v828_v57 = vor.u32 %v864_v53, %v825_v54  ;;  %v863_v59 = vld [vmem:[%s1104_s12 + $0x54] sm:$0xf]  ;;  %v851_v61 = vld [vmem:[%s1278_s1] sm:$0xff]  ;;  %v816_v63 = vor.u32 %v867_v58, %v815_v55  ;;  %v791_v1 = vld [vmem:[%s1104_s12 + $0x18] sm:$0xf]  ;;  %s846_s10 = sshll.u32 (%p1055_p6), %s967_s14, 3 }
  0x3d   : > { %v817_v60 = vld [vmem:[%s1104_s12 + $0x70] sm:$0x30]  ;;  %v860_v2 = vld [vmem:[%s1104_s12 + $0x34] sm:$0xf0]  ;;  %267 = vperm.xlu0 %927, %v257_v39   ;;  %v856_v4 = vld [vmem:[%s1104_s12 + $0x1c] sm:$0xf] }
  0x3e   : > { %v392_v62 = vand.u32 %v824_v52, %v1098_v19  ;;  %v820_v0 = vor.u32 %v863_v59, %v817_v60  ;;  %404 = vmatpush.bf16.msra.mxu0 %v768_v46  ;;  %v395_v3 = vand.u32 %v828_v57, %v1098_v19  ;;  %v793_v5 = vld [vmem:[%s1104_s12 + $0x38] sm:$0xf0]  ;;  %423 = vmatpush.bf16.msra.mxu1 %v772_v50  ;;  %v783_v9 = vld [vmem:[%s1104_s12 + $0x10] sm:$0xf]  ;;  %v855_v12 = vld [vmem:[%s1104_s12 + $0x14] sm:$0xf] }
  0x3f   : > { %v386_v6 = vand.u32 %v816_v63, %v1098_v19  ;;  %v792_v8 = vor.u32 %v860_v2, %v791_v1  ;;  %v859_v10 = vld [vmem:[%s1104_s12 + $0x2c] sm:$0xf0]  ;;  %v796_v11 = vor.u32 %v856_v4, %v793_v5  ;;  %v785_v13 = vld [vmem:[%s1104_s12 + $0x30] sm:$0xf0]  ;;  %v259_v15 = vld [vmem:[%s1279_s2 + $0x18] sm:$0xff]  ;;  %s847_s11 = sshll.u32 (%p1055_p6), %s971_s15, 7 }
  0x40   : > { %442 = vmatpush.bf16.msra.mxu2 %v776_v51  ;;  %461 = vmatpush.bf16.msra.mxu3 %v780_v56  ;;  %v389_v7 = vand.u32 %v820_v0, %v1098_v19  ;;  %v784_v14 = vor.u32 %v859_v10, %v783_v9  ;;  %v788_v16 = vor.u32 %v855_v12, %v785_v13  ;;  %v852_v17 = vld [vmem:[%s1278_s1 + $0x8] sm:$0xff]  ;;  %s622_s21 = sadd.s32 (%p1055_p6), %s847_s11, %s846_s10 }
  0x41   : > { %829 = vmatmul.msk.bf16.vlgmr.msra.gmra.mxu0 %vm362_vm2, %v851_v61  ;;  %831 = vmatmul.msk.bf16.vlgmr.msra.gmra.mxu1 %vm362_vm2, %v851_v61  ;;  %s848_s22 = sshll.u32 (%p1055_p6), %s622_s21, 2 }
  0x42   : > { %479 = vmatpush.bf16.msrb.mxu0 %v386_v6  ;;  %498 = vmatpush.bf16.msrb.mxu1 %v389_v7  ;;  %s624_s25 = scalar_lea.vmem (%p1055_p6), %s1280_s3, %s848_s22 }
  0x43   : > { %833 = vmatmul.msk.bf16.vlgmr.msra.gmra.mxu2 %vm362_vm2, %v851_v61  ;;  %835 = vmatmul.msk.bf16.vlgmr.msra.gmra.mxu3 %vm362_vm2, %v851_v61 }
  0x44   : > { %517 = vmatpush.bf16.msrb.mxu2 %v392_v62  ;;  %536 = vmatpush.bf16.msrb.mxu3 %v395_v3 }
  0x45   : > { %277 = vperm.xlu1 %928, %v259_v15  }
  0x46   : > { %480 = vmatpush.bf16.msrb.mxu0 %v784_v14  ;;  %499 = vmatpush.bf16.msrb.mxu1 %v788_v16 }
  0x48   : > { %518 = vmatpush.bf16.msrb.mxu2 %v792_v8  ;;  %537 = vmatpush.bf16.msrb.mxu3 %v796_v11 }
  0x51   : > { %830 = vmatmul.msk.bf16.gmra.mxu0 %vm362_vm2, %v852_v17  ;;  %832 = vmatmul.msk.bf16.gmra.mxu1 %vm362_vm2, %v852_v17 }
  0x53   : > { %834 = vmatmul.msk.bf16.gmra.mxu2 %vm362_vm2, %v852_v17  ;;  %836 = vmatmul.msk.bf16.gmra.mxu3 %vm362_vm2, %v852_v17 }
  0x61   : > { %837 = vmatmul.msk.bf16.vlgmr.msrb.gmra.mxu0 %vm362_vm2, %v851_v61  ;;  %839 = vmatmul.msk.bf16.vlgmr.msrb.gmra.mxu1 %vm362_vm2, %v851_v61 }
  0x63   : > { %841 = vmatmul.msk.bf16.vlgmr.msrb.gmra.mxu2 %vm362_vm2, %v851_v61  ;;  %843 = vmatmul.msk.bf16.vlgmr.msrb.gmra.mxu3 %vm362_vm2, %v851_v61 }
  0x71   : > { %838 = vmatmul.msk.bf16.gmra.mxu0 %vm362_vm2, %v852_v17  ;;  %840 = vmatmul.msk.bf16.gmra.mxu1 %vm362_vm2, %v852_v17 }
  0x73   : > { %842 = vmatmul.msk.bf16.gmra.mxu2 %vm362_vm2, %v852_v17  ;;  %844 = vmatmul.msk.bf16.gmra.mxu3 %vm362_vm2, %v852_v17 }
  0xa7   : > { %v1174_v18 = vpop.permute.xlu0 %262  ;;  %v1188_v39 = vpop.permute.xlu1 %272 }
  0xaf   : > { %v1178_v26 = vpop.permute.xlu0 %267 }
  0xb7   : > { %v1196_v56 = vpop.permute.xlu1 %277 }
  0xbe   : > { %v406_v19 = vpop.f32.mrf.mxu0  ;;  %v425_v21 = vpop.f32.mrf.mxu1 }
  0xbf   : > { %v407_v20 = vadd.f32 %v406_v19, %v1174_v18  ;;  %v426_v22 = vadd.f32 %v425_v21, %v1174_v18 }
  0xc1   : > { %v549_v23 = vmax.f32 %v407_v20, 0.0  ;;  %v550_v24 = vmax.f32 %v426_v22, 0.0 }
  0xc3   : > { %v581_v25 = vpack.c.bf16 %v550_v24, %v549_v23 }
  0xc5   : > { %597 = vst [vmem:[%s1181_s9] sm:$0xff] %v581_v25 }
  0xc6   : > { %v444_v27 = vpop.f32.mrf.mxu2  ;;  %v463_v29 = vpop.f32.mrf.mxu3 }
  0xc7   : > { %v445_v28 = vadd.f32 %v444_v27, %v1174_v18  ;;  %v408_v30 = vpop.f32.mrf.mxu0  ;;  %v464_v31 = vadd.f32 %v463_v29, %v1174_v18  ;;  %v427_v33 = vpop.f32.mrf.mxu1 }
  0xc8   : > { %v409_v32 = vadd.f32 %v408_v30, %v1178_v26  ;;  %v428_v35 = vadd.f32 %v427_v33, %v1178_v26 }
  0xc9   : > { %v551_v34 = vmax.f32 %v445_v28, 0.0  ;;  %v552_v36 = vmax.f32 %v464_v31, 0.0 }
  0xca   : > { %v557_v37 = vmax.f32 %v409_v32, 0.0  ;;  %v558_v38 = vmax.f32 %v428_v35, 0.0 }
  0xcb   : > { %v582_v40 = vpack.c.bf16 %v552_v36, %v551_v34 }
  0xcc   : > { %v585_v41 = vpack.c.bf16 %v558_v38, %v557_v37 }
  0xcd   : > { %598 = vst [vmem:[%s1181_s9 + $0x8] sm:$0xff] %v582_v40 }
  0xce   : > { %v446_v42 = vpop.f32.mrf.mxu2  ;;  %601 = vst [vmem:[%s1181_s9 + $0x20] sm:$0xff] %v585_v41  ;;  %v465_v44 = vpop.f32.mrf.mxu3 }
  0xcf   : > { %v447_v43 = vadd.f32 %v446_v42, %v1178_v26  ;;  %v411_v45 = vpop.f32.mrf.mxu0  ;;  %v466_v46 = vadd.f32 %v465_v44, %v1178_v26  ;;  %v430_v48 = vpop.f32.mrf.mxu1 }
  0xd0   : > { %v412_v47 = vadd.f32 %v411_v45, %v1188_v39  ;;  %v431_v50 = vadd.f32 %v430_v48, %v1188_v39 }
  0xd1   : > { %v559_v49 = vmax.f32 %v447_v43, 0.0  ;;  %v560_v51 = vmax.f32 %v466_v46, 0.0 }
  0xd2   : > { %v565_v52 = vmax.f32 %v412_v47, 0.0  ;;  %v566_v53 = vmax.f32 %v431_v50, 0.0 }
  0xd3   : > { %v586_v54 = vpack.c.bf16 %v560_v51, %v559_v49 }
  0xd4   : > { %v589_v55 = vpack.c.bf16 %v566_v53, %v565_v52 }
  0xd5   : > { %602 = vst [vmem:[%s1181_s9 + $0x28] sm:$0xff] %v586_v54 }
  0xd6   : > { %v449_v57 = vpop.f32.mrf.mxu2  ;;  %605 = vst [vmem:[%s1181_s9 + $0x40] sm:$0xff] %v589_v55  ;;  %v468_v59 = vpop.f32.mrf.mxu3 }
  0xd7   : > { %v450_v58 = vadd.f32 %v449_v57, %v1188_v39  ;;  %v413_v60 = vpop.f32.mrf.mxu0  ;;  %v469_v61 = vadd.f32 %v468_v59, %v1188_v39  ;;  %v432_v63 = vpop.f32.mrf.mxu1 }
  0xd8   : > { %v414_v62 = vadd.f32 %v413_v60, %v1196_v56  ;;  %v433_v1 = vadd.f32 %v432_v63, %v1196_v56 }
  0xd9   : > { %v567_v0 = vmax.f32 %v450_v58, 0.0  ;;  %v568_v2 = vmax.f32 %v469_v61, 0.0 }
  0xda   : > { %v573_v3 = vmax.f32 %v414_v62, 0.0  ;;  %v574_v4 = vmax.f32 %v433_v1, 0.0 }
  0xdb   : > { %v590_v5 = vpack.c.bf16 %v568_v2, %v567_v0 }
  0xdc   : > { %v593_v6 = vpack.c.bf16 %v574_v4, %v573_v3 }
  0xdd   : > { %606 = vst [vmem:[%s1181_s9 + $0x48] sm:$0xff] %v590_v5 }
  0xde   : > { %v451_v7 = vpop.f32.mrf.mxu2  ;;  %609 = vst [vmem:[%s1181_s9 + $0x60] sm:$0xff] %v593_v6  ;;  %v470_v9 = vpop.f32.mrf.mxu3 }
  0xdf   : > { %v452_v8 = vadd.f32 %v451_v7, %v1196_v56  ;;  %v482_v10 = vpop.f32.mrf.mxu0  ;;  %v471_v11 = vadd.f32 %v470_v9, %v1196_v56  ;;  %v501_v13 = vpop.f32.mrf.mxu1  ;;  %v639_v7 = vld [vmem:[%s1181_s9 + $0x8] sm:$0xff] (%p1055_p6) }
  0xe0   : > { %v483_v12 = vadd.f32 %v482_v10, %v1174_v18  ;;  %v502_v15 = vadd.f32 %v501_v13, %v1174_v18  ;;  %640 = vst [vmem:[%s624_s25 + $0x8] sm:$0xff] (%p1055_p6), %v639_v7  ;;  %v645_v10 = vld [vmem:[%s1181_s9 + $0x20] sm:$0xff] (%p1055_p6) }
  0xe1   : > { %v575_v14 = vmax.f32 %v452_v8, 0.0  ;;  %v576_v16 = vmax.f32 %v471_v11, 0.0  ;;  %v647_v11 = vld [vmem:[%s1181_s9 + $0x28] sm:$0xff] (%p1055_p6)  ;;  %646 = vst [vmem:[%s624_s25 + $0x80] sm:$0xff] (%p1055_p6), %v645_v10 }
  0xe2   : > { %v553_v17 = vmax.f32 %v483_v12, 0.0  ;;  %v554_v19 = vmax.f32 %v502_v15, 0.0  ;;  %648 = vst [vmem:[%s624_s25 + $0x88] sm:$0xff] (%p1055_p6), %v647_v11 }
  0xe3   : > { %v594_v20 = vpack.c.bf16 %v576_v16, %v575_v14  ;;  %v653_v14 = vld [vmem:[%s1181_s9 + $0x40] sm:$0xff] (%p1055_p6) }
  0xe4   : > { %v583_v21 = vpack.c.bf16 %v554_v19, %v553_v17  ;;  %v655_v15 = vld [vmem:[%s1181_s9 + $0x48] sm:$0xff] (%p1055_p6)  ;;  %654 = vst [vmem:[%s624_s25 + $0x100] sm:$0xff] (%p1055_p6), %v653_v14 }
  0xe5   : > { %610 = vst [vmem:[%s1181_s9 + $0x68] sm:$0xff] %v594_v20  ;;  %v661_v19 = vld [vmem:[%s1181_s9 + $0x60] sm:$0xff] (%p1055_p6) }
  0xe6   : > { %v520_v22 = vpop.f32.mrf.mxu2  ;;  %599 = vst [vmem:[%s1181_s9 + $0x10] sm:$0xff] %v583_v21  ;;  %v539_v24 = vpop.f32.mrf.mxu3 }
  0xe7   : > { %v521_v23 = vadd.f32 %v520_v22, %v1174_v18  ;;  %v484_v25 = vpop.f32.mrf.mxu0  ;;  %v540_v27 = vadd.f32 %v539_v24, %v1174_v18  ;;  %v503_v29 = vpop.f32.mrf.mxu1  ;;  %656 = vst [vmem:[%s624_s25 + $0x108] sm:$0xff] (%p1055_p6), %v655_v15 }
  0xe8   : > { %v485_v28 = vadd.f32 %v484_v25, %v1178_v26  ;;  %v504_v31 = vadd.f32 %v503_v29, %v1178_v26  ;;  %662 = vst [vmem:[%s624_s25 + $0x180] sm:$0xff] (%p1055_p6), %v661_v19 }
  0xe9   : > { %v555_v30 = vmax.f32 %v521_v23, 0.0  ;;  %v556_v32 = vmax.f32 %v540_v27, 0.0 }
  0xea   : > { %v561_v33 = vmax.f32 %v485_v28, 0.0  ;;  %v562_v34 = vmax.f32 %v504_v31, 0.0 }
  0xeb   : > { %v584_v35 = vpack.c.bf16 %v556_v32, %v555_v30 }
  0xec   : > { %v587_v36 = vpack.c.bf16 %v562_v34, %v561_v33  ;;  %v663_v20 = vld [vmem:[%s1181_s9 + $0x68] sm:$0xff] (%p1055_p6) }
  0xed   : > { %600 = vst [vmem:[%s1181_s9 + $0x18] sm:$0xff] %v584_v35  ;;  %v641_v8 = vld [vmem:[%s1181_s9 + $0x10] sm:$0xff] (%p1055_p6) }
  0xee   : > { %v522_v37 = vpop.f32.mrf.mxu2  ;;  %603 = vst [vmem:[%s1181_s9 + $0x30] sm:$0xff] %v587_v36  ;;  %v541_v40 = vpop.f32.mrf.mxu3 }
  0xef   : > { %v523_v38 = vadd.f32 %v522_v37, %v1178_v26  ;;  %v487_v18 = vpop.f32.mrf.mxu0  ;;  %v542_v41 = vadd.f32 %v541_v40, %v1178_v26  ;;  %v506_v43 = vpop.f32.mrf.mxu1  ;;  %642 = vst [vmem:[%s624_s25 + $0x10] sm:$0xff] (%p1055_p6), %v641_v8 }
  0xf0   : > { %v488_v42 = vadd.f32 %v487_v18, %v1188_v39  ;;  %v507_v45 = vadd.f32 %v506_v43, %v1188_v39  ;;  %664 = vst [vmem:[%s624_s25 + $0x188] sm:$0xff] (%p1055_p6), %v663_v20 }
  0xf1   : > { %v563_v44 = vmax.f32 %v523_v38, 0.0  ;;  %v564_v46 = vmax.f32 %v542_v41, 0.0 }
  0xf2   : > { %v569_v47 = vmax.f32 %v488_v42, 0.0  ;;  %v570_v48 = vmax.f32 %v507_v45, 0.0 }
  0xf3   : > { %v588_v49 = vpack.c.bf16 %v564_v46, %v563_v44 }
  0xf4   : > { %v591_v50 = vpack.c.bf16 %v570_v48, %v569_v47  ;;  %v643_v9 = vld [vmem:[%s1181_s9 + $0x18] sm:$0xff] (%p1055_p6) }
  0xf5   : > { %604 = vst [vmem:[%s1181_s9 + $0x38] sm:$0xff] %v588_v49  ;;  %v649_v12 = vld [vmem:[%s1181_s9 + $0x30] sm:$0xff] (%p1055_p6) }
  0xf6   : > { %v525_v51 = vpop.f32.mrf.mxu2  ;;  %607 = vst [vmem:[%s1181_s9 + $0x50] sm:$0xff] %v591_v50  ;;  %v544_v53 = vpop.f32.mrf.mxu3 }
  0xf7   : > { %v526_v52 = vadd.f32 %v525_v51, %v1188_v39  ;;  %v489_v26 = vpop.f32.mrf.mxu0  ;;  %v545_v54 = vadd.f32 %v544_v53, %v1188_v39  ;;  %v508_v57 = vpop.f32.mrf.mxu1  ;;  %644 = vst [vmem:[%s624_s25 + $0x18] sm:$0xff] (%p1055_p6), %v643_v9 }
  0xf8   : > { %v490_v55 = vadd.f32 %v489_v26, %v1196_v56  ;;  %v509_v59 = vadd.f32 %v508_v57, %v1196_v56  ;;  %650 = vst [vmem:[%s624_s25 + $0x90] sm:$0xff] (%p1055_p6), %v649_v12 }
  0xf9   : > { %v571_v58 = vmax.f32 %v526_v52, 0.0  ;;  %v572_v60 = vmax.f32 %v545_v54, 0.0 }
  0xfa   : > { %v577_v61 = vmax.f32 %v490_v55, 0.0  ;;  %v578_v62 = vmax.f32 %v509_v59, 0.0 }
  0xfb   : > { %v592_v63 = vpack.c.bf16 %v572_v60, %v571_v58 }
  0xfc   : > { %v595_v0 = vpack.c.bf16 %v578_v62, %v577_v61  ;;  %v651_v13 = vld [vmem:[%s1181_s9 + $0x38] sm:$0xff] (%p1055_p6) }
  0xfd   : > { %608 = vst [vmem:[%s1181_s9 + $0x58] sm:$0xff] %v592_v63  ;;  %v657_v16 = vld [vmem:[%s1181_s9 + $0x50] sm:$0xff] (%p1055_p6) }
  0xfe   : > { %v527_v1 = vpop.f32.mrf.mxu2  ;;  %611 = vst [vmem:[%s1181_s9 + $0x70] sm:$0xff] %v595_v0  ;;  %v546_v3 = vpop.f32.mrf.mxu3 }
  0xff   : > { %v528_v2 = vadd.f32 %v527_v1, %v1196_v56  ;;  %v547_v39 = vadd.f32 %v546_v3, %v1196_v56  ;;  %v637_v56 = vld [vmem:[%s1181_s9] sm:$0xff] (%p1055_p6)  ;;  %652 = vst [vmem:[%s624_s25 + $0x98] sm:$0xff] (%p1055_p6), %v651_v13 }
 0x100   : > { %638 = vst [vmem:[%s624_s25] sm:$0xff] (%p1055_p6), %v637_v56 }
 0x101   : > { %v579_v4 = vmax.f32 %v528_v2, 0.0  ;;  %v580_v5 = vmax.f32 %v547_v39, 0.0  ;;  %619 = sbr.rel (!%p1055_p6) target bundleno = 270 (0x10e), region = 59  ;;  %658 = vst [vmem:[%s624_s25 + $0x110] sm:$0xff] (%p1055_p6), %v657_v16 }
 0x103   : > { %v596_v6 = vpack.c.bf16 %v580_v5, %v579_v4 }
 0x104   : > { %v659_v17 = vld [vmem:[%s1181_s9 + $0x58] sm:$0xff] (%p1055_p6) }
 0x105   : > { %612 = vst [vmem:[%s1181_s9 + $0x78] sm:$0xff] %v596_v6  ;;  %v665_v21 = vld [vmem:[%s1181_s9 + $0x70] sm:$0xff] (%p1055_p6) }
 0x106   : > { %660 = vst [vmem:[%s624_s25 + $0x118] sm:$0xff] %v659_v17 }
 0x107   : > { %666 = vst [vmem:[%s624_s25 + $0x190] sm:$0xff] %v665_v21 }
 0x10c   : > { %v667_v22 = vld [vmem:[%s1181_s9 + $0x78] sm:$0xff] }
 0x10d   : > { %668 = vst [vmem:[%s624_s25 + $0x198] sm:$0xff] %v667_v22 }
 0x10e PF: > { %s13_s18 = sadd.s32 1, %s983_s18   ;;  %s1282_s12 = smov %s963_s13 }
 0x10f   : > { %p10_p12 = scmp.ge.s32.totalorder %s13_s18, 10   ;;  %s1283_s13 = smov %s1063_s27 }
 0x110   : > { %s1284_s14 = smov %s975_s16  ;;  %s1285_s15 = smov %s979_s17 }
 0x111   : > { %s1286_s16 = smov %s1289_s19  ;;  %s1287_s17 = smov %s1293_s20 }
 0x112   :  { %12 = sbr.rel (!%p10_p12) target bundleno = 4 (0x4), region = 113 }

// kernel: policy_forward.5
= control target key start
LH: loop header
LB: loop body
LE: loop exit
PB: predicated region body
PF: predicated region fallthrough
CT: control target
= control target key end

     0   :  { %s2052_s12 = smov 0   ;;  %s2054_s13 = smov 0   ;;  %s2823_s0 = inlined_call_operand.vmem [shape: bf16[2,288,1024], index: 0, kind: input, shape index: {}]   ;;  %s2824_s1 = inlined_call_operand.vmem [shape: bf16[64,288], index: 1, kind: input, shape index: {}]   ;;  %s2825_s2 = inlined_call_operand.vmem [shape: f32[64,1], index: 2, kind: input, shape index: {}]   ;;  %s2826_s3 = inlined_call_operand.vmem [shape: bf16[2,64,1024], index: 3, kind: output, shape index: {}]  }
   0x1   :  { %s2056_s14 = smov 0   ;;  %s2058_s15 = smov 0  }
   0x2   :  { %s2060_s16 = smov 0   ;;  %s2062_s17 = smov 0  }
   0x3   :  { %s2064_s18 = smov 0  }
   0x4 LB: > { %s22_s19 = sadd.s32 1, %s2021_s16  ;;  %s25_s20 = sadd.s32 1, %s2025_s17  ;;  %s2029_s18 = sphi %s2064_s18, %s13_s18   ;;  %s2025_s17 = sphi %s2062_s17, %s2833_s17   ;;  %s2021_s16 = sphi %s2060_s16, %s2832_s16   ;;  %s2017_s15 = sphi %s2058_s15, %s2831_s15   ;;  %s2013_s14 = sphi %s2056_s14, %s2830_s14   ;;  %s2009_s13 = sphi %s2054_s13, %s2829_s13   ;;  %s2005_s12 = sphi %s2052_s12, %s2828_s12  }
   0x5   : > { %p23_p0 = scmp.ge.s32.totalorder %s22_s19, 2  ;;  %s1462_s21 = sadd.s32 4294967295, %s2029_s18  }
   0x6   : > { %p41_p1 = scmp.ne.s32.totalorder %s2009_s13, %s2005_s12  ;;  %p42_p2 = scmp.eq.s32.totalorder %s2029_s18, 0 }
   0x7   : > { %s2835_s19 = smov (%p23_p0, %s22_s19), 0  ;;  %s2837_s20 = smov (!%p23_p0, %s25_s20), %s2025_s17 }
   0x8   : > { %p27_p3 = scmp.ge.s32.totalorder %s2837_s20, 2  ;;  %p115_p4 = scmp.eq.s32.totalorder %s1462_s21, 3 }
   0x9   : > { %s30_s22 = ssub.s32 %s2021_s16, %s2835_s19  ;;  %p43_p5 = por %p42_p2, %p41_p1 }
   0xa   : > { %s2839_s20 = smov (%p27_p3, %s2837_s20), 0  ;;  %p2100_p6 = por %p115_p4, %p41_p1 }
   0xb   : > { %s29_s24 = ssub.s32 %s2025_s17, %s2839_s20  ;;  %s34_s26 = sadd.s32 1, %s2009_s13 }
   0xc   : > { %s31_s25 = sor.u32 %s30_s22, %s29_s24  ;;  %p1465_p8 = scmp.ge.s32.totalorder %s2029_s18, 4 }
   0xd   : > { %p32_p7 = scmp.eq.s32.totalorder %s31_s25, 0 }
   0xe   : > { %143 = sbr.rel (%p1465_p8) target bundleno = 99 (0x63), region = 24 }
   0xf   : > { %s2108_s27 = scalar_select %p32_p7, %s2009_s13, %s34_s26  }
  0x13   : > { %146 = sbr.rel (!%p43_p5) target bundleno = 99 (0x63), region = 28  ;;  %s148_s28 = sand.u32 (%p43_p5), 1, %s2009_s13  }
  0x14   : > { %s1912_s29 = smul.u32 (%p43_p5), 576, %s148_s28  ;;  %s1466_s30 = sshll.u32 (%p43_p5), %s2021_s16, 2 }
  0x15   : > { %s1913_s4 = smul.u32 (%p43_p5), 288, %s2025_s17 }
  0x16   : > { %s2122_s10 = scalar_lea.vmem (%p43_p5), [#allocation2], %s1912_s29 }
  0x17   : > { %s153_s5 = sadd.s32 (%p43_p5), %s1913_s4, %s1466_s30 }
  0x18   : > { %s1467_s6 = sshll.u32 %s153_s5, 2 }
  0x19   : > { %s2117_s9 = scalar_lea.vmem %s2823_s0, %s1467_s6 }
  0x1a   : > { %v168_v0 = vld [vmem:[%s2117_s9] sm:$0xff]  ;;  %v170_v1 = vld [vmem:[%s2117_s9 + $0x8] sm:$0xff] }
  0x1b   : > { %v172_v2 = vld [vmem:[%s2117_s9 + $0x20] sm:$0xff]  ;;  %169 = vst [vmem:[%s2122_s10] sm:$0xff] %v168_v0  ;;  %v174_v3 = vld [vmem:[%s2117_s9 + $0x28] sm:$0xff] }
  0x1c   : > { %171 = vst [vmem:[%s2122_s10 + $0x8] sm:$0xff] %v170_v1  ;;  %v176_v4 = vld [vmem:[%s2117_s9 + $0x40] sm:$0xff]  ;;  %v178_v5 = vld [vmem:[%s2117_s9 + $0x48] sm:$0xff] }
  0x1d   : > { %173 = vst [vmem:[%s2122_s10 + $0x10] sm:$0xff] %v172_v2  ;;  %v180_v6 = vld [vmem:[%s2117_s9 + $0x60] sm:$0xff]  ;;  %v182_v7 = vld [vmem:[%s2117_s9 + $0x68] sm:$0xff] }
  0x1e   : > { %175 = vst [vmem:[%s2122_s10 + $0x18] sm:$0xff] %v174_v3  ;;  %v184_v8 = vld [vmem:[%s2117_s9 + $0x80] sm:$0xff]  ;;  %v186_v9 = vld [vmem:[%s2117_s9 + $0x88] sm:$0xff] }
  0x1f   : > { %177 = vst [vmem:[%s2122_s10 + $0x20] sm:$0xff] %v176_v4  ;;  %v188_v10 = vld [vmem:[%s2117_s9 + $0xa0] sm:$0xff]  ;;  %v190_v11 = vld [vmem:[%s2117_s9 + $0xa8] sm:$0xff] }
  0x20   : > { %179 = vst [vmem:[%s2122_s10 + $0x28] sm:$0xff] %v178_v5  ;;  %v192_v12 = vld [vmem:[%s2117_s9 + $0xc0] sm:$0xff]  ;;  %v194_v13 = vld [vmem:[%s2117_s9 + $0xc8] sm:$0xff] }
  0x21   : > { %181 = vst [vmem:[%s2122_s10 + $0x30] sm:$0xff] %v180_v6  ;;  %v196_v14 = vld [vmem:[%s2117_s9 + $0xe0] sm:$0xff]  ;;  %v198_v15 = vld [vmem:[%s2117_s9 + $0xe8] sm:$0xff] }
  0x22   : > { %183 = vst [vmem:[%s2122_s10 + $0x38] sm:$0xff] %v182_v7  ;;  %v200_v16 = vld [vmem:[%s2117_s9 + $0x100] sm:$0xff]  ;;  %v202_v17 = vld [vmem:[%s2117_s9 + $0x108] sm:$0xff] }
  0x23   : > { %185 = vst [vmem:[%s2122_s10 + $0x40] sm:$0xff] %v184_v8  ;;  %v204_v18 = vld [vmem:[%s2117_s9 + $0x120] sm:$0xff]  ;;  %v206_v19 = vld [vmem:[%s2117_s9 + $0x128] sm:$0xff] }
  0x24   : > { %187 = vst [vmem:[%s2122_s10 + $0x48] sm:$0xff] %v186_v9  ;;  %v208_v20 = vld [vmem:[%s2117_s9 + $0x140] sm:$0xff]  ;;  %v210_v21 = vld [vmem:[%s2117_s9 + $0x148] sm:$0xff] }
  0x25   : > { %189 = vst [vmem:[%s2122_s10 + $0x50] sm:$0xff] %v188_v10  ;;  %v212_v22 = vld [vmem:[%s2117_s9 + $0x160] sm:$0xff]  ;;  %v214_v23 = vld [vmem:[%s2117_s9 + $0x168] sm:$0xff] }
  0x26   : > { %191 = vst [vmem:[%s2122_s10 + $0x58] sm:$0xff] %v190_v11  ;;  %v216_v24 = vld [vmem:[%s2117_s9 + $0x180] sm:$0xff]  ;;  %v218_v25 = vld [vmem:[%s2117_s9 + $0x188] sm:$0xff] }
  0x27   : > { %193 = vst [vmem:[%s2122_s10 + $0x60] sm:$0xff] %v192_v12  ;;  %v220_v26 = vld [vmem:[%s2117_s9 + $0x1a0] sm:$0xff]  ;;  %v222_v27 = vld [vmem:[%s2117_s9 + $0x1a8] sm:$0xff] }
  0x28   : > { %195 = vst [vmem:[%s2122_s10 + $0x68] sm:$0xff] %v194_v13  ;;  %v224_v28 = vld [vmem:[%s2117_s9 + $0x1c0] sm:$0xff]  ;;  %v226_v29 = vld [vmem:[%s2117_s9 + $0x1c8] sm:$0xff] }
  0x29   : > { %197 = vst [vmem:[%s2122_s10 + $0x70] sm:$0xff] %v196_v14  ;;  %v228_v30 = vld [vmem:[%s2117_s9 + $0x1e0] sm:$0xff]  ;;  %v230_v31 = vld [vmem:[%s2117_s9 + $0x1e8] sm:$0xff] }
  0x2a   : > { %199 = vst [vmem:[%s2122_s10 + $0x78] sm:$0xff] %v198_v15  ;;  %v232_v32 = vld [vmem:[%s2117_s9 + $0x200] sm:$0xff]  ;;  %v234_v33 = vld [vmem:[%s2117_s9 + $0x208] sm:$0xff] }
  0x2b   : > { %201 = vst [vmem:[%s2122_s10 + $0x80] sm:$0xff] %v200_v16  ;;  %v236_v34 = vld [vmem:[%s2117_s9 + $0x220] sm:$0xff]  ;;  %v238_v35 = vld [vmem:[%s2117_s9 + $0x228] sm:$0xff] }
  0x2c   : > { %203 = vst [vmem:[%s2122_s10 + $0x88] sm:$0xff] %v202_v17  ;;  %v240_v36 = vld [vmem:[%s2117_s9 + $0x240] sm:$0xff]  ;;  %v242_v37 = vld [vmem:[%s2117_s9 + $0x248] sm:$0xff] }
  0x2d   : > { %205 = vst [vmem:[%s2122_s10 + $0x90] sm:$0xff] %v204_v18  ;;  %v244_v38 = vld [vmem:[%s2117_s9 + $0x260] sm:$0xff]  ;;  %v246_v39 = vld [vmem:[%s2117_s9 + $0x268] sm:$0xff] }
  0x2e   : > { %207 = vst [vmem:[%s2122_s10 + $0x98] sm:$0xff] %v206_v19  ;;  %v248_v40 = vld [vmem:[%s2117_s9 + $0x280] sm:$0xff]  ;;  %v250_v41 = vld [vmem:[%s2117_s9 + $0x288] sm:$0xff] }
  0x2f   : > { %209 = vst [vmem:[%s2122_s10 + $0xa0] sm:$0xff] %v208_v20  ;;  %v252_v42 = vld [vmem:[%s2117_s9 + $0x2a0] sm:$0xff]  ;;  %v254_v43 = vld [vmem:[%s2117_s9 + $0x2a8] sm:$0xff] }
  0x30   : > { %211 = vst [vmem:[%s2122_s10 + $0xa8] sm:$0xff] %v210_v21  ;;  %v256_v44 = vld [vmem:[%s2117_s9 + $0x2c0] sm:$0xff]  ;;  %v258_v45 = vld [vmem:[%s2117_s9 + $0x2c8] sm:$0xff] }
  0x31   : > { %213 = vst [vmem:[%s2122_s10 + $0xb0] sm:$0xff] %v212_v22  ;;  %v260_v46 = vld [vmem:[%s2117_s9 + $0x2e0] sm:$0xff]  ;;  %v262_v47 = vld [vmem:[%s2117_s9 + $0x2e8] sm:$0xff] }
  0x32   : > { %215 = vst [vmem:[%s2122_s10 + $0xb8] sm:$0xff] %v214_v23  ;;  %v264_v48 = vld [vmem:[%s2117_s9 + $0x300] sm:$0xff]  ;;  %v266_v49 = vld [vmem:[%s2117_s9 + $0x308] sm:$0xff] }
  0x33   : > { %217 = vst [vmem:[%s2122_s10 + $0xc0] sm:$0xff] %v216_v24  ;;  %v268_v50 = vld [vmem:[%s2117_s9 + $0x320] sm:$0xff]  ;;  %v270_v51 = vld [vmem:[%s2117_s9 + $0x328] sm:$0xff] }
  0x34   : > { %219 = vst [vmem:[%s2122_s10 + $0xc8] sm:$0xff] %v218_v25  ;;  %v272_v52 = vld [vmem:[%s2117_s9 + $0x340] sm:$0xff]  ;;  %v274_v53 = vld [vmem:[%s2117_s9 + $0x348] sm:$0xff] }
  0x35   : > { %221 = vst [vmem:[%s2122_s10 + $0xd0] sm:$0xff] %v220_v26  ;;  %v276_v54 = vld [vmem:[%s2117_s9 + $0x360] sm:$0xff]  ;;  %v278_v55 = vld [vmem:[%s2117_s9 + $0x368] sm:$0xff] }
  0x36   : > { %223 = vst [vmem:[%s2122_s10 + $0xd8] sm:$0xff] %v222_v27  ;;  %v280_v56 = vld [vmem:[%s2117_s9 + $0x380] sm:$0xff]  ;;  %v282_v57 = vld [vmem:[%s2117_s9 + $0x388] sm:$0xff] }
  0x37   : > { %225 = vst [vmem:[%s2122_s10 + $0xe0] sm:$0xff] %v224_v28  ;;  %v284_v58 = vld [vmem:[%s2117_s9 + $0x3a0] sm:$0xff]  ;;  %v286_v59 = vld [vmem:[%s2117_s9 + $0x3a8] sm:$0xff] }
  0x38   : > { %227 = vst [vmem:[%s2122_s10 + $0xe8] sm:$0xff] %v226_v29  ;;  %v288_v60 = vld [vmem:[%s2117_s9 + $0x3c0] sm:$0xff]  ;;  %v290_v61 = vld [vmem:[%s2117_s9 + $0x3c8] sm:$0xff] }
  0x39   : > { %229 = vst [vmem:[%s2122_s10 + $0xf0] sm:$0xff] %v228_v30  ;;  %v292_v62 = vld [vmem:[%s2117_s9 + $0x3e0] sm:$0xff]  ;;  %v294_v63 = vld [vmem:[%s2117_s9 + $0x3e8] sm:$0xff] }
  0x3a   : > { %231 = vst [vmem:[%s2122_s10 + $0xf8] sm:$0xff] %v230_v31  ;;  %v296_v0 = vld [vmem:[%s2117_s9 + $0x400] sm:$0xff]  ;;  %v298_v1 = vld [vmem:[%s2117_s9 + $0x408] sm:$0xff] }
  0x3b   : > { %233 = vst [vmem:[%s2122_s10 + $0x100] sm:$0xff] %v232_v32  ;;  %v300_v2 = vld [vmem:[%s2117_s9 + $0x420] sm:$0xff]  ;;  %v302_v3 = vld [vmem:[%s2117_s9 + $0x428] sm:$0xff] }
  0x3c   : > { %235 = vst [vmem:[%s2122_s10 + $0x108] sm:$0xff] %v234_v33  ;;  %v304_v4 = vld [vmem:[%s2117_s9 + $0x440] sm:$0xff]  ;;  %v306_v5 = vld [vmem:[%s2117_s9 + $0x448] sm:$0xff] }
  0x3d   : > { %237 = vst [vmem:[%s2122_s10 + $0x110] sm:$0xff] %v236_v34  ;;  %v308_v6 = vld [vmem:[%s2117_s9 + $0x460] sm:$0xff]  ;;  %v310_v7 = vld [vmem:[%s2117_s9 + $0x468] sm:$0xff] }
  0x3e   : > { %239 = vst [vmem:[%s2122_s10 + $0x118] sm:$0xff] %v238_v35 }
  0x3f   : > { %241 = vst [vmem:[%s2122_s10 + $0x120] sm:$0xff] %v240_v36 }
  0x40   : > { %243 = vst [vmem:[%s2122_s10 + $0x128] sm:$0xff] %v242_v37 }
  0x41   : > { %245 = vst [vmem:[%s2122_s10 + $0x130] sm:$0xff] %v244_v38 }
  0x42   : > { %247 = vst [vmem:[%s2122_s10 + $0x138] sm:$0xff] %v246_v39 }
  0x43   : > { %249 = vst [vmem:[%s2122_s10 + $0x140] sm:$0xff] %v248_v40 }
  0x44   : > { %251 = vst [vmem:[%s2122_s10 + $0x148] sm:$0xff] %v250_v41 }
  0x45   : > { %253 = vst [vmem:[%s2122_s10 + $0x150] sm:$0xff] %v252_v42 }
  0x46   : > { %255 = vst [vmem:[%s2122_s10 + $0x158] sm:$0xff] %v254_v43 }
  0x47   : > { %257 = vst [vmem:[%s2122_s10 + $0x160] sm:$0xff] %v256_v44 }
  0x48   : > { %259 = vst [vmem:[%s2122_s10 + $0x168] sm:$0xff] %v258_v45 }
  0x49   : > { %261 = vst [vmem:[%s2122_s10 + $0x170] sm:$0xff] %v260_v46 }
  0x4a   : > { %263 = vst [vmem:[%s2122_s10 + $0x178] sm:$0xff] %v262_v47 }
  0x4b   : > { %265 = vst [vmem:[%s2122_s10 + $0x180] sm:$0xff] %v264_v48 }
  0x4c   : > { %267 = vst [vmem:[%s2122_s10 + $0x188] sm:$0xff] %v266_v49 }
  0x4d   : > { %269 = vst [vmem:[%s2122_s10 + $0x190] sm:$0xff] %v268_v50 }
  0x4e   : > { %271 = vst [vmem:[%s2122_s10 + $0x198] sm:$0xff] %v270_v51 }
  0x4f   : > { %273 = vst [vmem:[%s2122_s10 + $0x1a0] sm:$0xff] %v272_v52 }
  0x50   : > { %275 = vst [vmem:[%s2122_s10 + $0x1a8] sm:$0xff] %v274_v53 }
  0x51   : > { %277 = vst [vmem:[%s2122_s10 + $0x1b0] sm:$0xff] %v276_v54 }
  0x52   : > { %279 = vst [vmem:[%s2122_s10 + $0x1b8] sm:$0xff] %v278_v55 }
  0x53   : > { %281 = vst [vmem:[%s2122_s10 + $0x1c0] sm:$0xff] %v280_v56 }
  0x54   : > { %283 = vst [vmem:[%s2122_s10 + $0x1c8] sm:$0xff] %v282_v57 }
  0x55   : > { %285 = vst [vmem:[%s2122_s10 + $0x1d0] sm:$0xff] %v284_v58 }
  0x56   : > { %287 = vst [vmem:[%s2122_s10 + $0x1d8] sm:$0xff] %v286_v59 }
  0x57   : > { %289 = vst [vmem:[%s2122_s10 + $0x1e0] sm:$0xff] %v288_v60 }
  0x58   : > { %291 = vst [vmem:[%s2122_s10 + $0x1e8] sm:$0xff] %v290_v61 }
  0x59   : > { %293 = vst [vmem:[%s2122_s10 + $0x1f0] sm:$0xff] %v292_v62 }
  0x5a   : > { %295 = vst [vmem:[%s2122_s10 + $0x1f8] sm:$0xff] %v294_v63 }
  0x5b   : > { %297 = vst [vmem:[%s2122_s10 + $0x200] sm:$0xff] %v296_v0 }
  0x5c   : > { %299 = vst [vmem:[%s2122_s10 + $0x208] sm:$0xff] %v298_v1 }
  0x5d   : > { %301 = vst [vmem:[%s2122_s10 + $0x210] sm:$0xff] %v300_v2 }
  0x5e   : > { %303 = vst [vmem:[%s2122_s10 + $0x218] sm:$0xff] %v302_v3 }
  0x5f   : > { %305 = vst [vmem:[%s2122_s10 + $0x220] sm:$0xff] %v304_v4 }
  0x60   : > { %307 = vst [vmem:[%s2122_s10 + $0x228] sm:$0xff] %v306_v5 }
  0x61   : > { %309 = vst [vmem:[%s2122_s10 + $0x230] sm:$0xff] %v308_v6 }
  0x62   : > { %311 = vst [vmem:[%s2122_s10 + $0x238] sm:$0xff] %v310_v7 }
  0x63 PF: > { %p1468_p9 = scmp.ge.s32.totalorder %s2029_s18, 1  ;;  %p316_p10 = scmp.lt.s32.totalorder %s2029_s18, 5 }
  0x65   : > { %p317_p11 = pnand %p1468_p9, %p316_p10 }
  0x66   : > { %s323_s11 = sand.u32 (!%p317_p11), 1, %s2005_s12  }
  0x67   : > { %320 = sbr.rel (%p317_p11) target bundleno = 475 (0x1db), region = 51 }
  0x68   : > { %s1914_s21 = smul.u32 (!%p317_p11), 576, %s323_s11 }
  0x6a   : > { %s2270_s22 = scalar_lea.vmem (!%p317_p11), [#allocation2], %s1914_s21 }
  0x6c   : > { %v1632_v8 = vld [vmem:[%s2270_s22 + $0xe0] sm:$0xf]  ;;  %v1870_v9 = vld [vmem:[%s2270_s22 + $0xec] sm:$0xf0]  ;;  %v1868_v17 = vld [vmem:[%s2270_s22 + $0xe4] sm:$0xf] }
  0x6d   : > { %v1760_v10 = vld [vmem:[%s2270_s22 + $0x1e0] sm:$0xf]  ;;  %v1633_v11 = vor.u32 %v1870_v9, %v1632_v8  ;;  %v1902_v12 = vld [vmem:[%s2270_s22 + $0x1ec] sm:$0xf0]  ;;  %v1634_v18 = vld [vmem:[%s2270_s22 + $0xf0] sm:$0xf0] }
  0x6e   : > { %v1792_v13 = vld [vmem:[%s2270_s22 + $0x220] sm:$0xf]  ;;  %v1910_v14 = vld [vmem:[%s2270_s22 + $0x22c] sm:$0xf0]  ;;  %v1761_v15 = vor.u32 %v1902_v12, %v1760_v10  ;;  %v1480_v20 = vld [vmem:[%s2824_s1 + $0x8] sm:$0xf]  ;;  %v1637_v22 = vor.u32 %v1868_v17, %v1634_v18 }
  0x6f   : > { %v1793_v16 = vor.u32 %v1910_v14, %v1792_v13  ;;  %v1616_v19 = vld [vmem:[%s2270_s22 + $0xc0] sm:$0xf]  ;;  %v1830_v21 = vld [vmem:[%s2824_s1 + $0x10] sm:$0xf0]  ;;  %917 = vmatpush.bf16.msra.mxu0 %v1633_v11  ;;  %v1866_v23 = vld [vmem:[%s2270_s22 + $0xcc] sm:$0xf0] }
  0x70   : > { %v1744_v24 = vld [vmem:[%s2270_s22 + $0x1c0] sm:$0xf]  ;;  %v1898_v25 = vld [vmem:[%s2270_s22 + $0x1cc] sm:$0xf0]  ;;  %946 = vmatpush.bf16.msra.mxu1 %v1761_v15  ;;  %v1617_v26 = vor.u32 %v1866_v23, %v1616_v19  ;;  %v1864_v30 = vld [vmem:[%s2270_s22 + $0xc4] sm:$0xf]  ;;  %1004 = vmatpush.bf16.msra.mxu3 %v1637_v22  ;;  %v2299_v39 = vor.u32 %v1830_v21, %v1480_v20 }
  0x71   : > { %981 = vmatpush.bf16.msra.mxu2 %v1793_v16  ;;  %v1745_v27 = vor.u32 %v1898_v25, %v1744_v24  ;;  %v1776_v28 = vld [vmem:[%s2270_s22 + $0x200] sm:$0xf]  ;;  %v1906_v29 = vld [vmem:[%s2270_s22 + $0x20c] sm:$0xf0]  ;;  %v1618_v32 = vld [vmem:[%s2270_s22 + $0xd0] sm:$0xf0] }
  0x72   : > { %v1777_v31 = vor.u32 %v1906_v29, %v1776_v28  ;;  %v1600_v33 = vld [vmem:[%s2270_s22 + $0xa0] sm:$0xf]  ;;  %v1862_v34 = vld [vmem:[%s2270_s22 + $0xac] sm:$0xf0]  ;;  %v1621_v35 = vor.u32 %v1864_v30, %v1618_v32  ;;  %v1860_v38 = vld [vmem:[%s2270_s22 + $0xa4] sm:$0xf] }
  0x73   : > { %v1728_v36 = vld [vmem:[%s2270_s22 + $0x1a0] sm:$0xf]  ;;  %v1894_v37 = vld [vmem:[%s2270_s22 + $0x1ac] sm:$0xf0]  ;;  %918 = vmatpush.bf16.msra.mxu0 %v1617_v26  ;;  %v1601_v40 = vor.u32 %v1862_v34, %v1600_v33  ;;  %v1602_v41 = vld [vmem:[%s2270_s22 + $0xb0] sm:$0xf0] }
  0x74   : > { %947 = vmatpush.bf16.msra.mxu1 %v1745_v27  ;;  %vm904_vm0 = vcmask 261120   ;;  %v1729_v42 = vor.u32 %v1894_v37, %v1728_v36  ;;  %v1584_v43 = vld [vmem:[%s2270_s22 + $0x80] sm:$0xf]  ;;  %v1858_v44 = vld [vmem:[%s2270_s22 + $0x8c] sm:$0xf0]  ;;  %1005 = vmatpush.bf16.msra.mxu3 %v1621_v35  ;;  %v1605_v45 = vor.u32 %v1860_v38, %v1602_v41  ;;  %s1823_s12 = sshll.u32 (%p2100_p6), %s2013_s14, 2 }
  0x75   : > { %982 = vmatpush.bf16.msra.mxu2 %v1777_v31  ;;  %v1712_v46 = vld [vmem:[%s2270_s22 + $0x180] sm:$0xf]  ;;  %v1890_v47 = vld [vmem:[%s2270_s22 + $0x18c] sm:$0xf0]  ;;  %v1856_v48 = vld [vmem:[%s2270_s22 + $0x84] sm:$0xf]  ;;  %v1585_v50 = vor.u32 %v1858_v44, %v1584_v43 }
  0x76   : > { %v1586_v49 = vld [vmem:[%s2270_s22 + $0x90] sm:$0xf0]  ;;  %v1713_v51 = vor.u32 %v1890_v47, %v1712_v46  ;;  %v1568_v52 = vld [vmem:[%s2270_s22 + $0x60] sm:$0xf]  ;;  %v1854_v53 = vld [vmem:[%s2270_s22 + $0x6c] sm:$0xf0] }
  0x77   : > { %919 = vmatpush.bf16.msra.mxu0 %v1601_v40  ;;  %v1589_v54 = vor.u32 %v1856_v48, %v1586_v49  ;;  %v1696_v55 = vld [vmem:[%s2270_s22 + $0x160] sm:$0xf]  ;;  %v1886_v56 = vld [vmem:[%s2270_s22 + $0x16c] sm:$0xf0]  ;;  %v1852_v57 = vld [vmem:[%s2270_s22 + $0x64] sm:$0xf]  ;;  %v1569_v59 = vor.u32 %v1854_v53, %v1568_v52 }
  0x78   : > { %1806 = vmatmul.msk.bf16.vlgmr.msra.gmra.mxu2 %vm904_vm0, %v2299_v39  ;;  %948 = vmatpush.bf16.msra.mxu1 %v1729_v42  ;;  %v1570_v58 = vld [vmem:[%s2270_s22 + $0x70] sm:$0xf0]  ;;  %v1697_v60 = vor.u32 %v1886_v56, %v1696_v55  ;;  %v1552_v61 = vld [vmem:[%s2270_s22 + $0x40] sm:$0xf]  ;;  %v1850_v62 = vld [vmem:[%s2270_s22 + $0x4c] sm:$0xf0] }
  0x79   : > { %1006 = vmatpush.bf16.msra.mxu3 %v1605_v45  ;;  %v1573_v63 = vor.u32 %v1852_v57, %v1570_v58  ;;  %v1680_v0 = vld [vmem:[%s2270_s22 + $0x140] sm:$0xf]  ;;  %v1882_v1 = vld [vmem:[%s2270_s22 + $0x14c] sm:$0xf0]  ;;  %v1848_v2 = vld [vmem:[%s2270_s22 + $0x44] sm:$0xf]  ;;  %v1553_v5 = vor.u32 %v1850_v62, %v1552_v61 }
  0x7a   : > { %v1554_v3 = vld [vmem:[%s2270_s22 + $0x50] sm:$0xf0]  ;;  %v1900_v4 = vld [vmem:[%s2270_s22 + $0x1e4] sm:$0xf]  ;;  %v1492_v6 = vld [vmem:[%s2824_s1 + $0x20] sm:$0xf]  ;;  %v1681_v9 = vor.u32 %v1882_v1, %v1680_v0 }
  0x7b   : > { %920 = vmatpush.bf16.msra.mxu0 %v1585_v50  ;;  %v1833_v7 = vld [vmem:[%s2824_s1 + $0x28] sm:$0xf0]  ;;  %v1762_v8 = vld [vmem:[%s2270_s22 + $0x1f0] sm:$0xf0]  ;;  %v1536_v10 = vld [vmem:[%s2270_s22 + $0x20] sm:$0xf]  ;;  %v1557_v14 = vor.u32 %v1848_v2, %v1554_v3 }
  0x7c   : > { %949 = vmatpush.bf16.msra.mxu1 %v1713_v51  ;;  %v1846_v11 = vld [vmem:[%s2270_s22 + $0x2c] sm:$0xf0]  ;;  %v1664_v12 = vld [vmem:[%s2270_s22 + $0x120] sm:$0xf]  ;;  %v1765_v13 = vor.u32 %v1900_v4, %v1762_v8  ;;  %v1844_v16 = vld [vmem:[%s2270_s22 + $0x24] sm:$0xf]  ;;  %v2339_v21 = vor.u32 %v1833_v7, %v1492_v6 }
  0x7d   : > { %1007 = vmatpush.bf16.msra.mxu3 %v1589_v54  ;;  %v1878_v15 = vld [vmem:[%s2270_s22 + $0x12c] sm:$0xf0]  ;;  %v1538_v17 = vld [vmem:[%s2270_s22 + $0x30] sm:$0xf0]  ;;  %v1520_v18 = vld [vmem:[%s2270_s22] sm:$0xf]  ;;  %v1537_v22 = vor.u32 %v1846_v11, %v1536_v10 }
  0x7e   : > { %1033 = vmatpush.bf16.msrb.mxu2 %v1765_v13  ;;  %v1896_v19 = vld [vmem:[%s2270_s22 + $0x1c4] sm:$0xf]  ;;  %v1746_v20 = vld [vmem:[%s2270_s22 + $0x1d0] sm:$0xf0]  ;;  %v1842_v23 = vld [vmem:[%s2270_s22 + $0xc] sm:$0xf0]  ;;  %v1665_v27 = vor.u32 %v1878_v15, %v1664_v12  ;;  %v1541_v32 = vor.u32 %v1844_v16, %v1538_v17 }
  0x7f   : > { %921 = vmatpush.bf16.msra.mxu0 %v1569_v59  ;;  %v1648_v24 = vld [vmem:[%s2270_s22 + $0x100] sm:$0xf]  ;;  %v1749_v25 = vor.u32 %v1896_v19, %v1746_v20  ;;  %v1874_v28 = vld [vmem:[%s2270_s22 + $0x10c] sm:$0xf0]  ;;  %v1840_v29 = vld [vmem:[%s2270_s22 + $0x4] sm:$0xf]  ;;  %v1521_v41 = vor.u32 %v1842_v23, %v1520_v18 }
  0x80   : > { %950 = vmatpush.bf16.msra.mxu1 %v1697_v60  ;;  %v436_v26 = vld [vmem:[%s2825_s2] sm:$0xff]  ;;  %v1522_v30 = vld [vmem:[%s2270_s22 + $0x10] sm:$0xf0]  ;;  %v2031_v31 = vmov 0   ;;  %v1640_v37 = vld [vmem:[%s2270_s22 + $0xe8] sm:$0xf]  ;;  %v1649_v46 = vor.u32 %v1874_v28, %v1648_v24 }
  0x81   : > { %1008 = vmatpush.bf16.msra.mxu3 %v1573_v63  ;;  %1972 = vset.pattern.permute.xlu0 %v2031_v31  ;;  %v1472_v33 = vld [vmem:[%s2824_s1] sm:$0xf]  ;;  %v1908_v34 = vld [vmem:[%s2270_s22 + $0x224] sm:$0xf]  ;;  %v1794_v35 = vld [vmem:[%s2270_s22 + $0x230] sm:$0xf0]  ;;  %v1525_v50 = vor.u32 %v1840_v29, %v1522_v30 }
  0x82   : > { %446 = vperm.xlu0 %1972, %v436_v26   ;;  %v1892_v36 = vld [vmem:[%s2270_s22 + $0x1a4] sm:$0xf]  ;;  %v1871_v38 = vld [vmem:[%s2270_s22 + $0xf4] sm:$0xf0]  ;;  %1034 = vmatpush.bf16.msrb.mxu2 %v1749_v25  ;;  %v1730_v40 = vld [vmem:[%s2270_s22 + $0x1b0] sm:$0xf0]  ;;  %v1797_v49 = vor.u32 %v1908_v34, %v1794_v35 }
  0x83   : > { %922 = vmatpush.bf16.msra.mxu0 %v1553_v5  ;;  %1973 = vset.pattern.permute.xlu1 %v2031_v31  ;;  %v1829_v42 = vld [vmem:[%s2824_s1 + $0x8] sm:$0xf0]  ;;  %v1768_v43 = vld [vmem:[%s2270_s22 + $0x1e8] sm:$0xf]  ;;  %v1903_v44 = vld [vmem:[%s2270_s22 + $0x1f4] sm:$0xf0]  ;;  %v1733_v45 = vor.u32 %v1892_v36, %v1730_v40  ;;  %v1641_v51 = vor.u32 %v1871_v38, %v1640_v37 }
  0x84   : > { %951 = vmatpush.bf16.msra.mxu1 %v1681_v9  ;;  %v1828_v47 = vld [vmem:[%s2824_s1 + $0x4] sm:$0xf]  ;;  %v1474_v48 = vld [vmem:[%s2824_s1 + $0xc] sm:$0xf0]  ;;  %1974 = vset.pattern.permute.xlu2 %v2031_v31  ;;  %v1714_v53 = vld [vmem:[%s2270_s22 + $0x190] sm:$0xf0]  ;;  %v2373_v54 = vor.u32 %v1829_v42, %v1472_v33  ;;  %v1769_v55 = vor.u32 %v1903_v44, %v1768_v43 }
  0x85   : > { %1009 = vmatpush.bf16.msra.mxu3 %v1557_v14  ;;  %v1888_v52 = vld [vmem:[%s2270_s22 + $0x184] sm:$0xf]  ;;  %v1624_v56 = vld [vmem:[%s2270_s22 + $0xc8] sm:$0xf]  ;;  %v1867_v57 = vld [vmem:[%s2270_s22 + $0xd4] sm:$0xf0]  ;;  %v2380_v59 = vor.u32 %v1828_v47, %v1474_v48 }
  0x86   : > { %1035 = vmatpush.bf16.msrb.mxu2 %v1733_v45  ;;  %v438_v58 = vld [vmem:[%s2825_s2 + $0x10] sm:$0xff]  ;;  %v1752_v60 = vld [vmem:[%s2270_s22 + $0x1c8] sm:$0xf]  ;;  %v1899_v61 = vld [vmem:[%s2270_s22 + $0x1d4] sm:$0xf0]  ;;  %v1717_v63 = vor.u32 %v1888_v52, %v1714_v53  ;;  %v1625_v0 = vor.u32 %v1867_v57, %v1624_v56 }
  0x87   : > { %923 = vmatpush.bf16.msra.mxu0 %v1537_v22  ;;  %456 = vperm.xlu1 %1973, %v438_v58   ;;  %v437_v62 = vld [vmem:[%s2825_s2 + $0x8] sm:$0xff]  ;;  %v1884_v1 = vld [vmem:[%s2270_s22 + $0x164] sm:$0xf]  ;;  %v1698_v2 = vld [vmem:[%s2270_s22 + $0x170] sm:$0xf0]  ;;  %v1753_v3 = vor.u32 %v1899_v61, %v1752_v60 }
  0x88   : > { %1807 = vmatmul.msk.bf16.gmra.mxu2 %vm904_vm0, %v2339_v21  ;;  %952 = vmatpush.bf16.msra.mxu1 %v1665_v27  ;;  %v1608_v4 = vld [vmem:[%s2270_s22 + $0xa8] sm:$0xf]  ;;  %v1863_v5 = vld [vmem:[%s2270_s22 + $0xb4] sm:$0xf0]  ;;  %v1836_v9 = vld [vmem:[%s2824_s1 + $0x40] sm:$0xf0]  ;;  %v1701_v10 = vor.u32 %v1884_v1, %v1698_v2 }
  0x89   : > { %1010 = vmatpush.bf16.msra.mxu3 %v1541_v32  ;;  %v1504_v6 = vld [vmem:[%s2824_s1 + $0x38] sm:$0xf]  ;;  %v1736_v7 = vld [vmem:[%s2270_s22 + $0x1a8] sm:$0xf]  ;;  %v1880_v11 = vld [vmem:[%s2270_s22 + $0x144] sm:$0xf]  ;;  %v1609_v13 = vor.u32 %v1863_v5, %v1608_v4 }
  0x8a   : > { %v1895_v8 = vld [vmem:[%s2270_s22 + $0x1b4] sm:$0xf0]  ;;  %451 = vperm.xlu0 %1972, %v437_v62   ;;  %1036 = vmatpush.bf16.msrb.mxu2 %v1717_v63  ;;  %v1904_v12 = vld [vmem:[%s2270_s22 + $0x204] sm:$0xf]  ;;  %v1682_v14 = vld [vmem:[%s2270_s22 + $0x150] sm:$0xf0]  ;;  %v2411_v22 = vor.u32 %v1836_v9, %v1504_v6 }
  0x8b   : > { %924 = vmatpush.bf16.msra.mxu0 %v1521_v41  ;;  %v1778_v15 = vld [vmem:[%s2270_s22 + $0x210] sm:$0xf0]  ;;  %v439_v16 = vld [vmem:[%s2825_s2 + $0x18] sm:$0xff]  ;;  %v1737_v17 = vor.u32 %v1895_v8, %v1736_v7  ;;  %v1592_v18 = vld [vmem:[%s2270_s22 + $0x88] sm:$0xf]  ;;  %v1685_v25 = vor.u32 %v1880_v11, %v1682_v14 }
  0x8c   : > { %953 = vmatpush.bf16.msra.mxu1 %v1649_v46  ;;  %v1859_v19 = vld [vmem:[%s2270_s22 + $0x94] sm:$0xf0]  ;;  %v1781_v20 = vor.u32 %v1904_v12, %v1778_v15  ;;  %v1720_v23 = vld [vmem:[%s2270_s22 + $0x188] sm:$0xf]  ;;  %v1876_v27 = vld [vmem:[%s2270_s22 + $0x124] sm:$0xf] }
  0x8d   : > { %1011 = vmatpush.bf16.msra.mxu3 %v1525_v50  ;;  %v1891_v24 = vld [vmem:[%s2270_s22 + $0x194] sm:$0xf0]  ;;  %v1593_v26 = vor.u32 %v1859_v19, %v1592_v18  ;;  %v1666_v28 = vld [vmem:[%s2270_s22 + $0x130] sm:$0xf0]  ;;  %v1576_v31 = vld [vmem:[%s2270_s22 + $0x68] sm:$0xf] }
  0x8e   : > { %925 = vmatmul.bf16.vlgmr.msra.gmra.mxu0 %v2373_v54  ;;  %1037 = vmatpush.bf16.msrb.mxu2 %v1701_v10  ;;  %v1484_v29 = vld [vmem:[%s2824_s1 + $0x18] sm:$0xf]  ;;  %v1721_v30 = vor.u32 %v1891_v24, %v1720_v23  ;;  %v1832_v33 = vld [vmem:[%s2824_s1 + $0x20] sm:$0xf0]  ;;  %v1704_v34 = vld [vmem:[%s2270_s22 + $0x168] sm:$0xf]  ;;  %v1669_v38 = vor.u32 %v1876_v27, %v1666_v28 }
  0x8f   : > { %1068 = vmatpush.bf16.msrb.mxu0 %v1797_v49  ;;  %954 = vmatmul.bf16.vlgmr.msra.gmra.mxu1 %v2380_v59  ;;  %v1855_v32 = vld [vmem:[%s2270_s22 + $0x74] sm:$0xf0]  ;;  %v1831_v36 = vld [vmem:[%s2824_s1 + $0x1c] sm:$0xf]  ;;  %v1486_v37 = vld [vmem:[%s2824_s1 + $0x24] sm:$0xf0]  ;;  %v2437_v43 = vor.u32 %v1832_v33, %v1484_v29 }
  0x90   : > { %1091 = vmatpush.bf16.msrb.mxu1 %v1641_v51  ;;  %1012 = vmatmul.bf16.vlgmr.msra.gmra.mxu3 %v2373_v54  ;;  %v1887_v35 = vld [vmem:[%s2270_s22 + $0x174] sm:$0xf0]  ;;  %v1577_v40 = vor.u32 %v1855_v32, %v1576_v31  ;;  %v1872_v41 = vld [vmem:[%s2270_s22 + $0x104] sm:$0xf]  ;;  %v1650_v42 = vld [vmem:[%s2270_s22 + $0x110] sm:$0xf0]  ;;  %v2441_v47 = vor.u32 %v1831_v36, %v1486_v37 }
  0x91   : > { %1120 = vmatpush.bf16.msrb.mxu3 %v1769_v55  ;;  %461 = vperm.xlu1 %1973, %v439_v16   ;;  %v1705_v44 = vor.u32 %v1887_v35, %v1704_v34  ;;  %v1560_v45 = vld [vmem:[%s2270_s22 + $0x48] sm:$0xf]  ;;  %v1851_v46 = vld [vmem:[%s2270_s22 + $0x54] sm:$0xf0]  ;;  %v1653_v50 = vor.u32 %v1872_v41, %v1650_v42  ;;  %v1516_v53 = vld [vmem:[%s2824_s1 + $0x50] sm:$0xf] }
  0x92   : > { %1038 = vmatpush.bf16.msrb.mxu2 %v1685_v25  ;;  %v1688_v48 = vld [vmem:[%s2270_s22 + $0x148] sm:$0xf]  ;;  %v1883_v49 = vld [vmem:[%s2270_s22 + $0x154] sm:$0xf0]  ;;  %v1561_v51 = vor.u32 %v1851_v46, %v1560_v45  ;;  %v1839_v55 = vld [vmem:[%s2824_s1 + $0x58] sm:$0xf0] }
  0x93   : > { %1069 = vmatpush.bf16.msrb.mxu0 %v1781_v20  ;;  %v1689_v52 = vor.u32 %v1883_v49, %v1688_v48  ;;  %v1672_v56 = vld [vmem:[%s2270_s22 + $0x128] sm:$0xf]  ;;  %v1879_v57 = vld [vmem:[%s2270_s22 + $0x134] sm:$0xf0]  ;;  %v2458_v63 = vor.u32 %v1839_v55, %v1516_v53  ;;  %v1835_v1 = vld [vmem:[%s2824_s1 + $0x38] sm:$0xf0] }
  0x94   : > { %1092 = vmatpush.bf16.msrb.mxu1 %v1625_v0  ;;  %v1544_v58 = vld [vmem:[%s2270_s22 + $0x28] sm:$0xf]  ;;  %v1847_v60 = vld [vmem:[%s2270_s22 + $0x34] sm:$0xf0]  ;;  %v1673_v61 = vor.u32 %v1879_v57, %v1672_v56  ;;  %v1496_v0 = vld [vmem:[%s2824_s1 + $0x30] sm:$0xf] }
  0x95   : > { %1121 = vmatpush.bf16.msrb.mxu3 %v1753_v3  ;;  %v1545_v62 = vor.u32 %v1847_v60, %v1544_v58  ;;  %v1834_v2 = vld [vmem:[%s2824_s1 + $0x34] sm:$0xf]  ;;  %v1656_v3 = vld [vmem:[%s2270_s22 + $0x108] sm:$0xf]  ;;  %v1875_v4 = vld [vmem:[%s2270_s22 + $0x114] sm:$0xf0]  ;;  %v2481_v11 = vor.u32 %v1835_v1, %v1496_v0 }
  0x96   : > { %1039 = vmatpush.bf16.msrb.mxu2 %v1669_v38  ;;  %v1528_v5 = vld [vmem:[%s2270_s22 + $0x8] sm:$0xf]  ;;  %v1498_v6 = vld [vmem:[%s2824_s1 + $0x3c] sm:$0xf0]  ;;  %v1657_v7 = vor.u32 %v1875_v4, %v1656_v3  ;;  %v1843_v8 = vld [vmem:[%s2270_s22 + $0x14] sm:$0xf0] }
  0x97   : > { %v442_v9 = vld [vmem:[%s2825_s2 + $0x30] sm:$0xff]  ;;  %v1529_v10 = vor.u32 %v1843_v8, %v1528_v5  ;;  %v2483_v12 = vor.u32 %v1834_v2, %v1498_v6  ;;  %v1911_v14 = vld [vmem:[%s2270_s22 + $0x234] sm:$0xf0]  ;;  %v1909_v15 = vld [vmem:[%s2270_s22 + $0x22c] sm:$0xf] }
  0x98   : > { %1093 = vmatpush.bf16.msrb.mxu1 %v1609_v13  ;;  %1808 = vmatmul.msk.bf16.gmra.mxu2 %vm904_vm0, %v2411_v22  ;;  %v1800_v13 = vld [vmem:[%s2270_s22 + $0x228] sm:$0xf]  ;;  %v1869_v18 = vld [vmem:[%s2270_s22 + $0xec] sm:$0xf]  ;;  %v1642_v19 = vld [vmem:[%s2270_s22 + $0xf8] sm:$0xf0] }
  0x99   : > { %1122 = vmatpush.bf16.msrb.mxu3 %v1737_v17  ;;  %476 = vperm.xlu0 %1972, %v442_v9   ;;  %v1801_v16 = vor.u32 %v1911_v14, %v1800_v13  ;;  %v1802_v17 = vld [vmem:[%s2270_s22 + $0x238] sm:$0xf0]  ;;  %v1645_v23 = vor.u32 %v1869_v18, %v1642_v19  ;;  %v440_v24 = vld [vmem:[%s2825_s2 + $0x20] sm:$0xff]  ;;  %v1508_v29 = vld [vmem:[%s2824_s1 + $0x48] sm:$0xf] }
  0x9a   : > { %1040 = vmatpush.bf16.msrb.mxu2 %v1653_v50  ;;  %v1805_v20 = vor.u32 %v1909_v15, %v1802_v17  ;;  %v443_v25 = vld [vmem:[%s2825_s2 + $0x38] sm:$0xff]  ;;  %466 = vperm.xlu2 %1974, %v440_v24   ;;  %v1837_v31 = vld [vmem:[%s2824_s1 + $0x4c] sm:$0xf]  ;;  %v1784_v58 = vld [vmem:[%s2270_s22 + $0x208] sm:$0xf] }
  0x9b   : > { %v1770_v27 = vld [vmem:[%s2270_s22 + $0x1f8] sm:$0xf0]  ;;  %1178 = vmatpush.bf16.msra.mxu0 %v1645_v23  ;;  %481 = vperm.xlu1 %1973, %v443_v25   ;;  %v1510_v32 = vld [vmem:[%s2824_s1 + $0x54] sm:$0xf0]  ;;  %v1865_v33 = vld [vmem:[%s2270_s22 + $0xcc] sm:$0xf] }
  0x9c   : > { %1094 = vmatpush.bf16.msrb.mxu1 %v1593_v26  ;;  %v1901_v26 = vld [vmem:[%s2270_s22 + $0x1ec] sm:$0xf]  ;;  %v1626_v34 = vld [vmem:[%s2270_s22 + $0xd8] sm:$0xf0]  ;;  %v2524_v42 = vor.u32 %v1837_v31, %v1510_v32  ;;  %v1907_v60 = vld [vmem:[%s2270_s22 + $0x214] sm:$0xf0] }
  0x9d   : > { %1123 = vmatpush.bf16.msrb.mxu3 %v1721_v30  ;;  %v1773_v28 = vor.u32 %v1901_v26, %v1770_v27  ;;  %v1838_v30 = vld [vmem:[%s2824_s1 + $0x50] sm:$0xf0]  ;;  %v1629_v35 = vor.u32 %v1865_v33, %v1626_v34  ;;  %v441_v36 = vld [vmem:[%s2825_s2 + $0x28] sm:$0xff]  ;;  %v1754_v38 = vld [vmem:[%s2270_s22 + $0x1d8] sm:$0xf0] }
  0x9e   : > { %930 = vmatmul.bf16.gmra.mxu0 %v2437_v43  ;;  %1155 = vmatpush.bf16.msra.mxu2 %v1801_v16  ;;  %v1897_v37 = vld [vmem:[%s2270_s22 + $0x1cc] sm:$0xf]  ;;  %v2522_v41 = vor.u32 %v1838_v30, %v1508_v29  ;;  %v1610_v45 = vld [vmem:[%s2270_s22 + $0xb8] sm:$0xf0] }
  0x9f   : > { %959 = vmatmul.bf16.gmra.mxu1 %v2441_v47  ;;  %1179 = vmatpush.bf16.msra.mxu0 %v1629_v35  ;;  %v1893_v46 = vld [vmem:[%s2270_s22 + $0x1ac] sm:$0xf]  ;;  %v1738_v49 = vld [vmem:[%s2270_s22 + $0x1b8] sm:$0xf0] }
  0xa0   : > { %1095 = vmatpush.bf16.msrb.mxu1 %v1577_v40  ;;  %1017 = vmatmul.bf16.gmra.mxu3 %v2437_v43  ;;  %v1757_v40 = vor.u32 %v1897_v37, %v1754_v38  ;;  %v1741_v50 = vor.u32 %v1893_v46, %v1738_v49  ;;  %v1889_v53 = vld [vmem:[%s2270_s22 + $0x18c] sm:$0xf]  ;;  %v1722_v56 = vld [vmem:[%s2270_s22 + $0x198] sm:$0xf0] }
  0xa1   : > { %1124 = vmatpush.bf16.msrb.mxu3 %v1705_v44  ;;  %v1861_v44 = vld [vmem:[%s2270_s22 + $0xac] sm:$0xf]  ;;  %v1725_v57 = vor.u32 %v1889_v53, %v1722_v56  ;;  %v1786_v0 = vld [vmem:[%s2270_s22 + $0x218] sm:$0xf0] }
  0xa2   : > { %471 = vperm.xlu2 %1974, %v441_v36   ;;  %v1613_v48 = vor.u32 %v1861_v44, %v1610_v45  ;;  %v1853_v1 = vld [vmem:[%s2270_s22 + $0x6c] sm:$0xf]  ;;  %v1578_v2 = vld [vmem:[%s2270_s22 + $0x78] sm:$0xf0] }
  0xa3   : > { %v1581_v4 = vor.u32 %v1853_v1, %v1578_v2  ;;  %v1885_v5 = vld [vmem:[%s2270_s22 + $0x16c] sm:$0xf]  ;;  %v1706_v6 = vld [vmem:[%s2270_s22 + $0x178] sm:$0xf0] }
  0xa4   : > { %1096 = vmatpush.bf16.msrb.mxu1 %v1561_v51  ;;  %1180 = vmatpush.bf16.msra.mxu0 %v1613_v48  ;;  %v1857_v51 = vld [vmem:[%s2270_s22 + $0x8c] sm:$0xf]  ;;  %v1562_v9 = vld [vmem:[%s2270_s22 + $0x58] sm:$0xf0] }
  0xa5   : > { %1125 = vmatpush.bf16.msrb.mxu3 %v1689_v52  ;;  %v1594_v52 = vld [vmem:[%s2270_s22 + $0x98] sm:$0xf0]  ;;  %v1849_v8 = vld [vmem:[%s2270_s22 + $0x4c] sm:$0xf] }
  0xa6   : > { %v1597_v55 = vor.u32 %v1857_v51, %v1594_v52  ;;  %v1881_v13 = vld [vmem:[%s2270_s22 + $0x14c] sm:$0xf]  ;;  %v1690_v14 = vld [vmem:[%s2270_s22 + $0x158] sm:$0xf0] }
  0xa7   : > { %v1693_v15 = vor.u32 %v1881_v13, %v1690_v14  ;;  %v1845_v16 = vld [vmem:[%s2270_s22 + $0x2c] sm:$0xf]  ;;  %v1546_v17 = vld [vmem:[%s2270_s22 + $0x38] sm:$0xf0] }
  0xa8   : > { %1097 = vmatpush.bf16.msrb.mxu1 %v1545_v62  ;;  %1809 = vmatmul.msk.bf16.gmra.mxu2 %vm904_vm0, %v2458_v63  ;;  %v1785_v62 = vor.u32 %v1907_v60, %v1784_v58  ;;  %v1549_v18 = vor.u32 %v1845_v16, %v1546_v17  ;;  %v1877_v19 = vld [vmem:[%s2270_s22 + $0x12c] sm:$0xf]  ;;  %v1530_v25 = vld [vmem:[%s2270_s22 + $0x18] sm:$0xf0] }
  0xa9   : > { %1126 = vmatpush.bf16.msrb.mxu3 %v1673_v61  ;;  %1181 = vmatpush.bf16.msra.mxu0 %v1597_v55  ;;  %v1905_v61 = vld [vmem:[%s2270_s22 + $0x20c] sm:$0xf] }
  0xaa   : > { %v1789_v3 = vor.u32 %v1905_v61, %v1786_v0  ;;  %1156 = vmatpush.bf16.msra.mxu2 %v1785_v62  ;;  %v1841_v24 = vld [vmem:[%s2270_s22 + $0xc] sm:$0xf] }
  0xab   : > { %v1533_v26 = vor.u32 %v1841_v24, %v1530_v25  ;;  %v1873_v27 = vld [vmem:[%s2270_s22 + $0x10c] sm:$0xf] }
  0xac   : > { %1098 = vmatpush.bf16.msrb.mxu1 %v1529_v10  ;;  %v1565_v10 = vor.u32 %v1849_v8, %v1562_v9 }
  0xad   : > { %1127 = vmatpush.bf16.msrb.mxu3 %v1657_v7  ;;  %v1709_v7 = vor.u32 %v1885_v5, %v1706_v6  ;;  %1182 = vmatpush.bf16.msra.mxu0 %v1581_v4 }
  0xae   : > { %935 = vmatmul.bf16.gmra.mxu0 %v2481_v11 }
  0xaf   : > { %964 = vmatmul.bf16.gmra.mxu1 %v2483_v12 }
  0xb0   : > { %1022 = vmatmul.bf16.gmra.mxu3 %v2481_v11  ;;  %1207 = vmatpush.bf16.msra.mxu1 %v1773_v28  ;;  %v1658_v28 = vld [vmem:[%s2270_s22 + $0x118] sm:$0xf0] }
  0xb1   : > { %1242 = vmatpush.bf16.msra.mxu3 %v1805_v20  ;;  %1183 = vmatpush.bf16.msra.mxu0 %v1565_v10  ;;  %v1674_v20 = vld [vmem:[%s2270_s22 + $0x138] sm:$0xf0]  ;;  %v1661_v29 = vor.u32 %v1873_v27, %v1658_v28  ;;  %s1469_s22 = sshll.u32 %s323_s11, 7  ;;  %s1824_s11 = sshll.u32 (%p2100_p6), %s2017_s15, 6 }
  0xb2   : > { %v1677_v23 = vor.u32 %v1877_v19, %v1674_v20  ;;  %s2658_s6 = scalar_lea.vmem [#allocation3], %s1469_s22  ;;  %s1338_s7 = sadd.s32 (%p2100_p6), %s1824_s11, %s1823_s12 }
  0xb3   : > { %s1825_s8 = sshll.u32 (%p2100_p6), %s1338_s7, 2 }
  0xb4   : > { %1208 = vmatpush.bf16.msra.mxu1 %v1757_v40  ;;  %s1340_s10 = scalar_lea.vmem (%p2100_p6), %s2826_s3, %s1825_s8 }
  0xb5   : > { %1243 = vmatpush.bf16.msra.mxu3 %v1789_v3  ;;  %1184 = vmatpush.bf16.msra.mxu0 %v1549_v18 }
  0xb8   : > { %1041 = vmatmul.bf16.vlgmr.msrb.gmra.mxu2 %v2380_v59  ;;  %1209 = vmatpush.bf16.msra.mxu1 %v1741_v50 }
  0xb9   : > { %1185 = vmatpush.bf16.msra.mxu0 %v1533_v26 }
  0xbc   : > { %1210 = vmatpush.bf16.msra.mxu1 %v1725_v57 }
  0xbe   : > { %940 = vmatmul.bf16.gmra.mxu0 %v2522_v41 }
  0xbf   : > { %969 = vmatmul.bf16.gmra.mxu1 %v2524_v42 }
  0xc0   : > { %1027 = vmatmul.bf16.gmra.mxu3 %v2522_v41  ;;  %1211 = vmatpush.bf16.msra.mxu1 %v1709_v7 }
  0xc4   : > { %1212 = vmatpush.bf16.msra.mxu1 %v1693_v15 }
  0xc8   : > { %1046 = vmatmul.bf16.gmra.mxu2 %v2441_v47  ;;  %1213 = vmatpush.bf16.msra.mxu1 %v1677_v23 }
  0xcc   : > { %1214 = vmatpush.bf16.msra.mxu1 %v1661_v29 }
  0xce   : > { %1810 = vmatmul.msk.bf16.vlgmr.msrb.gmra.mxu0 %vm904_vm0, %v2299_v39 }
  0xcf   : > { %1099 = vmatmul.bf16.vlgmr.msrb.gmra.mxu1 %v2373_v54 }
  0xd0   : > { %1128 = vmatmul.bf16.vlgmr.msrb.gmra.mxu3 %v2380_v59 }
  0xd8   : > { %1051 = vmatmul.bf16.gmra.mxu2 %v2483_v12 }
  0xde   : > { %1811 = vmatmul.msk.bf16.gmra.mxu0 %vm904_vm0, %v2339_v21 }
  0xdf   : > { %1104 = vmatmul.bf16.gmra.mxu1 %v2437_v43 }
  0xe0   : > { %1133 = vmatmul.bf16.gmra.mxu3 %v2441_v47 }
  0xe8   : > { %1056 = vmatmul.bf16.gmra.mxu2 %v2524_v42 }
  0xee   : > { %1812 = vmatmul.msk.bf16.gmra.mxu0 %vm904_vm0, %v2411_v22 }
  0xef   : > { %1109 = vmatmul.bf16.gmra.mxu1 %v2481_v11 }
  0xf0   : > { %1138 = vmatmul.bf16.gmra.mxu3 %v2483_v12 }
  0xf8   : > { %1814 = vmatmul.msk.bf16.vlgmr.msra.gmra.mxu2 %vm904_vm0, %v2299_v39 }
  0xf9   : > { %v2653_v8 = vpop.permute.xlu1 %456 }
  0xfb   : > { %v984_v30 = vpop.f32.mrf.mxu2 }
  0xfe   : > { %1813 = vmatmul.msk.bf16.gmra.mxu0 %vm904_vm0, %v2458_v63 }
  0xff   : > { %1114 = vmatmul.bf16.gmra.mxu1 %v2522_v41 }
 0x100   : > { %1143 = vmatmul.bf16.gmra.mxu3 %v2524_v42 }
 0x103   : > { %v2578_v31 = vpop.f32.mrf.mxu2  ;;  %v2665_v29 = vpop.permute.xlu1 %461 }
 0x108   : > { %1815 = vmatmul.msk.bf16.gmra.mxu2 %vm904_vm0, %v2339_v21 }
 0x10b   : > { %v2582_v32 = vpop.f32.mrf.mxu2  ;;  %v926_v33 = vpop.f32.mrf.mxu0 }
 0x10c   : > { %v955_v34 = vpop.f32.mrf.mxu1 }
 0x10e   : > { %1186 = vmatmul.bf16.vlgmr.msra.gmra.mxu0 %v2373_v54 }
 0x10f   : > { %1215 = vmatmul.bf16.vlgmr.msra.gmra.mxu1 %v2380_v59 }
 0x110   : > { %1818 = vmatmul.msk.bf16.vlgmr.msra.gmra.mxu3 %vm904_vm0, %v2299_v39 }
 0x113   : > { %v2588_v35 = vpop.f32.mrf.mxu2  ;;  %v1013_v36 = vpop.f32.mrf.mxu3 }
 0x114   : > { %v928_v37 = vpop.f32.mrf.mxu0  ;;  %v957_v38 = vpop.f32.mrf.mxu1 }
 0x118   : > { %1816 = vmatmul.msk.bf16.gmra.mxu2 %vm904_vm0, %v2411_v22 }
 0x11b   : > { %v2592_v40 = vpop.f32.mrf.mxu2  ;;  %v1015_v44 = vpop.f32.mrf.mxu3 }
 0x11c   : > { %v931_v45 = vpop.f32.mrf.mxu0  ;;  %v960_v46 = vpop.f32.mrf.mxu1 }
 0x11d   : > { %v932_v17 = vadd.f32 %v931_v45, %v2653_v8 }
 0x11e   : > { %1191 = vmatmul.bf16.gmra.mxu0 %v2437_v43 }
 0x11f   : > { %1220 = vmatmul.bf16.gmra.mxu1 %v2441_v47  ;;  %v961_v27 = vadd.f32 %v960_v46, %v932_v17  ;;  %v2675_v46 = vpop.permute.xlu2 %466 }
 0x120   : > { %1819 = vmatmul.msk.bf16.gmra.mxu3 %vm904_vm0, %v2339_v21 }
 0x123   : > { %v2598_v39 = vpop.f32.mrf.mxu2  ;;  %v1018_v54 = vpop.f32.mrf.mxu3 }
 0x124   : > { %v933_v59 = vpop.f32.mrf.mxu0  ;;  %v2600_v48 = vpop.f32.mrf.mxu1 }
 0x128   : > { %1817 = vmatmul.msk.bf16.gmra.mxu2 %vm904_vm0, %v2458_v63 }
 0x12b   : > { %v2604_v49 = vpop.f32.mrf.mxu2  ;;  %v2606_v50 = vpop.f32.mrf.mxu3 }
 0x12c   : > { %v2608_v51 = vpop.f32.mrf.mxu0  ;;  %v2610_v43 = vpop.f32.mrf.mxu1 }
 0x12e   : > { %1196 = vmatmul.bf16.gmra.mxu0 %v2481_v11  ;;  %v2630_v11 = vpop.permute.xlu0 %446 }
 0x12f   : > { %1225 = vmatmul.bf16.gmra.mxu1 %v2483_v12 }
 0x130   : > { %1820 = vmatmul.msk.bf16.gmra.mxu3 %vm904_vm0, %v2411_v22  ;;  %v927_v22 = vadd.f32 %v926_v33, %v2630_v11  ;;  %v990_v33 = vadd.f32 %v2582_v32, %v961_v27  ;;  %v1021_v32 = vadd.f32 %v2606_v50, %v2665_v29 }
 0x132   : > { %v956_v0 = vadd.f32 %v955_v34, %v927_v22  ;;  %v934_v34 = vadd.f32 %v933_v59, %v2665_v29  ;;  %v1273_v22 = vmax.f32 %v990_v33, 0.0 }
 0x133   : > { %v2616_v21 = vpop.f32.mrf.mxu2  ;;  %v2618_v47 = vpop.f32.mrf.mxu3 }
 0x134   : > { %v2620_v52 = vpop.f32.mrf.mxu0  ;;  %v2622_v53 = vpop.f32.mrf.mxu1  ;;  %v985_v2 = vadd.f32 %v984_v30, %v956_v0  ;;  %v1019_v30 = vadd.f32 %v1018_v54, %v2653_v8  ;;  %v963_v54 = vadd.f32 %v2600_v48, %v934_v34 }
 0x136   : > { %v2643_v1 = vpop.permute.xlu0 %451  ;;  %v1265_v9 = vmax.f32 %v985_v2, 0.0  ;;  %v992_v0 = vadd.f32 %v2588_v35, %v963_v54  ;;  %v1024_v35 = vadd.f32 %v2618_v47, %v2675_v46 }
 0x137   : > { %v1016_v14 = vadd.f32 %v1015_v44, %v2643_v1 }
 0x138   : > { %v1277_v48 = vmax.f32 %v992_v0, 0.0 }
 0x13b   : > { %v1042_v55 = vpop.f32.mrf.mxu2  ;;  %v2624_v56 = vpop.f32.mrf.mxu3 }
 0x13c   : > { %v2626_v57 = vpop.f32.mrf.mxu0  ;;  %v2628_v58 = vpop.f32.mrf.mxu1 }
 0x13e   : > { %1201 = vmatmul.bf16.gmra.mxu0 %v2522_v41  ;;  %v1014_v41 = vadd.f32 %v1013_v36, %v2630_v11 }
 0x13f   : > { %1230 = vmatmul.bf16.gmra.mxu1 %v2524_v42  ;;  %v929_v42 = vadd.f32 %v928_v37, %v2643_v1 }
 0x140   : > { %1821 = vmatmul.msk.bf16.gmra.mxu3 %vm904_vm0, %v2458_v63  ;;  %v1043_v3 = vadd.f32 %v1042_v55, %v1014_v41  ;;  %v937_v41 = vadd.f32 %v2608_v51, %v2675_v46 }
 0x141   : > { %v958_v10 = vadd.f32 %v957_v38, %v929_v42 }
 0x143   : > { %v1044_v12 = vpop.f32.mrf.mxu2  ;;  %v2637_v60 = vpop.f32.mrf.mxu3  ;;  %v987_v16 = vadd.f32 %v2578_v31, %v958_v10 }
 0x144   : > { %v2639_v61 = vpop.f32.mrf.mxu0  ;;  %v2641_v62 = vpop.f32.mrf.mxu1  ;;  %v1045_v18 = vadd.f32 %v1044_v12, %v1016_v14 }
 0x145   : > { %v1269_v26 = vmax.f32 %v987_v16, 0.0  ;;  %v2689_v10 = vpop.permute.xlu2 %471 }
 0x146   : > { %v939_v14 = vadd.f32 %v2620_v52, %v2689_v10 }
 0x14b   : > { %v1047_v4 = vpop.f32.mrf.mxu2  ;;  %v2647_v63 = vpop.f32.mrf.mxu3 }
 0x14c   : > { %v1071_v5 = vpop.f32.mrf.mxu0  ;;  %v2651_v7 = vpop.f32.mrf.mxu1  ;;  %v1048_v36 = vadd.f32 %v1047_v4, %v1019_v30 }
 0x14d   : > { %v1072_v6 = vadd.f32 %v1071_v5, %v1043_v3 }
 0x14f   : > { %v1266_v13 = vmax.f32 %v1072_v6, 0.0 }
 0x151   : > { %v1297_v15 = vpack.c.bf16 %v1266_v13, %v1265_v9  ;;  %v966_v9 = vadd.f32 %v2610_v43, %v937_v41 }
 0x153   : > { %1313 = vst [vmem:[%s2658_s6] sm:$0xff] %v1297_v15  ;;  %v1049_v19 = vpop.f32.mrf.mxu2  ;;  %v2661_v20 = vpop.f32.mrf.mxu3  ;;  %v995_v13 = vadd.f32 %v2592_v40, %v966_v9  ;;  %v1026_v40 = vadd.f32 %v2624_v56, %v2689_v10 }
 0x154   : > { %v1073_v23 = vpop.f32.mrf.mxu0  ;;  %v2663_v25 = vpop.f32.mrf.mxu1  ;;  %v1050_v2 = vadd.f32 %v1049_v19, %v1021_v32 }
 0x155   : > { %v1074_v24 = vadd.f32 %v1073_v23, %v1045_v18  ;;  %v1281_v23 = vmax.f32 %v995_v13, 0.0 }
 0x157   : > { %v1270_v28 = vmax.f32 %v1074_v24, 0.0  ;;  %v968_v24 = vadd.f32 %v2622_v53, %v939_v14 }
 0x159   : > { %v1299_v31 = vpack.c.bf16 %v1270_v28, %v1269_v26  ;;  %v2702_v26 = vpop.permute.xlu0 %476  ;;  %v997_v27 = vadd.f32 %v2598_v39, %v968_v24 }
 0x15a   : > { %v942_v28 = vadd.f32 %v2626_v57, %v2702_v26  ;;  %v1029_v39 = vadd.f32 %v2637_v60, %v2702_v26 }
 0x15b   : > { %1315 = vst [vmem:[%s2658_s6 + $0x10] sm:$0xff] %v1299_v31  ;;  %v1052_v37 = vpop.f32.mrf.mxu2  ;;  %v2671_v38 = vpop.f32.mrf.mxu3 }
 0x15c   : > { %v1076_v44 = vpop.f32.mrf.mxu0  ;;  %v2673_v55 = vpop.f32.mrf.mxu1  ;;  %v1053_v15 = vadd.f32 %v1052_v37, %v1024_v35  ;;  %v971_v37 = vadd.f32 %v2628_v58, %v942_v28 }
 0x15d   : > { %v1077_v45 = vadd.f32 %v1076_v44, %v1048_v36  ;;  %v1285_v36 = vmax.f32 %v997_v27, 0.0 }
 0x15f   : > { %v1274_v12 = vmax.f32 %v1077_v45, 0.0  ;;  %v2715_v45 = vpop.permute.xlu1 %481 }
 0x161   : > { %v1301_v59 = vpack.c.bf16 %v1274_v12, %v1273_v22  ;;  %v944_v22 = vadd.f32 %v2639_v61, %v2715_v45  ;;  %v1000_v12 = vadd.f32 %v2604_v49, %v971_v37 }
 0x163   : > { %1317 = vst [vmem:[%s2658_s6 + $0x20] sm:$0xff] %v1301_v59  ;;  %v1054_v42 = vpop.f32.mrf.mxu2  ;;  %v2684_v3 = vpop.f32.mrf.mxu3  ;;  %v973_v41 = vadd.f32 %v2641_v62, %v944_v22 }
 0x164   : > { %v1078_v4 = vpop.f32.mrf.mxu0  ;;  %v2686_v6 = vpop.f32.mrf.mxu1  ;;  %v1055_v30 = vadd.f32 %v1054_v42, %v1026_v40  ;;  %v1031_v42 = vadd.f32 %v2647_v63, %v2715_v45 }
 0x165   : > { %v1079_v5 = vadd.f32 %v1078_v4, %v1050_v2  ;;  %v1289_v2 = vmax.f32 %v1000_v12, 0.0 }
 0x167   : > { %v1278_v50 = vmax.f32 %v1079_v5, 0.0  ;;  %v1002_v5 = vadd.f32 %v2616_v21, %v973_v41 }
 0x169   : > { %v1303_v51 = vpack.c.bf16 %v1278_v50, %v1277_v48 }
 0x16b   : > { %1319 = vst [vmem:[%s2658_s6 + $0x30] sm:$0xff] %v1303_v51  ;;  %v2697_v16 = vpop.f32.mrf.mxu3  ;;  %v1057_v18 = vpop.f32.mrf.mxu2  ;;  %v1293_v51 = vmax.f32 %v1002_v5, 0.0 }
 0x16c   : > { %v1081_v17 = vpop.f32.mrf.mxu0  ;;  %v2699_v19 = vpop.f32.mrf.mxu1  ;;  %v1058_v54 = vadd.f32 %v1057_v18, %v1029_v39  ;;  %v1106_v39 = vadd.f32 %v2673_v55, %v2653_v8  ;;  %v1108_v55 = vadd.f32 %v2686_v6, %v2665_v29 }
 0x16d   : > { %v1082_v43 = vadd.f32 %v1081_v17, %v1053_v15  ;;  %v1101_v17 = vadd.f32 %v2651_v7, %v2630_v11 }
 0x16f   : > { %v1282_v47 = vmax.f32 %v1082_v43, 0.0  ;;  %v1130_v43 = vadd.f32 %v2661_v20, %v1101_v17 }
 0x171   : > { %v1305_v52 = vpack.c.bf16 %v1282_v47, %v1281_v23 }
 0x173   : > { %1321 = vst [vmem:[%s2658_s6 + $0x40] sm:$0xff] %v1305_v52  ;;  %v2710_v31 = vpop.f32.mrf.mxu3  ;;  %v1059_v44 = vpop.f32.mrf.mxu2 }
 0x174   : > { %v1083_v33 = vpop.f32.mrf.mxu0  ;;  %v2712_v53 = vpop.f32.mrf.mxu1  ;;  %v1060_v48 = vadd.f32 %v1059_v44, %v1031_v42 }
 0x175   : > { %v1084_v34 = vadd.f32 %v1083_v33, %v1055_v30  ;;  %v1103_v30 = vadd.f32 %v2663_v25, %v2643_v1 }
 0x177   : > { %v1286_v56 = vmax.f32 %v1084_v34, 0.0 }
 0x179   : > { %v1307_v57 = vpack.c.bf16 %v1286_v56, %v1285_v36 }
 0x17b   : > { %1323 = vst [vmem:[%s2658_s6 + $0x50] sm:$0xff] %v1307_v57  ;;  %v2723_v32 = vpop.f32.mrf.mxu3  ;;  %v1158_v61 = vpop.f32.mrf.mxu2 }
 0x17c   : > { %v1086_v59 = vpop.f32.mrf.mxu0  ;;  %v2725_v0 = vpop.f32.mrf.mxu1  ;;  %v1159_v24 = vadd.f32 %v1158_v61, %v1130_v43 }
 0x17d   : > { %v1087_v58 = vadd.f32 %v1086_v59, %v1058_v54 }
 0x17e   : > { %v1267_v33 = vmax.f32 %v1159_v24, 0.0 }
 0x17f   : > { %v1290_v60 = vmax.f32 %v1087_v58, 0.0 }
 0x181   : > { %v1309_v4 = vpack.c.bf16 %v1290_v60, %v1289_v2 }
 0x183   : > { %1325 = vst [vmem:[%s2658_s6 + $0x60] sm:$0xff] %v1309_v4  ;;  %v2732_v49 = vpop.f32.mrf.mxu3  ;;  %v1160_v14 = vpop.f32.mrf.mxu2 }
 0x184   : > { %v1088_v9 = vpop.f32.mrf.mxu0  ;;  %v2734_v35 = vpop.f32.mrf.mxu1 }
 0x185   : > { %v1089_v50 = vadd.f32 %v1088_v9, %v1060_v48  ;;  %v1137_v48 = vadd.f32 %v2697_v16, %v1108_v55 }
 0x187   : > { %v1294_v62 = vmax.f32 %v1089_v50, 0.0 }
 0x189   : > { %v1311_v13 = vpack.c.bf16 %v1294_v62, %v1293_v51 }
 0x18b   : > { %1327 = vst [vmem:[%s2658_s6 + $0x70] sm:$0xff] %v1311_v13  ;;  %v2737_v15 = vpop.f32.mrf.mxu3  ;;  %v1163_v52 = vpop.f32.mrf.mxu2 }
 0x18c   : > { %v1187_v63 = vpop.f32.mrf.mxu0  ;;  %v1216_v18 = vpop.f32.mrf.mxu1 }
 0x18d   : > { %v1188_v21 = vadd.f32 %v1187_v63, %v2630_v11  ;;  %v1132_v11 = vadd.f32 %v2671_v38, %v1103_v30 }
 0x18f   : > { %v1217_v23 = vadd.f32 %v1216_v18, %v1188_v21  ;;  %v1161_v37 = vadd.f32 %v1160_v14, %v1132_v11  ;;  %v1111_v14 = vadd.f32 %v2699_v19, %v2675_v46  ;;  %v1113_v19 = vadd.f32 %v2712_v53, %v2689_v10 }
 0x191   : > { %v1271_v54 = vmax.f32 %v1161_v37, 0.0  ;;  %v1116_v37 = vadd.f32 %v2725_v0, %v2702_v26  ;;  %v1118_v0 = vadd.f32 %v2734_v35, %v2715_v45 }
 0x193   : > { %v1245_v47 = vpop.f32.mrf.mxu3  ;;  %v1165_v12 = vpop.f32.mrf.mxu2 }
 0x194   : > { %v1189_v40 = vpop.f32.mrf.mxu0  ;;  %v1246_v27 = vadd.f32 %v1245_v47, %v1217_v23  ;;  %v1218_v28 = vpop.f32.mrf.mxu1  ;;  %v1166_v50 = vadd.f32 %v1165_v12, %v1137_v48 }
 0x195   : > { %v1190_v7 = vadd.f32 %v1189_v40, %v2643_v1  ;;  %v1135_v1 = vadd.f32 %v2684_v3, %v1106_v39 }
 0x196   : > { %v1268_v34 = vmax.f32 %v1246_v27, 0.0  ;;  %v1279_v21 = vmax.f32 %v1166_v50, 0.0  ;;  %v1365_v50 = vld [vmem:[%s2658_s6 + $0x30] sm:$0xff] (%p2100_p6) }
 0x197   : > { %v1219_v20 = vadd.f32 %v1218_v28, %v1190_v7  ;;  %v1164_v41 = vadd.f32 %v1163_v52, %v1135_v1  ;;  %1366 = vst [vmem:[%s1340_s10 + $0x60] sm:$0xff] (%p2100_p6), %v1365_v50 }
 0x198   : > { %v1298_v36 = vpack.c.bf16 %v1268_v34, %v1267_v33  ;;  %v1142_v33 = vadd.f32 %v2723_v32, %v1113_v19 }
 0x199   : > { %v1275_v4 = vmax.f32 %v1164_v41, 0.0  ;;  %v1147_v41 = vadd.f32 %v2737_v15, %v1118_v0  ;;  %v1357_v15 = vld [vmem:[%s2658_s6 + $0x10] sm:$0xff] (%p2100_p6) }
 0x19a   : > { %1314 = vst [vmem:[%s2658_s6 + $0x8] sm:$0xff] %v1298_v36 }
 0x19b   : > { %v1247_v44 = vpop.f32.mrf.mxu3  ;;  %v1168_v9 = vpop.f32.mrf.mxu2  ;;  %1358 = vst [vmem:[%s1340_s10 + $0x20] sm:$0xff] (%p2100_p6), %v1357_v15 }
 0x19c   : > { %v1192_v56 = vpop.f32.mrf.mxu0  ;;  %v1248_v57 = vadd.f32 %v1247_v44, %v1219_v20  ;;  %v1221_v25 = vpop.f32.mrf.mxu1 }
 0x19d   : > { %v1193_v22 = vadd.f32 %v1192_v56, %v2653_v8 }
 0x19e   : > { %v1272_v59 = vmax.f32 %v1248_v57, 0.0 }
 0x19f   : > { %v1222_v58 = vadd.f32 %v1221_v25, %v1193_v22 }
 0x1a0   : > { %v1300_v38 = vpack.c.bf16 %v1272_v59, %v1271_v54 }
 0x1a1   : > { %v1355_v35 = vld [vmem:[%s2658_s6 + $0x8] sm:$0xff] (%p2100_p6) }
 0x1a2   : > { %1316 = vst [vmem:[%s2658_s6 + $0x18] sm:$0xff] %v1300_v38 }
 0x1a3   : > { %v1250_v2 = vpop.f32.mrf.mxu3  ;;  %v1170_v24 = vpop.f32.mrf.mxu2  ;;  %1356 = vst [vmem:[%s1340_s10 + $0x8] sm:$0xff] (%p2100_p6), %v1355_v35 }
 0x1a4   : > { %v1194_v60 = vpop.f32.mrf.mxu0  ;;  %v1251_v42 = vadd.f32 %v1250_v2, %v1222_v58  ;;  %v1223_v61 = vpop.f32.mrf.mxu1  ;;  %v1171_v34 = vadd.f32 %v1170_v24, %v1142_v33 }
 0x1a5   : > { %v1195_v5 = vadd.f32 %v1194_v60, %v2665_v29  ;;  %v1140_v29 = vadd.f32 %v2710_v31, %v1111_v14  ;;  %v1373_v14 = vld [vmem:[%s2658_s6 + $0x50] sm:$0xff] (%p2100_p6) }
 0x1a6   : > { %v1276_v8 = vmax.f32 %v1251_v42, 0.0  ;;  %v1287_v56 = vmax.f32 %v1171_v34, 0.0  ;;  %1374 = vst [vmem:[%s1340_s10 + $0xa0] sm:$0xff] (%p2100_p6), %v1373_v14 }
 0x1a7   : > { %v1224_v51 = vadd.f32 %v1223_v61, %v1195_v5  ;;  %v1169_v23 = vadd.f32 %v1168_v9, %v1140_v29  ;;  %v1361_v9 = vld [vmem:[%s2658_s6 + $0x20] sm:$0xff] (%p2100_p6) }
 0x1a8   : > { %v1302_v3 = vpack.c.bf16 %v1276_v8, %v1275_v4  ;;  %1362 = vst [vmem:[%s1340_s10 + $0x40] sm:$0xff] (%p2100_p6), %v1361_v9 }
 0x1a9   : > { %v1283_v28 = vmax.f32 %v1169_v23, 0.0  ;;  %v1359_v48 = vld [vmem:[%s2658_s6 + $0x18] sm:$0xff] (%p2100_p6) }
 0x1aa   : > { %1318 = vst [vmem:[%s2658_s6 + $0x28] sm:$0xff] %v1302_v3 }
 0x1ab   : > { %v1252_v62 = vpop.f32.mrf.mxu3  ;;  %v1173_v44 = vpop.f32.mrf.mxu2  ;;  %1360 = vst [vmem:[%s1340_s10 + $0x28] sm:$0xff] (%p2100_p6), %v1359_v48 }
 0x1ac   : > { %v1197_v13 = vpop.f32.mrf.mxu0  ;;  %v1253_v63 = vadd.f32 %v1252_v62, %v1224_v51  ;;  %v1226_v17 = vpop.f32.mrf.mxu1  ;;  %v1369_v62 = vld [vmem:[%s2658_s6 + $0x40] sm:$0xff] (%p2100_p6) }
 0x1ad   : > { %v1198_v6 = vadd.f32 %v1197_v13, %v2675_v46  ;;  %1370 = vst [vmem:[%s1340_s10 + $0x80] sm:$0xff] (%p2100_p6), %v1369_v62 }
 0x1ae   : > { %v1280_v18 = vmax.f32 %v1253_v63, 0.0 }
 0x1af   : > { %v1227_v43 = vadd.f32 %v1226_v17, %v1198_v6  ;;  %v1377_v6 = vld [vmem:[%s2658_s6 + $0x60] sm:$0xff] (%p2100_p6) }
 0x1b0   : > { %v1304_v16 = vpack.c.bf16 %v1280_v18, %v1279_v21  ;;  %v1381_v21 = vld [vmem:[%s2658_s6 + $0x70] sm:$0xff] (%p2100_p6)  ;;  %1378 = vst [vmem:[%s1340_s10 + $0xc0] sm:$0xff] (%p2100_p6), %v1377_v6 }
 0x1b1   : > { %v1363_v3 = vld [vmem:[%s2658_s6 + $0x28] sm:$0xff] (%p2100_p6)  ;;  %1382 = vst [vmem:[%s1340_s10 + $0xe0] sm:$0xff] (%p2100_p6), %v1381_v21 }
 0x1b2   : > { %1320 = vst [vmem:[%s2658_s6 + $0x38] sm:$0xff] %v1304_v16 }
 0x1b3   : > { %v1255_v47 = vpop.f32.mrf.mxu3  ;;  %1364 = vst [vmem:[%s1340_s10 + $0x48] sm:$0xff] (%p2100_p6), %v1363_v3 }
 0x1b4   : > { %v1199_v40 = vpop.f32.mrf.mxu0  ;;  %v1256_v52 = vadd.f32 %v1255_v47, %v1227_v43  ;;  %v1228_v27 = vpop.f32.mrf.mxu1 }
 0x1b5   : > { %v1200_v30 = vadd.f32 %v1199_v40, %v2689_v10  ;;  %v1145_v10 = vadd.f32 %v2732_v49, %v1116_v37 }
 0x1b6   : > { %v1284_v46 = vmax.f32 %v1256_v52, 0.0 }
 0x1b7   : > { %v1229_v7 = vadd.f32 %v1228_v27, %v1200_v30  ;;  %v1174_v22 = vadd.f32 %v1173_v44, %v1145_v10 }
 0x1b8   : > { %v1306_v31 = vpack.c.bf16 %v1284_v46, %v1283_v28 }
 0x1b9   : > { %v1291_v1 = vmax.f32 %v1174_v22, 0.0  ;;  %v1367_v51 = vld [vmem:[%s2658_s6 + $0x38] sm:$0xff] (%p2100_p6) }
 0x1ba   : > { %1322 = vst [vmem:[%s2658_s6 + $0x48] sm:$0xff] %v1306_v31 }
 0x1bb   : > { %v1257_v11 = vpop.f32.mrf.mxu3  ;;  %1368 = vst [vmem:[%s1340_s10 + $0x68] sm:$0xff] (%p2100_p6), %v1367_v51 }
 0x1bc   : > { %v1202_v36 = vpop.f32.mrf.mxu0  ;;  %v1258_v20 = vadd.f32 %v1257_v11, %v1229_v7  ;;  %v1231_v57 = vpop.f32.mrf.mxu1 }
 0x1bd   : > { %v1203_v39 = vadd.f32 %v1202_v36, %v2702_v26  ;;  %v1175_v26 = vpop.f32.mrf.mxu2 }
 0x1be   : > { %v1288_v53 = vmax.f32 %v1258_v20, 0.0  ;;  %v1176_v60 = vadd.f32 %v1175_v26, %v1147_v41 }
 0x1bf   : > { %v1232_v25 = vadd.f32 %v1231_v57, %v1203_v39 }
 0x1c0   : > { %v1308_v32 = vpack.c.bf16 %v1288_v53, %v1287_v56  ;;  %v1295_v4 = vmax.f32 %v1176_v60, 0.0 }
 0x1c1   : > { %v1371_v13 = vld [vmem:[%s2658_s6 + $0x48] sm:$0xff] (%p2100_p6) }
 0x1c2   : > { %1324 = vst [vmem:[%s2658_s6 + $0x58] sm:$0xff] %v1308_v32 }
 0x1c3   : > { %v1260_v54 = vpop.f32.mrf.mxu3  ;;  %1372 = vst [vmem:[%s1340_s10 + $0x88] sm:$0xff] (%p2100_p6), %v1371_v13 }
 0x1c4   : > { %v1204_v12 = vpop.f32.mrf.mxu0  ;;  %v1261_v59 = vadd.f32 %v1260_v54, %v1232_v25  ;;  %v1233_v2 = vpop.f32.mrf.mxu1 }
 0x1c5   : > { %v1205_v58 = vadd.f32 %v1204_v12, %v2715_v45  ;;  %v1353_v45 = vld [vmem:[%s2658_s6] sm:$0xff] (%p2100_p6) }
 0x1c6   : > { %v1292_v38 = vmax.f32 %v1261_v59, 0.0  ;;  %1354 = vst [vmem:[%s1340_s10] sm:$0xff] (%p2100_p6), %v1353_v45 }
 0x1c7   : > { %v1234_v42 = vadd.f32 %v1233_v2, %v1205_v58 }
 0x1c8   : > { %v1310_v49 = vpack.c.bf16 %v1292_v38, %v1291_v1 }
 0x1c9   : > { %v1375_v63 = vld [vmem:[%s2658_s6 + $0x58] sm:$0xff] (%p2100_p6) }
 0x1ca   : > { %1326 = vst [vmem:[%s2658_s6 + $0x68] sm:$0xff] %v1310_v49 }
 0x1cb   : > { %v1262_v61 = vpop.f32.mrf.mxu3  ;;  %1376 = vst [vmem:[%s1340_s10 + $0xa8] sm:$0xff] (%p2100_p6), %v1375_v63 }
 0x1cc   : > { %v1263_v55 = vadd.f32 %v1262_v61, %v1234_v42 }
 0x1ce   : > { %v1296_v8 = vmax.f32 %v1263_v55, 0.0  ;;  %1335 = sbr.rel (!%p2100_p6) target bundleno = 475 (0x1db), region = 59 }
 0x1d0   : > { %v1312_v5 = vpack.c.bf16 %v1296_v8, %v1295_v4 }
 0x1d1   : > { %v1379_v17 = vld [vmem:[%s2658_s6 + $0x68] sm:$0xff] (%p2100_p6) }
 0x1d2   : > { %1328 = vst [vmem:[%s2658_s6 + $0x78] sm:$0xff] %v1312_v5 }
 0x1d3   : > { %1380 = vst [vmem:[%s1340_s10 + $0xc8] sm:$0xff] %v1379_v17 }
 0x1d9   : > { %v1383_v18 = vld [vmem:[%s2658_s6 + $0x78] sm:$0xff] }
 0x1da   : > { %1384 = vst [vmem:[%s1340_s10 + $0xe8] sm:$0xff] %v1383_v18 }
 0x1db PF: > { %s13_s18 = sadd.s32 1, %s2029_s18   ;;  %s2828_s12 = smov %s2009_s13 }
 0x1dc   : > { %p10_p12 = scmp.ge.s32.totalorder %s13_s18, 6   ;;  %s2829_s13 = smov %s2108_s27 }
 0x1dd   : > { %s2830_s14 = smov %s2021_s16  ;;  %s2831_s15 = smov %s2025_s17 }
 0x1de   : > { %s2832_s16 = smov %s2835_s19  ;;  %s2833_s17 = smov %s2839_s20 }
 0x1df   :  { %12 = sbr.rel (!%p10_p12) target bundleno = 4 (0x4), region = 113 }

// kernel: policy_forward.6
= control target key start
LH: loop header
LB: loop body
LE: loop exit
PB: predicated region body
PF: predicated region fallthrough
CT: control target
= control target key end

     0   :  { %s2256_s12 = smov 0   ;;  %s2258_s13 = smov 0   ;;  %s2900_s0 = inlined_call_operand.vmem [shape: bf16[2,576,256], index: 0, kind: input, shape index: {}]   ;;  %s2901_s1 = inlined_call_operand.vmem [shape: bf16[128,576], index: 1, kind: input, shape index: {}]   ;;  %s2902_s2 = inlined_call_operand.vmem [shape: f32[128,1], index: 2, kind: input, shape index: {}]   ;;  %s2903_s3 = inlined_call_operand.vmem [shape: bf16[2,128,256], index: 3, kind: output, shape index: {}]  }
   0x1   :  { %s2260_s14 = smov 0   ;;  %s2262_s15 = smov 0  }
   0x2   :  { %s2264_s16 = smov 0   ;;  %s2266_s17 = smov 0  }
   0x3   :  { %s2268_s18 = smov 0  }
   0x4 LB: > { %s22_s19 = sadd.s32 1, %s2225_s16  ;;  %s25_s20 = sadd.s32 1, %s2229_s17  ;;  %s2233_s18 = sphi %s2268_s18, %s13_s18   ;;  %s2229_s17 = sphi %s2266_s17, %s2910_s17   ;;  %s2225_s16 = sphi %s2264_s16, %s2909_s16   ;;  %s2221_s15 = sphi %s2262_s15, %s2908_s15   ;;  %s2217_s14 = sphi %s2260_s14, %s2907_s14   ;;  %s2213_s13 = sphi %s2258_s13, %s2906_s13   ;;  %s2209_s12 = sphi %s2256_s12, %s2905_s12  }
   0x5   : > { %p23_p0 = scmp.ge.s32.totalorder %s22_s19, 2  ;;  %s1645_s21 = sadd.s32 4294967295, %s2233_s18  }
   0x6   : > { %p41_p1 = scmp.ne.s32.totalorder %s2213_s13, %s2209_s12  ;;  %p42_p2 = scmp.eq.s32.totalorder %s2233_s18, 0 }
   0x7   : > { %s2912_s19 = smov (%p23_p0, %s22_s19), 0  ;;  %s2914_s20 = smov (!%p23_p0, %s25_s20), %s2229_s17 }
   0x8   : > { %p27_p3 = scmp.ge.s32.totalorder %s2914_s20, 2  ;;  %p115_p4 = scmp.eq.s32.totalorder %s1645_s21, 3 }
   0x9   : > { %s30_s22 = ssub.s32 %s2225_s16, %s2912_s19  ;;  %p43_p5 = por %p42_p2, %p41_p1 }
   0xa   : > { %s2916_s20 = smov (%p27_p3, %s2914_s20), 0  ;;  %p2304_p6 = por %p115_p4, %p41_p1 }
   0xb   : > { %s29_s24 = ssub.s32 %s2229_s17, %s2916_s20  ;;  %s34_s26 = sadd.s32 1, %s2213_s13 }
   0xc   : > { %s31_s25 = sor.u32 %s30_s22, %s29_s24  ;;  %p1648_p8 = scmp.ge.s32.totalorder %s2233_s18, 4 }
   0xd   : > { %p32_p7 = scmp.eq.s32.totalorder %s31_s25, 0 }
   0xe   : > { %143 = sbr.rel (%p1648_p8) target bundleno = 98 (0x62), region = 24 }
   0xf   : > { %s2312_s27 = scalar_select %p32_p7, %s2213_s13, %s34_s26  }
  0x13   : > { %146 = sbr.rel (!%p43_p5) target bundleno = 98 (0x62), region = 28  ;;  %s148_s28 = sand.u32 (%p43_p5), 1, %s2213_s13  }
  0x14   : > { %s2117_s29 = smul.u32 (%p43_p5), 144, %s2229_s17 }
  0x15   : > { %s2116_s30 = smul.u32 (%p43_p5), 288, %s148_s28 }
  0x16   : > { %s152_s4 = sadd.s32 (%p43_p5), %s2225_s16, %s2117_s29 }
  0x17   : > { %s1649_s5 = sshll.u32 (%p43_p5), %s152_s4, 2  ;;  %s2326_s9 = scalar_lea.vmem (%p43_p5), [#allocation2], %s2116_s30 }
  0x18   : > { %s2321_s8 = scalar_lea.vmem %s2900_s0, %s1649_s5 }
  0x19   : > { %v171_v0 = vld [vmem:[%s2321_s8] sm:$0xf]  ;;  %v173_v1 = vld [vmem:[%s2321_s8 + $0x8] sm:$0xf]  ;;  %v175_v2 = vld [vmem:[%s2321_s8 + $0x10] sm:$0xf] }
  0x1a   : > { %172 = vst [vmem:[%s2326_s9] sm:$0xf] %v171_v0  ;;  %v177_v3 = vld [vmem:[%s2321_s8 + $0x18] sm:$0xf]  ;;  %v179_v4 = vld [vmem:[%s2321_s8 + $0x20] sm:$0xf] }
  0x1b   : > { %174 = vst [vmem:[%s2326_s9 + $0x4] sm:$0xf] %v173_v1  ;;  %v181_v5 = vld [vmem:[%s2321_s8 + $0x28] sm:$0xf]  ;;  %v183_v6 = vld [vmem:[%s2321_s8 + $0x30] sm:$0xf] }
  0x1c   : > { %176 = vst [vmem:[%s2326_s9 + $0x8] sm:$0xf] %v175_v2  ;;  %v185_v7 = vld [vmem:[%s2321_s8 + $0x38] sm:$0xf]  ;;  %v187_v8 = vld [vmem:[%s2321_s8 + $0x40] sm:$0xf] }
  0x1d   : > { %178 = vst [vmem:[%s2326_s9 + $0xc] sm:$0xf] %v177_v3  ;;  %v189_v9 = vld [vmem:[%s2321_s8 + $0x48] sm:$0xf]  ;;  %v191_v10 = vld [vmem:[%s2321_s8 + $0x50] sm:$0xf] }
  0x1e   : > { %180 = vst [vmem:[%s2326_s9 + $0x10] sm:$0xf] %v179_v4  ;;  %v193_v11 = vld [vmem:[%s2321_s8 + $0x58] sm:$0xf]  ;;  %v195_v12 = vld [vmem:[%s2321_s8 + $0x60] sm:$0xf] }
  0x1f   : > { %182 = vst [vmem:[%s2326_s9 + $0x14] sm:$0xf] %v181_v5  ;;  %v197_v13 = vld [vmem:[%s2321_s8 + $0x68] sm:$0xf]  ;;  %v199_v14 = vld [vmem:[%s2321_s8 + $0x70] sm:$0xf] }
  0x20   : > { %184 = vst [vmem:[%s2326_s9 + $0x18] sm:$0xf] %v183_v6  ;;  %v201_v15 = vld [vmem:[%s2321_s8 + $0x78] sm:$0xf]  ;;  %v203_v16 = vld [vmem:[%s2321_s8 + $0x80] sm:$0xf] }
  0x21   : > { %186 = vst [vmem:[%s2326_s9 + $0x1c] sm:$0xf] %v185_v7  ;;  %v205_v17 = vld [vmem:[%s2321_s8 + $0x88] sm:$0xf]  ;;  %v207_v18 = vld [vmem:[%s2321_s8 + $0x90] sm:$0xf] }
  0x22   : > { %188 = vst [vmem:[%s2326_s9 + $0x20] sm:$0xf] %v187_v8  ;;  %v209_v19 = vld [vmem:[%s2321_s8 + $0x98] sm:$0xf]  ;;  %v211_v20 = vld [vmem:[%s2321_s8 + $0xa0] sm:$0xf] }
  0x23   : > { %190 = vst [vmem:[%s2326_s9 + $0x24] sm:$0xf] %v189_v9  ;;  %v213_v21 = vld [vmem:[%s2321_s8 + $0xa8] sm:$0xf]  ;;  %v215_v22 = vld [vmem:[%s2321_s8 + $0xb0] sm:$0xf] }
  0x24   : > { %192 = vst [vmem:[%s2326_s9 + $0x28] sm:$0xf] %v191_v10  ;;  %v217_v23 = vld [vmem:[%s2321_s8 + $0xb8] sm:$0xf]  ;;  %v219_v24 = vld [vmem:[%s2321_s8 + $0xc0] sm:$0xf] }
  0x25   : > { %194 = vst [vmem:[%s2326_s9 + $0x2c] sm:$0xf] %v193_v11  ;;  %v221_v25 = vld [vmem:[%s2321_s8 + $0xc8] sm:$0xf]  ;;  %v223_v26 = vld [vmem:[%s2321_s8 + $0xd0] sm:$0xf] }
  0x26   : > { %196 = vst [vmem:[%s2326_s9 + $0x30] sm:$0xf] %v195_v12  ;;  %v225_v27 = vld [vmem:[%s2321_s8 + $0xd8] sm:$0xf]  ;;  %v227_v28 = vld [vmem:[%s2321_s8 + $0xe0] sm:$0xf] }
  0x27   : > { %198 = vst [vmem:[%s2326_s9 + $0x34] sm:$0xf] %v197_v13  ;;  %v229_v29 = vld [vmem:[%s2321_s8 + $0xe8] sm:$0xf]  ;;  %v231_v30 = vld [vmem:[%s2321_s8 + $0xf0] sm:$0xf] }
  0x28   : > { %200 = vst [vmem:[%s2326_s9 + $0x38] sm:$0xf] %v199_v14  ;;  %v233_v31 = vld [vmem:[%s2321_s8 + $0xf8] sm:$0xf]  ;;  %v235_v32 = vld [vmem:[%s2321_s8 + $0x100] sm:$0xf] }
  0x29   : > { %202 = vst [vmem:[%s2326_s9 + $0x3c] sm:$0xf] %v201_v15  ;;  %v237_v33 = vld [vmem:[%s2321_s8 + $0x108] sm:$0xf]  ;;  %v239_v34 = vld [vmem:[%s2321_s8 + $0x110] sm:$0xf] }
  0x2a   : > { %204 = vst [vmem:[%s2326_s9 + $0x40] sm:$0xf] %v203_v16  ;;  %v241_v35 = vld [vmem:[%s2321_s8 + $0x118] sm:$0xf]  ;;  %v243_v36 = vld [vmem:[%s2321_s8 + $0x120] sm:$0xf] }
  0x2b   : > { %206 = vst [vmem:[%s2326_s9 + $0x44] sm:$0xf] %v205_v17  ;;  %v245_v37 = vld [vmem:[%s2321_s8 + $0x128] sm:$0xf]  ;;  %v247_v38 = vld [vmem:[%s2321_s8 + $0x130] sm:$0xf] }
  0x2c   : > { %208 = vst [vmem:[%s2326_s9 + $0x48] sm:$0xf] %v207_v18  ;;  %v249_v39 = vld [vmem:[%s2321_s8 + $0x138] sm:$0xf]  ;;  %v251_v40 = vld [vmem:[%s2321_s8 + $0x140] sm:$0xf] }
  0x2d   : > { %210 = vst [vmem:[%s2326_s9 + $0x4c] sm:$0xf] %v209_v19  ;;  %v253_v41 = vld [vmem:[%s2321_s8 + $0x148] sm:$0xf]  ;;  %v255_v42 = vld [vmem:[%s2321_s8 + $0x150] sm:$0xf] }
  0x2e   : > { %212 = vst [vmem:[%s2326_s9 + $0x50] sm:$0xf] %v211_v20  ;;  %v257_v43 = vld [vmem:[%s2321_s8 + $0x158] sm:$0xf]  ;;  %v259_v44 = vld [vmem:[%s2321_s8 + $0x160] sm:$0xf] }
  0x2f   : > { %214 = vst [vmem:[%s2326_s9 + $0x54] sm:$0xf] %v213_v21  ;;  %v261_v45 = vld [vmem:[%s2321_s8 + $0x168] sm:$0xf]  ;;  %v263_v46 = vld [vmem:[%s2321_s8 + $0x170] sm:$0xf] }
  0x30   : > { %216 = vst [vmem:[%s2326_s9 + $0x58] sm:$0xf] %v215_v22  ;;  %v265_v47 = vld [vmem:[%s2321_s8 + $0x178] sm:$0xf]  ;;  %v267_v48 = vld [vmem:[%s2321_s8 + $0x180] sm:$0xf] }
  0x31   : > { %218 = vst [vmem:[%s2326_s9 + $0x5c] sm:$0xf] %v217_v23  ;;  %v269_v49 = vld [vmem:[%s2321_s8 + $0x188] sm:$0xf]  ;;  %v271_v50 = vld [vmem:[%s2321_s8 + $0x190] sm:$0xf] }
  0x32   : > { %220 = vst [vmem:[%s2326_s9 + $0x60] sm:$0xf] %v219_v24  ;;  %v273_v51 = vld [vmem:[%s2321_s8 + $0x198] sm:$0xf]  ;;  %v275_v52 = vld [vmem:[%s2321_s8 + $0x1a0] sm:$0xf] }
  0x33   : > { %222 = vst [vmem:[%s2326_s9 + $0x64] sm:$0xf] %v221_v25  ;;  %v277_v53 = vld [vmem:[%s2321_s8 + $0x1a8] sm:$0xf]  ;;  %v279_v54 = vld [vmem:[%s2321_s8 + $0x1b0] sm:$0xf] }
  0x34   : > { %224 = vst [vmem:[%s2326_s9 + $0x68] sm:$0xf] %v223_v26  ;;  %v281_v55 = vld [vmem:[%s2321_s8 + $0x1b8] sm:$0xf]  ;;  %v283_v56 = vld [vmem:[%s2321_s8 + $0x1c0] sm:$0xf] }
  0x35   : > { %226 = vst [vmem:[%s2326_s9 + $0x6c] sm:$0xf] %v225_v27  ;;  %v285_v57 = vld [vmem:[%s2321_s8 + $0x1c8] sm:$0xf]  ;;  %v287_v58 = vld [vmem:[%s2321_s8 + $0x1d0] sm:$0xf] }
  0x36   : > { %228 = vst [vmem:[%s2326_s9 + $0x70] sm:$0xf] %v227_v28  ;;  %v289_v59 = vld [vmem:[%s2321_s8 + $0x1d8] sm:$0xf]  ;;  %v291_v60 = vld [vmem:[%s2321_s8 + $0x1e0] sm:$0xf] }
  0x37   : > { %230 = vst [vmem:[%s2326_s9 + $0x74] sm:$0xf] %v229_v29  ;;  %v293_v61 = vld [vmem:[%s2321_s8 + $0x1e8] sm:$0xf]  ;;  %v295_v62 = vld [vmem:[%s2321_s8 + $0x1f0] sm:$0xf] }
  0x38   : > { %232 = vst [vmem:[%s2326_s9 + $0x78] sm:$0xf] %v231_v30  ;;  %v297_v63 = vld [vmem:[%s2321_s8 + $0x1f8] sm:$0xf]  ;;  %v299_v0 = vld [vmem:[%s2321_s8 + $0x200] sm:$0xf] }
  0x39   : > { %234 = vst [vmem:[%s2326_s9 + $0x7c] sm:$0xf] %v233_v31  ;;  %v301_v1 = vld [vmem:[%s2321_s8 + $0x208] sm:$0xf]  ;;  %v303_v2 = vld [vmem:[%s2321_s8 + $0x210] sm:$0xf] }
  0x3a   : > { %236 = vst [vmem:[%s2326_s9 + $0x80] sm:$0xf] %v235_v32  ;;  %v305_v3 = vld [vmem:[%s2321_s8 + $0x218] sm:$0xf]  ;;  %v307_v4 = vld [vmem:[%s2321_s8 + $0x220] sm:$0xf] }
  0x3b   : > { %238 = vst [vmem:[%s2326_s9 + $0x84] sm:$0xf] %v237_v33  ;;  %v309_v5 = vld [vmem:[%s2321_s8 + $0x228] sm:$0xf]  ;;  %v311_v6 = vld [vmem:[%s2321_s8 + $0x230] sm:$0xf] }
  0x3c   : > { %240 = vst [vmem:[%s2326_s9 + $0x88] sm:$0xf] %v239_v34  ;;  %v313_v7 = vld [vmem:[%s2321_s8 + $0x238] sm:$0xf] }
  0x3d   : > { %242 = vst [vmem:[%s2326_s9 + $0x8c] sm:$0xf] %v241_v35 }
  0x3e   : > { %244 = vst [vmem:[%s2326_s9 + $0x90] sm:$0xf] %v243_v36 }
  0x3f   : > { %246 = vst [vmem:[%s2326_s9 + $0x94] sm:$0xf] %v245_v37 }
  0x40   : > { %248 = vst [vmem:[%s2326_s9 + $0x98] sm:$0xf] %v247_v38 }
  0x41   : > { %250 = vst [vmem:[%s2326_s9 + $0x9c] sm:$0xf] %v249_v39 }
  0x42   : > { %252 = vst [vmem:[%s2326_s9 + $0xa0] sm:$0xf] %v251_v40 }
  0x43   : > { %254 = vst [vmem:[%s2326_s9 + $0xa4] sm:$0xf] %v253_v41 }
  0x44   : > { %256 = vst [vmem:[%s2326_s9 + $0xa8] sm:$0xf] %v255_v42 }
  0x45   : > { %258 = vst [vmem:[%s2326_s9 + $0xac] sm:$0xf] %v257_v43 }
  0x46   : > { %260 = vst [vmem:[%s2326_s9 + $0xb0] sm:$0xf] %v259_v44 }
  0x47   : > { %262 = vst [vmem:[%s2326_s9 + $0xb4] sm:$0xf] %v261_v45 }
  0x48   : > { %264 = vst [vmem:[%s2326_s9 + $0xb8] sm:$0xf] %v263_v46 }
  0x49   : > { %266 = vst [vmem:[%s2326_s9 + $0xbc] sm:$0xf] %v265_v47 }
  0x4a   : > { %268 = vst [vmem:[%s2326_s9 + $0xc0] sm:$0xf] %v267_v48 }
  0x4b   : > { %270 = vst [vmem:[%s2326_s9 + $0xc4] sm:$0xf] %v269_v49 }
  0x4c   : > { %272 = vst [vmem:[%s2326_s9 + $0xc8] sm:$0xf] %v271_v50 }
  0x4d   : > { %274 = vst [vmem:[%s2326_s9 + $0xcc] sm:$0xf] %v273_v51 }
  0x4e   : > { %276 = vst [vmem:[%s2326_s9 + $0xd0] sm:$0xf] %v275_v52 }
  0x4f   : > { %278 = vst [vmem:[%s2326_s9 + $0xd4] sm:$0xf] %v277_v53 }
  0x50   : > { %280 = vst [vmem:[%s2326_s9 + $0xd8] sm:$0xf] %v279_v54 }
  0x51   : > { %282 = vst [vmem:[%s2326_s9 + $0xdc] sm:$0xf] %v281_v55 }
  0x52   : > { %284 = vst [vmem:[%s2326_s9 + $0xe0] sm:$0xf] %v283_v56 }
  0x53   : > { %286 = vst [vmem:[%s2326_s9 + $0xe4] sm:$0xf] %v285_v57 }
  0x54   : > { %288 = vst [vmem:[%s2326_s9 + $0xe8] sm:$0xf] %v287_v58 }
  0x55   : > { %290 = vst [vmem:[%s2326_s9 + $0xec] sm:$0xf] %v289_v59 }
  0x56   : > { %292 = vst [vmem:[%s2326_s9 + $0xf0] sm:$0xf] %v291_v60 }
  0x57   : > { %294 = vst [vmem:[%s2326_s9 + $0xf4] sm:$0xf] %v293_v61 }
  0x58   : > { %296 = vst [vmem:[%s2326_s9 + $0xf8] sm:$0xf] %v295_v62 }
  0x59   : > { %298 = vst [vmem:[%s2326_s9 + $0xfc] sm:$0xf] %v297_v63 }
  0x5a   : > { %300 = vst [vmem:[%s2326_s9 + $0x100] sm:$0xf] %v299_v0 }
  0x5b   : > { %302 = vst [vmem:[%s2326_s9 + $0x104] sm:$0xf] %v301_v1 }
  0x5c   : > { %304 = vst [vmem:[%s2326_s9 + $0x108] sm:$0xf] %v303_v2 }
  0x5d   : > { %306 = vst [vmem:[%s2326_s9 + $0x10c] sm:$0xf] %v305_v3 }
  0x5e   : > { %308 = vst [vmem:[%s2326_s9 + $0x110] sm:$0xf] %v307_v4 }
  0x5f   : > { %310 = vst [vmem:[%s2326_s9 + $0x114] sm:$0xf] %v309_v5 }
  0x60   : > { %312 = vst [vmem:[%s2326_s9 + $0x118] sm:$0xf] %v311_v6 }
  0x61   : > { %314 = vst [vmem:[%s2326_s9 + $0x11c] sm:$0xf] %v313_v7 }
  0x62 PF: > { %p1650_p9 = scmp.ge.s32.totalorder %s2233_s18, 1  ;;  %p481_p10 = scmp.lt.s32.totalorder %s2233_s18, 5 }
  0x64   : > { %p482_p11 = pnand %p1650_p9, %p481_p10 }
  0x65   : > { %s488_s10 = sand.u32 (!%p482_p11), 1, %s2209_s12  }
  0x66   : > { %485 = sbr.rel (%p482_p11) target bundleno = 446 (0x1be), region = 69 }
  0x67   : > { %s2118_s25 = smul.u32 (!%p482_p11), 288, %s488_s10 }
  0x69   : > { %s2480_s26 = scalar_lea.vmem (!%p482_p11), [#allocation2], %s2118_s25 }
  0x6b   : > { %v631_v8 = vld [vmem:[%s2902_s2] sm:$0xff]  ;;  %v633_v9 = vld [vmem:[%s2902_s2 + $0x10] sm:$0xff]  ;;  %v2235_v10 = vmov 0   ;;  %v2016_v11 = vld [vmem:[%s2480_s26 + $0x38] sm:$0xff]  ;;  %vm1143_vm0 = vcmask 523264   ;;  %s1965_s12 = sshll.u32 (%p2304_p6), %s2221_s15, 5 }
  0x6c   : > { %2176 = vset.pattern.permute.xlu0 %v2235_v10  ;;  %2177 = vset.pattern.permute.xlu1 %v2235_v10  ;;  %v2015_v12 = vld [vmem:[%s2480_s26 + $0x30] sm:$0xff]  ;;  %v632_v13 = vld [vmem:[%s2902_s2 + $0x8] sm:$0xff]  ;;  %v634_v14 = vld [vmem:[%s2902_s2 + $0x18] sm:$0xff] }
  0x6d   : > { %649 = vperm.xlu0 %2176, %v631_v8   ;;  %659 = vperm.xlu1 %2177, %v633_v9   ;;  %v2014_v15 = vld [vmem:[%s2480_s26 + $0x28] sm:$0xff]  ;;  %v2013_v16 = vld [vmem:[%s2480_s26 + $0x20] sm:$0xff]  ;;  %v637_v17 = vld [vmem:[%s2902_s2 + $0x30] sm:$0xff] }
  0x6e   : > { %2178 = vset.pattern.permute.xlu2 %v2235_v10  ;;  %2092 = vmatpush.bf16.msra.mxu1 %v2016_v11  ;;  %v638_v18 = vld [vmem:[%s2902_s2 + $0x38] sm:$0xff]  ;;  %v2011_v20 = vld [vmem:[%s2480_s26 + $0x10] sm:$0xff]  ;;  %v640_v21 = vld [vmem:[%s2902_s2 + $0x48] sm:$0xff] }
  0x6f   : > { %2093 = vmatpush.bf16.msra.mxu2 %v2016_v11  ;;  %2094 = vmatpush.bf16.msra.mxu3 %v2016_v11  ;;  %v2012_v19 = vld [vmem:[%s2480_s26 + $0x18] sm:$0xff]  ;;  %v641_v22 = vld [vmem:[%s2902_s2 + $0x50] sm:$0xff]  ;;  %v2010_v23 = vld [vmem:[%s2480_s26 + $0x8] sm:$0xff] }
  0x70   : > { %1168 = vmatpush.bf16.msra.mxu0 %v2016_v11  ;;  %v635_v24 = vld [vmem:[%s2902_s2 + $0x20] sm:$0xff]  ;;  %v1694_v26 = vld [vmem:[%s2901_s1 + $0x50] sm:$0xf]  ;;  %v1991_v29 = vld [vmem:[%s2901_s1 + $0xb0] sm:$0xf0] }
  0x71   : > { %v2009_v25 = vld [vmem:[%s2480_s26] sm:$0xff]  ;;  %669 = vperm.xlu2 %2178, %v635_v24   ;;  %v1774_v30 = vld [vmem:[%s2901_s1 + $0xf0] sm:$0xf]  ;;  %v1971_v33 = vld [vmem:[%s2901_s1 + $0x10] sm:$0xf0] }
  0x72   : > { %2095 = vmatpush.bf16.msra.mxu1 %v2015_v12  ;;  %v1981_v27 = vld [vmem:[%s2901_s1 + $0x60] sm:$0xf0]  ;;  %v1734_v28 = vld [vmem:[%s2901_s1 + $0xa0] sm:$0xf]  ;;  %v2032_v34 = vld [vmem:[%s2480_s26 + $0xb8] sm:$0xff] }
  0x73   : > { %2096 = vmatpush.bf16.msra.mxu2 %v2015_v12  ;;  %2097 = vmatpush.bf16.msra.mxu3 %v2015_v12  ;;  %v2001_v31 = vld [vmem:[%s2901_s1 + $0x100] sm:$0xf0]  ;;  %v1654_v32 = vld [vmem:[%s2901_s1] sm:$0xf]  ;;  %v2024_v35 = vld [vmem:[%s2480_s26 + $0x78] sm:$0xff]  ;;  %v1695_v36 = vor.u32 %v1981_v27, %v1694_v26  ;;  %v1735_v37 = vor.u32 %v1991_v29, %v1734_v28 }
  0x74   : > { %1169 = vmatpush.bf16.msra.mxu0 %v2015_v12  ;;  %v1775_v38 = vor.u32 %v2001_v31, %v1774_v30  ;;  %v1655_v39 = vor.u32 %v1971_v33, %v1654_v32  ;;  %v2040_v40 = vld [vmem:[%s2480_s26 + $0xf8] sm:$0xff]  ;;  %v2031_v42 = vld [vmem:[%s2480_s26 + $0xb0] sm:$0xff]  ;;  %v643_v44 = vld [vmem:[%s2902_s2 + $0x60] sm:$0xff] }
  0x75   : > { %654 = vperm.xlu0 %2176, %v632_v13   ;;  %664 = vperm.xlu1 %2177, %v634_v14   ;;  %v2044_v41 = vld [vmem:[%s2480_s26 + $0x118] sm:$0xff]  ;;  %v2023_v43 = vld [vmem:[%s2480_s26 + $0x70] sm:$0xff]  ;;  %v644_v45 = vld [vmem:[%s2902_s2 + $0x68] sm:$0xff] }
  0x76   : > { %2098 = vmatpush.bf16.msra.mxu1 %v2014_v15  ;;  %v2039_v46 = vld [vmem:[%s2480_s26 + $0xf0] sm:$0xff]  ;;  %v636_v48 = vld [vmem:[%s2902_s2 + $0x28] sm:$0xff]  ;;  %v2029_v52 = vld [vmem:[%s2480_s26 + $0xa0] sm:$0xff] }
  0x77   : > { %2099 = vmatpush.bf16.msra.mxu2 %v2014_v15  ;;  %2100 = vmatpush.bf16.msra.mxu3 %v2014_v15  ;;  %v2043_v47 = vld [vmem:[%s2480_s26 + $0x110] sm:$0xff]  ;;  %v2030_v49 = vld [vmem:[%s2480_s26 + $0xa8] sm:$0xff]  ;;  %v2021_v54 = vld [vmem:[%s2480_s26 + $0x60] sm:$0xff] }
  0x78   : > { %1170 = vmatpush.bf16.msra.mxu0 %v2014_v15  ;;  %v2022_v50 = vld [vmem:[%s2480_s26 + $0x68] sm:$0xff]  ;;  %v1714_v55 = vld [vmem:[%s2901_s1 + $0x78] sm:$0xf]  ;;  %v2037_v57 = vld [vmem:[%s2480_s26 + $0xe0] sm:$0xff] }
  0x79   : > { %674 = vperm.xlu2 %2178, %v636_v48   ;;  %v2038_v51 = vld [vmem:[%s2480_s26 + $0xe8] sm:$0xff]  ;;  %v1996_v59 = vld [vmem:[%s2901_s1 + $0xd8] sm:$0xf0]  ;;  %v1794_v60 = vld [vmem:[%s2901_s1 + $0x118] sm:$0xf] }
  0x7a   : > { %2101 = vmatpush.bf16.msra.mxu1 %v2013_v16  ;;  %v2042_v53 = vld [vmem:[%s2480_s26 + $0x108] sm:$0xff]  ;;  %v646_v63 = vld [vmem:[%s2902_s2 + $0x78] sm:$0xff]  ;;  %v2041_v1 = vld [vmem:[%s2480_s26 + $0x100] sm:$0xff] }
  0x7b   : > { %2102 = vmatpush.bf16.msra.mxu2 %v2013_v16  ;;  %2103 = vmatpush.bf16.msra.mxu3 %v2013_v16  ;;  %v1986_v56 = vld [vmem:[%s2901_s1 + $0x88] sm:$0xf0]  ;;  %v1754_v58 = vld [vmem:[%s2901_s1 + $0xc8] sm:$0xf]  ;;  %v1976_v0 = vld [vmem:[%s2901_s1 + $0x38] sm:$0xf0] }
  0x7c   : > { %1171 = vmatpush.bf16.msra.mxu0 %v2013_v16  ;;  %v2006_v61 = vld [vmem:[%s2901_s1 + $0x128] sm:$0xf0]  ;;  %v1674_v62 = vld [vmem:[%s2901_s1 + $0x28] sm:$0xf]  ;;  %v639_v2 = vld [vmem:[%s2902_s2 + $0x40] sm:$0xff]  ;;  %v1715_v5 = vor.u32 %v1986_v56, %v1714_v55  ;;  %v1755_v6 = vor.u32 %v1996_v59, %v1754_v58 }
  0x7d   : > { %679 = vperm.xlu0 %2176, %v637_v17   ;;  %684 = vperm.xlu1 %2177, %v638_v18   ;;  %v2028_v3 = vld [vmem:[%s2480_s26 + $0x98] sm:$0xff]  ;;  %v1795_v7 = vor.u32 %v2006_v61, %v1794_v60  ;;  %v1675_v8 = vor.u32 %v1976_v0, %v1674_v62  ;;  %v2027_v10 = vld [vmem:[%s2480_s26 + $0x90] sm:$0xff]  ;;  %v2026_v14 = vld [vmem:[%s2480_s26 + $0x88] sm:$0xff] }
  0x7e   : > { %2104 = vmatpush.bf16.msra.mxu1 %v2012_v19  ;;  %v2020_v4 = vld [vmem:[%s2480_s26 + $0x58] sm:$0xff]  ;;  %v2019_v11 = vld [vmem:[%s2480_s26 + $0x50] sm:$0xff]  ;;  %v2018_v15 = vld [vmem:[%s2480_s26 + $0x48] sm:$0xff] }
  0x7f   : > { %2105 = vmatpush.bf16.msra.mxu2 %v2012_v19  ;;  %2106 = vmatpush.bf16.msra.mxu3 %v2012_v19  ;;  %v2036_v9 = vld [vmem:[%s2480_s26 + $0xd8] sm:$0xff]  ;;  %v2035_v12 = vld [vmem:[%s2480_s26 + $0xd0] sm:$0xff]  ;;  %v2034_v16 = vld [vmem:[%s2480_s26 + $0xc8] sm:$0xff] }
  0x80   : > { %1172 = vmatpush.bf16.msra.mxu0 %v2012_v19  ;;  %v642_v13 = vld [vmem:[%s2902_s2 + $0x58] sm:$0xff]  ;;  %v2025_v17 = vld [vmem:[%s2480_s26 + $0x80] sm:$0xff]  ;;  %v1970_v24 = vld [vmem:[%s2901_s1 + $0xc] sm:$0xf] }
  0x81   : > { %689 = vperm.xlu2 %2178, %v639_v2   ;;  %v2017_v18 = vld [vmem:[%s2480_s26 + $0x40] sm:$0xff]  ;;  %v1670_v26 = vld [vmem:[%s2901_s1 + $0x10] sm:$0xf]  ;;  %v1974_v33 = vld [vmem:[%s2901_s1 + $0x2c] sm:$0xf] }
  0x82   : > { %2107 = vmatpush.bf16.msra.mxu1 %v2011_v20  ;;  %v2033_v19 = vld [vmem:[%s2480_s26 + $0xc0] sm:$0xff]  ;;  %v645_v28 = vld [vmem:[%s2902_s2 + $0x70] sm:$0xff]  ;;  %v1982_v48 = vld [vmem:[%s2901_s1 + $0x68] sm:$0xf0]  ;;  %s1651_s26 = sshll.u32 %s488_s10, 6  ;;  %s1469_s10 = sadd.s32 (%p2304_p6), %s2217_s14, %s1965_s12 }
  0x83   : > { %2108 = vmatpush.bf16.msra.mxu2 %v2011_v20  ;;  %2109 = vmatpush.bf16.msra.mxu3 %v2011_v20  ;;  %v1973_v27 = vld [vmem:[%s2901_s1 + $0x20] sm:$0xf0]  ;;  %v1716_v58 = vld [vmem:[%s2901_s1 + $0x8c] sm:$0xf0]  ;;  %v1722_v59 = vld [vmem:[%s2901_s1 + $0x80] sm:$0xf] }
  0x84   : > { %1173 = vmatpush.bf16.msra.mxu0 %v2011_v20  ;;  %v1969_v20 = vld [vmem:[%s2901_s1 + $0x4] sm:$0xf]  ;;  %v1671_v32 = vor.u32 %v1973_v27, %v1670_v26  ;;  %v1987_v60 = vld [vmem:[%s2901_s1 + $0x90] sm:$0xf0]  ;;  %v1724_v62 = vld [vmem:[%s2901_s1 + $0x94] sm:$0xf0] }
  0x85   : > { %694 = vperm.xlu0 %2176, %v640_v21   ;;  %699 = vperm.xlu1 %2177, %v641_v22   ;;  %v1656_v21 = vld [vmem:[%s2901_s1 + $0x14] sm:$0xf0]  ;;  %v1662_v22 = vld [vmem:[%s2901_s1 + $0x8] sm:$0xf]  ;;  %v1985_v61 = vld [vmem:[%s2901_s1 + $0x84] sm:$0xf]  ;;  %v1723_v2 = vor.u32 %v1987_v60, %v1722_v59 }
  0x86   : > { %2110 = vmatpush.bf16.msra.mxu1 %v2010_v23  ;;  %v1659_v29 = vor.u32 %v1969_v20, %v1656_v21  ;;  %v1988_v0 = vld [vmem:[%s2901_s1 + $0x98] sm:$0xf0]  ;;  %v1997_v20 = vld [vmem:[%s2901_s1 + $0xe0] sm:$0xf0]  ;;  %v1995_v21 = vld [vmem:[%s2901_s1 + $0xd4] sm:$0xf] }
  0x87   : > { %2111 = vmatpush.bf16.msra.mxu2 %v2010_v23  ;;  %2112 = vmatpush.bf16.msra.mxu3 %v2010_v23  ;;  %s2834_s24 = scalar_lea.vmem [#allocation3], %s1651_s26  ;;  %s1966_s25 = sshll.u32 (%p2304_p6), %s1469_s10, 2 }
  0x88   : > { %1174 = vmatpush.bf16.msra.mxu0 %v2010_v23  ;;  %v1972_v23 = vld [vmem:[%s2901_s1 + $0x18] sm:$0xf0]  ;;  %s1471_s23 = scalar_lea.vmem (%p2304_p6), %s2903_s3, %s1966_s25 }
  0x89   : > { %704 = vperm.xlu2 %2178, %v642_v13   ;;  %v1663_v30 = vor.u32 %v1972_v23, %v1662_v22  ;;  %v1764_v22 = vld [vmem:[%s2901_s1 + $0xe4] sm:$0xf0]  ;;  %v1770_v23 = vld [vmem:[%s2901_s1 + $0xd8] sm:$0xf] }
  0x8a   : > { %2113 = vmatpush.bf16.msra.mxu1 %v2009_v25  ;;  %v1767_v27 = vor.u32 %v1995_v21, %v1764_v22 }
  0x8b   : > { %2114 = vmatpush.bf16.msra.mxu2 %v2009_v25  ;;  %2115 = vmatpush.bf16.msra.mxu3 %v2009_v25 }
  0x8c   : > { %1175 = vmatpush.bf16.msra.mxu0 %v2009_v25  ;;  %v1664_v25 = vld [vmem:[%s2901_s1 + $0x1c] sm:$0xf0] }
  0x8d   : > { %1186 = vmatmul.bf16.vlgmr.msra.gmra.mxu1 %v1695_v36  ;;  %709 = vperm.xlu0 %2176, %v643_v44   ;;  %v1667_v31 = vor.u32 %v1970_v24, %v1664_v25  ;;  %v1977_v36 = vld [vmem:[%s2901_s1 + $0x40] sm:$0xf0]  ;;  %v1998_v24 = vld [vmem:[%s2901_s1 + $0xe8] sm:$0xf0] }
  0x8e   : > { %1217 = vmatpush.bf16.msrb.mxu1 %v2024_v35  ;;  %1196 = vmatmul.bf16.vlgmr.msra.gmra.mxu2 %v1735_v37  ;;  %v1682_v35 = vld [vmem:[%s2901_s1 + $0x30] sm:$0xf]  ;;  %v1975_v37 = vld [vmem:[%s2901_s1 + $0x34] sm:$0xf] }
  0x8f   : > { %1266 = vmatpush.bf16.msrb.mxu2 %v2032_v34  ;;  %1206 = vmatmul.bf16.vlgmr.msra.gmra.mxu3 %v1775_v38  ;;  %v1676_v34 = vld [vmem:[%s2901_s1 + $0x3c] sm:$0xf0]  ;;  %v1684_v38 = vld [vmem:[%s2901_s1 + $0x44] sm:$0xf0] }
  0x90   : > { %1176 = vmatmul.bf16.vlgmr.msra.gmra.mxu0 %v1655_v39  ;;  %1315 = vmatpush.bf16.msrb.mxu3 %v2040_v40  ;;  %v1690_v39 = vld [vmem:[%s2901_s1 + $0x38] sm:$0xf]  ;;  %v1978_v40 = vld [vmem:[%s2901_s1 + $0x48] sm:$0xf0] }
  0x91   : > { %1368 = vmatpush.bf16.msrb.mxu0 %v2044_v41  ;;  %714 = vperm.xlu1 %2177, %v644_v45   ;;  %v1679_v41 = vor.u32 %v1974_v33, %v1676_v34  ;;  %v1691_v44 = vor.u32 %v1978_v40, %v1690_v39  ;;  %v1979_v45 = vld [vmem:[%s2901_s1 + $0x54] sm:$0xf]  ;;  %v2000_v33 = vld [vmem:[%s2901_s1 + $0xfc] sm:$0xf]  ;;  %v1784_v34 = vld [vmem:[%s2901_s1 + $0x10c] sm:$0xf0] }
  0x92   : > { %1218 = vmatpush.bf16.msrb.mxu1 %v2023_v43  ;;  %719 = vperm.xlu2 %2178, %v645_v28   ;;  %v1687_v43 = vor.u32 %v1975_v37, %v1684_v38  ;;  %v1771_v28 = vor.u32 %v1998_v24, %v1770_v23  ;;  %v1787_v40 = vor.u32 %v2000_v33, %v1784_v34 }
  0x93   : > { %1267 = vmatpush.bf16.msrb.mxu2 %v2031_v42  ;;  %v1683_v42 = vor.u32 %v1977_v36, %v1682_v35  ;;  %v1790_v35 = vld [vmem:[%s2901_s1 + $0x100] sm:$0xf]  ;;  %v2003_v36 = vld [vmem:[%s2901_s1 + $0x110] sm:$0xf0] }
  0x94   : > { %1316 = vmatpush.bf16.msrb.mxu3 %v2039_v46  ;;  %v1696_v46 = vld [vmem:[%s2901_s1 + $0x64] sm:$0xf0] }
  0x95   : > { %1369 = vmatpush.bf16.msrb.mxu0 %v2043_v47  ;;  %724 = vperm.xlu0 %2176, %v646_v63   ;;  %v1702_v47 = vld [vmem:[%s2901_s1 + $0x58] sm:$0xf]  ;;  %v1730_v63 = vld [vmem:[%s2901_s1 + $0x88] sm:$0xf] }
  0x96   : > { %1219 = vmatpush.bf16.msrb.mxu1 %v2022_v50  ;;  %v1704_v50 = vld [vmem:[%s2901_s1 + $0x6c] sm:$0xf0] }
  0x97   : > { %1268 = vmatpush.bf16.msrb.mxu2 %v2030_v49  ;;  %v1980_v49 = vld [vmem:[%s2901_s1 + $0x5c] sm:$0xf] }
  0x98   : > { %1317 = vmatpush.bf16.msrb.mxu3 %v2038_v51  ;;  %v1710_v51 = vld [vmem:[%s2901_s1 + $0x60] sm:$0xf]  ;;  %v1707_v55 = vor.u32 %v1980_v49, %v1704_v50  ;;  %v2007_v50 = vld [vmem:[%s2901_s1 + $0x130] sm:$0xf0] }
  0x99   : > { %1370 = vmatpush.bf16.msrb.mxu0 %v2042_v53  ;;  %v1699_v53 = vor.u32 %v1979_v45, %v1696_v46  ;;  %v1802_v49 = vld [vmem:[%s2901_s1 + $0x120] sm:$0xf] }
  0x9a   : > { %1220 = vmatpush.bf16.msrb.mxu1 %v2021_v54  ;;  %v1703_v54 = vor.u32 %v1982_v48, %v1702_v47  ;;  %v2004_v47 = vld [vmem:[%s2901_s1 + $0x11c] sm:$0xf]  ;;  %v1796_v48 = vld [vmem:[%s2901_s1 + $0x12c] sm:$0xf0] }
  0x9b   : > { %1269 = vmatpush.bf16.msrb.mxu2 %v2029_v52  ;;  %v1983_v52 = vld [vmem:[%s2901_s1 + $0x70] sm:$0xf0] }
  0x9c   : > { %1318 = vmatpush.bf16.msrb.mxu3 %v2037_v57  ;;  %v1711_v56 = vor.u32 %v1983_v52, %v1710_v51  ;;  %v1984_v57 = vld [vmem:[%s2901_s1 + $0x7c] sm:$0xf]  ;;  %v2005_v51 = vld [vmem:[%s2901_s1 + $0x124] sm:$0xf]  ;;  %v1804_v52 = vld [vmem:[%s2901_s1 + $0x134] sm:$0xf0] }
  0x9d   : > { %1371 = vmatpush.bf16.msrb.mxu0 %v2041_v1  ;;  %1191 = vmatmul.bf16.gmra.mxu1 %v1715_v5  ;;  %v1719_v1 = vor.u32 %v1984_v57, %v1716_v58  ;;  %v1989_v5 = vld [vmem:[%s2901_s1 + $0xa4] sm:$0xf]  ;;  %v1799_v57 = vor.u32 %v2004_v47, %v1796_v48  ;;  %v1803_v58 = vor.u32 %v2007_v50, %v1802_v49 }
  0x9e   : > { %1221 = vmatpush.bf16.msrb.mxu1 %v2020_v4  ;;  %1201 = vmatmul.bf16.gmra.mxu2 %v1755_v6  ;;  %v1731_v4 = vor.u32 %v1988_v0, %v1730_v63  ;;  %v1736_v6 = vld [vmem:[%s2901_s1 + $0xb4] sm:$0xf0]  ;;  %v1807_v60 = vor.u32 %v2005_v51, %v1804_v52 }
  0x9f   : > { %1270 = vmatpush.bf16.msrb.mxu2 %v2028_v3  ;;  %1211 = vmatmul.bf16.gmra.mxu3 %v1795_v7  ;;  %v1727_v3 = vor.u32 %v1985_v61, %v1724_v62  ;;  %v1742_v7 = vld [vmem:[%s2901_s1 + $0xa8] sm:$0xf]  ;;  %v1739_v13 = vor.u32 %v1989_v5, %v1736_v6 }
  0xa0   : > { %1181 = vmatmul.bf16.gmra.mxu0 %v1675_v8  ;;  %1319 = vmatpush.bf16.msrb.mxu3 %v2036_v9  ;;  %v1992_v8 = vld [vmem:[%s2901_s1 + $0xb8] sm:$0xf0]  ;;  %v1990_v9 = vld [vmem:[%s2901_s1 + $0xac] sm:$0xf] }
  0xa2   : > { %1222 = vmatpush.bf16.msrb.mxu1 %v2019_v11  ;;  %v1750_v11 = vld [vmem:[%s2901_s1 + $0xb0] sm:$0xf] }
  0xa3   : > { %1271 = vmatpush.bf16.msrb.mxu2 %v2027_v10  ;;  %v1744_v10 = vld [vmem:[%s2901_s1 + $0xbc] sm:$0xf0] }
  0xa4   : > { %1320 = vmatpush.bf16.msrb.mxu3 %v2035_v12  ;;  %v1993_v12 = vld [vmem:[%s2901_s1 + $0xc0] sm:$0xf0] }
  0xa6   : > { %1223 = vmatpush.bf16.msrb.mxu1 %v2018_v15  ;;  %v1747_v15 = vor.u32 %v1990_v9, %v1744_v10 }
  0xa7   : > { %1272 = vmatpush.bf16.msrb.mxu2 %v2026_v14  ;;  %v1743_v14 = vor.u32 %v1992_v8, %v1742_v7 }
  0xa8   : > { %1321 = vmatpush.bf16.msrb.mxu3 %v2034_v16  ;;  %v1751_v16 = vor.u32 %v1993_v12, %v1750_v11 }
  0xaa   : > { %1224 = vmatpush.bf16.msrb.mxu1 %v2017_v18  ;;  %v1756_v18 = vld [vmem:[%s2901_s1 + $0xdc] sm:$0xf0] }
  0xab   : > { %1273 = vmatpush.bf16.msrb.mxu2 %v2025_v17  ;;  %v1994_v17 = vld [vmem:[%s2901_s1 + $0xcc] sm:$0xf] }
  0xac   : > { %1322 = vmatpush.bf16.msrb.mxu3 %v2033_v19  ;;  %v1762_v19 = vld [vmem:[%s2901_s1 + $0xd0] sm:$0xf]  ;;  %v1759_v25 = vor.u32 %v1994_v17, %v1756_v18 }
  0xad   : > { %1225 = vmatmul.bf16.vlgmr.msrb.gmra.mxu1 %v1659_v29  ;;  %v1763_v26 = vor.u32 %v1997_v20, %v1762_v19  ;;  %v1999_v29 = vld [vmem:[%s2901_s1 + $0xf4] sm:$0xf] }
  0xae   : > { %1274 = vmatmul.bf16.vlgmr.msrb.gmra.mxu2 %v1663_v30  ;;  %v1776_v30 = vld [vmem:[%s2901_s1 + $0x104] sm:$0xf0] }
  0xaf   : > { %1323 = vmatmul.bf16.vlgmr.msrb.gmra.mxu3 %v1667_v31  ;;  %v1782_v31 = vld [vmem:[%s2901_s1 + $0xf8] sm:$0xf]  ;;  %v1779_v37 = vor.u32 %v1999_v29, %v1776_v30 }
  0xb0   : > { %1956 = vmatmul.msk.bf16.vlgmr.msrb.gmra.mxu0 %vm1143_vm0, %v1671_v32  ;;  %v2002_v32 = vld [vmem:[%s2901_s1 + $0x108] sm:$0xf0] }
  0xb1   : > { %v1783_v38 = vor.u32 %v2002_v32, %v1782_v31 }
  0xbd   : > { %1230 = vmatmul.bf16.gmra.mxu1 %v1679_v41  ;;  %v1791_v41 = vor.u32 %v2003_v36, %v1790_v35 }
  0xbe   : > { %1279 = vmatmul.bf16.gmra.mxu2 %v1683_v42 }
  0xbf   : > { %1328 = vmatmul.bf16.gmra.mxu3 %v1687_v43 }
  0xc0   : > { %1957 = vmatmul.msk.bf16.gmra.mxu0 %vm1143_vm0, %v1691_v44 }
  0xcb   : > { %v670_v49 = vpop.permute.xlu2 %669 }
  0xcd   : > { %1235 = vmatmul.bf16.gmra.mxu1 %v1699_v53  ;;  %v1810_v53 = vld [vmem:[%s2901_s1 + $0x128] sm:$0xf] }
  0xce   : > { %1284 = vmatmul.bf16.gmra.mxu2 %v1703_v54  ;;  %v2008_v54 = vld [vmem:[%s2901_s1 + $0x138] sm:$0xf0] }
  0xcf   : > { %1333 = vmatmul.bf16.gmra.mxu3 %v1707_v55  ;;  %v1811_v61 = vor.u32 %v2008_v54, %v1810_v53 }
  0xd0   : > { %1958 = vmatmul.msk.bf16.gmra.mxu0 %vm1143_vm0, %v1711_v56 }
  0xdd   : > { %1240 = vmatmul.bf16.gmra.mxu1 %v1719_v1 }
  0xde   : > { %1289 = vmatmul.bf16.gmra.mxu2 %v1723_v2 }
  0xdf   : > { %1338 = vmatmul.bf16.gmra.mxu3 %v1727_v3  ;;  %v650_v5 = vpop.permute.xlu0 %649  ;;  %v660_v22 = vpop.permute.xlu1 %659 }
  0xe0   : > { %1959 = vmatmul.msk.bf16.gmra.mxu0 %vm1143_vm0, %v1731_v4 }
  0xed   : > { %1245 = vmatmul.bf16.gmra.mxu1 %v1739_v13 }
  0xee   : > { %1294 = vmatmul.bf16.gmra.mxu2 %v1743_v14 }
  0xef   : > { %1343 = vmatmul.bf16.gmra.mxu3 %v1747_v15  ;;  %v655_v15 = vpop.permute.xlu0 %654 }
  0xf0   : > { %1960 = vmatmul.msk.bf16.gmra.mxu0 %vm1143_vm0, %v1751_v16 }
  0xfd   : > { %1250 = vmatmul.bf16.gmra.mxu1 %v1759_v25 }
  0xfe   : > { %1299 = vmatmul.bf16.gmra.mxu2 %v1763_v26 }
  0xff   : > { %1348 = vmatmul.bf16.gmra.mxu3 %v1767_v27 }
 0x100   : > { %1961 = vmatmul.msk.bf16.gmra.mxu0 %vm1143_vm0, %v1771_v28 }
 0x10a   : > { %v2782_v39 = vpop.f32.mrf.mxu1 }
 0x10d   : > { %v1177_v42 = vpop.f32.mrf.mxu0  ;;  %1255 = vmatmul.bf16.gmra.mxu1 %v1779_v37 }
 0x10e   : > { %1304 = vmatmul.bf16.gmra.mxu2 %v1783_v38  ;;  %v1178_v8 = vadd.f32 %v1177_v42, %v650_v5  ;;  %v665_v38 = vpop.permute.xlu1 %664 }
 0x10f   : > { %1353 = vmatmul.bf16.gmra.mxu3 %v1787_v40 }
 0x110   : > { %1962 = vmatmul.msk.bf16.gmra.mxu0 %vm1143_vm0, %v1791_v41 }
 0x111   : > { %v2785_v43 = vpop.f32.mrf.mxu2 }
 0x112   : > { %v2787_v44 = vpop.f32.mrf.mxu3  ;;  %v2789_v45 = vpop.f32.mrf.mxu1 }
 0x115   : > { %v1179_v46 = vpop.f32.mrf.mxu0 }
 0x116   : > { %v1180_v16 = vadd.f32 %v1179_v46, %v655_v15 }
 0x119   : > { %v2815_v55 = vpop.f32.mrf.mxu2 }
 0x11a   : > { %v2817_v56 = vpop.f32.mrf.mxu3  ;;  %v2819_v59 = vpop.f32.mrf.mxu1 }
 0x11d   : > { %v1182_v62 = vpop.f32.mrf.mxu0  ;;  %1260 = vmatmul.bf16.gmra.mxu1 %v1799_v57  ;;  %v1188_v57 = vadd.f32 %v2782_v39, %v670_v49 }
 0x11e   : > { %1309 = vmatmul.bf16.gmra.mxu2 %v1803_v58  ;;  %v1183_v28 = vadd.f32 %v1182_v62, %v660_v22 }
 0x11f   : > { %1358 = vmatmul.bf16.gmra.mxu3 %v1807_v60 }
 0x120   : > { %1963 = vmatmul.msk.bf16.gmra.mxu0 %vm1143_vm0, %v1811_v61 }
 0x121   : > { %v2822_v63 = vpop.f32.mrf.mxu2 }
 0x122   : > { %v2824_v0 = vpop.f32.mrf.mxu3  ;;  %v2826_v1 = vpop.f32.mrf.mxu1 }
 0x125   : > { %v1184_v2 = vpop.f32.mrf.mxu0 }
 0x126   : > { %v1185_v40 = vadd.f32 %v1184_v2, %v665_v38 }
 0x129   : > { %v2828_v3 = vpop.f32.mrf.mxu2 }
 0x12a   : > { %v2830_v4 = vpop.f32.mrf.mxu3  ;;  %v1226_v6 = vpop.f32.mrf.mxu1 }
 0x12b   : > { %v1227_v10 = vadd.f32 %v1226_v6, %v1178_v8 }
 0x12d   : > { %v1373_v7 = vpop.f32.mrf.mxu0 }
 0x131   : > { %v1275_v9 = vpop.f32.mrf.mxu2 }
 0x132   : > { %v1324_v11 = vpop.f32.mrf.mxu3  ;;  %v1228_v12 = vpop.f32.mrf.mxu1  ;;  %v1276_v13 = vadd.f32 %v1275_v9, %v1227_v10 }
 0x133   : > { %v1229_v18 = vadd.f32 %v1228_v12, %v1180_v16  ;;  %v675_v9 = vpop.permute.xlu2 %674 }
 0x134   : > { %v1325_v17 = vadd.f32 %v1324_v11, %v1276_v13  ;;  %v1190_v10 = vadd.f32 %v2789_v45, %v675_v9 }
 0x135   : > { %v1375_v14 = vpop.f32.mrf.mxu0 }
 0x136   : > { %v1374_v24 = vadd.f32 %v1373_v7, %v1325_v17 }
 0x138   : > { %v1413_v29 = vmax.f32 %v1374_v24, 0.0 }
 0x139   : > { %v1277_v19 = vpop.f32.mrf.mxu2 }
 0x13a   : > { %v1278_v20 = vadd.f32 %v1277_v19, %v1229_v18  ;;  %v1326_v21 = vpop.f32.mrf.mxu3  ;;  %v1231_v23 = vpop.f32.mrf.mxu1 }
 0x13b   : > { %v1232_v33 = vadd.f32 %v1231_v23, %v1183_v28 }
 0x13c   : > { %v1327_v25 = vadd.f32 %v1326_v21, %v1278_v20  ;;  %v680_v20 = vpop.permute.xlu0 %679 }
 0x13d   : > { %v1378_v26 = vpop.f32.mrf.mxu0  ;;  %v1193_v21 = vadd.f32 %v2819_v59, %v680_v20 }
 0x13e   : > { %v1376_v27 = vadd.f32 %v1375_v14, %v1327_v25 }
 0x140   : > { %v1414_v30 = vmax.f32 %v1376_v27, 0.0 }
 0x141   : > { %v1280_v31 = vpop.f32.mrf.mxu2 }
 0x142   : > { %v2048_v32 = vpack.c.bf16 %v1414_v30, %v1413_v29  ;;  %v1329_v34 = vpop.f32.mrf.mxu3  ;;  %v1233_v35 = vpop.f32.mrf.mxu1  ;;  %v1281_v36 = vadd.f32 %v1280_v31, %v1232_v33 }
 0x143   : > { %v1234_v42 = vadd.f32 %v1233_v35, %v1185_v40  ;;  %v685_v30 = vpop.permute.xlu1 %684 }
 0x144   : > { %2049 = vst [vmem:[%s2834_s24] sm:$0xff] %v2048_v32   ;;  %v1330_v41 = vadd.f32 %v1329_v34, %v1281_v36  ;;  %v1195_v31 = vadd.f32 %v2826_v1, %v685_v30 }
 0x145   : > { %v1380_v37 = vpop.f32.mrf.mxu0 }
 0x146   : > { %v1379_v51 = vadd.f32 %v1378_v26, %v1330_v41  ;;  %v690_v41 = vpop.permute.xlu2 %689 }
 0x148   : > { %v1415_v58 = vmax.f32 %v1379_v51, 0.0 }
 0x149   : > { %v1282_v46 = vpop.f32.mrf.mxu2 }
 0x14a   : > { %v1283_v47 = vadd.f32 %v1282_v46, %v1234_v42  ;;  %v1331_v48 = vpop.f32.mrf.mxu3  ;;  %v1236_v50 = vpop.f32.mrf.mxu1  ;;  %v1198_v46 = vadd.f32 %v2785_v43, %v690_v41 }
 0x14b   : > { %v1237_v5 = vadd.f32 %v1236_v50, %v1188_v57  ;;  %v695_v57 = vpop.permute.xlu0 %694 }
 0x14c   : > { %v1332_v52 = vadd.f32 %v1331_v48, %v1283_v47 }
 0x14d   : > { %v1383_v53 = vpop.f32.mrf.mxu0 }
 0x14e   : > { %v1381_v54 = vadd.f32 %v1380_v37, %v1332_v52 }
 0x150   : > { %v1416_v60 = vmax.f32 %v1381_v54, 0.0 }
 0x151   : > { %v1285_v61 = vpop.f32.mrf.mxu2 }
 0x152   : > { %v2053_v62 = vpack.c.bf16 %v1416_v60, %v1415_v58  ;;  %v1334_v2 = vpop.f32.mrf.mxu3  ;;  %v1238_v6 = vpop.f32.mrf.mxu1  ;;  %v1286_v7 = vadd.f32 %v1285_v61, %v1237_v5  ;;  %v1200_v58 = vadd.f32 %v2815_v55, %v695_v57 }
 0x153   : > { %v1239_v12 = vadd.f32 %v1238_v6, %v1190_v10  ;;  %v700_v10 = vpop.permute.xlu1 %699 }
 0x154   : > { %2085 = vst [vmem:[%s2834_s24 + $0x8] sm:$0xff] %v2053_v62   ;;  %v1335_v11 = vadd.f32 %v1334_v2, %v1286_v7 }
 0x155   : > { %v1385_v8 = vpop.f32.mrf.mxu0 }
 0x156   : > { %v1384_v16 = vadd.f32 %v1383_v53, %v1335_v11  ;;  %v1203_v11 = vadd.f32 %v2822_v63, %v700_v10 }
 0x158   : > { %v1417_v22 = vmax.f32 %v1384_v16, 0.0 }
 0x159   : > { %v1287_v13 = vpop.f32.mrf.mxu2 }
 0x15a   : > { %v1288_v14 = vadd.f32 %v1287_v13, %v1239_v12  ;;  %v1336_v15 = vpop.f32.mrf.mxu3  ;;  %v1241_v39 = vpop.f32.mrf.mxu1 }
 0x15b   : > { %v1242_v26 = vadd.f32 %v1241_v39, %v1193_v21 }
 0x15c   : > { %v1337_v17 = vadd.f32 %v1336_v15, %v1288_v14 }
 0x15d   : > { %v1388_v18 = vpop.f32.mrf.mxu0 }
 0x15e   : > { %v1386_v19 = vadd.f32 %v1385_v8, %v1337_v17 }
 0x160   : > { %v1418_v23 = vmax.f32 %v1386_v19, 0.0 }
 0x161   : > { %v1290_v24 = vpop.f32.mrf.mxu2 }
 0x162   : > { %v2058_v25 = vpack.c.bf16 %v1418_v23, %v1417_v22  ;;  %v1339_v45 = vpop.f32.mrf.mxu3  ;;  %v1243_v27 = vpop.f32.mrf.mxu1  ;;  %v1291_v28 = vadd.f32 %v1290_v24, %v1242_v26 }
 0x163   : > { %v1244_v33 = vadd.f32 %v1243_v27, %v1195_v31  ;;  %v710_v27 = vpop.permute.xlu0 %709 }
 0x164   : > { %2086 = vst [vmem:[%s2834_s24 + $0x10] sm:$0xff] %v2058_v25   ;;  %v1340_v32 = vadd.f32 %v1339_v45, %v1291_v28  ;;  %v1208_v30 = vadd.f32 %v2787_v44, %v710_v27 }
 0x165   : > { %v1390_v29 = vpop.f32.mrf.mxu0 }
 0x166   : > { %v1389_v37 = vadd.f32 %v1388_v18, %v1340_v32  ;;  %v705_v18 = vpop.permute.xlu2 %704 }
 0x167   : > { %v1205_v20 = vadd.f32 %v2828_v3, %v705_v18 }
 0x168   : > { %v1419_v47 = vmax.f32 %v1389_v37, 0.0 }
 0x169   : > { %v1292_v34 = vpop.f32.mrf.mxu2 }
 0x16a   : > { %v1293_v35 = vadd.f32 %v1292_v34, %v1244_v33  ;;  %v1341_v36 = vpop.f32.mrf.mxu3  ;;  %v1246_v59 = vpop.f32.mrf.mxu1 }
 0x16b   : > { %v1247_v51 = vadd.f32 %v1246_v59, %v1198_v46  ;;  %v1496_v18 = vld [vmem:[%s2834_s24 + $0x10] sm:$0xf] (%p2304_p6) }
 0x16c   : > { %v1342_v38 = vadd.f32 %v1341_v36, %v1293_v35  ;;  %v715_v36 = vpop.permute.xlu1 %714  ;;  %1497 = vst [vmem:[%s1471_s23 + $0x20] sm:$0xf] (%p2304_p6), %v1496_v18 }
 0x16d   : > { %v1393_v40 = vpop.f32.mrf.mxu0 }
 0x16e   : > { %v1391_v42 = vadd.f32 %v1390_v29, %v1342_v38  ;;  %v1210_v38 = vadd.f32 %v2817_v56, %v715_v36 }
 0x170   : > { %v1420_v48 = vmax.f32 %v1391_v42, 0.0 }
 0x171   : > { %v1295_v49 = vpop.f32.mrf.mxu2 }
 0x172   : > { %v2063_v50 = vpack.c.bf16 %v1420_v48, %v1419_v47  ;;  %v1344_v1 = vpop.f32.mrf.mxu3  ;;  %v1248_v52 = vpop.f32.mrf.mxu1  ;;  %v1296_v53 = vadd.f32 %v1295_v49, %v1247_v51 }
 0x173   : > { %v1249_v61 = vadd.f32 %v1248_v52, %v1200_v58  ;;  %v720_v51 = vpop.permute.xlu2 %719 }
 0x174   : > { %2087 = vst [vmem:[%s2834_s24 + $0x18] sm:$0xff] %v2063_v50   ;;  %v1345_v60 = vadd.f32 %v1344_v1, %v1296_v53  ;;  %v1213_v52 = vadd.f32 %v2824_v0, %v720_v51 }
 0x175   : > { %v1395_v54 = vpop.f32.mrf.mxu0 }
 0x176   : > { %v1394_v6 = vadd.f32 %v1393_v40, %v1345_v60 }
 0x178   : > { %v1421_v12 = vmax.f32 %v1394_v6, 0.0 }
 0x179   : > { %v1297_v62 = vpop.f32.mrf.mxu2 }
 0x17a   : > { %v1298_v5 = vadd.f32 %v1297_v62, %v1249_v61  ;;  %v1346_v2 = vpop.f32.mrf.mxu3  ;;  %v1251_v43 = vpop.f32.mrf.mxu1 }
 0x17b   : > { %v1252_v39 = vadd.f32 %v1251_v43, %v1203_v11  ;;  %v725_v61 = vpop.permute.xlu0 %724 }
 0x17c   : > { %v1347_v7 = vadd.f32 %v1346_v2, %v1298_v5  ;;  %v1215_v43 = vadd.f32 %v2830_v4, %v725_v61  ;;  %v1488_v4 = vld [vmem:[%s2834_s24] sm:$0xf] (%p2304_p6) }
 0x17d   : > { %v1398_v8 = vpop.f32.mrf.mxu0  ;;  %1489 = vst [vmem:[%s1471_s23] sm:$0xf] (%p2304_p6), %v1488_v4 }
 0x17e   : > { %v1396_v9 = vadd.f32 %v1395_v54, %v1347_v7 }
 0x180   : > { %v1422_v13 = vmax.f32 %v1396_v9, 0.0 }
 0x181   : > { %v1300_v14 = vpop.f32.mrf.mxu2 }
 0x182   : > { %v2068_v15 = vpack.c.bf16 %v1422_v13, %v1421_v12  ;;  %v1349_v55 = vpop.f32.mrf.mxu3  ;;  %v1253_v16 = vpop.f32.mrf.mxu1  ;;  %v1301_v17 = vadd.f32 %v1300_v14, %v1252_v39 }
 0x183   : > { %v1254_v22 = vadd.f32 %v1253_v16, %v1205_v20  ;;  %v1492_v16 = vld [vmem:[%s2834_s24 + $0x8] sm:$0xf] (%p2304_p6)  ;;  %v1500_v20 = vld [vmem:[%s2834_s24 + $0x18] sm:$0xf] (%p2304_p6) }
 0x184   : > { %2088 = vst [vmem:[%s2834_s24 + $0x20] sm:$0xff] %v2068_v15   ;;  %v1350_v21 = vadd.f32 %v1349_v55, %v1301_v17  ;;  %v1490_v55 = vld [vmem:[%s2834_s24 + $0x4] sm:$0xf] (%p2304_p6)  ;;  %v1494_v17 = vld [vmem:[%s2834_s24 + $0xc] sm:$0xf] (%p2304_p6) }
 0x185   : > { %v1400_v19 = vpop.f32.mrf.mxu0  ;;  %1491 = vst [vmem:[%s1471_s23 + $0x8] sm:$0xf] (%p2304_p6), %v1490_v55 }
 0x186   : > { %v1399_v26 = vadd.f32 %v1398_v8, %v1350_v21  ;;  %1493 = vst [vmem:[%s1471_s23 + $0x10] sm:$0xf] (%p2304_p6), %v1492_v16  ;;  %v1502_v21 = vld [vmem:[%s2834_s24 + $0x1c] sm:$0xf] (%p2304_p6) }
 0x187   : > { %1495 = vst [vmem:[%s1471_s23 + $0x18] sm:$0xf] (%p2304_p6), %v1494_v17 }
 0x188   : > { %v1423_v31 = vmax.f32 %v1399_v26, 0.0  ;;  %1501 = vst [vmem:[%s1471_s23 + $0x30] sm:$0xf] (%p2304_p6), %v1500_v20 }
 0x189   : > { %v1302_v23 = vpop.f32.mrf.mxu2  ;;  %1503 = vst [vmem:[%s1471_s23 + $0x38] sm:$0xf] (%p2304_p6), %v1502_v21 }
 0x18a   : > { %v1303_v24 = vadd.f32 %v1302_v23, %v1254_v22  ;;  %v1351_v25 = vpop.f32.mrf.mxu3  ;;  %v1256_v63 = vpop.f32.mrf.mxu1 }
 0x18b   : > { %v1257_v35 = vadd.f32 %v1256_v63, %v1208_v30  ;;  %v1504_v22 = vld [vmem:[%s2834_s24 + $0x20] sm:$0xf] (%p2304_p6)  ;;  %v1506_v23 = vld [vmem:[%s2834_s24 + $0x24] sm:$0xf] (%p2304_p6) }
 0x18c   : > { %v1352_v45 = vadd.f32 %v1351_v25, %v1303_v24  ;;  %1505 = vst [vmem:[%s1471_s23 + $0x40] sm:$0xf] (%p2304_p6), %v1504_v22 }
 0x18d   : > { %v1403_v29 = vpop.f32.mrf.mxu0  ;;  %1507 = vst [vmem:[%s1471_s23 + $0x48] sm:$0xf] (%p2304_p6), %v1506_v23 }
 0x18e   : > { %v1401_v28 = vadd.f32 %v1400_v19, %v1352_v45  ;;  %v1498_v19 = vld [vmem:[%s2834_s24 + $0x14] sm:$0xf] (%p2304_p6) }
 0x18f   : > { %1499 = vst [vmem:[%s1471_s23 + $0x28] sm:$0xf] (%p2304_p6), %v1498_v19 }
 0x190   : > { %v1424_v32 = vmax.f32 %v1401_v28, 0.0 }
 0x191   : > { %v1305_v33 = vpop.f32.mrf.mxu2 }
 0x192   : > { %v2073_v34 = vpack.c.bf16 %v1424_v32, %v1423_v31  ;;  %v1354_v3 = vpop.f32.mrf.mxu3  ;;  %v1258_v59 = vpop.f32.mrf.mxu1  ;;  %v1306_v37 = vadd.f32 %v1305_v33, %v1257_v35 }
 0x193   : > { %v1259_v41 = vadd.f32 %v1258_v59, %v1210_v38 }
 0x194   : > { %2089 = vst [vmem:[%s2834_s24 + $0x28] sm:$0xff] %v2073_v34   ;;  %v1355_v40 = vadd.f32 %v1354_v3, %v1306_v37 }
 0x195   : > { %v1405_v42 = vpop.f32.mrf.mxu0 }
 0x196   : > { %v1404_v49 = vadd.f32 %v1403_v29, %v1355_v40 }
 0x198   : > { %v1425_v53 = vmax.f32 %v1404_v49, 0.0 }
 0x199   : > { %v1307_v46 = vpop.f32.mrf.mxu2 }
 0x19a   : > { %v1308_v47 = vadd.f32 %v1307_v46, %v1259_v41  ;;  %v1356_v48 = vpop.f32.mrf.mxu3  ;;  %v1261_v44 = vpop.f32.mrf.mxu1 }
 0x19b   : > { %v1262_v60 = vadd.f32 %v1261_v44, %v1213_v52  ;;  %v1508_v24 = vld [vmem:[%s2834_s24 + $0x28] sm:$0xf] (%p2304_p6)  ;;  %v1510_v25 = vld [vmem:[%s2834_s24 + $0x2c] sm:$0xf] (%p2304_p6) }
 0x19c   : > { %v1357_v50 = vadd.f32 %v1356_v48, %v1308_v47  ;;  %1509 = vst [vmem:[%s1471_s23 + $0x50] sm:$0xf] (%p2304_p6), %v1508_v24 }
 0x19d   : > { %v1408_v62 = vpop.f32.mrf.mxu0  ;;  %1511 = vst [vmem:[%s1471_s23 + $0x58] sm:$0xf] (%p2304_p6), %v1510_v25 }
 0x19e   : > { %v1406_v1 = vadd.f32 %v1405_v42, %v1357_v50 }
 0x1a0   : > { %v1426_v54 = vmax.f32 %v1406_v1, 0.0 }
 0x1a1   : > { %v1310_v57 = vpop.f32.mrf.mxu2 }
 0x1a2   : > { %v2078_v58 = vpack.c.bf16 %v1426_v54, %v1425_v53  ;;  %v1359_v56 = vpop.f32.mrf.mxu3  ;;  %v1311_v5 = vadd.f32 %v1310_v57, %v1262_v60  ;;  %v1263_v2 = vpop.f32.mrf.mxu1 }
 0x1a3   : > { %v1264_v7 = vadd.f32 %v1263_v2, %v1215_v43 }
 0x1a4   : > { %2090 = vst [vmem:[%s2834_s24 + $0x30] sm:$0xff] %v2078_v58   ;;  %v1360_v6 = vadd.f32 %v1359_v56, %v1311_v5 }
 0x1a5   : > { %v1410_v12 = vpop.f32.mrf.mxu0 }
 0x1a6   : > { %v1409_v0 = vadd.f32 %v1408_v62, %v1360_v6 }
 0x1a8   : > { %v1427_v14 = vmax.f32 %v1409_v0, 0.0 }
 0x1a9   : > { %v1312_v8 = vpop.f32.mrf.mxu2 }
 0x1aa   : > { %v1313_v9 = vadd.f32 %v1312_v8, %v1264_v7  ;;  %v1361_v10 = vpop.f32.mrf.mxu3 }
 0x1ab   : > { %v1512_v63 = vld [vmem:[%s2834_s24 + $0x30] sm:$0xf] (%p2304_p6)  ;;  %v1514_v26 = vld [vmem:[%s2834_s24 + $0x34] sm:$0xf] (%p2304_p6) }
 0x1ac   : > { %v1362_v11 = vadd.f32 %v1361_v10, %v1313_v9  ;;  %1513 = vst [vmem:[%s1471_s23 + $0x60] sm:$0xf] (%p2304_p6), %v1512_v63 }
 0x1ad   : > { %1515 = vst [vmem:[%s1471_s23 + $0x68] sm:$0xf] (%p2304_p6), %v1514_v26 }
 0x1ae   : > { %v1411_v13 = vadd.f32 %v1410_v12, %v1362_v11 }
 0x1b0   : > { %v1428_v15 = vmax.f32 %v1411_v13, 0.0  ;;  %1467 = sbr.rel (!%p2304_p6) target bundleno = 446 (0x1be), region = 77 }
 0x1b2   : > { %v2083_v39 = vpack.c.bf16 %v1428_v15, %v1427_v14 }
 0x1b4   : > { %2091 = vst [vmem:[%s2834_s24 + $0x38] sm:$0xff] %v2083_v39  }
 0x1bb   : > { %v1516_v45 = vld [vmem:[%s2834_s24 + $0x38] sm:$0xf]  ;;  %v1518_v27 = vld [vmem:[%s2834_s24 + $0x3c] sm:$0xf] }
 0x1bc   : > { %1517 = vst [vmem:[%s1471_s23 + $0x70] sm:$0xf] %v1516_v45 }
 0x1bd   : > { %1519 = vst [vmem:[%s1471_s23 + $0x78] sm:$0xf] %v1518_v27 }
 0x1be PF: > { %s13_s18 = sadd.s32 1, %s2233_s18   ;;  %s2905_s12 = smov %s2213_s13 }
 0x1bf   : > { %p10_p12 = scmp.ge.s32.totalorder %s13_s18, 6   ;;  %s2906_s13 = smov %s2312_s27 }
 0x1c0   : > { %s2907_s14 = smov %s2225_s16  ;;  %s2908_s15 = smov %s2229_s17 }
 0x1c1   : > { %s2909_s16 = smov %s2912_s19  ;;  %s2910_s17 = smov %s2916_s20 }
 0x1c2   :  { %12 = sbr.rel (!%p10_p12) target bundleno = 4 (0x4), region = 149 }

// kernel: policy_forward.7
= control target key start
LH: loop header
LB: loop body
LE: loop exit
PB: predicated region body
PF: predicated region fallthrough
CT: control target
= control target key end

     0   :  { %16 = vsyncpa [#allocation5], 0  ;;  %s6367_s0 = inlined_call_operand.vmem [shape: bf16[2,32768], index: 0, kind: input, shape index: {}]   ;;  %s6368_s1 = inlined_call_operand.vmem [shape: bf16[64,32768], index: 1, kind: input, shape index: {}]   ;;  %s6369_s2 = inlined_call_operand.vmem [shape: f32[1,64], index: 2, kind: input, shape index: {}]   ;;  %s6370_s3 = inlined_call_operand.vmem [shape: f32[2,32], index: 3, kind: input, shape index: {}]   ;;  %s6371_s4 = inlined_call_operand.vmem [shape: bf16[32,8], index: 4, kind: input, shape index: {}]   ;;  %s6372_s5 = inlined_call_operand.vmem [shape: f32[1,8], index: 5, kind: input, shape index: {}]   ;;  %s6373_s6 = inlined_call_operand.vmem [shape: bf16[8,8], index: 6, kind: input, shape index: {}]   ;;  %s6374_s7 = inlined_call_operand.vmem [shape: f32[1,8], index: 7, kind: input, shape index: {}]   ;;  %s6375_s8 = inlined_call_operand.hbm [shape: f32[2,32], index: 8, kind: output, shape index: {0}]   ;;  %s6376_s9 = inlined_call_operand.hbm [shape: f32[2,32], index: 9, kind: output, shape index: {1}]   ;;  %s6377_s10 = inlined_call_operand.hbm [shape: f32[2,8], index: 10, kind: output, shape index: {2}]  }
   0x1   :  { %17 = vsyncpa [#allocation7], 0  ;;  %s5215_s13 = smov 0   ;;  %s5217_s14 = smov 0  }
   0x2   :  { %s5219_s15 = smov 0  }
   0x3 LB: > { %s5231_s16 = sadd.s32 4294967295, %s5152_s15   ;;  %s5234_s17 = sadd.s32 1, %s5152_s15   ;;  %s5152_s15 = sphi %s5219_s15, %s6380_s15   ;;  %s5148_s14 = sphi %s5217_s14, %s6379_s14   ;;  %s5144_s13 = sphi %s5215_s13, %s6378_s13  }
   0x4   : > { %s53_s18 = ssub.s32 %s5152_s15, %s5234_s17  ;;  %s56_s19 = sadd.s32 1, %s5148_s14 }
   0x5   : > { %p54_p0 = scmp.eq.s32.totalorder %s53_s18, 0  ;;  %p63_p1 = scmp.ne.s32.totalorder %s5148_s14, %s5144_s13 }
   0x6   : > { %p64_p2 = scmp.eq.s32.totalorder %s5152_s15, 0  ;;  %p3669_p4 = scmp.ge.s32.totalorder %s5152_s15, 4 }
   0x7   : > { %s5243_s20 = scalar_select %p54_p0, %s5148_s14, %s56_s19  }
   0x8   : > { %p65_p3 = por %p64_p2, %p63_p1  ;;  %296 = sbr.rel (%p3669_p4) target bundleno = 273 (0x111), region = 40 }
   0xd   : > { %307 = sbr.rel (!%p65_p3) target bundleno = 273 (0x111), region = 48  ;;  %s309_s21 = sand.u32 (%p65_p3), 1, %s5148_s14  }
   0xe   : > { %s4720_s22 = sshll.u32 (%p65_p3), %s5152_s15, 8  ;;  %s3670_s23 = sshll.u32 (%p65_p3), %s309_s21, 11 }
   0xf   : > { %s5251_s26 = scalar_lea.vmem (%p65_p3), %s6368_s1, %s4720_s22  ;;  %s5256_s27 = scalar_lea.vmem (%p65_p3), [#allocation3], %s3670_s23 }
  0x10   : > { %v327_v0 = vld [vmem:[%s5251_s26] sm:$0xff] (%p65_p3)  ;;  %v329_v1 = vld [vmem:[%s5251_s26 + $0x8] sm:$0xff] (%p65_p3)  ;;  %v331_v2 = vld [vmem:[%s5251_s26 + $0x10] sm:$0xff] (%p65_p3) }
  0x11   : > { %328 = vst [vmem:[%s5256_s27] sm:$0xff] (%p65_p3), %v327_v0  ;;  %v333_v3 = vld [vmem:[%s5251_s26 + $0x18] sm:$0xff] (%p65_p3)  ;;  %v335_v4 = vld [vmem:[%s5251_s26 + $0x20] sm:$0xff] (%p65_p3)  ;;  %v337_v5 = vld [vmem:[%s5251_s26 + $0x28] sm:$0xff] (%p65_p3) }
  0x12   : > { %330 = vst [vmem:[%s5256_s27 + $0x8] sm:$0xff] %v329_v1  ;;  %v339_v6 = vld [vmem:[%s5251_s26 + $0x30] sm:$0xff]  ;;  %v341_v7 = vld [vmem:[%s5251_s26 + $0x38] sm:$0xff]  ;;  %v343_v8 = vld [vmem:[%s5251_s26 + $0x40] sm:$0xff] }
  0x13   : > { %332 = vst [vmem:[%s5256_s27 + $0x10] sm:$0xff] %v331_v2  ;;  %v345_v9 = vld [vmem:[%s5251_s26 + $0x48] sm:$0xff]  ;;  %v347_v10 = vld [vmem:[%s5251_s26 + $0x50] sm:$0xff]  ;;  %v349_v11 = vld [vmem:[%s5251_s26 + $0x58] sm:$0xff] }
  0x14   : > { %334 = vst [vmem:[%s5256_s27 + $0x18] sm:$0xff] %v333_v3  ;;  %v351_v12 = vld [vmem:[%s5251_s26 + $0x60] sm:$0xff]  ;;  %v353_v13 = vld [vmem:[%s5251_s26 + $0x68] sm:$0xff]  ;;  %v355_v14 = vld [vmem:[%s5251_s26 + $0x70] sm:$0xff] }
  0x15   : > { %336 = vst [vmem:[%s5256_s27 + $0x20] sm:$0xff] %v335_v4  ;;  %v357_v15 = vld [vmem:[%s5251_s26 + $0x78] sm:$0xff]  ;;  %v359_v16 = vld [vmem:[%s5251_s26 + $0x80] sm:$0xff]  ;;  %v361_v17 = vld [vmem:[%s5251_s26 + $0x88] sm:$0xff] }
  0x16   : > { %338 = vst [vmem:[%s5256_s27 + $0x28] sm:$0xff] %v337_v5  ;;  %v363_v18 = vld [vmem:[%s5251_s26 + $0x90] sm:$0xff]  ;;  %v365_v19 = vld [vmem:[%s5251_s26 + $0x98] sm:$0xff]  ;;  %v367_v20 = vld [vmem:[%s5251_s26 + $0xa0] sm:$0xff] }
  0x17   : > { %340 = vst [vmem:[%s5256_s27 + $0x30] sm:$0xff] %v339_v6  ;;  %v369_v21 = vld [vmem:[%s5251_s26 + $0xa8] sm:$0xff]  ;;  %v371_v22 = vld [vmem:[%s5251_s26 + $0xb0] sm:$0xff]  ;;  %v373_v23 = vld [vmem:[%s5251_s26 + $0xb8] sm:$0xff] }
  0x18   : > { %342 = vst [vmem:[%s5256_s27 + $0x38] sm:$0xff] %v341_v7  ;;  %v375_v24 = vld [vmem:[%s5251_s26 + $0xc0] sm:$0xff]  ;;  %v377_v25 = vld [vmem:[%s5251_s26 + $0xc8] sm:$0xff]  ;;  %v379_v26 = vld [vmem:[%s5251_s26 + $0xd0] sm:$0xff] }
  0x19   : > { %344 = vst [vmem:[%s5256_s27 + $0x40] sm:$0xff] %v343_v8  ;;  %v381_v27 = vld [vmem:[%s5251_s26 + $0xd8] sm:$0xff]  ;;  %v383_v28 = vld [vmem:[%s5251_s26 + $0xe0] sm:$0xff]  ;;  %v385_v29 = vld [vmem:[%s5251_s26 + $0xe8] sm:$0xff] }
  0x1a   : > { %346 = vst [vmem:[%s5256_s27 + $0x48] sm:$0xff] %v345_v9  ;;  %v387_v30 = vld [vmem:[%s5251_s26 + $0xf0] sm:$0xff]  ;;  %v389_v31 = vld [vmem:[%s5251_s26 + $0xf8] sm:$0xff]  ;;  %v391_v32 = vld [vmem:[%s5251_s26 + $0x400] sm:$0xff] }
  0x1b   : > { %348 = vst [vmem:[%s5256_s27 + $0x50] sm:$0xff] %v347_v10  ;;  %v393_v33 = vld [vmem:[%s5251_s26 + $0x408] sm:$0xff]  ;;  %v395_v34 = vld [vmem:[%s5251_s26 + $0x410] sm:$0xff]  ;;  %v397_v35 = vld [vmem:[%s5251_s26 + $0x418] sm:$0xff] }
  0x1c   : > { %350 = vst [vmem:[%s5256_s27 + $0x58] sm:$0xff] %v349_v11  ;;  %v399_v36 = vld [vmem:[%s5251_s26 + $0x420] sm:$0xff]  ;;  %v401_v37 = vld [vmem:[%s5251_s26 + $0x428] sm:$0xff]  ;;  %v403_v38 = vld [vmem:[%s5251_s26 + $0x430] sm:$0xff] }
  0x1d   : > { %352 = vst [vmem:[%s5256_s27 + $0x60] sm:$0xff] %v351_v12  ;;  %v405_v39 = vld [vmem:[%s5251_s26 + $0x438] sm:$0xff]  ;;  %v407_v40 = vld [vmem:[%s5251_s26 + $0x440] sm:$0xff]  ;;  %v409_v41 = vld [vmem:[%s5251_s26 + $0x448] sm:$0xff] }
  0x1e   : > { %354 = vst [vmem:[%s5256_s27 + $0x68] sm:$0xff] %v353_v13  ;;  %v411_v42 = vld [vmem:[%s5251_s26 + $0x450] sm:$0xff]  ;;  %v413_v43 = vld [vmem:[%s5251_s26 + $0x458] sm:$0xff]  ;;  %v415_v44 = vld [vmem:[%s5251_s26 + $0x460] sm:$0xff] }
  0x1f   : > { %356 = vst [vmem:[%s5256_s27 + $0x70] sm:$0xff] %v355_v14  ;;  %v417_v45 = vld [vmem:[%s5251_s26 + $0x468] sm:$0xff]  ;;  %v419_v46 = vld [vmem:[%s5251_s26 + $0x470] sm:$0xff]  ;;  %v421_v47 = vld [vmem:[%s5251_s26 + $0x478] sm:$0xff] }
  0x20   : > { %358 = vst [vmem:[%s5256_s27 + $0x78] sm:$0xff] %v357_v15  ;;  %v423_v48 = vld [vmem:[%s5251_s26 + $0x480] sm:$0xff]  ;;  %v425_v49 = vld [vmem:[%s5251_s26 + $0x488] sm:$0xff]  ;;  %v427_v50 = vld [vmem:[%s5251_s26 + $0x490] sm:$0xff] }
  0x21   : > { %360 = vst [vmem:[%s5256_s27 + $0x80] sm:$0xff] %v359_v16  ;;  %v429_v51 = vld [vmem:[%s5251_s26 + $0x498] sm:$0xff]  ;;  %v431_v52 = vld [vmem:[%s5251_s26 + $0x4a0] sm:$0xff]  ;;  %v433_v53 = vld [vmem:[%s5251_s26 + $0x4a8] sm:$0xff] }
  0x22   : > { %362 = vst [vmem:[%s5256_s27 + $0x88] sm:$0xff] %v361_v17  ;;  %v435_v54 = vld [vmem:[%s5251_s26 + $0x4b0] sm:$0xff]  ;;  %v437_v55 = vld [vmem:[%s5251_s26 + $0x4b8] sm:$0xff]  ;;  %v439_v56 = vld [vmem:[%s5251_s26 + $0x4c0] sm:$0xff] }
  0x23   : > { %364 = vst [vmem:[%s5256_s27 + $0x90] sm:$0xff] %v363_v18  ;;  %v441_v57 = vld [vmem:[%s5251_s26 + $0x4c8] sm:$0xff]  ;;  %v443_v58 = vld [vmem:[%s5251_s26 + $0x4d0] sm:$0xff]  ;;  %v445_v59 = vld [vmem:[%s5251_s26 + $0x4d8] sm:$0xff] }
  0x24   : > { %366 = vst [vmem:[%s5256_s27 + $0x98] sm:$0xff] %v365_v19  ;;  %v447_v60 = vld [vmem:[%s5251_s26 + $0x4e0] sm:$0xff]  ;;  %v449_v61 = vld [vmem:[%s5251_s26 + $0x4e8] sm:$0xff]  ;;  %v451_v62 = vld [vmem:[%s5251_s26 + $0x4f0] sm:$0xff] }
  0x25   : > { %368 = vst [vmem:[%s5256_s27 + $0xa0] sm:$0xff] %v367_v20  ;;  %v453_v63 = vld [vmem:[%s5251_s26 + $0x4f8] sm:$0xff]  ;;  %v455_v0 = vld [vmem:[%s5251_s26 + $0x800] sm:$0xff]  ;;  %v457_v1 = vld [vmem:[%s5251_s26 + $0x808] sm:$0xff] }
  0x26   : > { %370 = vst [vmem:[%s5256_s27 + $0xa8] sm:$0xff] %v369_v21  ;;  %v459_v2 = vld [vmem:[%s5251_s26 + $0x810] sm:$0xff]  ;;  %v461_v3 = vld [vmem:[%s5251_s26 + $0x818] sm:$0xff]  ;;  %v463_v4 = vld [vmem:[%s5251_s26 + $0x820] sm:$0xff] }
  0x27   : > { %372 = vst [vmem:[%s5256_s27 + $0xb0] sm:$0xff] %v371_v22  ;;  %v465_v5 = vld [vmem:[%s5251_s26 + $0x828] sm:$0xff]  ;;  %v467_v6 = vld [vmem:[%s5251_s26 + $0x830] sm:$0xff]  ;;  %v469_v7 = vld [vmem:[%s5251_s26 + $0x838] sm:$0xff] }
  0x28   : > { %374 = vst [vmem:[%s5256_s27 + $0xb8] sm:$0xff] %v373_v23  ;;  %v471_v8 = vld [vmem:[%s5251_s26 + $0x840] sm:$0xff]  ;;  %v473_v9 = vld [vmem:[%s5251_s26 + $0x848] sm:$0xff]  ;;  %v475_v10 = vld [vmem:[%s5251_s26 + $0x850] sm:$0xff] }
  0x29   : > { %376 = vst [vmem:[%s5256_s27 + $0xc0] sm:$0xff] %v375_v24  ;;  %v477_v11 = vld [vmem:[%s5251_s26 + $0x858] sm:$0xff]  ;;  %v479_v12 = vld [vmem:[%s5251_s26 + $0x860] sm:$0xff]  ;;  %v481_v13 = vld [vmem:[%s5251_s26 + $0x868] sm:$0xff] }
  0x2a   : > { %378 = vst [vmem:[%s5256_s27 + $0xc8] sm:$0xff] %v377_v25  ;;  %v483_v14 = vld [vmem:[%s5251_s26 + $0x870] sm:$0xff]  ;;  %v485_v15 = vld [vmem:[%s5251_s26 + $0x878] sm:$0xff]  ;;  %v487_v16 = vld [vmem:[%s5251_s26 + $0x880] sm:$0xff] }
  0x2b   : > { %380 = vst [vmem:[%s5256_s27 + $0xd0] sm:$0xff] %v379_v26  ;;  %v489_v17 = vld [vmem:[%s5251_s26 + $0x888] sm:$0xff]  ;;  %v491_v18 = vld [vmem:[%s5251_s26 + $0x890] sm:$0xff]  ;;  %v493_v19 = vld [vmem:[%s5251_s26 + $0x898] sm:$0xff] }
  0x2c   : > { %382 = vst [vmem:[%s5256_s27 + $0xd8] sm:$0xff] %v381_v27  ;;  %v495_v20 = vld [vmem:[%s5251_s26 + $0x8a0] sm:$0xff]  ;;  %v497_v21 = vld [vmem:[%s5251_s26 + $0x8a8] sm:$0xff]  ;;  %v499_v22 = vld [vmem:[%s5251_s26 + $0x8b0] sm:$0xff] }
  0x2d   : > { %384 = vst [vmem:[%s5256_s27 + $0xe0] sm:$0xff] %v383_v28  ;;  %v501_v23 = vld [vmem:[%s5251_s26 + $0x8b8] sm:$0xff]  ;;  %v503_v24 = vld [vmem:[%s5251_s26 + $0x8c0] sm:$0xff]  ;;  %v505_v25 = vld [vmem:[%s5251_s26 + $0x8c8] sm:$0xff] }
  0x2e   : > { %386 = vst [vmem:[%s5256_s27 + $0xe8] sm:$0xff] %v385_v29  ;;  %v507_v26 = vld [vmem:[%s5251_s26 + $0x8d0] sm:$0xff]  ;;  %v509_v27 = vld [vmem:[%s5251_s26 + $0x8d8] sm:$0xff]  ;;  %v511_v28 = vld [vmem:[%s5251_s26 + $0x8e0] sm:$0xff] }
  0x2f   : > { %388 = vst [vmem:[%s5256_s27 + $0xf0] sm:$0xff] %v387_v30  ;;  %v513_v29 = vld [vmem:[%s5251_s26 + $0x8e8] sm:$0xff]  ;;  %v515_v30 = vld [vmem:[%s5251_s26 + $0x8f0] sm:$0xff] }
  0x30   : > { %390 = vst [vmem:[%s5256_s27 + $0xf8] sm:$0xff] %v389_v31  ;;  %v517_v31 = vld [vmem:[%s5251_s26 + $0x8f8] sm:$0xff] }
  0x31   : > { %392 = vst [vmem:[%s5256_s27 + $0x100] sm:$0xff] %v391_v32  ;;  %v519_v32 = vld [vmem:[%s5251_s26 + $0xc00] sm:$0xff] }
  0x32   : > { %394 = vst [vmem:[%s5256_s27 + $0x108] sm:$0xff] %v393_v33  ;;  %v521_v33 = vld [vmem:[%s5251_s26 + $0xc08] sm:$0xff] }
  0x33   : > { %396 = vst [vmem:[%s5256_s27 + $0x110] sm:$0xff] %v395_v34  ;;  %v523_v34 = vld [vmem:[%s5251_s26 + $0xc10] sm:$0xff] }
  0x34   : > { %398 = vst [vmem:[%s5256_s27 + $0x118] sm:$0xff] %v397_v35  ;;  %v525_v35 = vld [vmem:[%s5251_s26 + $0xc18] sm:$0xff] }
  0x35   : > { %400 = vst [vmem:[%s5256_s27 + $0x120] sm:$0xff] %v399_v36  ;;  %v527_v36 = vld [vmem:[%s5251_s26 + $0xc20] sm:$0xff] }
  0x36   : > { %402 = vst [vmem:[%s5256_s27 + $0x128] sm:$0xff] %v401_v37  ;;  %v529_v37 = vld [vmem:[%s5251_s26 + $0xc28] sm:$0xff] }
  0x37   : > { %404 = vst [vmem:[%s5256_s27 + $0x130] sm:$0xff] %v403_v38  ;;  %v531_v38 = vld [vmem:[%s5251_s26 + $0xc30] sm:$0xff] }
  0x38   : > { %406 = vst [vmem:[%s5256_s27 + $0x138] sm:$0xff] %v405_v39  ;;  %v533_v39 = vld [vmem:[%s5251_s26 + $0xc38] sm:$0xff] }
  0x39   : > { %408 = vst [vmem:[%s5256_s27 + $0x140] sm:$0xff] %v407_v40  ;;  %v535_v40 = vld [vmem:[%s5251_s26 + $0xc40] sm:$0xff] }
  0x3a   : > { %410 = vst [vmem:[%s5256_s27 + $0x148] sm:$0xff] %v409_v41  ;;  %v537_v41 = vld [vmem:[%s5251_s26 + $0xc48] sm:$0xff] }
  0x3b   : > { %412 = vst [vmem:[%s5256_s27 + $0x150] sm:$0xff] %v411_v42  ;;  %v539_v42 = vld [vmem:[%s5251_s26 + $0xc50] sm:$0xff] }
  0x3c   : > { %414 = vst [vmem:[%s5256_s27 + $0x158] sm:$0xff] %v413_v43  ;;  %v541_v43 = vld [vmem:[%s5251_s26 + $0xc58] sm:$0xff] }
  0x3d   : > { %416 = vst [vmem:[%s5256_s27 + $0x160] sm:$0xff] %v415_v44  ;;  %v543_v44 = vld [vmem:[%s5251_s26 + $0xc60] sm:$0xff] }
  0x3e   : > { %418 = vst [vmem:[%s5256_s27 + $0x168] sm:$0xff] %v417_v45  ;;  %v545_v45 = vld [vmem:[%s5251_s26 + $0xc68] sm:$0xff] }
  0x3f   : > { %420 = vst [vmem:[%s5256_s27 + $0x170] sm:$0xff] %v419_v46  ;;  %v547_v46 = vld [vmem:[%s5251_s26 + $0xc70] sm:$0xff] }
  0x40   : > { %422 = vst [vmem:[%s5256_s27 + $0x178] sm:$0xff] %v421_v47  ;;  %v549_v47 = vld [vmem:[%s5251_s26 + $0xc78] sm:$0xff] }
  0x41   : > { %424 = vst [vmem:[%s5256_s27 + $0x180] sm:$0xff] %v423_v48  ;;  %v551_v48 = vld [vmem:[%s5251_s26 + $0xc80] sm:$0xff] }
  0x42   : > { %426 = vst [vmem:[%s5256_s27 + $0x188] sm:$0xff] %v425_v49  ;;  %v553_v49 = vld [vmem:[%s5251_s26 + $0xc88] sm:$0xff] }
  0x43   : > { %428 = vst [vmem:[%s5256_s27 + $0x190] sm:$0xff] %v427_v50  ;;  %v555_v50 = vld [vmem:[%s5251_s26 + $0xc90] sm:$0xff] }
  0x44   : > { %430 = vst [vmem:[%s5256_s27 + $0x198] sm:$0xff] %v429_v51  ;;  %v557_v51 = vld [vmem:[%s5251_s26 + $0xc98] sm:$0xff] }
  0x45   : > { %432 = vst [vmem:[%s5256_s27 + $0x1a0] sm:$0xff] %v431_v52  ;;  %v559_v52 = vld [vmem:[%s5251_s26 + $0xca0] sm:$0xff] }
  0x46   : > { %434 = vst [vmem:[%s5256_s27 + $0x1a8] sm:$0xff] %v433_v53  ;;  %v561_v53 = vld [vmem:[%s5251_s26 + $0xca8] sm:$0xff] }
  0x47   : > { %436 = vst [vmem:[%s5256_s27 + $0x1b0] sm:$0xff] %v435_v54  ;;  %v563_v54 = vld [vmem:[%s5251_s26 + $0xcb0] sm:$0xff] }
  0x48   : > { %438 = vst [vmem:[%s5256_s27 + $0x1b8] sm:$0xff] %v437_v55  ;;  %v565_v55 = vld [vmem:[%s5251_s26 + $0xcb8] sm:$0xff] }
  0x49   : > { %440 = vst [vmem:[%s5256_s27 + $0x1c0] sm:$0xff] %v439_v56  ;;  %v567_v56 = vld [vmem:[%s5251_s26 + $0xcc0] sm:$0xff] }
  0x4a   : > { %442 = vst [vmem:[%s5256_s27 + $0x1c8] sm:$0xff] %v441_v57  ;;  %v569_v57 = vld [vmem:[%s5251_s26 + $0xcc8] sm:$0xff] }
  0x4b   : > { %444 = vst [vmem:[%s5256_s27 + $0x1d0] sm:$0xff] %v443_v58  ;;  %v571_v58 = vld [vmem:[%s5251_s26 + $0xcd0] sm:$0xff] }
  0x4c   : > { %446 = vst [vmem:[%s5256_s27 + $0x1d8] sm:$0xff] %v445_v59  ;;  %v573_v59 = vld [vmem:[%s5251_s26 + $0xcd8] sm:$0xff] }
  0x4d   : > { %448 = vst [vmem:[%s5256_s27 + $0x1e0] sm:$0xff] %v447_v60  ;;  %v575_v60 = vld [vmem:[%s5251_s26 + $0xce0] sm:$0xff] }
  0x4e   : > { %450 = vst [vmem:[%s5256_s27 + $0x1e8] sm:$0xff] %v449_v61  ;;  %v577_v61 = vld [vmem:[%s5251_s26 + $0xce8] sm:$0xff] }
  0x4f   : > { %452 = vst [vmem:[%s5256_s27 + $0x1f0] sm:$0xff] %v451_v62  ;;  %v579_v62 = vld [vmem:[%s5251_s26 + $0xcf0] sm:$0xff] }
  0x50   : > { %454 = vst [vmem:[%s5256_s27 + $0x1f8] sm:$0xff] %v453_v63  ;;  %v581_v63 = vld [vmem:[%s5251_s26 + $0xcf8] sm:$0xff] }
  0x51   : > { %456 = vst [vmem:[%s5256_s27 + $0x200] sm:$0xff] %v455_v0  ;;  %v583_v0 = vld [vmem:[%s5251_s26 + $0x1000] sm:$0xff] }
  0x52   : > { %458 = vst [vmem:[%s5256_s27 + $0x208] sm:$0xff] %v457_v1  ;;  %v585_v1 = vld [vmem:[%s5251_s26 + $0x1008] sm:$0xff] }
  0x53   : > { %460 = vst [vmem:[%s5256_s27 + $0x210] sm:$0xff] %v459_v2  ;;  %v587_v2 = vld [vmem:[%s5251_s26 + $0x1010] sm:$0xff] }
  0x54   : > { %462 = vst [vmem:[%s5256_s27 + $0x218] sm:$0xff] %v461_v3  ;;  %v589_v3 = vld [vmem:[%s5251_s26 + $0x1018] sm:$0xff] }
  0x55   : > { %464 = vst [vmem:[%s5256_s27 + $0x220] sm:$0xff] %v463_v4  ;;  %v591_v4 = vld [vmem:[%s5251_s26 + $0x1020] sm:$0xff] }
  0x56   : > { %466 = vst [vmem:[%s5256_s27 + $0x228] sm:$0xff] %v465_v5  ;;  %v593_v5 = vld [vmem:[%s5251_s26 + $0x1028] sm:$0xff] }
  0x57   : > { %468 = vst [vmem:[%s5256_s27 + $0x230] sm:$0xff] %v467_v6  ;;  %v595_v6 = vld [vmem:[%s5251_s26 + $0x1030] sm:$0xff] }
  0x58   : > { %470 = vst [vmem:[%s5256_s27 + $0x238] sm:$0xff] %v469_v7  ;;  %v597_v7 = vld [vmem:[%s5251_s26 + $0x1038] sm:$0xff] }
  0x59   : > { %472 = vst [vmem:[%s5256_s27 + $0x240] sm:$0xff] %v471_v8  ;;  %v599_v8 = vld [vmem:[%s5251_s26 + $0x1040] sm:$0xff] }
  0x5a   : > { %474 = vst [vmem:[%s5256_s27 + $0x248] sm:$0xff] %v473_v9  ;;  %v601_v9 = vld [vmem:[%s5251_s26 + $0x1048] sm:$0xff] }
  0x5b   : > { %476 = vst [vmem:[%s5256_s27 + $0x250] sm:$0xff] %v475_v10  ;;  %v603_v10 = vld [vmem:[%s5251_s26 + $0x1050] sm:$0xff] }
  0x5c   : > { %478 = vst [vmem:[%s5256_s27 + $0x258] sm:$0xff] %v477_v11  ;;  %v605_v11 = vld [vmem:[%s5251_s26 + $0x1058] sm:$0xff] }
  0x5d   : > { %480 = vst [vmem:[%s5256_s27 + $0x260] sm:$0xff] %v479_v12  ;;  %v607_v12 = vld [vmem:[%s5251_s26 + $0x1060] sm:$0xff] }
  0x5e   : > { %482 = vst [vmem:[%s5256_s27 + $0x268] sm:$0xff] %v481_v13  ;;  %v609_v13 = vld [vmem:[%s5251_s26 + $0x1068] sm:$0xff] }
  0x5f   : > { %484 = vst [vmem:[%s5256_s27 + $0x270] sm:$0xff] %v483_v14  ;;  %v611_v14 = vld [vmem:[%s5251_s26 + $0x1070] sm:$0xff] }
  0x60   : > { %486 = vst [vmem:[%s5256_s27 + $0x278] sm:$0xff] %v485_v15  ;;  %v613_v15 = vld [vmem:[%s5251_s26 + $0x1078] sm:$0xff] }
  0x61   : > { %488 = vst [vmem:[%s5256_s27 + $0x280] sm:$0xff] %v487_v16  ;;  %v615_v16 = vld [vmem:[%s5251_s26 + $0x1080] sm:$0xff] }
  0x62   : > { %490 = vst [vmem:[%s5256_s27 + $0x288] sm:$0xff] %v489_v17  ;;  %v617_v17 = vld [vmem:[%s5251_s26 + $0x1088] sm:$0xff] }
  0x63   : > { %492 = vst [vmem:[%s5256_s27 + $0x290] sm:$0xff] %v491_v18  ;;  %v619_v18 = vld [vmem:[%s5251_s26 + $0x1090] sm:$0xff] }
  0x64   : > { %494 = vst [vmem:[%s5256_s27 + $0x298] sm:$0xff] %v493_v19  ;;  %v621_v19 = vld [vmem:[%s5251_s26 + $0x1098] sm:$0xff] }
  0x65   : > { %496 = vst [vmem:[%s5256_s27 + $0x2a0] sm:$0xff] %v495_v20  ;;  %v623_v20 = vld [vmem:[%s5251_s26 + $0x10a0] sm:$0xff] }
  0x66   : > { %498 = vst [vmem:[%s5256_s27 + $0x2a8] sm:$0xff] %v497_v21  ;;  %v625_v21 = vld [vmem:[%s5251_s26 + $0x10a8] sm:$0xff] }
  0x67   : > { %500 = vst [vmem:[%s5256_s27 + $0x2b0] sm:$0xff] %v499_v22  ;;  %v627_v22 = vld [vmem:[%s5251_s26 + $0x10b0] sm:$0xff] }
  0x68   : > { %502 = vst [vmem:[%s5256_s27 + $0x2b8] sm:$0xff] %v501_v23  ;;  %v629_v23 = vld [vmem:[%s5251_s26 + $0x10b8] sm:$0xff] }
  0x69   : > { %504 = vst [vmem:[%s5256_s27 + $0x2c0] sm:$0xff] %v503_v24  ;;  %v631_v24 = vld [vmem:[%s5251_s26 + $0x10c0] sm:$0xff] }
  0x6a   : > { %506 = vst [vmem:[%s5256_s27 + $0x2c8] sm:$0xff] %v505_v25  ;;  %v633_v25 = vld [vmem:[%s5251_s26 + $0x10c8] sm:$0xff] }
  0x6b   : > { %508 = vst [vmem:[%s5256_s27 + $0x2d0] sm:$0xff] %v507_v26  ;;  %v635_v26 = vld [vmem:[%s5251_s26 + $0x10d0] sm:$0xff] }
  0x6c   : > { %510 = vst [vmem:[%s5256_s27 + $0x2d8] sm:$0xff] %v509_v27  ;;  %v637_v27 = vld [vmem:[%s5251_s26 + $0x10d8] sm:$0xff] }
  0x6d   : > { %512 = vst [vmem:[%s5256_s27 + $0x2e0] sm:$0xff] %v511_v28  ;;  %v639_v28 = vld [vmem:[%s5251_s26 + $0x10e0] sm:$0xff] }
  0x6e   : > { %514 = vst [vmem:[%s5256_s27 + $0x2e8] sm:$0xff] %v513_v29  ;;  %v641_v29 = vld [vmem:[%s5251_s26 + $0x10e8] sm:$0xff] }
  0x6f   : > { %516 = vst [vmem:[%s5256_s27 + $0x2f0] sm:$0xff] %v515_v30  ;;  %v643_v30 = vld [vmem:[%s5251_s26 + $0x10f0] sm:$0xff] }
  0x70   : > { %518 = vst [vmem:[%s5256_s27 + $0x2f8] sm:$0xff] %v517_v31  ;;  %v645_v31 = vld [vmem:[%s5251_s26 + $0x10f8] sm:$0xff] }
  0x71   : > { %520 = vst [vmem:[%s5256_s27 + $0x300] sm:$0xff] %v519_v32  ;;  %v647_v32 = vld [vmem:[%s5251_s26 + $0x1400] sm:$0xff] }
  0x72   : > { %522 = vst [vmem:[%s5256_s27 + $0x308] sm:$0xff] %v521_v33  ;;  %v649_v33 = vld [vmem:[%s5251_s26 + $0x1408] sm:$0xff] }
  0x73   : > { %524 = vst [vmem:[%s5256_s27 + $0x310] sm:$0xff] %v523_v34  ;;  %v651_v34 = vld [vmem:[%s5251_s26 + $0x1410] sm:$0xff] }
  0x74   : > { %526 = vst [vmem:[%s5256_s27 + $0x318] sm:$0xff] %v525_v35  ;;  %v653_v35 = vld [vmem:[%s5251_s26 + $0x1418] sm:$0xff] }
  0x75   : > { %528 = vst [vmem:[%s5256_s27 + $0x320] sm:$0xff] %v527_v36  ;;  %v655_v36 = vld [vmem:[%s5251_s26 + $0x1420] sm:$0xff] }
  0x76   : > { %530 = vst [vmem:[%s5256_s27 + $0x328] sm:$0xff] %v529_v37  ;;  %v657_v37 = vld [vmem:[%s5251_s26 + $0x1428] sm:$0xff] }
  0x77   : > { %532 = vst [vmem:[%s5256_s27 + $0x330] sm:$0xff] %v531_v38  ;;  %v659_v38 = vld [vmem:[%s5251_s26 + $0x1430] sm:$0xff] }
  0x78   : > { %534 = vst [vmem:[%s5256_s27 + $0x338] sm:$0xff] %v533_v39  ;;  %v661_v39 = vld [vmem:[%s5251_s26 + $0x1438] sm:$0xff] }
  0x79   : > { %536 = vst [vmem:[%s5256_s27 + $0x340] sm:$0xff] %v535_v40  ;;  %v663_v40 = vld [vmem:[%s5251_s26 + $0x1440] sm:$0xff] }
  0x7a   : > { %538 = vst [vmem:[%s5256_s27 + $0x348] sm:$0xff] %v537_v41  ;;  %v665_v41 = vld [vmem:[%s5251_s26 + $0x1448] sm:$0xff] }
  0x7b   : > { %540 = vst [vmem:[%s5256_s27 + $0x350] sm:$0xff] %v539_v42  ;;  %v667_v42 = vld [vmem:[%s5251_s26 + $0x1450] sm:$0xff] }
  0x7c   : > { %542 = vst [vmem:[%s5256_s27 + $0x358] sm:$0xff] %v541_v43  ;;  %v669_v43 = vld [vmem:[%s5251_s26 + $0x1458] sm:$0xff] }
  0x7d   : > { %544 = vst [vmem:[%s5256_s27 + $0x360] sm:$0xff] %v543_v44  ;;  %v671_v44 = vld [vmem:[%s5251_s26 + $0x1460] sm:$0xff] }
  0x7e   : > { %546 = vst [vmem:[%s5256_s27 + $0x368] sm:$0xff] %v545_v45  ;;  %v673_v45 = vld [vmem:[%s5251_s26 + $0x1468] sm:$0xff] }
  0x7f   : > { %548 = vst [vmem:[%s5256_s27 + $0x370] sm:$0xff] %v547_v46  ;;  %v675_v46 = vld [vmem:[%s5251_s26 + $0x1470] sm:$0xff] }
  0x80   : > { %550 = vst [vmem:[%s5256_s27 + $0x378] sm:$0xff] %v549_v47  ;;  %v677_v47 = vld [vmem:[%s5251_s26 + $0x1478] sm:$0xff] }
  0x81   : > { %552 = vst [vmem:[%s5256_s27 + $0x380] sm:$0xff] %v551_v48  ;;  %v679_v48 = vld [vmem:[%s5251_s26 + $0x1480] sm:$0xff] }
  0x82   : > { %554 = vst [vmem:[%s5256_s27 + $0x388] sm:$0xff] %v553_v49  ;;  %v681_v49 = vld [vmem:[%s5251_s26 + $0x1488] sm:$0xff] }
  0x83   : > { %556 = vst [vmem:[%s5256_s27 + $0x390] sm:$0xff] %v555_v50  ;;  %v683_v50 = vld [vmem:[%s5251_s26 + $0x1490] sm:$0xff] }
  0x84   : > { %558 = vst [vmem:[%s5256_s27 + $0x398] sm:$0xff] %v557_v51  ;;  %v685_v51 = vld [vmem:[%s5251_s26 + $0x1498] sm:$0xff] }
  0x85   : > { %560 = vst [vmem:[%s5256_s27 + $0x3a0] sm:$0xff] %v559_v52  ;;  %v687_v52 = vld [vmem:[%s5251_s26 + $0x14a0] sm:$0xff] }
  0x86   : > { %562 = vst [vmem:[%s5256_s27 + $0x3a8] sm:$0xff] %v561_v53  ;;  %v689_v53 = vld [vmem:[%s5251_s26 + $0x14a8] sm:$0xff] }
  0x87   : > { %564 = vst [vmem:[%s5256_s27 + $0x3b0] sm:$0xff] %v563_v54  ;;  %v691_v54 = vld [vmem:[%s5251_s26 + $0x14b0] sm:$0xff] }
  0x88   : > { %566 = vst [vmem:[%s5256_s27 + $0x3b8] sm:$0xff] %v565_v55  ;;  %v693_v55 = vld [vmem:[%s5251_s26 + $0x14b8] sm:$0xff] }
  0x89   : > { %568 = vst [vmem:[%s5256_s27 + $0x3c0] sm:$0xff] %v567_v56  ;;  %v695_v56 = vld [vmem:[%s5251_s26 + $0x14c0] sm:$0xff] }
  0x8a   : > { %570 = vst [vmem:[%s5256_s27 + $0x3c8] sm:$0xff] %v569_v57  ;;  %v697_v57 = vld [vmem:[%s5251_s26 + $0x14c8] sm:$0xff] }
  0x8b   : > { %572 = vst [vmem:[%s5256_s27 + $0x3d0] sm:$0xff] %v571_v58  ;;  %v699_v58 = vld [vmem:[%s5251_s26 + $0x14d0] sm:$0xff] }
  0x8c   : > { %574 = vst [vmem:[%s5256_s27 + $0x3d8] sm:$0xff] %v573_v59  ;;  %v701_v59 = vld [vmem:[%s5251_s26 + $0x14d8] sm:$0xff] }
  0x8d   : > { %576 = vst [vmem:[%s5256_s27 + $0x3e0] sm:$0xff] %v575_v60  ;;  %v703_v60 = vld [vmem:[%s5251_s26 + $0x14e0] sm:$0xff] }
  0x8e   : > { %578 = vst [vmem:[%s5256_s27 + $0x3e8] sm:$0xff] %v577_v61  ;;  %v705_v61 = vld [vmem:[%s5251_s26 + $0x14e8] sm:$0xff] }
  0x8f   : > { %580 = vst [vmem:[%s5256_s27 + $0x3f0] sm:$0xff] %v579_v62  ;;  %v707_v62 = vld [vmem:[%s5251_s26 + $0x14f0] sm:$0xff] }
  0x90   : > { %582 = vst [vmem:[%s5256_s27 + $0x3f8] sm:$0xff] %v581_v63  ;;  %v709_v63 = vld [vmem:[%s5251_s26 + $0x14f8] sm:$0xff] }
  0x91   : > { %584 = vst [vmem:[%s5256_s27 + $0x400] sm:$0xff] %v583_v0  ;;  %v711_v0 = vld [vmem:[%s5251_s26 + $0x1800] sm:$0xff] }
  0x92   : > { %586 = vst [vmem:[%s5256_s27 + $0x408] sm:$0xff] %v585_v1  ;;  %v713_v1 = vld [vmem:[%s5251_s26 + $0x1808] sm:$0xff] }
  0x93   : > { %588 = vst [vmem:[%s5256_s27 + $0x410] sm:$0xff] %v587_v2  ;;  %v715_v2 = vld [vmem:[%s5251_s26 + $0x1810] sm:$0xff] }
  0x94   : > { %590 = vst [vmem:[%s5256_s27 + $0x418] sm:$0xff] %v589_v3  ;;  %v717_v3 = vld [vmem:[%s5251_s26 + $0x1818] sm:$0xff] }
  0x95   : > { %592 = vst [vmem:[%s5256_s27 + $0x420] sm:$0xff] %v591_v4  ;;  %v719_v4 = vld [vmem:[%s5251_s26 + $0x1820] sm:$0xff] }
  0x96   : > { %594 = vst [vmem:[%s5256_s27 + $0x428] sm:$0xff] %v593_v5  ;;  %v721_v5 = vld [vmem:[%s5251_s26 + $0x1828] sm:$0xff] }
  0x97   : > { %596 = vst [vmem:[%s5256_s27 + $0x430] sm:$0xff] %v595_v6  ;;  %v723_v6 = vld [vmem:[%s5251_s26 + $0x1830] sm:$0xff] }
  0x98   : > { %598 = vst [vmem:[%s5256_s27 + $0x438] sm:$0xff] %v597_v7  ;;  %v725_v7 = vld [vmem:[%s5251_s26 + $0x1838] sm:$0xff] }
  0x99   : > { %600 = vst [vmem:[%s5256_s27 + $0x440] sm:$0xff] %v599_v8  ;;  %v727_v8 = vld [vmem:[%s5251_s26 + $0x1840] sm:$0xff] }
  0x9a   : > { %602 = vst [vmem:[%s5256_s27 + $0x448] sm:$0xff] %v601_v9  ;;  %v729_v9 = vld [vmem:[%s5251_s26 + $0x1848] sm:$0xff] }
  0x9b   : > { %604 = vst [vmem:[%s5256_s27 + $0x450] sm:$0xff] %v603_v10  ;;  %v731_v10 = vld [vmem:[%s5251_s26 + $0x1850] sm:$0xff] }
  0x9c   : > { %606 = vst [vmem:[%s5256_s27 + $0x458] sm:$0xff] %v605_v11  ;;  %v733_v11 = vld [vmem:[%s5251_s26 + $0x1858] sm:$0xff] }
  0x9d   : > { %608 = vst [vmem:[%s5256_s27 + $0x460] sm:$0xff] %v607_v12  ;;  %v735_v12 = vld [vmem:[%s5251_s26 + $0x1860] sm:$0xff] }
  0x9e   : > { %610 = vst [vmem:[%s5256_s27 + $0x468] sm:$0xff] %v609_v13  ;;  %v737_v13 = vld [vmem:[%s5251_s26 + $0x1868] sm:$0xff] }
  0x9f   : > { %612 = vst [vmem:[%s5256_s27 + $0x470] sm:$0xff] %v611_v14  ;;  %v739_v14 = vld [vmem:[%s5251_s26 + $0x1870] sm:$0xff] }
  0xa0   : > { %614 = vst [vmem:[%s5256_s27 + $0x478] sm:$0xff] %v613_v15  ;;  %v741_v15 = vld [vmem:[%s5251_s26 + $0x1878] sm:$0xff] }
  0xa1   : > { %616 = vst [vmem:[%s5256_s27 + $0x480] sm:$0xff] %v615_v16  ;;  %v743_v16 = vld [vmem:[%s5251_s26 + $0x1880] sm:$0xff] }
  0xa2   : > { %618 = vst [vmem:[%s5256_s27 + $0x488] sm:$0xff] %v617_v17  ;;  %v745_v17 = vld [vmem:[%s5251_s26 + $0x1888] sm:$0xff] }
  0xa3   : > { %620 = vst [vmem:[%s5256_s27 + $0x490] sm:$0xff] %v619_v18  ;;  %v747_v18 = vld [vmem:[%s5251_s26 + $0x1890] sm:$0xff] }
  0xa4   : > { %622 = vst [vmem:[%s5256_s27 + $0x498] sm:$0xff] %v621_v19  ;;  %v749_v19 = vld [vmem:[%s5251_s26 + $0x1898] sm:$0xff] }
  0xa5   : > { %624 = vst [vmem:[%s5256_s27 + $0x4a0] sm:$0xff] %v623_v20  ;;  %v751_v20 = vld [vmem:[%s5251_s26 + $0x18a0] sm:$0xff] }
  0xa6   : > { %626 = vst [vmem:[%s5256_s27 + $0x4a8] sm:$0xff] %v625_v21  ;;  %v753_v21 = vld [vmem:[%s5251_s26 + $0x18a8] sm:$0xff] }
  0xa7   : > { %628 = vst [vmem:[%s5256_s27 + $0x4b0] sm:$0xff] %v627_v22  ;;  %v755_v22 = vld [vmem:[%s5251_s26 + $0x18b0] sm:$0xff] }
  0xa8   : > { %630 = vst [vmem:[%s5256_s27 + $0x4b8] sm:$0xff] %v629_v23  ;;  %v757_v23 = vld [vmem:[%s5251_s26 + $0x18b8] sm:$0xff] }
  0xa9   : > { %632 = vst [vmem:[%s5256_s27 + $0x4c0] sm:$0xff] %v631_v24  ;;  %v759_v24 = vld [vmem:[%s5251_s26 + $0x18c0] sm:$0xff] }
  0xaa   : > { %634 = vst [vmem:[%s5256_s27 + $0x4c8] sm:$0xff] %v633_v25  ;;  %v761_v25 = vld [vmem:[%s5251_s26 + $0x18c8] sm:$0xff] }
  0xab   : > { %636 = vst [vmem:[%s5256_s27 + $0x4d0] sm:$0xff] %v635_v26  ;;  %v763_v26 = vld [vmem:[%s5251_s26 + $0x18d0] sm:$0xff] }
  0xac   : > { %638 = vst [vmem:[%s5256_s27 + $0x4d8] sm:$0xff] %v637_v27  ;;  %v765_v27 = vld [vmem:[%s5251_s26 + $0x18d8] sm:$0xff] }
  0xad   : > { %640 = vst [vmem:[%s5256_s27 + $0x4e0] sm:$0xff] %v639_v28  ;;  %v767_v28 = vld [vmem:[%s5251_s26 + $0x18e0] sm:$0xff] }
  0xae   : > { %642 = vst [vmem:[%s5256_s27 + $0x4e8] sm:$0xff] %v641_v29  ;;  %v769_v29 = vld [vmem:[%s5251_s26 + $0x18e8] sm:$0xff] }
  0xaf   : > { %644 = vst [vmem:[%s5256_s27 + $0x4f0] sm:$0xff] %v643_v30  ;;  %v771_v30 = vld [vmem:[%s5251_s26 + $0x18f0] sm:$0xff] }
  0xb0   : > { %646 = vst [vmem:[%s5256_s27 + $0x4f8] sm:$0xff] %v645_v31  ;;  %v773_v31 = vld [vmem:[%s5251_s26 + $0x18f8] sm:$0xff] }
  0xb1   : > { %648 = vst [vmem:[%s5256_s27 + $0x500] sm:$0xff] %v647_v32  ;;  %v775_v32 = vld [vmem:[%s5251_s26 + $0x1c00] sm:$0xff] }
  0xb2   : > { %650 = vst [vmem:[%s5256_s27 + $0x508] sm:$0xff] %v649_v33  ;;  %v777_v33 = vld [vmem:[%s5251_s26 + $0x1c08] sm:$0xff] }
  0xb3   : > { %652 = vst [vmem:[%s5256_s27 + $0x510] sm:$0xff] %v651_v34  ;;  %v779_v34 = vld [vmem:[%s5251_s26 + $0x1c10] sm:$0xff] }
  0xb4   : > { %654 = vst [vmem:[%s5256_s27 + $0x518] sm:$0xff] %v653_v35  ;;  %v781_v35 = vld [vmem:[%s5251_s26 + $0x1c18] sm:$0xff] }
  0xb5   : > { %656 = vst [vmem:[%s5256_s27 + $0x520] sm:$0xff] %v655_v36  ;;  %v783_v36 = vld [vmem:[%s5251_s26 + $0x1c20] sm:$0xff] }
  0xb6   : > { %658 = vst [vmem:[%s5256_s27 + $0x528] sm:$0xff] %v657_v37  ;;  %v785_v37 = vld [vmem:[%s5251_s26 + $0x1c28] sm:$0xff] }
  0xb7   : > { %660 = vst [vmem:[%s5256_s27 + $0x530] sm:$0xff] %v659_v38  ;;  %v787_v38 = vld [vmem:[%s5251_s26 + $0x1c30] sm:$0xff] }
  0xb8   : > { %662 = vst [vmem:[%s5256_s27 + $0x538] sm:$0xff] %v661_v39  ;;  %v789_v39 = vld [vmem:[%s5251_s26 + $0x1c38] sm:$0xff] }
  0xb9   : > { %664 = vst [vmem:[%s5256_s27 + $0x540] sm:$0xff] %v663_v40  ;;  %v791_v40 = vld [vmem:[%s5251_s26 + $0x1c40] sm:$0xff] }
  0xba   : > { %666 = vst [vmem:[%s5256_s27 + $0x548] sm:$0xff] %v665_v41  ;;  %v793_v41 = vld [vmem:[%s5251_s26 + $0x1c48] sm:$0xff] }
  0xbb   : > { %668 = vst [vmem:[%s5256_s27 + $0x550] sm:$0xff] %v667_v42  ;;  %v795_v42 = vld [vmem:[%s5251_s26 + $0x1c50] sm:$0xff] }
  0xbc   : > { %670 = vst [vmem:[%s5256_s27 + $0x558] sm:$0xff] %v669_v43  ;;  %v797_v43 = vld [vmem:[%s5251_s26 + $0x1c58] sm:$0xff] }
  0xbd   : > { %672 = vst [vmem:[%s5256_s27 + $0x560] sm:$0xff] %v671_v44  ;;  %v799_v44 = vld [vmem:[%s5251_s26 + $0x1c60] sm:$0xff] }
  0xbe   : > { %674 = vst [vmem:[%s5256_s27 + $0x568] sm:$0xff] %v673_v45  ;;  %v801_v45 = vld [vmem:[%s5251_s26 + $0x1c68] sm:$0xff] }
  0xbf   : > { %676 = vst [vmem:[%s5256_s27 + $0x570] sm:$0xff] %v675_v46  ;;  %v803_v46 = vld [vmem:[%s5251_s26 + $0x1c70] sm:$0xff] }
  0xc0   : > { %678 = vst [vmem:[%s5256_s27 + $0x578] sm:$0xff] %v677_v47  ;;  %v805_v47 = vld [vmem:[%s5251_s26 + $0x1c78] sm:$0xff] }
  0xc1   : > { %680 = vst [vmem:[%s5256_s27 + $0x580] sm:$0xff] %v679_v48  ;;  %v807_v48 = vld [vmem:[%s5251_s26 + $0x1c80] sm:$0xff] }
  0xc2   : > { %682 = vst [vmem:[%s5256_s27 + $0x588] sm:$0xff] %v681_v49  ;;  %v809_v49 = vld [vmem:[%s5251_s26 + $0x1c88] sm:$0xff] }
  0xc3   : > { %684 = vst [vmem:[%s5256_s27 + $0x590] sm:$0xff] %v683_v50  ;;  %v811_v50 = vld [vmem:[%s5251_s26 + $0x1c90] sm:$0xff] }
  0xc4   : > { %686 = vst [vmem:[%s5256_s27 + $0x598] sm:$0xff] %v685_v51  ;;  %v813_v51 = vld [vmem:[%s5251_s26 + $0x1c98] sm:$0xff] }
  0xc5   : > { %688 = vst [vmem:[%s5256_s27 + $0x5a0] sm:$0xff] %v687_v52  ;;  %v815_v52 = vld [vmem:[%s5251_s26 + $0x1ca0] sm:$0xff] }
  0xc6   : > { %690 = vst [vmem:[%s5256_s27 + $0x5a8] sm:$0xff] %v689_v53  ;;  %v817_v53 = vld [vmem:[%s5251_s26 + $0x1ca8] sm:$0xff] }
  0xc7   : > { %692 = vst [vmem:[%s5256_s27 + $0x5b0] sm:$0xff] %v691_v54  ;;  %v819_v54 = vld [vmem:[%s5251_s26 + $0x1cb0] sm:$0xff] }
  0xc8   : > { %694 = vst [vmem:[%s5256_s27 + $0x5b8] sm:$0xff] %v693_v55  ;;  %v821_v55 = vld [vmem:[%s5251_s26 + $0x1cb8] sm:$0xff] }
  0xc9   : > { %696 = vst [vmem:[%s5256_s27 + $0x5c0] sm:$0xff] %v695_v56  ;;  %v823_v56 = vld [vmem:[%s5251_s26 + $0x1cc0] sm:$0xff] }
  0xca   : > { %698 = vst [vmem:[%s5256_s27 + $0x5c8] sm:$0xff] %v697_v57  ;;  %v825_v57 = vld [vmem:[%s5251_s26 + $0x1cc8] sm:$0xff] }
  0xcb   : > { %700 = vst [vmem:[%s5256_s27 + $0x5d0] sm:$0xff] %v699_v58  ;;  %v827_v58 = vld [vmem:[%s5251_s26 + $0x1cd0] sm:$0xff] }
  0xcc   : > { %702 = vst [vmem:[%s5256_s27 + $0x5d8] sm:$0xff] %v701_v59  ;;  %v829_v59 = vld [vmem:[%s5251_s26 + $0x1cd8] sm:$0xff] }
  0xcd   : > { %704 = vst [vmem:[%s5256_s27 + $0x5e0] sm:$0xff] %v703_v60  ;;  %v831_v60 = vld [vmem:[%s5251_s26 + $0x1ce0] sm:$0xff] }
  0xce   : > { %706 = vst [vmem:[%s5256_s27 + $0x5e8] sm:$0xff] %v705_v61  ;;  %v833_v61 = vld [vmem:[%s5251_s26 + $0x1ce8] sm:$0xff] }
  0xcf   : > { %708 = vst [vmem:[%s5256_s27 + $0x5f0] sm:$0xff] %v707_v62  ;;  %v835_v62 = vld [vmem:[%s5251_s26 + $0x1cf0] sm:$0xff] }
  0xd0   : > { %710 = vst [vmem:[%s5256_s27 + $0x5f8] sm:$0xff] %v709_v63  ;;  %v837_v63 = vld [vmem:[%s5251_s26 + $0x1cf8] sm:$0xff] }
  0xd1   : > { %712 = vst [vmem:[%s5256_s27 + $0x600] sm:$0xff] %v711_v0 }
  0xd2   : > { %714 = vst [vmem:[%s5256_s27 + $0x608] sm:$0xff] %v713_v1 }
  0xd3   : > { %716 = vst [vmem:[%s5256_s27 + $0x610] sm:$0xff] %v715_v2 }
  0xd4   : > { %718 = vst [vmem:[%s5256_s27 + $0x618] sm:$0xff] %v717_v3 }
  0xd5   : > { %720 = vst [vmem:[%s5256_s27 + $0x620] sm:$0xff] %v719_v4 }
  0xd6   : > { %722 = vst [vmem:[%s5256_s27 + $0x628] sm:$0xff] %v721_v5 }
  0xd7   : > { %724 = vst [vmem:[%s5256_s27 + $0x630] sm:$0xff] %v723_v6 }
  0xd8   : > { %726 = vst [vmem:[%s5256_s27 + $0x638] sm:$0xff] %v725_v7 }
  0xd9   : > { %728 = vst [vmem:[%s5256_s27 + $0x640] sm:$0xff] %v727_v8 }
  0xda   : > { %730 = vst [vmem:[%s5256_s27 + $0x648] sm:$0xff] %v729_v9 }
  0xdb   : > { %732 = vst [vmem:[%s5256_s27 + $0x650] sm:$0xff] %v731_v10 }
  0xdc   : > { %734 = vst [vmem:[%s5256_s27 + $0x658] sm:$0xff] %v733_v11 }
  0xdd   : > { %736 = vst [vmem:[%s5256_s27 + $0x660] sm:$0xff] %v735_v12 }
  0xde   : > { %738 = vst [vmem:[%s5256_s27 + $0x668] sm:$0xff] %v737_v13 }
  0xdf   : > { %740 = vst [vmem:[%s5256_s27 + $0x670] sm:$0xff] %v739_v14 }
  0xe0   : > { %742 = vst [vmem:[%s5256_s27 + $0x678] sm:$0xff] %v741_v15 }
  0xe1   : > { %744 = vst [vmem:[%s5256_s27 + $0x680] sm:$0xff] %v743_v16 }
  0xe2   : > { %746 = vst [vmem:[%s5256_s27 + $0x688] sm:$0xff] %v745_v17 }
  0xe3   : > { %748 = vst [vmem:[%s5256_s27 + $0x690] sm:$0xff] %v747_v18 }
  0xe4   : > { %750 = vst [vmem:[%s5256_s27 + $0x698] sm:$0xff] %v749_v19 }
  0xe5   : > { %752 = vst [vmem:[%s5256_s27 + $0x6a0] sm:$0xff] %v751_v20 }
  0xe6   : > { %754 = vst [vmem:[%s5256_s27 + $0x6a8] sm:$0xff] %v753_v21 }
  0xe7   : > { %756 = vst [vmem:[%s5256_s27 + $0x6b0] sm:$0xff] %v755_v22 }
  0xe8   : > { %758 = vst [vmem:[%s5256_s27 + $0x6b8] sm:$0xff] %v757_v23 }
  0xe9   : > { %760 = vst [vmem:[%s5256_s27 + $0x6c0] sm:$0xff] %v759_v24 }
  0xea   : > { %762 = vst [vmem:[%s5256_s27 + $0x6c8] sm:$0xff] %v761_v25 }
  0xeb   : > { %764 = vst [vmem:[%s5256_s27 + $0x6d0] sm:$0xff] %v763_v26 }
  0xec   : > { %766 = vst [vmem:[%s5256_s27 + $0x6d8] sm:$0xff] %v765_v27 }
  0xed   : > { %768 = vst [vmem:[%s5256_s27 + $0x6e0] sm:$0xff] %v767_v28 }
  0xee   : > { %770 = vst [vmem:[%s5256_s27 + $0x6e8] sm:$0xff] %v769_v29 }
  0xef   : > { %772 = vst [vmem:[%s5256_s27 + $0x6f0] sm:$0xff] %v771_v30 }
  0xf0   : > { %774 = vst [vmem:[%s5256_s27 + $0x6f8] sm:$0xff] %v773_v31 }
  0xf1   : > { %776 = vst [vmem:[%s5256_s27 + $0x700] sm:$0xff] %v775_v32 }
  0xf2   : > { %778 = vst [vmem:[%s5256_s27 + $0x708] sm:$0xff] %v777_v33 }
  0xf3   : > { %780 = vst [vmem:[%s5256_s27 + $0x710] sm:$0xff] %v779_v34 }
  0xf4   : > { %782 = vst [vmem:[%s5256_s27 + $0x718] sm:$0xff] %v781_v35 }
  0xf5   : > { %784 = vst [vmem:[%s5256_s27 + $0x720] sm:$0xff] %v783_v36 }
  0xf6   : > { %786 = vst [vmem:[%s5256_s27 + $0x728] sm:$0xff] %v785_v37 }
  0xf7   : > { %788 = vst [vmem:[%s5256_s27 + $0x730] sm:$0xff] %v787_v38 }
  0xf8   : > { %790 = vst [vmem:[%s5256_s27 + $0x738] sm:$0xff] %v789_v39 }
  0xf9   : > { %792 = vst [vmem:[%s5256_s27 + $0x740] sm:$0xff] %v791_v40 }
  0xfa   : > { %794 = vst [vmem:[%s5256_s27 + $0x748] sm:$0xff] %v793_v41 }
  0xfb   : > { %796 = vst [vmem:[%s5256_s27 + $0x750] sm:$0xff] %v795_v42 }
  0xfc   : > { %798 = vst [vmem:[%s5256_s27 + $0x758] sm:$0xff] %v797_v43 }
  0xfd   : > { %800 = vst [vmem:[%s5256_s27 + $0x760] sm:$0xff] %v799_v44 }
  0xfe   : > { %802 = vst [vmem:[%s5256_s27 + $0x768] sm:$0xff] %v801_v45 }
  0xff   : > { %804 = vst [vmem:[%s5256_s27 + $0x770] sm:$0xff] %v803_v46 }
 0x100   : > { %806 = vst [vmem:[%s5256_s27 + $0x778] sm:$0xff] %v805_v47 }
 0x101   : > { %808 = vst [vmem:[%s5256_s27 + $0x780] sm:$0xff] %v807_v48 }
 0x102   : > { %810 = vst [vmem:[%s5256_s27 + $0x788] sm:$0xff] %v809_v49 }
 0x103   : > { %812 = vst [vmem:[%s5256_s27 + $0x790] sm:$0xff] %v811_v50 }
 0x104   : > { %814 = vst [vmem:[%s5256_s27 + $0x798] sm:$0xff] %v813_v51 }
 0x105   : > { %816 = vst [vmem:[%s5256_s27 + $0x7a0] sm:$0xff] %v815_v52 }
 0x106   : > { %818 = vst [vmem:[%s5256_s27 + $0x7a8] sm:$0xff] %v817_v53 }
 0x107   : > { %820 = vst [vmem:[%s5256_s27 + $0x7b0] sm:$0xff] %v819_v54 }
 0x108   : > { %822 = vst [vmem:[%s5256_s27 + $0x7b8] sm:$0xff] %v821_v55 }
 0x109   : > { %824 = vst [vmem:[%s5256_s27 + $0x7c0] sm:$0xff] %v823_v56 }
 0x10a   : > { %826 = vst [vmem:[%s5256_s27 + $0x7c8] sm:$0xff] %v825_v57 }
 0x10b   : > { %828 = vst [vmem:[%s5256_s27 + $0x7d0] sm:$0xff] %v827_v58 }
 0x10c   : > { %830 = vst [vmem:[%s5256_s27 + $0x7d8] sm:$0xff] %v829_v59 }
 0x10d   : > { %832 = vst [vmem:[%s5256_s27 + $0x7e0] sm:$0xff] %v831_v60 }
 0x10e   : > { %834 = vst [vmem:[%s5256_s27 + $0x7e8] sm:$0xff] %v833_v61 }
 0x10f   : > { %836 = vst [vmem:[%s5256_s27 + $0x7f0] sm:$0xff] %v835_v62 }
 0x110   : > { %838 = vst [vmem:[%s5256_s27 + $0x7f8] sm:$0xff] %v837_v63 }
 0x111 PF: > { %p3673_p5 = scmp.ge.s32.totalorder %s5152_s15, 1  ;;  %p843_p6 = scmp.lt.s32.totalorder %s5152_s15, 5 }
 0x113   : > { %p844_p7 = pnand %p3673_p5, %p843_p6 }
 0x114   : > { %s850_s28 = sand.u32 (!%p844_p7), 1, %s5144_s13   ;;  %s3675_s29 = sshll.u32 (!%p844_p7), %s5231_s16, 6 }
 0x115   : > { %847 = sbr.rel (%p844_p7) target bundleno = 1486 (0x5ce), region = 71  ;;  %s3674_s30 = sshll.u32 (!%p844_p7), %s850_s28, 11 }
 0x116   : > { %p887_p8 = scmp.lt.s32.totalorder (!%p844_p7), %s3675_s29, 255  ;;  %s5776_s19 = scalar_lea.vmem (!%p844_p7), [#allocation3], %s3674_s30 }
 0x117   : > { %p3676_p9 = scmp.ne.s32.totalorder (!%p844_p7), %s5231_s16, 0 }
 0x11a   : > { %s6382_s29 = smov (!%p887_p8, %s3675_s29), 255  ;;  %896 = sbr.rel (%p3676_p9) target bundleno = 289 (0x121), region = 79 }
 0x11b   : > { %s5774_s18 = scalar_lea.vmem %s6367_s0, %s6382_s29 }
 0x11f   : > { %vm897_vm0 = vcmask 517120   ;;  %v5154_v0 = vmov 0.0  }
 0x120   : > { %898 = vst.msk [vmem:[#allocation2] sm:$0x3] %vm897_vm0, %v5154_v0 }
 0x121 PF: > { %v4447_v1 = vld [vmem:[%s5776_s19 + $0x600] sm:$0xf]  ;;  %v4913_v3 = vld [vmem:[%s5776_s19 + $0x604] sm:$0xf]  ;;  %v4455_v6 = vld [vmem:[%s5776_s19 + $0x608] sm:$0xf] }
 0x122   : > { %v4945_v2 = vld [vmem:[%s5776_s19 + $0x6fc] sm:$0xf0]  ;;  %v4449_v5 = vld [vmem:[%s5776_s19 + $0x700] sm:$0xf0]  ;;  %v4946_v7 = vld [vmem:[%s5776_s19 + $0x704] sm:$0xf0] }
 0x123   : > { %v4448_v4 = vor.u32 %v4945_v2, %v4447_v1  ;;  %v4452_v8 = vor.u32 %v4913_v3, %v4449_v5  ;;  %v4456_v9 = vor.u32 %v4946_v7, %v4455_v6  ;;  %v4914_v10 = vld [vmem:[%s5776_s19 + $0x60c] sm:$0xf]  ;;  %v4191_v13 = vld [vmem:[%s5776_s19 + $0x400] sm:$0xf]  ;;  %v4849_v15 = vld [vmem:[%s5776_s19 + $0x404] sm:$0xf] }
 0x124   : > { %v4457_v11 = vld [vmem:[%s5776_s19 + $0x708] sm:$0xf0]  ;;  %v4881_v14 = vld [vmem:[%s5776_s19 + $0x4fc] sm:$0xf0]  ;;  %v4193_v16 = vld [vmem:[%s5776_s19 + $0x500] sm:$0xf0] }
 0x125   : > { %2592 = vmatpush.bf16.xpose.msra.mxu0 %v4448_v4  ;;  %v4460_v12 = vor.u32 %v4914_v10, %v4457_v11  ;;  %2605 = vmatpush.bf16.xpose.msra.mxu1 %v4452_v8  ;;  %v4199_v17 = vld [vmem:[%s5776_s19 + $0x408] sm:$0xf]  ;;  %v4850_v19 = vld [vmem:[%s5776_s19 + $0x40c] sm:$0xf]  ;;  %v4192_v21 = vor.u32 %v4881_v14, %v4191_v13  ;;  %v4196_v22 = vor.u32 %v4849_v15, %v4193_v16  ;;  %v3935_v25 = vld [vmem:[%s5776_s19 + $0x200] sm:$0xf] }
 0x126   : > { %2618 = vmatpush.bf16.xpose.msra.mxu2 %v4456_v9  ;;  %v4882_v18 = vld [vmem:[%s5776_s19 + $0x504] sm:$0xf0]  ;;  %v4201_v20 = vld [vmem:[%s5776_s19 + $0x508] sm:$0xf0]  ;;  %v4817_v26 = vld [vmem:[%s5776_s19 + $0x2fc] sm:$0xf0] }
 0x127   : > { %2631 = vmatpush.bf16.xpose.msra.mxu3 %v4460_v12  ;;  %v4200_v23 = vor.u32 %v4882_v18, %v4199_v17  ;;  %v4204_v24 = vor.u32 %v4850_v19, %v4201_v20  ;;  %v4785_v27 = vld [vmem:[%s5776_s19 + $0x204] sm:$0xf]  ;;  %v3943_v29 = vld [vmem:[%s5776_s19 + $0x208] sm:$0xf]  ;;  %v4786_v31 = vld [vmem:[%s5776_s19 + $0x20c] sm:$0xf]  ;;  %v3936_v33 = vor.u32 %v4817_v26, %v3935_v25 }
 0x128   : > { %v3937_v28 = vld [vmem:[%s5776_s19 + $0x300] sm:$0xf0]  ;;  %v4818_v30 = vld [vmem:[%s5776_s19 + $0x304] sm:$0xf0]  ;;  %v3945_v32 = vld [vmem:[%s5776_s19 + $0x308] sm:$0xf0] }
 0x129   : > { %v3940_v34 = vor.u32 %v4785_v27, %v3937_v28  ;;  %v3944_v35 = vor.u32 %v4818_v30, %v3943_v29  ;;  %v900_v36 = vld [vmem:[%s5774_s18] sm:$0xff]  ;;  %v3948_v37 = vor.u32 %v4786_v31, %v3945_v32  ;;  %v3679_v38 = vld [vmem:[%s5776_s19] sm:$0xf]  ;;  %v4721_v40 = vld [vmem:[%s5776_s19 + $0x4] sm:$0xf]  ;;  %vm3421_vm1 = vcmask 517120  }
 0x12a   : > { %1165 = vst [vmem:[#allocation1] ss:$9 sm:$0xff] %v900_v36  ;;  %v4753_v39 = vld [vmem:[%s5776_s19 + $0xfc] sm:$0xf0]  ;;  %v3681_v41 = vld [vmem:[%s5776_s19 + $0x100] sm:$0xf0] }
 0x12b   : > { %v3687_v42 = vld [vmem:[%s5776_s19 + $0x8] sm:$0xf]  ;;  %v4722_v44 = vld [vmem:[%s5776_s19 + $0xc] sm:$0xf]  ;;  %v4463_v46 = vld [vmem:[%s5776_s19 + $0x610] sm:$0xf]  ;;  %v3680_v49 = vor.u32 %v4753_v39, %v3679_v38  ;;  %v3684_v53 = vor.u32 %v4721_v40, %v3681_v41 }
 0x12c   : > { %v4754_v43 = vld [vmem:[%s5776_s19 + $0x104] sm:$0xf0]  ;;  %v3689_v45 = vld [vmem:[%s5776_s19 + $0x108] sm:$0xf0]  ;;  %v4947_v47 = vld [vmem:[%s5776_s19 + $0x70c] sm:$0xf0] }
 0x12d   : > { %2593 = vmatpush.bf16.xpose.msra.mxu0 %v4192_v21  ;;  %2606 = vmatpush.bf16.xpose.msra.mxu1 %v4196_v22  ;;  %v4915_v48 = vld [vmem:[%s5776_s19 + $0x614] sm:$0xf]  ;;  %v4471_v51 = vld [vmem:[%s5776_s19 + $0x618] sm:$0xf]  ;;  %v3688_v54 = vor.u32 %v4754_v43, %v3687_v42  ;;  %v4916_v55 = vld [vmem:[%s5776_s19 + $0x61c] sm:$0xf]  ;;  %v3692_v57 = vor.u32 %v4722_v44, %v3689_v45  ;;  %v4464_v58 = vor.u32 %v4947_v47, %v4463_v46 }
 0x12e   : > { %2619 = vmatpush.bf16.xpose.msra.mxu2 %v4200_v23  ;;  %v4465_v50 = vld [vmem:[%s5776_s19 + $0x710] sm:$0xf0]  ;;  %v4948_v52 = vld [vmem:[%s5776_s19 + $0x714] sm:$0xf0]  ;;  %v4473_v56 = vld [vmem:[%s5776_s19 + $0x718] sm:$0xf0] }
 0x12f   : > { %2632 = vmatpush.bf16.xpose.msra.mxu3 %v4204_v24  ;;  %v4468_v59 = vor.u32 %v4915_v48, %v4465_v50  ;;  %v4472_v60 = vor.u32 %v4948_v52, %v4471_v51  ;;  %v4476_v61 = vor.u32 %v4916_v55, %v4473_v56  ;;  %v4207_v62 = vld [vmem:[%s5776_s19 + $0x410] sm:$0xf]  ;;  %v4851_v0 = vld [vmem:[%s5776_s19 + $0x414] sm:$0xf]  ;;  %v4215_v2 = vld [vmem:[%s5776_s19 + $0x418] sm:$0xf] }
 0x130   : > { %v4883_v63 = vld [vmem:[%s5776_s19 + $0x50c] sm:$0xf0]  ;;  %v4209_v1 = vld [vmem:[%s5776_s19 + $0x510] sm:$0xf0]  ;;  %v4884_v3 = vld [vmem:[%s5776_s19 + $0x514] sm:$0xf0] }
 0x131   : > { %v4852_v4 = vld [vmem:[%s5776_s19 + $0x41c] sm:$0xf]  ;;  %v1168_v6 = vld [vmem:[#allocation1 + $0x12] sm:$0xff]  ;;  %v1169_v8 = vld [vmem:[#allocation1 + $0x1b] sm:$0xff]  ;;  %v4208_v12 = vor.u32 %v4883_v63, %v4207_v62  ;;  %v4212_v16 = vor.u32 %v4851_v0, %v4209_v1  ;;  %v4216_v17 = vor.u32 %v4884_v3, %v4215_v2  ;;  %p4701_p10 = scmp.ne.s32.totalorder %s5231_s16, 3 }
 0x132   : > { %v4217_v5 = vld [vmem:[%s5776_s19 + $0x518] sm:$0xf0]  ;;  %v5828_v10 = vld [vmem:[#allocation1 + $0x36] sm:$0xff]  ;;  %v5835_v15 = vld [vmem:[#allocation1 + $0x2d] sm:$0xff]  ;;  %s5155_s21 = smov (!%p4701_p10), 32   ;;  %s5156_s24 = smov (!%p4701_p10), 96  }
 0x133   : > { %v1166_v7 = vld [vmem:[#allocation1] sm:$0xff]  ;;  %v1167_v9 = vld [vmem:[#allocation1 + $0x9] sm:$0xff]  ;;  %v4220_v18 = vor.u32 %v4852_v4, %v4217_v5  ;;  %v3951_v19 = vld [vmem:[%s5776_s19 + $0x210] sm:$0xf] }
 0x134   : > { %v5830_v11 = vld [vmem:[#allocation1 + $0x24] sm:$0xff]  ;;  %v4819_v20 = vld [vmem:[%s5776_s19 + $0x30c] sm:$0xf0]  ;;  %v4787_v21 = vld [vmem:[%s5776_s19 + $0x214] sm:$0xf] }
 0x135   : > { %2594 = vmatpush.bf16.xpose.msra.mxu0 %v3936_v33  ;;  %2607 = vmatpush.bf16.xpose.msra.mxu1 %v3940_v34  ;;  %v5832_v13 = vld [vmem:[#allocation1 + $0x3f] sm:$0xff]  ;;  %v901_v14 = vld [vmem:[%s5774_s18 + $0x8] sm:$0xff]  ;;  %v3952_v27 = vor.u32 %v4819_v20, %v3951_v19  ;;  %v3695_v31 = vld [vmem:[%s5776_s19 + $0x10] sm:$0xf] }
 0x136   : > { %2620 = vmatpush.bf16.xpose.msra.mxu2 %v3944_v35  ;;  %1175 = vst [vmem:[#allocation1] ss:$9 sm:$0xff] %v901_v14  ;;  %v3953_v22 = vld [vmem:[%s5776_s19 + $0x310] sm:$0xf0]  ;;  %v3959_v23 = vld [vmem:[%s5776_s19 + $0x218] sm:$0xf] }
 0x137   : > { %2633 = vmatpush.bf16.xpose.msra.mxu3 %v3948_v37  ;;  %v4820_v24 = vld [vmem:[%s5776_s19 + $0x314] sm:$0xf0]  ;;  %v4788_v25 = vld [vmem:[%s5776_s19 + $0x21c] sm:$0xf]  ;;  %v3956_v28 = vor.u32 %v4787_v21, %v3953_v22  ;;  %v4755_v32 = vld [vmem:[%s5776_s19 + $0x10c] sm:$0xf0] }
 0x138   : > { %v3961_v26 = vld [vmem:[%s5776_s19 + $0x318] sm:$0xf0]  ;;  %v3960_v29 = vor.u32 %v4820_v24, %v3959_v23  ;;  %v4723_v33 = vld [vmem:[%s5776_s19 + $0x14] sm:$0xf]  ;;  %v3703_v35 = vld [vmem:[%s5776_s19 + $0x18] sm:$0xf]  ;;  %v3696_v42 = vor.u32 %v4755_v32, %v3695_v31 }
 0x139   : > { %v3964_v30 = vor.u32 %v4788_v25, %v3961_v26  ;;  %v3697_v34 = vld [vmem:[%s5776_s19 + $0x110] sm:$0xf0]  ;;  %v4756_v36 = vld [vmem:[%s5776_s19 + $0x114] sm:$0xf0]  ;;  %v4724_v37 = vld [vmem:[%s5776_s19 + $0x1c] sm:$0xf] }
 0x13a   : > { %v3705_v38 = vld [vmem:[%s5776_s19 + $0x118] sm:$0xf0]  ;;  %v4479_v39 = vld [vmem:[%s5776_s19 + $0x620] sm:$0xf]  ;;  %v4917_v41 = vld [vmem:[%s5776_s19 + $0x624] sm:$0xf]  ;;  %v3700_v46 = vor.u32 %v4723_v33, %v3697_v34  ;;  %v3704_v47 = vor.u32 %v4756_v36, %v3703_v35 }
 0x13b   : > { %v4949_v40 = vld [vmem:[%s5776_s19 + $0x71c] sm:$0xf0]  ;;  %v4481_v43 = vld [vmem:[%s5776_s19 + $0x720] sm:$0xf0]  ;;  %v4487_v44 = vld [vmem:[%s5776_s19 + $0x628] sm:$0xf]  ;;  %v3708_v50 = vor.u32 %v4724_v37, %v3705_v38 }
 0x13c   : > { %v4950_v45 = vld [vmem:[%s5776_s19 + $0x724] sm:$0xf0]  ;;  %v4918_v48 = vld [vmem:[%s5776_s19 + $0x62c] sm:$0xf]  ;;  %v4480_v51 = vor.u32 %v4949_v40, %v4479_v39  ;;  %v4484_v52 = vor.u32 %v4917_v41, %v4481_v43  ;;  %v4223_v55 = vld [vmem:[%s5776_s19 + $0x420] sm:$0xf] }
 0x13d   : > { %2595 = vmatpush.bf16.xpose.msra.mxu0 %v3680_v49  ;;  %2608 = vmatpush.bf16.xpose.msra.mxu1 %v3684_v53  ;;  %v4489_v49 = vld [vmem:[%s5776_s19 + $0x728] sm:$0xf0]  ;;  %v4488_v53 = vor.u32 %v4950_v45, %v4487_v44  ;;  %v4885_v56 = vld [vmem:[%s5776_s19 + $0x51c] sm:$0xf0]  ;;  %v4789_v5 = vld [vmem:[%s5776_s19 + $0x224] sm:$0xf] }
 0x13e   : > { %2621 = vmatpush.bf16.xpose.msra.mxu2 %v3688_v54  ;;  %v4492_v54 = vor.u32 %v4918_v48, %v4489_v49  ;;  %v4233_v62 = vld [vmem:[%s5776_s19 + $0x528] sm:$0xf0]  ;;  %v4224_v63 = vor.u32 %v4885_v56, %v4223_v55  ;;  %v3967_v3 = vld [vmem:[%s5776_s19 + $0x220] sm:$0xf]  ;;  %v3719_v19 = vld [vmem:[%s5776_s19 + $0x28] sm:$0xf] }
 0x13f   : > { %2634 = vmatpush.bf16.xpose.msra.mxu3 %v3692_v57  ;;  %v4853_v57 = vld [vmem:[%s5776_s19 + $0x424] sm:$0xf]  ;;  %v4821_v4 = vld [vmem:[%s5776_s19 + $0x31c] sm:$0xf0]  ;;  %v4758_v20 = vld [vmem:[%s5776_s19 + $0x124] sm:$0xf0] }
 0x140   : > { %v4726_v21 = vld [vmem:[%s5776_s19 + $0x2c] sm:$0xf]  ;;  %v4495_v23 = vld [vmem:[%s5776_s19 + $0x630] sm:$0xf]  ;;  %v4919_v25 = vld [vmem:[%s5776_s19 + $0x634] sm:$0xf]  ;;  %v3720_v31 = vor.u32 %v4758_v20, %v3719_v19 }
 0x141   : > { %v3721_v22 = vld [vmem:[%s5776_s19 + $0x128] sm:$0xf0]  ;;  %v4951_v24 = vld [vmem:[%s5776_s19 + $0x72c] sm:$0xf0]  ;;  %v4920_v32 = vld [vmem:[%s5776_s19 + $0x63c] sm:$0xf] }
 0x142   : > { %v4505_v33 = vld [vmem:[%s5776_s19 + $0x738] sm:$0xf0]  ;;  %v3724_v34 = vor.u32 %v4726_v21, %v3721_v22  ;;  %v4496_v35 = vor.u32 %v4951_v24, %v4495_v23  ;;  %v1178_v40 = vld [vmem:[#allocation1 + $0x12] sm:$0xff]  ;;  %v4239_v41 = vld [vmem:[%s5776_s19 + $0x430] sm:$0xf] }
 0x143   : > { %v4508_v38 = vor.u32 %v4920_v32, %v4505_v33  ;;  %v1176_v39 = vld [vmem:[#allocation1] sm:$0xff]  ;;  %v3983_v55 = vld [vmem:[%s5776_s19 + $0x230] sm:$0xf]  ;;  %v4521_v19 = vld [vmem:[%s5776_s19 + $0x748] sm:$0xf0] }
 0x144   : > { %2596 = vmatmul.bf16.vlgmr.msra.gmra.mxu0 %v1166_v7  ;;  %2609 = vmatmul.bf16.vlgmr.msra.gmra.mxu1 %v1167_v9  ;;  %v3975_v7 = vld [vmem:[%s5776_s19 + $0x228] sm:$0xf]  ;;  %v4790_v9 = vld [vmem:[%s5776_s19 + $0x22c] sm:$0xf]  ;;  %v4855_v43 = vld [vmem:[%s5776_s19 + $0x434] sm:$0xf] }
 0x145   : > { %2644 = vmatpush.bf16.xpose.msrb.mxu0 %v4464_v58  ;;  %2657 = vmatpush.bf16.xpose.msrb.mxu1 %v4468_v59  ;;  %v4225_v58 = vld [vmem:[%s5776_s19 + $0x520] sm:$0xf0]  ;;  %v4231_v59 = vld [vmem:[%s5776_s19 + $0x428] sm:$0xf]  ;;  %v4241_v44 = vld [vmem:[%s5776_s19 + $0x530] sm:$0xf0] }
 0x146   : > { %2670 = vmatpush.bf16.xpose.msrb.mxu2 %v4472_v60  ;;  %2635 = vmatmul.bf16.vlgmr.msra.gmra.mxu3 %v1169_v8  ;;  %v4886_v60 = vld [vmem:[%s5776_s19 + $0x524] sm:$0xf0]  ;;  %v4228_v0 = vor.u32 %v4853_v57, %v4225_v58  ;;  %v4247_v45 = vld [vmem:[%s5776_s19 + $0x438] sm:$0xf]  ;;  %v4856_v48 = vld [vmem:[%s5776_s19 + $0x43c] sm:$0xf] }
 0x147   : > { %2683 = vmatpush.bf16.xpose.msrb.mxu3 %v4476_v61  ;;  %2622 = vmatmul.bf16.vlgmr.msra.gmra.mxu2 %v1168_v6  ;;  %v4854_v61 = vld [vmem:[%s5776_s19 + $0x42c] sm:$0xf]  ;;  %v4232_v1 = vor.u32 %v4886_v60, %v4231_v59  ;;  %v3969_v6 = vld [vmem:[%s5776_s19 + $0x320] sm:$0xf0]  ;;  %v4822_v8 = vld [vmem:[%s5776_s19 + $0x324] sm:$0xf0] }
 0x148   : > { %v4236_v2 = vor.u32 %v4854_v61, %v4233_v62  ;;  %v4249_v49 = vld [vmem:[%s5776_s19 + $0x538] sm:$0xf0]  ;;  %v4823_v56 = vld [vmem:[%s5776_s19 + $0x32c] sm:$0xf0]  ;;  %v4791_v57 = vld [vmem:[%s5776_s19 + $0x234] sm:$0xf] }
 0x149   : > { %v3985_v58 = vld [vmem:[%s5776_s19 + $0x330] sm:$0xf0]  ;;  %v3991_v59 = vld [vmem:[%s5776_s19 + $0x238] sm:$0xf]  ;;  %v4792_v61 = vld [vmem:[%s5776_s19 + $0x23c] sm:$0xf] }
 0x14a   : > { %v4824_v60 = vld [vmem:[%s5776_s19 + $0x334] sm:$0xf0]  ;;  %v3993_v62 = vld [vmem:[%s5776_s19 + $0x338] sm:$0xf0]  ;;  %v1182_v21 = vld [vmem:[#allocation1 + $0x36] sm:$0xff] }
 0x14b   : > { %v1180_v20 = vld [vmem:[#allocation1 + $0x24] sm:$0xff]  ;;  %v1181_v24 = vld [vmem:[#allocation1 + $0x2d] sm:$0xff] }
 0x14c   : > { %v4255_v32 = vld [vmem:[%s5776_s19 + $0x440] sm:$0xf] }
 0x14d   : > { %2645 = vmatpush.bf16.xpose.msrb.mxu0 %v4208_v12  ;;  %2658 = vmatpush.bf16.xpose.msrb.mxu1 %v4212_v16  ;;  %v3972_v12 = vor.u32 %v4789_v5, %v3969_v6  ;;  %v4757_v16 = vld [vmem:[%s5776_s19 + $0x11c] sm:$0xf0]  ;;  %v4727_v5 = vld [vmem:[%s5776_s19 + $0x34] sm:$0xf] }
 0x14e   : > { %2671 = vmatpush.bf16.xpose.msrb.mxu2 %v4216_v17  ;;  %v4725_v17 = vld [vmem:[%s5776_s19 + $0x24] sm:$0xf]  ;;  %v3729_v6 = vld [vmem:[%s5776_s19 + $0x130] sm:$0xf0]  ;;  %v4889_v33 = vld [vmem:[%s5776_s19 + $0x53c] sm:$0xf0] }
 0x14f   : > { %2684 = vmatpush.bf16.xpose.msrb.mxu3 %v4220_v18  ;;  %v3713_v18 = vld [vmem:[%s5776_s19 + $0x120] sm:$0xf0]  ;;  %v3732_v22 = vor.u32 %v4727_v5, %v3729_v6  ;;  %v4535_v5 = vld [vmem:[%s5776_s19 + $0x658] sm:$0xf] }
 0x150   : > { %v4956_v6 = vld [vmem:[%s5776_s19 + $0x754] sm:$0xf0] }
 0x155   : > { %2646 = vmatpush.bf16.xpose.msrb.mxu0 %v3952_v27  ;;  %2659 = vmatpush.bf16.xpose.msrb.mxu1 %v3956_v28  ;;  %v4497_v27 = vld [vmem:[%s5776_s19 + $0x730] sm:$0xf0]  ;;  %v4503_v28 = vld [vmem:[%s5776_s19 + $0x638] sm:$0xf] }
 0x156   : > { %2672 = vmatpush.bf16.xpose.msrb.mxu2 %v3960_v29  ;;  %v4952_v29 = vld [vmem:[%s5776_s19 + $0x734] sm:$0xf0]  ;;  %v4500_v36 = vor.u32 %v4919_v25, %v4497_v27 }
 0x157   : > { %2685 = vmatpush.bf16.xpose.msrb.mxu3 %v3964_v30  ;;  %v3716_v30 = vor.u32 %v4725_v17, %v3713_v18  ;;  %v4504_v37 = vor.u32 %v4952_v29, %v4503_v28  ;;  %v4922_v17 = vld [vmem:[%s5776_s19 + $0x64c] sm:$0xf]  ;;  %v1183_v25 = vld [vmem:[#allocation1 + $0x3f] sm:$0xff] }
 0x15d   : > { %2647 = vmatpush.bf16.xpose.msrb.mxu0 %v3696_v42  ;;  %2660 = vmatpush.bf16.xpose.msrb.mxu1 %v3700_v46  ;;  %v4887_v42 = vld [vmem:[%s5776_s19 + $0x52c] sm:$0xf0]  ;;  %v4888_v46 = vld [vmem:[%s5776_s19 + $0x534] sm:$0xf0] }
 0x15e   : > { %2673 = vmatpush.bf16.xpose.msrb.mxu2 %v3704_v47  ;;  %v1177_v47 = vld [vmem:[#allocation1 + $0x9] sm:$0xff] }
 0x15f   : > { %2686 = vmatpush.bf16.xpose.msrb.mxu3 %v3708_v50  ;;  %v1179_v50 = vld [vmem:[#allocation1 + $0x1b] sm:$0xff] }
 0x164   : > { %2648 = vmatmul.bf16.vlgmr.msrb.gmra.mxu0 %v5830_v11  ;;  %2661 = vmatmul.bf16.vlgmr.msrb.gmra.mxu1 %v5835_v15  ;;  %v3968_v11 = vor.u32 %v4821_v4, %v3967_v3  ;;  %v3711_v15 = vld [vmem:[%s5776_s19 + $0x20] sm:$0xf]  ;;  %v3727_v3 = vld [vmem:[%s5776_s19 + $0x30] sm:$0xf] }
 0x165   : > { %2696 = vmatpush.bf16.xpose.msra.mxu0 %v4480_v51  ;;  %2709 = vmatpush.bf16.xpose.msra.mxu1 %v4484_v52  ;;  %v3712_v26 = vor.u32 %v4757_v16, %v3711_v15  ;;  %v4240_v51 = vor.u32 %v4887_v42, %v4239_v41  ;;  %v4244_v52 = vor.u32 %v4855_v43, %v4241_v44  ;;  %v4759_v4 = vld [vmem:[%s5776_s19 + $0x12c] sm:$0xf0]  ;;  %v4519_v15 = vld [vmem:[%s5776_s19 + $0x648] sm:$0xf]  ;;  %v3999_v44 = vld [vmem:[%s5776_s19 + $0x240] sm:$0xf] }
 0x166   : > { %2722 = vmatpush.bf16.xpose.msra.mxu2 %v4488_v53  ;;  %2687 = vmatmul.bf16.vlgmr.msrb.gmra.mxu3 %v5832_v13  ;;  %v3976_v13 = vor.u32 %v4822_v8, %v3975_v7  ;;  %v4248_v53 = vor.u32 %v4888_v46, %v4247_v45  ;;  %v3735_v7 = vld [vmem:[%s5776_s19 + $0x38] sm:$0xf]  ;;  %v4954_v16 = vld [vmem:[%s5776_s19 + $0x744] sm:$0xf0]  ;;  %v3728_v18 = vor.u32 %v4759_v4, %v3727_v3  ;;  %v4825_v45 = vld [vmem:[%s5776_s19 + $0x33c] sm:$0xf0] }
 0x167   : > { %2735 = vmatpush.bf16.xpose.msra.mxu3 %v4492_v54  ;;  %2674 = vmatmul.bf16.vlgmr.msrb.gmra.mxu2 %v5828_v10  ;;  %v3977_v10 = vld [vmem:[%s5776_s19 + $0x328] sm:$0xf0]  ;;  %v4252_v54 = vor.u32 %v4856_v48, %v4249_v49  ;;  %v4760_v8 = vld [vmem:[%s5776_s19 + $0x134] sm:$0xf0]  ;;  %v4793_v46 = vld [vmem:[%s5776_s19 + $0x244] sm:$0xf] }
 0x168   : > { %v3980_v14 = vor.u32 %v4790_v9, %v3977_v10  ;;  %v4728_v9 = vld [vmem:[%s5776_s19 + $0x3c] sm:$0xf]  ;;  %v3736_v23 = vor.u32 %v4760_v8, %v3735_v7  ;;  %v4007_v48 = vld [vmem:[%s5776_s19 + $0x248] sm:$0xf]  ;;  %v4529_v4 = vld [vmem:[%s5776_s19 + $0x750] sm:$0xf0] }
 0x169   : > { %v3737_v10 = vld [vmem:[%s5776_s19 + $0x138] sm:$0xf0]  ;;  %v4826_v49 = vld [vmem:[%s5776_s19 + $0x344] sm:$0xf0] }
 0x16a   : > { %v3740_v27 = vor.u32 %v4728_v9, %v3737_v10  ;;  %v4924_v9 = vld [vmem:[%s5776_s19 + $0x65c] sm:$0xf] }
 0x16b   : > { %v4537_v10 = vld [vmem:[%s5776_s19 + $0x758] sm:$0xf0] }
 0x16d   : > { %2697 = vmatpush.bf16.xpose.msra.mxu0 %v4224_v63  ;;  %2710 = vmatpush.bf16.xpose.msra.mxu1 %v4228_v0  ;;  %v3984_v63 = vor.u32 %v4823_v56, %v3983_v55  ;;  %v3988_v0 = vor.u32 %v4791_v57, %v3985_v58  ;;  %v3743_v56 = vld [vmem:[%s5776_s19 + $0x40] sm:$0xf]  ;;  %v4729_v58 = vld [vmem:[%s5776_s19 + $0x44] sm:$0xf] }
 0x16e   : > { %2723 = vmatpush.bf16.xpose.msra.mxu2 %v4232_v1  ;;  %v3992_v1 = vor.u32 %v4824_v60, %v3991_v59  ;;  %v4761_v57 = vld [vmem:[%s5776_s19 + $0x13c] sm:$0xf0]  ;;  %v3745_v59 = vld [vmem:[%s5776_s19 + $0x140] sm:$0xf0]  ;;  %v3751_v60 = vld [vmem:[%s5776_s19 + $0x48] sm:$0xf] }
 0x16f   : > { %2736 = vmatpush.bf16.xpose.msra.mxu3 %v4236_v2  ;;  %v3996_v2 = vor.u32 %v4792_v61, %v3993_v62  ;;  %v4762_v61 = vld [vmem:[%s5776_s19 + $0x144] sm:$0xf0]  ;;  %v4730_v62 = vld [vmem:[%s5776_s19 + $0x4c] sm:$0xf]  ;;  %v3744_v3 = vor.u32 %v4761_v57, %v3743_v56  ;;  %v3748_v7 = vor.u32 %v4729_v58, %v3745_v59 }
 0x170   : > { %v3752_v8 = vor.u32 %v4762_v61, %v3751_v60  ;;  %v4551_v56 = vld [vmem:[%s5776_s19 + $0x668] sm:$0xf]  ;;  %v4926_v58 = vld [vmem:[%s5776_s19 + $0x66c] sm:$0xf] }
 0x171   : > { %v4958_v57 = vld [vmem:[%s5776_s19 + $0x764] sm:$0xf0]  ;;  %v4553_v60 = vld [vmem:[%s5776_s19 + $0x768] sm:$0xf0] }
 0x175   : > { %2698 = vmatpush.bf16.xpose.msra.mxu0 %v3968_v11  ;;  %2711 = vmatpush.bf16.xpose.msra.mxu1 %v3972_v12  ;;  %v4511_v11 = vld [vmem:[%s5776_s19 + $0x640] sm:$0xf] }
 0x176   : > { %2724 = vmatpush.bf16.xpose.msra.mxu2 %v3976_v13  ;;  %v4953_v12 = vld [vmem:[%s5776_s19 + $0x73c] sm:$0xf0]  ;;  %v4921_v13 = vld [vmem:[%s5776_s19 + $0x644] sm:$0xf] }
 0x177   : > { %2737 = vmatpush.bf16.xpose.msra.mxu3 %v3980_v14  ;;  %v4513_v14 = vld [vmem:[%s5776_s19 + $0x740] sm:$0xf0]  ;;  %v4512_v28 = vor.u32 %v4953_v12, %v4511_v11 }
 0x178   : > { %v4516_v29 = vor.u32 %v4921_v13, %v4513_v14  ;;  %v4536_v14 = vor.u32 %v4956_v6, %v4535_v5 }
 0x17d   : > { %2699 = vmatpush.bf16.xpose.msra.mxu0 %v3712_v26  ;;  %2712 = vmatpush.bf16.xpose.msra.mxu1 %v3716_v30  ;;  %v902_v26 = vld [vmem:[%s5774_s18 + $0x10] sm:$0xff]  ;;  %v4520_v30 = vor.u32 %v4954_v16, %v4519_v15  ;;  %v4540_v15 = vor.u32 %v4924_v9, %v4537_v10  ;;  %v4271_v16 = vld [vmem:[%s5776_s19 + $0x450] sm:$0xf]  ;;  %v4287_v10 = vld [vmem:[%s5776_s19 + $0x460] sm:$0xf] }
 0x17e   : > { %2725 = vmatpush.bf16.xpose.msra.mxu2 %v3720_v31  ;;  %1185 = vst [vmem:[#allocation1] ss:$9 sm:$0xff] %v902_v26  ;;  %v4524_v31 = vor.u32 %v4922_v17, %v4521_v19  ;;  %v4891_v17 = vld [vmem:[%s5776_s19 + $0x54c] sm:$0xf0]  ;;  %v4273_v19 = vld [vmem:[%s5776_s19 + $0x550] sm:$0xf0] }
 0x17f   : > { %2738 = vmatpush.bf16.xpose.msra.mxu3 %v3724_v34  ;;  %v4857_v34 = vld [vmem:[%s5776_s19 + $0x444] sm:$0xf]  ;;  %v4281_v26 = vld [vmem:[%s5776_s19 + $0x558] sm:$0xf0] }
 0x184   : > { %2700 = vmatmul.bf16.vlgmr.msra.gmra.mxu0 %v1176_v39  ;;  %2713 = vmatmul.bf16.vlgmr.msra.gmra.mxu1 %v1177_v47  ;;  %v4265_v39 = vld [vmem:[%s5776_s19 + $0x548] sm:$0xf0]  ;;  %v4001_v47 = vld [vmem:[%s5776_s19 + $0x340] sm:$0xf0] }
 0x185   : > { %2748 = vmatpush.bf16.xpose.msrb.mxu0 %v4496_v35  ;;  %2761 = vmatpush.bf16.xpose.msrb.mxu1 %v4500_v36  ;;  %v4257_v35 = vld [vmem:[%s5776_s19 + $0x540] sm:$0xf0]  ;;  %v4263_v36 = vld [vmem:[%s5776_s19 + $0x448] sm:$0xf]  ;;  %v1190_v61 = vld [vmem:[#allocation1 + $0x24] sm:$0xff] }
 0x186   : > { %2774 = vmatpush.bf16.xpose.msrb.mxu2 %v4504_v37  ;;  %2739 = vmatmul.bf16.vlgmr.msra.gmra.mxu3 %v1179_v50  ;;  %v4890_v37 = vld [vmem:[%s5776_s19 + $0x544] sm:$0xf0]  ;;  %v4260_v41 = vor.u32 %v4857_v34, %v4257_v35  ;;  %v4794_v50 = vld [vmem:[%s5776_s19 + $0x24c] sm:$0xf]  ;;  %v4795_v34 = vld [vmem:[%s5776_s19 + $0x254] sm:$0xf] }
 0x187   : > { %2787 = vmatpush.bf16.xpose.msrb.mxu3 %v4508_v38  ;;  %2726 = vmatmul.bf16.vlgmr.msra.gmra.mxu2 %v1178_v40  ;;  %v4858_v38 = vld [vmem:[%s5776_s19 + $0x44c] sm:$0xf]  ;;  %v4256_v40 = vor.u32 %v4889_v33, %v4255_v32  ;;  %v4264_v42 = vor.u32 %v4890_v37, %v4263_v36  ;;  %v4015_v32 = vld [vmem:[%s5776_s19 + $0x250] sm:$0xf]  ;;  %v4017_v35 = vld [vmem:[%s5776_s19 + $0x350] sm:$0xf0] }
 0x188   : > { %v4268_v43 = vor.u32 %v4858_v38, %v4265_v39  ;;  %v4827_v33 = vld [vmem:[%s5776_s19 + $0x34c] sm:$0xf0]  ;;  %v4023_v36 = vld [vmem:[%s5776_s19 + $0x258] sm:$0xf]  ;;  %v4796_v38 = vld [vmem:[%s5776_s19 + $0x25c] sm:$0xf] }
 0x189   : > { %v4828_v37 = vld [vmem:[%s5776_s19 + $0x354] sm:$0xf0]  ;;  %v4025_v39 = vld [vmem:[%s5776_s19 + $0x358] sm:$0xf0] }
 0x18d   : > { %2749 = vmatpush.bf16.xpose.msrb.mxu0 %v4240_v51  ;;  %2762 = vmatpush.bf16.xpose.msrb.mxu1 %v4244_v52  ;;  %v4009_v51 = vld [vmem:[%s5776_s19 + $0x348] sm:$0xf0]  ;;  %v4000_v52 = vor.u32 %v4825_v45, %v3999_v44  ;;  %v3759_v44 = vld [vmem:[%s5776_s19 + $0x50] sm:$0xf] }
 0x18e   : > { %2775 = vmatpush.bf16.xpose.msrb.mxu2 %v4248_v53  ;;  %v4004_v53 = vor.u32 %v4793_v46, %v4001_v47  ;;  %v4012_v55 = vor.u32 %v4794_v50, %v4009_v51  ;;  %v4763_v45 = vld [vmem:[%s5776_s19 + $0x14c] sm:$0xf0]  ;;  %v4731_v46 = vld [vmem:[%s5776_s19 + $0x54] sm:$0xf]  ;;  %v4732_v50 = vld [vmem:[%s5776_s19 + $0x5c] sm:$0xf] }
 0x18f   : > { %2788 = vmatpush.bf16.xpose.msrb.mxu3 %v4252_v54  ;;  %v4008_v54 = vor.u32 %v4826_v49, %v4007_v48  ;;  %v3761_v47 = vld [vmem:[%s5776_s19 + $0x150] sm:$0xf0]  ;;  %v3767_v48 = vld [vmem:[%s5776_s19 + $0x58] sm:$0xf]  ;;  %v3769_v51 = vld [vmem:[%s5776_s19 + $0x158] sm:$0xf0]  ;;  %v3760_v59 = vor.u32 %v4763_v45, %v3759_v44 }
 0x190   : > { %v4764_v49 = vld [vmem:[%s5776_s19 + $0x154] sm:$0xf0]  ;;  %v4765_v44 = vld [vmem:[%s5776_s19 + $0x15c] sm:$0xf0] }
 0x195   : > { %2750 = vmatpush.bf16.xpose.msrb.mxu0 %v3984_v63  ;;  %2763 = vmatpush.bf16.xpose.msrb.mxu1 %v3988_v0  ;;  %v3753_v63 = vld [vmem:[%s5776_s19 + $0x148] sm:$0xf0]  ;;  %v4527_v0 = vld [vmem:[%s5776_s19 + $0x650] sm:$0xf] }
 0x196   : > { %2776 = vmatpush.bf16.xpose.msrb.mxu2 %v3992_v1  ;;  %v4955_v1 = vld [vmem:[%s5776_s19 + $0x74c] sm:$0xf0]  ;;  %v3756_v11 = vor.u32 %v4730_v62, %v3753_v63  ;;  %v3764_v63 = vor.u32 %v4731_v46, %v3761_v47  ;;  %v4733_v46 = vld [vmem:[%s5776_s19 + $0x64] sm:$0xf] }
 0x197   : > { %2789 = vmatpush.bf16.xpose.msrb.mxu3 %v3996_v2  ;;  %v4923_v2 = vld [vmem:[%s5776_s19 + $0x654] sm:$0xf]  ;;  %v4528_v12 = vor.u32 %v4955_v1, %v4527_v0  ;;  %v1192_v62 = vld [vmem:[#allocation1 + $0x36] sm:$0xff]  ;;  %v3768_v0 = vor.u32 %v4764_v49, %v3767_v48  ;;  %v1191_v1 = vld [vmem:[#allocation1 + $0x2d] sm:$0xff] }
 0x198   : > { %v4532_v13 = vor.u32 %v4923_v2, %v4529_v4  ;;  %v1193_v2 = vld [vmem:[#allocation1 + $0x3f] sm:$0xff]  ;;  %v3772_v4 = vor.u32 %v4732_v50, %v3769_v51  ;;  %v3777_v47 = vld [vmem:[%s5776_s19 + $0x160] sm:$0xf0]  ;;  %v3783_v48 = vld [vmem:[%s5776_s19 + $0x68] sm:$0xf] }
 0x199   : > { %v4766_v49 = vld [vmem:[%s5776_s19 + $0x164] sm:$0xf0]  ;;  %v4734_v50 = vld [vmem:[%s5776_s19 + $0x6c] sm:$0xf] }
 0x19a   : > { %v3785_v51 = vld [vmem:[%s5776_s19 + $0x168] sm:$0xf0] }
 0x19d   : > { %2751 = vmatpush.bf16.xpose.msrb.mxu0 %v3728_v18  ;;  %2764 = vmatpush.bf16.xpose.msrb.mxu1 %v3732_v22  ;;  %v4859_v18 = vld [vmem:[%s5776_s19 + $0x454] sm:$0xf]  ;;  %v1188_v22 = vld [vmem:[#allocation1 + $0x12] sm:$0xff] }
 0x19e   : > { %2777 = vmatpush.bf16.xpose.msrb.mxu2 %v3736_v23  ;;  %v4892_v23 = vld [vmem:[%s5776_s19 + $0x554] sm:$0xf0] }
 0x19f   : > { %2790 = vmatpush.bf16.xpose.msrb.mxu3 %v3740_v27  ;;  %v1189_v27 = vld [vmem:[#allocation1 + $0x1b] sm:$0xff] }
 0x1a4   : > { %2752 = vmatmul.bf16.vlgmr.msrb.gmra.mxu0 %v1180_v20  ;;  %2765 = vmatmul.bf16.vlgmr.msrb.gmra.mxu1 %v1181_v24  ;;  %v4279_v20 = vld [vmem:[%s5776_s19 + $0x458] sm:$0xf]  ;;  %v1187_v24 = vld [vmem:[#allocation1 + $0x9] sm:$0xff] }
 0x1a5   : > { %2800 = vmatpush.bf16.xpose.msra.mxu0 %v4512_v28  ;;  %2813 = vmatpush.bf16.xpose.msra.mxu1 %v4516_v29  ;;  %v4272_v28 = vor.u32 %v4891_v17, %v4271_v16  ;;  %v4276_v29 = vor.u32 %v4859_v18, %v4273_v19  ;;  %v4894_v16 = vld [vmem:[%s5776_s19 + $0x564] sm:$0xf0]  ;;  %v4862_v18 = vld [vmem:[%s5776_s19 + $0x46c] sm:$0xf] }
 0x1a6   : > { %2826 = vmatpush.bf16.xpose.msra.mxu2 %v4520_v30  ;;  %2791 = vmatmul.bf16.vlgmr.msrb.gmra.mxu3 %v1183_v25  ;;  %v4860_v25 = vld [vmem:[%s5776_s19 + $0x45c] sm:$0xf]  ;;  %v4280_v30 = vor.u32 %v4892_v23, %v4279_v20  ;;  %v4297_v19 = vld [vmem:[%s5776_s19 + $0x568] sm:$0xf0] }
 0x1a7   : > { %2839 = vmatpush.bf16.xpose.msra.mxu3 %v4524_v31  ;;  %2778 = vmatmul.bf16.vlgmr.msrb.gmra.mxu2 %v1182_v21  ;;  %v1186_v21 = vld [vmem:[#allocation1] sm:$0xff]  ;;  %v4284_v31 = vor.u32 %v4860_v25, %v4281_v26  ;;  %v4300_v23 = vor.u32 %v4862_v18, %v4297_v19 }
 0x1ad   : > { %2801 = vmatpush.bf16.xpose.msra.mxu0 %v4256_v40  ;;  %2814 = vmatpush.bf16.xpose.msra.mxu1 %v4260_v41  ;;  %v4016_v40 = vor.u32 %v4827_v33, %v4015_v32  ;;  %v4020_v41 = vor.u32 %v4795_v34, %v4017_v35  ;;  %v4033_v32 = vld [vmem:[%s5776_s19 + $0x360] sm:$0xf0]  ;;  %v4039_v33 = vld [vmem:[%s5776_s19 + $0x268] sm:$0xf] }
 0x1ae   : > { %2827 = vmatpush.bf16.xpose.msra.mxu2 %v4264_v42  ;;  %v4024_v42 = vor.u32 %v4828_v37, %v4023_v36  ;;  %v4830_v34 = vld [vmem:[%s5776_s19 + $0x364] sm:$0xf0]  ;;  %v4798_v36 = vld [vmem:[%s5776_s19 + $0x26c] sm:$0xf] }
 0x1af   : > { %2840 = vmatpush.bf16.xpose.msra.mxu3 %v4268_v43  ;;  %v4028_v43 = vor.u32 %v4796_v38, %v4025_v39  ;;  %v4041_v37 = vld [vmem:[%s5776_s19 + $0x368] sm:$0xf0] }
 0x1b5   : > { %2802 = vmatpush.bf16.xpose.msra.mxu0 %v4000_v52  ;;  %2815 = vmatpush.bf16.xpose.msra.mxu1 %v4004_v53  ;;  %v4543_v52 = vld [vmem:[%s5776_s19 + $0x660] sm:$0xf] }
 0x1b6   : > { %2828 = vmatpush.bf16.xpose.msra.mxu2 %v4008_v54  ;;  %v4957_v53 = vld [vmem:[%s5776_s19 + $0x75c] sm:$0xf0]  ;;  %v4925_v54 = vld [vmem:[%s5776_s19 + $0x664] sm:$0xf] }
 0x1b7   : > { %2841 = vmatpush.bf16.xpose.msra.mxu3 %v4012_v55  ;;  %v4545_v55 = vld [vmem:[%s5776_s19 + $0x760] sm:$0xf0]  ;;  %v4544_v5 = vor.u32 %v4957_v53, %v4543_v52  ;;  %v4559_v52 = vld [vmem:[%s5776_s19 + $0x670] sm:$0xf] }
 0x1b8   : > { %v4548_v6 = vor.u32 %v4925_v54, %v4545_v55  ;;  %v4959_v53 = vld [vmem:[%s5776_s19 + $0x76c] sm:$0xf0]  ;;  %v4927_v54 = vld [vmem:[%s5776_s19 + $0x674] sm:$0xf] }
 0x1bd   : > { %2803 = vmatpush.bf16.xpose.msra.mxu0 %v3744_v3  ;;  %2816 = vmatpush.bf16.xpose.msra.mxu1 %v3748_v7  ;;  %v903_v3 = vld [vmem:[%s5774_s18 + $0x18] sm:$0xff]  ;;  %v4552_v7 = vor.u32 %v4958_v57, %v4551_v56  ;;  %v4567_v57 = vld [vmem:[%s5776_s19 + $0x678] sm:$0xf] }
 0x1be   : > { %2829 = vmatpush.bf16.xpose.msra.mxu2 %v3752_v8  ;;  %1195 = vst [vmem:[#allocation1] ss:$9 sm:$0xff] %v903_v3  ;;  %v4556_v8 = vor.u32 %v4926_v58, %v4553_v60  ;;  %v4561_v56 = vld [vmem:[%s5776_s19 + $0x770] sm:$0xf0]  ;;  %v4960_v58 = vld [vmem:[%s5776_s19 + $0x774] sm:$0xf0]  ;;  %v3784_v60 = vor.u32 %v4766_v49, %v3783_v48 }
 0x1bf   : > { %2842 = vmatpush.bf16.xpose.msra.mxu3 %v3756_v11  ;;  %v4893_v11 = vld [vmem:[%s5776_s19 + $0x55c] sm:$0xf0]  ;;  %v4768_v48 = vld [vmem:[%s5776_s19 + $0x174] sm:$0xf0] }
 0x1c0   : > { %v4288_v20 = vor.u32 %v4893_v11, %v4287_v10  ;;  %v4311_v10 = vld [vmem:[%s5776_s19 + $0x478] sm:$0xf] }
 0x1c1   : > { %v2597_v9 = vpop.f32.mrf.mxu0 }
 0x1c4   : > { %2804 = vmatmul.bf16.vlgmr.msra.gmra.mxu0 %v1186_v21  ;;  %2817 = vmatmul.bf16.vlgmr.msra.gmra.mxu1 %v1187_v24 }
 0x1c5   : > { %2852 = vmatpush.bf16.xpose.msrb.mxu0 %v4528_v12  ;;  %2865 = vmatpush.bf16.xpose.msrb.mxu1 %v4532_v13  ;;  %v4861_v12 = vld [vmem:[%s5776_s19 + $0x464] sm:$0xf]  ;;  %v2610_v13 = vpop.f32.mrf.mxu1  ;;  %v1199_v19 = vld [vmem:[#allocation1 + $0x1b] sm:$0xff] }
 0x1c6   : > { %2878 = vmatpush.bf16.xpose.msrb.mxu2 %v4536_v14  ;;  %2843 = vmatmul.bf16.vlgmr.msra.gmra.mxu3 %v1189_v27  ;;  %v4289_v14 = vld [vmem:[%s5776_s19 + $0x560] sm:$0xf0]  ;;  %v2611_v17 = vadd.f32 %v2610_v13, %v2597_v9  ;;  %v4305_v9 = vld [vmem:[%s5776_s19 + $0x570] sm:$0xf0]  ;;  %v1198_v13 = vld [vmem:[#allocation1 + $0x12] sm:$0xff] }
 0x1c7   : > { %2891 = vmatpush.bf16.xpose.msrb.mxu3 %v4540_v15  ;;  %2830 = vmatmul.bf16.vlgmr.msra.gmra.mxu2 %v1188_v22  ;;  %v4295_v15 = vld [vmem:[%s5776_s19 + $0x468] sm:$0xf]  ;;  %v4292_v21 = vor.u32 %v4861_v12, %v4289_v14  ;;  %v1196_v12 = vld [vmem:[#allocation1] sm:$0xff] }
 0x1c8   : > { %v4296_v22 = vor.u32 %v4894_v16, %v4295_v15  ;;  %v4896_v14 = vld [vmem:[%s5776_s19 + $0x574] sm:$0xf0]  ;;  %v1197_v15 = vld [vmem:[#allocation1 + $0x9] sm:$0xff] }
 0x1c9   : > { %v2636_v26 = vpop.f32.mrf.mxu3  ;;  %v2599_v27 = vpop.f32.mrf.mxu0  ;;  %v4864_v16 = vld [vmem:[%s5776_s19 + $0x47c] sm:$0xf] }
 0x1ca   : > { %v2623_v24 = vpop.f32.mrf.mxu2 }
 0x1cb   : > { %v2624_v25 = vadd.f32 %v2623_v24, %v2611_v17  ;;  %v4313_v17 = vld [vmem:[%s5776_s19 + $0x578] sm:$0xf0] }
 0x1cd   : > { %2853 = vmatpush.bf16.xpose.msrb.mxu0 %v4272_v28  ;;  %2866 = vmatpush.bf16.xpose.msrb.mxu1 %v4276_v29  ;;  %v4031_v28 = vld [vmem:[%s5776_s19 + $0x260] sm:$0xf]  ;;  %v2637_v35 = vadd.f32 %v2636_v26, %v2624_v25 }
 0x1ce   : > { %2879 = vmatpush.bf16.xpose.msrb.mxu2 %v4280_v30  ;;  %v4829_v29 = vld [vmem:[%s5776_s19 + $0x35c] sm:$0xf0]  ;;  %v4797_v30 = vld [vmem:[%s5776_s19 + $0x264] sm:$0xf] }
 0x1cf   : > { %2892 = vmatpush.bf16.xpose.msrb.mxu3 %v4284_v31  ;;  %v2612_v31 = vpop.f32.mrf.mxu1  ;;  %v4032_v38 = vor.u32 %v4829_v29, %v4031_v28  ;;  %v4036_v39 = vor.u32 %v4797_v30, %v4033_v32  ;;  %v4047_v28 = vld [vmem:[%s5776_s19 + $0x270] sm:$0xf]  ;;  %v4799_v30 = vld [vmem:[%s5776_s19 + $0x274] sm:$0xf] }
 0x1d0   : > { %v4831_v29 = vld [vmem:[%s5776_s19 + $0x36c] sm:$0xf0] }
 0x1d1   : > { %v2638_v45 = vpop.f32.mrf.mxu3 }
 0x1d2   : > { %v4735_v45 = vld [vmem:[%s5776_s19 + $0x74] sm:$0xf] }
 0x1d5   : > { %2854 = vmatpush.bf16.xpose.msrb.mxu0 %v4016_v40  ;;  %2867 = vmatpush.bf16.xpose.msrb.mxu1 %v4020_v41  ;;  %v4040_v40 = vor.u32 %v4830_v34, %v4039_v33  ;;  %v4044_v41 = vor.u32 %v4798_v36, %v4041_v37  ;;  %v4049_v33 = vld [vmem:[%s5776_s19 + $0x370] sm:$0xf0]  ;;  %v4055_v34 = vld [vmem:[%s5776_s19 + $0x278] sm:$0xf]  ;;  %v4800_v36 = vld [vmem:[%s5776_s19 + $0x27c] sm:$0xf] }
 0x1d6   : > { %2880 = vmatpush.bf16.xpose.msrb.mxu2 %v4024_v42  ;;  %v2625_v42 = vpop.f32.mrf.mxu2  ;;  %v4057_v37 = vld [vmem:[%s5776_s19 + $0x378] sm:$0xf0] }
 0x1d7   : > { %2893 = vmatpush.bf16.xpose.msrb.mxu3 %v4028_v43  ;;  %v3775_v43 = vld [vmem:[%s5776_s19 + $0x60] sm:$0xf]  ;;  %v3791_v42 = vld [vmem:[%s5776_s19 + $0x70] sm:$0xf] }
 0x1d8   : > { %v3776_v55 = vor.u32 %v4765_v44, %v3775_v43  ;;  %v4767_v43 = vld [vmem:[%s5776_s19 + $0x16c] sm:$0xf0] }
 0x1dd   : > { %2855 = vmatpush.bf16.xpose.msrb.mxu0 %v3760_v59  ;;  %2868 = vmatpush.bf16.xpose.msrb.mxu1 %v3764_v63  ;;  %v3780_v59 = vor.u32 %v4733_v46, %v3777_v47  ;;  %v3788_v63 = vor.u32 %v4734_v50, %v3785_v51  ;;  %v3793_v46 = vld [vmem:[%s5776_s19 + $0x170] sm:$0xf0]  ;;  %v3799_v47 = vld [vmem:[%s5776_s19 + $0x78] sm:$0xf]  ;;  %v4736_v50 = vld [vmem:[%s5776_s19 + $0x7c] sm:$0xf] }
 0x1de   : > { %2881 = vmatpush.bf16.xpose.msrb.mxu2 %v3768_v0  ;;  %v4560_v0 = vor.u32 %v4959_v53, %v4559_v52  ;;  %v3801_v51 = vld [vmem:[%s5776_s19 + $0x178] sm:$0xf0]  ;;  %v4575_v52 = vld [vmem:[%s5776_s19 + $0x680] sm:$0xf] }
 0x1df   : > { %2894 = vmatpush.bf16.xpose.msrb.mxu3 %v3772_v4  ;;  %v4961_v53 = vld [vmem:[%s5776_s19 + $0x77c] sm:$0xf0] }
 0x1e1   : > { %v2649_v4 = vpop.f32.mrf.mxu0  ;;  %v2662_v11 = vpop.f32.mrf.mxu1 }
 0x1e4   : > { %2856 = vmatmul.bf16.vlgmr.msrb.gmra.mxu0 %v1190_v61  ;;  %2869 = vmatmul.bf16.vlgmr.msrb.gmra.mxu1 %v1191_v1  ;;  %v4928_v61 = vld [vmem:[%s5776_s19 + $0x67c] sm:$0xf]  ;;  %v4564_v1 = vor.u32 %v4927_v54, %v4561_v56  ;;  %v4929_v54 = vld [vmem:[%s5776_s19 + $0x684] sm:$0xf]  ;;  %v4583_v56 = vld [vmem:[%s5776_s19 + $0x688] sm:$0xf] }
 0x1e5   : > { %2904 = vmatpush.bf16.xpose.msra.mxu0 %v4544_v5  ;;  %2917 = vmatpush.bf16.xpose.msra.mxu1 %v4548_v6  ;;  %v4303_v5 = vld [vmem:[%s5776_s19 + $0x470] sm:$0xf] }
 0x1e6   : > { %2930 = vmatpush.bf16.xpose.msra.mxu2 %v4552_v7  ;;  %2895 = vmatmul.bf16.vlgmr.msrb.gmra.mxu3 %v1193_v2  ;;  %v4568_v2 = vor.u32 %v4960_v58, %v4567_v57  ;;  %v4895_v6 = vld [vmem:[%s5776_s19 + $0x56c] sm:$0xf0]  ;;  %v2650_v7 = vadd.f32 %v2649_v4, %v2637_v35  ;;  %v4832_v35 = vld [vmem:[%s5776_s19 + $0x374] sm:$0xf0]  ;;  %v4962_v57 = vld [vmem:[%s5776_s19 + $0x784] sm:$0xf0]  ;;  %v3804_v4 = vor.u32 %v4736_v50, %v3801_v51 }
 0x1e7   : > { %2943 = vmatpush.bf16.xpose.msra.mxu3 %v4556_v8  ;;  %2882 = vmatmul.bf16.vlgmr.msrb.gmra.mxu2 %v1192_v62  ;;  %v4569_v62 = vld [vmem:[%s5776_s19 + $0x778] sm:$0xf0]  ;;  %v4863_v8 = vld [vmem:[%s5776_s19 + $0x474] sm:$0xf]  ;;  %v4930_v58 = vld [vmem:[%s5776_s19 + $0x68c] sm:$0xf] }
 0x1e8   : > { %v4572_v3 = vor.u32 %v4928_v61, %v4569_v62  ;;  %v2663_v18 = vadd.f32 %v2662_v11, %v2650_v7  ;;  %v1200_v61 = vld [vmem:[#allocation1 + $0x24] sm:$0xff]  ;;  %v1202_v62 = vld [vmem:[#allocation1 + $0x36] sm:$0xff]  ;;  %v4584_v7 = vor.u32 %v4962_v57, %v4583_v56  ;;  %v4770_v50 = vld [vmem:[%s5776_s19 + $0x184] sm:$0xf0] }
 0x1e9   : > { %v2688_v26 = vpop.f32.mrf.mxu3  ;;  %v2651_v27 = vpop.f32.mrf.mxu0  ;;  %v4738_v51 = vld [vmem:[%s5776_s19 + $0x8c] sm:$0xf]  ;;  %v4593_v57 = vld [vmem:[%s5776_s19 + $0x790] sm:$0xf0] }
 0x1ea   : > { %v2675_v24 = vpop.f32.mrf.mxu2  ;;  %v2664_v31 = vpop.f32.mrf.mxu1 }
 0x1eb   : > { %v2676_v25 = vadd.f32 %v2675_v24, %v2663_v18  ;;  %v4801_v31 = vld [vmem:[%s5776_s19 + $0x284] sm:$0xf] }
 0x1ed   : > { %2905 = vmatpush.bf16.xpose.msra.mxu0 %v4288_v20  ;;  %2918 = vmatpush.bf16.xpose.msra.mxu1 %v4292_v21  ;;  %v4304_v20 = vor.u32 %v4895_v6, %v4303_v5  ;;  %v4308_v21 = vor.u32 %v4863_v8, %v4305_v9  ;;  %v2689_v32 = vadd.f32 %v2688_v26, %v2676_v25 }
 0x1ee   : > { %2931 = vmatpush.bf16.xpose.msra.mxu2 %v4296_v22  ;;  %v4312_v22 = vor.u32 %v4896_v14, %v4311_v10  ;;  %v4576_v5 = vor.u32 %v4961_v53, %v4575_v52  ;;  %v4865_v14 = vld [vmem:[%s5776_s19 + $0x484] sm:$0xf]  ;;  %v3817_v52 = vld [vmem:[%s5776_s19 + $0x188] sm:$0xf0]  ;;  %v4591_v53 = vld [vmem:[%s5776_s19 + $0x690] sm:$0xf] }
 0x1ef   : > { %2944 = vmatpush.bf16.xpose.msra.mxu3 %v4300_v23  ;;  %v4316_v23 = vor.u32 %v4864_v16, %v4313_v17  ;;  %v4327_v16 = vld [vmem:[%s5776_s19 + $0x488] sm:$0xf] }
 0x1f0   : > { %v4898_v17 = vld [vmem:[%s5776_s19 + $0x584] sm:$0xf0] }
 0x1f1   : > { %v2690_v49 = vpop.f32.mrf.mxu3 }
 0x1f2   : > { %v2677_v44 = vpop.f32.mrf.mxu2  ;;  %v3815_v49 = vld [vmem:[%s5776_s19 + $0x88] sm:$0xf] }
 0x1f3   : > { %v3807_v44 = vld [vmem:[%s5776_s19 + $0x80] sm:$0xf] }
 0x1f5   : > { %2906 = vmatpush.bf16.xpose.msra.mxu0 %v4032_v38  ;;  %2919 = vmatpush.bf16.xpose.msra.mxu1 %v4036_v39  ;;  %v4048_v38 = vor.u32 %v4831_v29, %v4047_v28  ;;  %v4052_v39 = vor.u32 %v4799_v30, %v4049_v33  ;;  %v4063_v29 = vld [vmem:[%s5776_s19 + $0x280] sm:$0xf] }
 0x1f6   : > { %2932 = vmatpush.bf16.xpose.msra.mxu2 %v4040_v40  ;;  %v4056_v40 = vor.u32 %v4832_v35, %v4055_v34  ;;  %v4833_v30 = vld [vmem:[%s5776_s19 + $0x37c] sm:$0xf0]  ;;  %v4065_v34 = vld [vmem:[%s5776_s19 + $0x380] sm:$0xf0]  ;;  %v4071_v35 = vld [vmem:[%s5776_s19 + $0x288] sm:$0xf] }
 0x1f7   : > { %2945 = vmatpush.bf16.xpose.msra.mxu3 %v4044_v41  ;;  %v4060_v41 = vor.u32 %v4800_v36, %v4057_v37  ;;  %v4834_v36 = vld [vmem:[%s5776_s19 + $0x384] sm:$0xf0]  ;;  %v4802_v37 = vld [vmem:[%s5776_s19 + $0x28c] sm:$0xf] }
 0x1fd   : > { %2907 = vmatpush.bf16.xpose.msra.mxu0 %v3776_v55  ;;  %2920 = vmatpush.bf16.xpose.msra.mxu1 %v3780_v59  ;;  %v4577_v55 = vld [vmem:[%s5776_s19 + $0x780] sm:$0xf0]  ;;  %v3792_v59 = vor.u32 %v4767_v43, %v3791_v42 }
 0x1fe   : > { %2933 = vmatpush.bf16.xpose.msra.mxu2 %v3784_v60  ;;  %v4585_v60 = vld [vmem:[%s5776_s19 + $0x788] sm:$0xf0]  ;;  %v4580_v6 = vor.u32 %v4929_v54, %v4577_v55  ;;  %v4963_v54 = vld [vmem:[%s5776_s19 + $0x78c] sm:$0xf0]  ;;  %v4931_v55 = vld [vmem:[%s5776_s19 + $0x694] sm:$0xf] }
 0x1ff   : > { %2946 = vmatpush.bf16.xpose.msra.mxu3 %v3788_v63  ;;  %v3796_v63 = vor.u32 %v4735_v45, %v3793_v46  ;;  %v4588_v8 = vor.u32 %v4930_v58, %v4585_v60  ;;  %v4769_v45 = vld [vmem:[%s5776_s19 + $0x17c] sm:$0xf0]  ;;  %v4599_v58 = vld [vmem:[%s5776_s19 + $0x698] sm:$0xf] }
 0x200   : > { %v3808_v56 = vor.u32 %v4769_v45, %v3807_v44  ;;  %v4771_v44 = vld [vmem:[%s5776_s19 + $0x18c] sm:$0xf0] }
 0x201   : > { %v2701_v9 = vpop.f32.mrf.mxu0  ;;  %v2714_v11 = vpop.f32.mrf.mxu1 }
 0x202   : > { %v2702_v10 = vadd.f32 %v2701_v9, %v2689_v32 }
 0x204   : > { %2908 = vmatmul.bf16.vlgmr.msra.gmra.mxu0 %v1196_v12  ;;  %2921 = vmatmul.bf16.vlgmr.msra.gmra.mxu1 %v1197_v15  ;;  %v4319_v12 = vld [vmem:[%s5776_s19 + $0x480] sm:$0xf]  ;;  %v4321_v15 = vld [vmem:[%s5776_s19 + $0x580] sm:$0xf0]  ;;  %v2715_v18 = vadd.f32 %v2714_v11, %v2702_v10  ;;  %v4867_v10 = vld [vmem:[%s5776_s19 + $0x494] sm:$0xf] }
 0x205   : > { %2956 = vmatpush.bf16.xpose.msrb.mxu0 %v4560_v0  ;;  %2969 = vmatpush.bf16.xpose.msrb.mxu1 %v4564_v1  ;;  %v3800_v0 = vor.u32 %v4768_v48, %v3799_v47  ;;  %v1201_v1 = vld [vmem:[#allocation1 + $0x2d] sm:$0xff]  ;;  %v4337_v11 = vld [vmem:[%s5776_s19 + $0x590] sm:$0xf0] }
 0x206   : > { %2982 = vmatpush.bf16.xpose.msrb.mxu2 %v4568_v2  ;;  %2947 = vmatmul.bf16.vlgmr.msra.gmra.mxu3 %v1199_v19  ;;  %v1203_v2 = vld [vmem:[#allocation1 + $0x3f] sm:$0xff]  ;;  %v4866_v19 = vld [vmem:[%s5776_s19 + $0x48c] sm:$0xf]  ;;  %v4737_v47 = vld [vmem:[%s5776_s19 + $0x84] sm:$0xf] }
 0x207   : > { %2995 = vmatpush.bf16.xpose.msrb.mxu3 %v4572_v3  ;;  %2934 = vmatmul.bf16.vlgmr.msra.gmra.mxu2 %v1198_v13  ;;  %v904_v3 = vld [vmem:[%s5774_s18 + $0x20] sm:$0xff]  ;;  %v4897_v13 = vld [vmem:[%s5776_s19 + $0x57c] sm:$0xf0]  ;;  %v3809_v48 = vld [vmem:[%s5776_s19 + $0x180] sm:$0xf0] }
 0x208   : > { %1205 = vst [vmem:[#allocation1] ss:$9 sm:$0xff] %v904_v3  ;;  %v3812_v60 = vor.u32 %v4737_v47, %v3809_v48  ;;  %v3825_v47 = vld [vmem:[%s5776_s19 + $0x190] sm:$0xf0]  ;;  %v3831_v48 = vld [vmem:[%s5776_s19 + $0x98] sm:$0xf] }
 0x209   : > { %v2740_v27 = vpop.f32.mrf.mxu3  ;;  %v2703_v28 = vpop.f32.mrf.mxu0 }
 0x20a   : > { %v2727_v25 = vpop.f32.mrf.mxu2  ;;  %v2716_v32 = vpop.f32.mrf.mxu1 }
 0x20b   : > { %v2728_v26 = vadd.f32 %v2727_v25, %v2715_v18  ;;  %v4868_v18 = vld [vmem:[%s5776_s19 + $0x49c] sm:$0xf] }
 0x20d   : > { %2957 = vmatpush.bf16.xpose.msrb.mxu0 %v4304_v20  ;;  %2970 = vmatpush.bf16.xpose.msrb.mxu1 %v4308_v21  ;;  %v4329_v20 = vld [vmem:[%s5776_s19 + $0x588] sm:$0xf0]  ;;  %v4320_v21 = vor.u32 %v4897_v13, %v4319_v12  ;;  %v2741_v33 = vadd.f32 %v2740_v27, %v2728_v26  ;;  %v4343_v12 = vld [vmem:[%s5776_s19 + $0x498] sm:$0xf] }
 0x20e   : > { %2983 = vmatpush.bf16.xpose.msrb.mxu2 %v4312_v22  ;;  %v4324_v22 = vor.u32 %v4865_v14, %v4321_v15  ;;  %v4332_v24 = vor.u32 %v4866_v19, %v4329_v20  ;;  %v4900_v15 = vld [vmem:[%s5776_s19 + $0x594] sm:$0xf0]  ;;  %v4345_v19 = vld [vmem:[%s5776_s19 + $0x598] sm:$0xf0] }
 0x20f   : > { %2996 = vmatpush.bf16.xpose.msrb.mxu3 %v4316_v23  ;;  %v4328_v23 = vor.u32 %v4898_v17, %v4327_v16  ;;  %v1206_v13 = vld [vmem:[#allocation1] sm:$0xff]  ;;  %v1208_v14 = vld [vmem:[#allocation1 + $0x12] sm:$0xff]  ;;  %v1207_v17 = vld [vmem:[#allocation1 + $0x9] sm:$0xff] }
 0x210   : > { %v1209_v20 = vld [vmem:[#allocation1 + $0x1b] sm:$0xff] }
 0x211   : > { %v2742_v46 = vpop.f32.mrf.mxu3 }
 0x212   : > { %v2729_v43 = vpop.f32.mrf.mxu2  ;;  %v4739_v46 = vld [vmem:[%s5776_s19 + $0x94] sm:$0xf] }
 0x213   : > { %v3823_v43 = vld [vmem:[%s5776_s19 + $0x90] sm:$0xf] }
 0x215   : > { %2958 = vmatpush.bf16.xpose.msrb.mxu0 %v4048_v38  ;;  %2971 = vmatpush.bf16.xpose.msrb.mxu1 %v4052_v39  ;;  %v4073_v38 = vld [vmem:[%s5776_s19 + $0x388] sm:$0xf0]  ;;  %v4064_v39 = vor.u32 %v4833_v30, %v4063_v29  ;;  %v4079_v29 = vld [vmem:[%s5776_s19 + $0x290] sm:$0xf] }
 0x216   : > { %2984 = vmatpush.bf16.xpose.msrb.mxu2 %v4056_v40  ;;  %v4068_v40 = vor.u32 %v4801_v31, %v4065_v34  ;;  %v4076_v42 = vor.u32 %v4802_v37, %v4073_v38  ;;  %v4835_v30 = vld [vmem:[%s5776_s19 + $0x38c] sm:$0xf0]  ;;  %v4803_v31 = vld [vmem:[%s5776_s19 + $0x294] sm:$0xf]  ;;  %v4804_v37 = vld [vmem:[%s5776_s19 + $0x29c] sm:$0xf] }
 0x217   : > { %2997 = vmatpush.bf16.xpose.msrb.mxu3 %v4060_v41  ;;  %v4072_v41 = vor.u32 %v4834_v36, %v4071_v35  ;;  %v4081_v34 = vld [vmem:[%s5776_s19 + $0x390] sm:$0xf0]  ;;  %v4087_v35 = vld [vmem:[%s5776_s19 + $0x298] sm:$0xf]  ;;  %v4089_v38 = vld [vmem:[%s5776_s19 + $0x398] sm:$0xf0] }
 0x218   : > { %v4836_v36 = vld [vmem:[%s5776_s19 + $0x394] sm:$0xf0] }
 0x21d   : > { %2959 = vmatpush.bf16.xpose.msrb.mxu0 %v3792_v59  ;;  %2972 = vmatpush.bf16.xpose.msrb.mxu1 %v3796_v63  ;;  %v4964_v59 = vld [vmem:[%s5776_s19 + $0x794] sm:$0xf0]  ;;  %v4601_v63 = vld [vmem:[%s5776_s19 + $0x798] sm:$0xf0] }
 0x21e   : > { %2985 = vmatpush.bf16.xpose.msrb.mxu2 %v3800_v0  ;;  %v3820_v0 = vor.u32 %v4738_v51, %v3817_v52  ;;  %v4600_v3 = vor.u32 %v4964_v59, %v4599_v58  ;;  %v4740_v51 = vld [vmem:[%s5776_s19 + $0x9c] sm:$0xf]  ;;  %v4966_v58 = vld [vmem:[%s5776_s19 + $0x7a4] sm:$0xf0]  ;;  %v4934_v59 = vld [vmem:[%s5776_s19 + $0x6ac] sm:$0xf] }
 0x21f   : > { %2998 = vmatpush.bf16.xpose.msrb.mxu3 %v3804_v4  ;;  %v3833_v52 = vld [vmem:[%s5776_s19 + $0x198] sm:$0xf0] }
 0x221   : > { %v2766_v9 = vpop.f32.mrf.mxu1 }
 0x224   : > { %2960 = vmatmul.bf16.vlgmr.msrb.gmra.mxu0 %v1200_v61  ;;  %2973 = vmatmul.bf16.vlgmr.msrb.gmra.mxu1 %v1201_v1  ;;  %v3816_v61 = vor.u32 %v4770_v50, %v3815_v49  ;;  %v4592_v1 = vor.u32 %v4963_v54, %v4591_v53  ;;  %v4772_v49 = vld [vmem:[%s5776_s19 + $0x194] sm:$0xf0]  ;;  %v4607_v53 = vld [vmem:[%s5776_s19 + $0x6a0] sm:$0xf] }
 0x225   : > { %3008 = vmatpush.bf16.xpose.msra.mxu0 %v4576_v5  ;;  %3021 = vmatpush.bf16.xpose.msra.mxu1 %v4580_v6  ;;  %v2753_v5 = vpop.f32.mrf.mxu0  ;;  %v4335_v6 = vld [vmem:[%s5776_s19 + $0x490] sm:$0xf]  ;;  %v4965_v54 = vld [vmem:[%s5776_s19 + $0x79c] sm:$0xf0] }
 0x226   : > { %3034 = vmatpush.bf16.xpose.msra.mxu2 %v4584_v7  ;;  %2999 = vmatmul.bf16.vlgmr.msrb.gmra.mxu3 %v1203_v2  ;;  %v4596_v2 = vor.u32 %v4931_v55, %v4593_v57  ;;  %v4899_v7 = vld [vmem:[%s5776_s19 + $0x58c] sm:$0xf0]  ;;  %v4933_v55 = vld [vmem:[%s5776_s19 + $0x6a4] sm:$0xf]  ;;  %v4615_v57 = vld [vmem:[%s5776_s19 + $0x6a8] sm:$0xf] }
 0x227   : > { %3047 = vmatpush.bf16.xpose.msra.mxu3 %v4588_v8  ;;  %2986 = vmatmul.bf16.vlgmr.msrb.gmra.mxu2 %v1202_v62  ;;  %v4932_v62 = vld [vmem:[%s5776_s19 + $0x69c] sm:$0xf]  ;;  %v2754_v8 = vadd.f32 %v2753_v5, %v2741_v33  ;;  %v3836_v5 = vor.u32 %v4740_v51, %v3833_v52  ;;  %v4774_v51 = vld [vmem:[%s5776_s19 + $0x1a4] sm:$0xf0]  ;;  %v4742_v52 = vld [vmem:[%s5776_s19 + $0xac] sm:$0xf] }
 0x228   : > { %v4604_v4 = vor.u32 %v4932_v62, %v4601_v63  ;;  %v1210_v62 = vld [vmem:[#allocation1 + $0x24] sm:$0xff]  ;;  %v1212_v63 = vld [vmem:[#allocation1 + $0x36] sm:$0xff] }
 0x229   : > { %v2767_v16 = vadd.f32 %v2766_v9, %v2754_v8  ;;  %v2792_v27 = vpop.f32.mrf.mxu3  ;;  %v2768_v32 = vpop.f32.mrf.mxu1  ;;  %v4616_v8 = vor.u32 %v4966_v58, %v4615_v57  ;;  %v4625_v58 = vld [vmem:[%s5776_s19 + $0x7b0] sm:$0xf0] }
 0x22a   : > { %v2779_v25 = vpop.f32.mrf.mxu2  ;;  %v4805_v32 = vld [vmem:[%s5776_s19 + $0x2a4] sm:$0xf] }
 0x22b   : > { %v2780_v26 = vadd.f32 %v2779_v25, %v2767_v16  ;;  %v4353_v16 = vld [vmem:[%s5776_s19 + $0x5a0] sm:$0xf0] }
 0x22d   : > { %3009 = vmatpush.bf16.xpose.msra.mxu0 %v4320_v21  ;;  %3022 = vmatpush.bf16.xpose.msra.mxu1 %v4324_v22  ;;  %v4336_v21 = vor.u32 %v4899_v7, %v4335_v6  ;;  %v4340_v22 = vor.u32 %v4867_v10, %v4337_v11  ;;  %v2755_v28 = vpop.f32.mrf.mxu0  ;;  %v2793_v33 = vadd.f32 %v2792_v27, %v2780_v26 }
 0x22e   : > { %3035 = vmatpush.bf16.xpose.msra.mxu2 %v4328_v23  ;;  %v4344_v23 = vor.u32 %v4900_v15, %v4343_v12  ;;  %v4608_v6 = vor.u32 %v4965_v54, %v4607_v53  ;;  %v4869_v15 = vld [vmem:[%s5776_s19 + $0x4a4] sm:$0xf]  ;;  %v3849_v53 = vld [vmem:[%s5776_s19 + $0x1a8] sm:$0xf0]  ;;  %v4623_v54 = vld [vmem:[%s5776_s19 + $0x6b0] sm:$0xf] }
 0x22f   : > { %3048 = vmatpush.bf16.xpose.msra.mxu3 %v4332_v24  ;;  %v4348_v24 = vor.u32 %v4868_v18, %v4345_v19  ;;  %v4902_v18 = vld [vmem:[%s5776_s19 + $0x5a4] sm:$0xf0] }
 0x231   : > { %v2794_v50 = vpop.f32.mrf.mxu3 }
 0x232   : > { %v2781_v45 = vpop.f32.mrf.mxu2  ;;  %v3847_v50 = vld [vmem:[%s5776_s19 + $0xa8] sm:$0xf] }
 0x233   : > { %v3839_v45 = vld [vmem:[%s5776_s19 + $0xa0] sm:$0xf] }
 0x235   : > { %3010 = vmatpush.bf16.xpose.msra.mxu0 %v4064_v39  ;;  %3023 = vmatpush.bf16.xpose.msra.mxu1 %v4068_v40  ;;  %v4080_v39 = vor.u32 %v4835_v30, %v4079_v29  ;;  %v4084_v40 = vor.u32 %v4803_v31, %v4081_v34  ;;  %v4095_v30 = vld [vmem:[%s5776_s19 + $0x2a0] sm:$0xf] }
 0x236   : > { %3036 = vmatpush.bf16.xpose.msra.mxu2 %v4072_v41  ;;  %v4088_v41 = vor.u32 %v4836_v36, %v4087_v35  ;;  %v4837_v31 = vld [vmem:[%s5776_s19 + $0x39c] sm:$0xf0]  ;;  %v4097_v35 = vld [vmem:[%s5776_s19 + $0x3a0] sm:$0xf0]  ;;  %v4103_v36 = vld [vmem:[%s5776_s19 + $0x2a8] sm:$0xf] }
 0x237   : > { %3049 = vmatpush.bf16.xpose.msra.mxu3 %v4076_v42  ;;  %v4092_v42 = vor.u32 %v4804_v37, %v4089_v38  ;;  %v4838_v37 = vld [vmem:[%s5776_s19 + $0x3a4] sm:$0xf0]  ;;  %v4806_v38 = vld [vmem:[%s5776_s19 + $0x2ac] sm:$0xf] }
 0x23d   : > { %3011 = vmatpush.bf16.xpose.msra.mxu0 %v3808_v56  ;;  %3024 = vmatpush.bf16.xpose.msra.mxu1 %v3812_v60  ;;  %v4609_v56 = vld [vmem:[%s5776_s19 + $0x7a0] sm:$0xf0]  ;;  %v3824_v60 = vor.u32 %v4771_v44, %v3823_v43 }
 0x23e   : > { %3037 = vmatpush.bf16.xpose.msra.mxu2 %v3816_v61  ;;  %v4617_v61 = vld [vmem:[%s5776_s19 + $0x7a8] sm:$0xf0]  ;;  %v4612_v7 = vor.u32 %v4933_v55, %v4609_v56  ;;  %v4967_v55 = vld [vmem:[%s5776_s19 + $0x7ac] sm:$0xf0]  ;;  %v4935_v56 = vld [vmem:[%s5776_s19 + $0x6b4] sm:$0xf] }
 0x23f   : > { %3050 = vmatpush.bf16.xpose.msra.mxu3 %v3820_v0  ;;  %v3828_v0 = vor.u32 %v4739_v46, %v3825_v47  ;;  %v4620_v9 = vor.u32 %v4934_v59, %v4617_v61  ;;  %v4773_v46 = vld [vmem:[%s5776_s19 + $0x19c] sm:$0xf0]  ;;  %v4631_v59 = vld [vmem:[%s5776_s19 + $0x6b8] sm:$0xf] }
 0x240   : > { %v3840_v57 = vor.u32 %v4773_v46, %v3839_v45  ;;  %v4775_v45 = vld [vmem:[%s5776_s19 + $0x1ac] sm:$0xf0] }
 0x241   : > { %v2805_v10 = vpop.f32.mrf.mxu0  ;;  %v2818_v12 = vpop.f32.mrf.mxu1 }
 0x242   : > { %v2806_v11 = vadd.f32 %v2805_v10, %v2793_v33 }
 0x244   : > { %3012 = vmatmul.bf16.vlgmr.msra.gmra.mxu0 %v1206_v13  ;;  %3025 = vmatmul.bf16.vlgmr.msra.gmra.mxu1 %v1207_v17  ;;  %v4351_v13 = vld [vmem:[%s5776_s19 + $0x4a0] sm:$0xf]  ;;  %v4359_v17 = vld [vmem:[%s5776_s19 + $0x4a8] sm:$0xf]  ;;  %v2819_v19 = vadd.f32 %v2818_v12, %v2806_v11  ;;  %v4871_v11 = vld [vmem:[%s5776_s19 + $0x4b4] sm:$0xf] }
 0x245   : > { %3060 = vmatpush.bf16.xpose.msrb.mxu0 %v4592_v1  ;;  %3073 = vmatpush.bf16.xpose.msrb.mxu1 %v4596_v2  ;;  %v3832_v1 = vor.u32 %v4772_v49, %v3831_v48  ;;  %v1211_v2 = vld [vmem:[#allocation1 + $0x2d] sm:$0xff]  ;;  %v4369_v12 = vld [vmem:[%s5776_s19 + $0x5b0] sm:$0xf0] }
 0x246   : > { %3086 = vmatpush.bf16.xpose.msrb.mxu2 %v4600_v3  ;;  %3051 = vmatmul.bf16.vlgmr.msra.gmra.mxu3 %v1209_v20  ;;  %v1213_v3 = vld [vmem:[#allocation1 + $0x3f] sm:$0xff]  ;;  %v4870_v20 = vld [vmem:[%s5776_s19 + $0x4ac] sm:$0xf]  ;;  %v4741_v48 = vld [vmem:[%s5776_s19 + $0xa4] sm:$0xf] }
 0x247   : > { %3099 = vmatpush.bf16.xpose.msrb.mxu3 %v4604_v4  ;;  %3038 = vmatmul.bf16.vlgmr.msra.gmra.mxu2 %v1208_v14  ;;  %v905_v4 = vld [vmem:[%s5774_s18 + $0x28] sm:$0xff] }
 0x248   : > { %1215 = vst [vmem:[#allocation1] ss:$9 sm:$0xff] %v905_v4  ;;  %v4901_v14 = vld [vmem:[%s5776_s19 + $0x59c] sm:$0xf0]  ;;  %v3841_v49 = vld [vmem:[%s5776_s19 + $0x1a0] sm:$0xf0] }
 0x249   : > { %v2844_v28 = vpop.f32.mrf.mxu3  ;;  %v2807_v29 = vpop.f32.mrf.mxu0  ;;  %v3844_v61 = vor.u32 %v4741_v48, %v3841_v49  ;;  %v3857_v48 = vld [vmem:[%s5776_s19 + $0x1b0] sm:$0xf0]  ;;  %v3863_v49 = vld [vmem:[%s5776_s19 + $0xb8] sm:$0xf] }
 0x24a   : > { %v2831_v26 = vpop.f32.mrf.mxu2  ;;  %v2820_v33 = vpop.f32.mrf.mxu1 }
 0x24b   : > { %v2832_v27 = vadd.f32 %v2831_v26, %v2819_v19  ;;  %v4872_v19 = vld [vmem:[%s5776_s19 + $0x4bc] sm:$0xf] }
 0x24d   : > { %3061 = vmatpush.bf16.xpose.msrb.mxu0 %v4336_v21  ;;  %3074 = vmatpush.bf16.xpose.msrb.mxu1 %v4340_v22  ;;  %v4361_v21 = vld [vmem:[%s5776_s19 + $0x5a8] sm:$0xf0]  ;;  %v4352_v22 = vor.u32 %v4901_v14, %v4351_v13  ;;  %v2845_v34 = vadd.f32 %v2844_v28, %v2832_v27  ;;  %v4375_v13 = vld [vmem:[%s5776_s19 + $0x4b8] sm:$0xf] }
 0x24e   : > { %3087 = vmatpush.bf16.xpose.msrb.mxu2 %v4344_v23  ;;  %v4356_v23 = vor.u32 %v4869_v15, %v4353_v16  ;;  %v4364_v25 = vor.u32 %v4870_v20, %v4361_v21  ;;  %v4904_v16 = vld [vmem:[%s5776_s19 + $0x5b4] sm:$0xf0]  ;;  %v4377_v20 = vld [vmem:[%s5776_s19 + $0x5b8] sm:$0xf0] }
 0x24f   : > { %3100 = vmatpush.bf16.xpose.msrb.mxu3 %v4348_v24  ;;  %v4360_v24 = vor.u32 %v4902_v18, %v4359_v17  ;;  %v1216_v14 = vld [vmem:[#allocation1] sm:$0xff]  ;;  %v1218_v15 = vld [vmem:[#allocation1 + $0x12] sm:$0xff]  ;;  %v1217_v18 = vld [vmem:[#allocation1 + $0x9] sm:$0xff] }
 0x250   : > { %v1219_v21 = vld [vmem:[#allocation1 + $0x1b] sm:$0xff] }
 0x251   : > { %v2846_v47 = vpop.f32.mrf.mxu3 }
 0x252   : > { %v2833_v44 = vpop.f32.mrf.mxu2  ;;  %v4743_v47 = vld [vmem:[%s5776_s19 + $0xb4] sm:$0xf] }
 0x253   : > { %v3855_v44 = vld [vmem:[%s5776_s19 + $0xb0] sm:$0xf] }
 0x255   : > { %3062 = vmatpush.bf16.xpose.msrb.mxu0 %v4080_v39  ;;  %3075 = vmatpush.bf16.xpose.msrb.mxu1 %v4084_v40  ;;  %v4105_v39 = vld [vmem:[%s5776_s19 + $0x3a8] sm:$0xf0]  ;;  %v4096_v40 = vor.u32 %v4837_v31, %v4095_v30  ;;  %v4111_v30 = vld [vmem:[%s5776_s19 + $0x2b0] sm:$0xf] }
 0x256   : > { %3088 = vmatpush.bf16.xpose.msrb.mxu2 %v4088_v41  ;;  %v4100_v41 = vor.u32 %v4805_v32, %v4097_v35  ;;  %v4108_v43 = vor.u32 %v4806_v38, %v4105_v39  ;;  %v4839_v31 = vld [vmem:[%s5776_s19 + $0x3ac] sm:$0xf0]  ;;  %v4807_v32 = vld [vmem:[%s5776_s19 + $0x2b4] sm:$0xf]  ;;  %v4808_v38 = vld [vmem:[%s5776_s19 + $0x2bc] sm:$0xf] }
 0x257   : > { %3101 = vmatpush.bf16.xpose.msrb.mxu3 %v4092_v42  ;;  %v4104_v42 = vor.u32 %v4838_v37, %v4103_v36  ;;  %v4113_v35 = vld [vmem:[%s5776_s19 + $0x3b0] sm:$0xf0]  ;;  %v4119_v36 = vld [vmem:[%s5776_s19 + $0x2b8] sm:$0xf]  ;;  %v4121_v39 = vld [vmem:[%s5776_s19 + $0x3b8] sm:$0xf0] }
 0x258   : > { %v4840_v37 = vld [vmem:[%s5776_s19 + $0x3b4] sm:$0xf0] }
 0x25d   : > { %3063 = vmatpush.bf16.xpose.msrb.mxu0 %v3824_v60  ;;  %3076 = vmatpush.bf16.xpose.msrb.mxu1 %v3828_v0  ;;  %v4968_v60 = vld [vmem:[%s5776_s19 + $0x7b4] sm:$0xf0]  ;;  %v4633_v0 = vld [vmem:[%s5776_s19 + $0x7b8] sm:$0xf0] }
 0x25e   : > { %3089 = vmatpush.bf16.xpose.msrb.mxu2 %v3832_v1  ;;  %v3852_v1 = vor.u32 %v4742_v52, %v3849_v53  ;;  %v4632_v4 = vor.u32 %v4968_v60, %v4631_v59  ;;  %v4744_v52 = vld [vmem:[%s5776_s19 + $0xbc] sm:$0xf]  ;;  %v4970_v59 = vld [vmem:[%s5776_s19 + $0x7c4] sm:$0xf0]  ;;  %v4938_v60 = vld [vmem:[%s5776_s19 + $0x6cc] sm:$0xf] }
 0x25f   : > { %3102 = vmatpush.bf16.xpose.msrb.mxu3 %v3836_v5  ;;  %v3865_v53 = vld [vmem:[%s5776_s19 + $0x1b8] sm:$0xf0] }
 0x261   : > { %v2870_v10 = vpop.f32.mrf.mxu1 }
 0x264   : > { %3064 = vmatmul.bf16.vlgmr.msrb.gmra.mxu0 %v1210_v62  ;;  %3077 = vmatmul.bf16.vlgmr.msrb.gmra.mxu1 %v1211_v2  ;;  %v3848_v62 = vor.u32 %v4774_v51, %v3847_v50  ;;  %v4624_v2 = vor.u32 %v4967_v55, %v4623_v54  ;;  %v4776_v50 = vld [vmem:[%s5776_s19 + $0x1b4] sm:$0xf0]  ;;  %v4639_v54 = vld [vmem:[%s5776_s19 + $0x6c0] sm:$0xf] }
 0x265   : > { %3112 = vmatpush.bf16.xpose.msra.mxu0 %v4608_v6  ;;  %3125 = vmatpush.bf16.xpose.msra.mxu1 %v4612_v7  ;;  %v2857_v6 = vpop.f32.mrf.mxu0  ;;  %v4367_v7 = vld [vmem:[%s5776_s19 + $0x4b0] sm:$0xf]  ;;  %v4969_v55 = vld [vmem:[%s5776_s19 + $0x7bc] sm:$0xf0] }
 0x266   : > { %3138 = vmatpush.bf16.xpose.msra.mxu2 %v4616_v8  ;;  %3103 = vmatmul.bf16.vlgmr.msrb.gmra.mxu3 %v1213_v3  ;;  %v4628_v3 = vor.u32 %v4935_v56, %v4625_v58  ;;  %v4903_v8 = vld [vmem:[%s5776_s19 + $0x5ac] sm:$0xf0]  ;;  %v4937_v56 = vld [vmem:[%s5776_s19 + $0x6c4] sm:$0xf]  ;;  %v4647_v58 = vld [vmem:[%s5776_s19 + $0x6c8] sm:$0xf] }
 0x267   : > { %3151 = vmatpush.bf16.xpose.msra.mxu3 %v4620_v9  ;;  %3090 = vmatmul.bf16.vlgmr.msrb.gmra.mxu2 %v1212_v63  ;;  %v4936_v63 = vld [vmem:[%s5776_s19 + $0x6bc] sm:$0xf]  ;;  %v2858_v9 = vadd.f32 %v2857_v6, %v2845_v34  ;;  %v3868_v6 = vor.u32 %v4744_v52, %v3865_v53  ;;  %v4778_v52 = vld [vmem:[%s5776_s19 + $0x1c4] sm:$0xf0]  ;;  %v4746_v53 = vld [vmem:[%s5776_s19 + $0xcc] sm:$0xf] }
 0x268   : > { %v4636_v5 = vor.u32 %v4936_v63, %v4633_v0  ;;  %v1220_v63 = vld [vmem:[#allocation1 + $0x24] sm:$0xff]  ;;  %v1222_v0 = vld [vmem:[#allocation1 + $0x36] sm:$0xff] }
 0x269   : > { %v2871_v17 = vadd.f32 %v2870_v10, %v2858_v9  ;;  %v2896_v28 = vpop.f32.mrf.mxu3  ;;  %v2872_v33 = vpop.f32.mrf.mxu1  ;;  %v4648_v9 = vor.u32 %v4970_v59, %v4647_v58  ;;  %v4657_v59 = vld [vmem:[%s5776_s19 + $0x7d0] sm:$0xf0] }
 0x26a   : > { %v2883_v26 = vpop.f32.mrf.mxu2  ;;  %v4809_v33 = vld [vmem:[%s5776_s19 + $0x2c4] sm:$0xf] }
 0x26b   : > { %v2884_v27 = vadd.f32 %v2883_v26, %v2871_v17  ;;  %v4385_v17 = vld [vmem:[%s5776_s19 + $0x5c0] sm:$0xf0] }
 0x26d   : > { %3113 = vmatpush.bf16.xpose.msra.mxu0 %v4352_v22  ;;  %3126 = vmatpush.bf16.xpose.msra.mxu1 %v4356_v23  ;;  %v4368_v22 = vor.u32 %v4903_v8, %v4367_v7  ;;  %v4372_v23 = vor.u32 %v4871_v11, %v4369_v12  ;;  %v2859_v29 = vpop.f32.mrf.mxu0  ;;  %v2897_v34 = vadd.f32 %v2896_v28, %v2884_v27 }
 0x26e   : > { %3139 = vmatpush.bf16.xpose.msra.mxu2 %v4360_v24  ;;  %v4376_v24 = vor.u32 %v4904_v16, %v4375_v13  ;;  %v4640_v7 = vor.u32 %v4969_v55, %v4639_v54  ;;  %v4873_v16 = vld [vmem:[%s5776_s19 + $0x4c4] sm:$0xf]  ;;  %v3881_v54 = vld [vmem:[%s5776_s19 + $0x1c8] sm:$0xf0]  ;;  %v4655_v55 = vld [vmem:[%s5776_s19 + $0x6d0] sm:$0xf] }
 0x26f   : > { %3152 = vmatpush.bf16.xpose.msra.mxu3 %v4364_v25  ;;  %v4380_v25 = vor.u32 %v4872_v19, %v4377_v20  ;;  %v4906_v19 = vld [vmem:[%s5776_s19 + $0x5c4] sm:$0xf0] }
 0x271   : > { %v2898_v51 = vpop.f32.mrf.mxu3 }
 0x272   : > { %v2885_v46 = vpop.f32.mrf.mxu2  ;;  %v3879_v51 = vld [vmem:[%s5776_s19 + $0xc8] sm:$0xf] }
 0x273   : > { %v3871_v46 = vld [vmem:[%s5776_s19 + $0xc0] sm:$0xf] }
 0x275   : > { %3114 = vmatpush.bf16.xpose.msra.mxu0 %v4096_v40  ;;  %3127 = vmatpush.bf16.xpose.msra.mxu1 %v4100_v41  ;;  %v4112_v40 = vor.u32 %v4839_v31, %v4111_v30  ;;  %v4116_v41 = vor.u32 %v4807_v32, %v4113_v35  ;;  %v4127_v31 = vld [vmem:[%s5776_s19 + $0x2c0] sm:$0xf] }
 0x276   : > { %3140 = vmatpush.bf16.xpose.msra.mxu2 %v4104_v42  ;;  %v4120_v42 = vor.u32 %v4840_v37, %v4119_v36  ;;  %v4841_v32 = vld [vmem:[%s5776_s19 + $0x3bc] sm:$0xf0]  ;;  %v4129_v36 = vld [vmem:[%s5776_s19 + $0x3c0] sm:$0xf0]  ;;  %v4135_v37 = vld [vmem:[%s5776_s19 + $0x2c8] sm:$0xf] }
 0x277   : > { %3153 = vmatpush.bf16.xpose.msra.mxu3 %v4108_v43  ;;  %v4124_v43 = vor.u32 %v4808_v38, %v4121_v39  ;;  %v4842_v38 = vld [vmem:[%s5776_s19 + $0x3c4] sm:$0xf0]  ;;  %v4810_v39 = vld [vmem:[%s5776_s19 + $0x2cc] sm:$0xf] }
 0x27d   : > { %3115 = vmatpush.bf16.xpose.msra.mxu0 %v3840_v57  ;;  %3128 = vmatpush.bf16.xpose.msra.mxu1 %v3844_v61  ;;  %v4641_v57 = vld [vmem:[%s5776_s19 + $0x7c0] sm:$0xf0]  ;;  %v3856_v61 = vor.u32 %v4775_v45, %v3855_v44 }
 0x27e   : > { %3141 = vmatpush.bf16.xpose.msra.mxu2 %v3848_v62  ;;  %v4649_v62 = vld [vmem:[%s5776_s19 + $0x7c8] sm:$0xf0]  ;;  %v4644_v8 = vor.u32 %v4937_v56, %v4641_v57  ;;  %v4971_v56 = vld [vmem:[%s5776_s19 + $0x7cc] sm:$0xf0]  ;;  %v4939_v57 = vld [vmem:[%s5776_s19 + $0x6d4] sm:$0xf] }
 0x27f   : > { %3154 = vmatpush.bf16.xpose.msra.mxu3 %v3852_v1  ;;  %v3860_v1 = vor.u32 %v4743_v47, %v3857_v48  ;;  %v4652_v10 = vor.u32 %v4938_v60, %v4649_v62  ;;  %v4777_v47 = vld [vmem:[%s5776_s19 + $0x1bc] sm:$0xf0]  ;;  %v4663_v60 = vld [vmem:[%s5776_s19 + $0x6d8] sm:$0xf] }
 0x280   : > { %v3872_v58 = vor.u32 %v4777_v47, %v3871_v46  ;;  %v4779_v46 = vld [vmem:[%s5776_s19 + $0x1cc] sm:$0xf0] }
 0x281   : > { %v2909_v11 = vpop.f32.mrf.mxu0  ;;  %v2922_v13 = vpop.f32.mrf.mxu1 }
 0x282   : > { %v2910_v12 = vadd.f32 %v2909_v11, %v2897_v34 }
 0x284   : > { %3116 = vmatmul.bf16.vlgmr.msra.gmra.mxu0 %v1216_v14  ;;  %3129 = vmatmul.bf16.vlgmr.msra.gmra.mxu1 %v1217_v18  ;;  %v4383_v14 = vld [vmem:[%s5776_s19 + $0x4c0] sm:$0xf]  ;;  %v4391_v18 = vld [vmem:[%s5776_s19 + $0x4c8] sm:$0xf]  ;;  %v2923_v20 = vadd.f32 %v2922_v13, %v2910_v12  ;;  %v4875_v12 = vld [vmem:[%s5776_s19 + $0x4d4] sm:$0xf] }
 0x285   : > { %3164 = vmatpush.bf16.xpose.msrb.mxu0 %v4624_v2  ;;  %3177 = vmatpush.bf16.xpose.msrb.mxu1 %v4628_v3  ;;  %v3864_v2 = vor.u32 %v4776_v50, %v3863_v49  ;;  %v1221_v3 = vld [vmem:[#allocation1 + $0x2d] sm:$0xff]  ;;  %v4401_v13 = vld [vmem:[%s5776_s19 + $0x5d0] sm:$0xf0] }
 0x286   : > { %3190 = vmatpush.bf16.xpose.msrb.mxu2 %v4632_v4  ;;  %3155 = vmatmul.bf16.vlgmr.msra.gmra.mxu3 %v1219_v21  ;;  %v1223_v4 = vld [vmem:[#allocation1 + $0x3f] sm:$0xff]  ;;  %v4874_v21 = vld [vmem:[%s5776_s19 + $0x4cc] sm:$0xf]  ;;  %v4745_v49 = vld [vmem:[%s5776_s19 + $0xc4] sm:$0xf] }
 0x287   : > { %3203 = vmatpush.bf16.xpose.msrb.mxu3 %v4636_v5  ;;  %3142 = vmatmul.bf16.vlgmr.msra.gmra.mxu2 %v1218_v15  ;;  %v906_v5 = vld [vmem:[%s5774_s18 + $0x30] sm:$0xff]  ;;  %v4905_v15 = vld [vmem:[%s5776_s19 + $0x5bc] sm:$0xf0] }
 0x288   : > { %1225 = vst [vmem:[#allocation1] ss:$9 sm:$0xff] %v906_v5  ;;  %v3873_v50 = vld [vmem:[%s5776_s19 + $0x1c0] sm:$0xf0] }
 0x289   : > { %v2948_v29 = vpop.f32.mrf.mxu3  ;;  %v2911_v30 = vpop.f32.mrf.mxu0  ;;  %v3876_v62 = vor.u32 %v4745_v49, %v3873_v50  ;;  %v3889_v49 = vld [vmem:[%s5776_s19 + $0x1d0] sm:$0xf0]  ;;  %v3895_v50 = vld [vmem:[%s5776_s19 + $0xd8] sm:$0xf] }
 0x28a   : > { %v2935_v27 = vpop.f32.mrf.mxu2  ;;  %v2924_v34 = vpop.f32.mrf.mxu1 }
 0x28b   : > { %v2936_v28 = vadd.f32 %v2935_v27, %v2923_v20  ;;  %v4876_v20 = vld [vmem:[%s5776_s19 + $0x4dc] sm:$0xf] }
 0x28d   : > { %3165 = vmatpush.bf16.xpose.msrb.mxu0 %v4368_v22  ;;  %3178 = vmatpush.bf16.xpose.msrb.mxu1 %v4372_v23  ;;  %v4393_v22 = vld [vmem:[%s5776_s19 + $0x5c8] sm:$0xf0]  ;;  %v4384_v23 = vor.u32 %v4905_v15, %v4383_v14  ;;  %v2949_v35 = vadd.f32 %v2948_v29, %v2936_v28  ;;  %v4407_v14 = vld [vmem:[%s5776_s19 + $0x4d8] sm:$0xf] }
 0x28e   : > { %3191 = vmatpush.bf16.xpose.msrb.mxu2 %v4376_v24  ;;  %v4388_v24 = vor.u32 %v4873_v16, %v4385_v17  ;;  %v4396_v26 = vor.u32 %v4874_v21, %v4393_v22  ;;  %v4908_v17 = vld [vmem:[%s5776_s19 + $0x5d4] sm:$0xf0]  ;;  %v4409_v21 = vld [vmem:[%s5776_s19 + $0x5d8] sm:$0xf0] }
 0x28f   : > { %3204 = vmatpush.bf16.xpose.msrb.mxu3 %v4380_v25  ;;  %v4392_v25 = vor.u32 %v4906_v19, %v4391_v18  ;;  %v1226_v15 = vld [vmem:[#allocation1] sm:$0xff]  ;;  %v1228_v16 = vld [vmem:[#allocation1 + $0x12] sm:$0xff]  ;;  %v1227_v19 = vld [vmem:[#allocation1 + $0x9] sm:$0xff] }
 0x290   : > { %v1229_v22 = vld [vmem:[#allocation1 + $0x1b] sm:$0xff] }
 0x291   : > { %v2950_v48 = vpop.f32.mrf.mxu3 }
 0x292   : > { %v2937_v45 = vpop.f32.mrf.mxu2  ;;  %v4747_v48 = vld [vmem:[%s5776_s19 + $0xd4] sm:$0xf] }
 0x293   : > { %v3887_v45 = vld [vmem:[%s5776_s19 + $0xd0] sm:$0xf] }
 0x295   : > { %3166 = vmatpush.bf16.xpose.msrb.mxu0 %v4112_v40  ;;  %3179 = vmatpush.bf16.xpose.msrb.mxu1 %v4116_v41  ;;  %v4137_v40 = vld [vmem:[%s5776_s19 + $0x3c8] sm:$0xf0]  ;;  %v4128_v41 = vor.u32 %v4841_v32, %v4127_v31  ;;  %v4143_v31 = vld [vmem:[%s5776_s19 + $0x2d0] sm:$0xf] }
 0x296   : > { %3192 = vmatpush.bf16.xpose.msrb.mxu2 %v4120_v42  ;;  %v4132_v42 = vor.u32 %v4809_v33, %v4129_v36  ;;  %v4140_v44 = vor.u32 %v4810_v39, %v4137_v40  ;;  %v4843_v32 = vld [vmem:[%s5776_s19 + $0x3cc] sm:$0xf0]  ;;  %v4811_v33 = vld [vmem:[%s5776_s19 + $0x2d4] sm:$0xf]  ;;  %v4812_v39 = vld [vmem:[%s5776_s19 + $0x2dc] sm:$0xf] }
 0x297   : > { %3205 = vmatpush.bf16.xpose.msrb.mxu3 %v4124_v43  ;;  %v4136_v43 = vor.u32 %v4842_v38, %v4135_v37  ;;  %v4145_v36 = vld [vmem:[%s5776_s19 + $0x3d0] sm:$0xf0]  ;;  %v4151_v37 = vld [vmem:[%s5776_s19 + $0x2d8] sm:$0xf]  ;;  %v4153_v40 = vld [vmem:[%s5776_s19 + $0x3d8] sm:$0xf0] }
 0x298   : > { %v4844_v38 = vld [vmem:[%s5776_s19 + $0x3d4] sm:$0xf0] }
 0x29d   : > { %3167 = vmatpush.bf16.xpose.msrb.mxu0 %v3856_v61  ;;  %3180 = vmatpush.bf16.xpose.msrb.mxu1 %v3860_v1  ;;  %v4972_v61 = vld [vmem:[%s5776_s19 + $0x7d4] sm:$0xf0]  ;;  %v4665_v1 = vld [vmem:[%s5776_s19 + $0x7d8] sm:$0xf0] }
 0x29e   : > { %3193 = vmatpush.bf16.xpose.msrb.mxu2 %v3864_v2  ;;  %v3884_v2 = vor.u32 %v4746_v53, %v3881_v54  ;;  %v4664_v5 = vor.u32 %v4972_v61, %v4663_v60  ;;  %v4748_v53 = vld [vmem:[%s5776_s19 + $0xdc] sm:$0xf]  ;;  %v4974_v60 = vld [vmem:[%s5776_s19 + $0x7e4] sm:$0xf0]  ;;  %v4942_v61 = vld [vmem:[%s5776_s19 + $0x6ec] sm:$0xf] }
 0x29f   : > { %3206 = vmatpush.bf16.xpose.msrb.mxu3 %v3868_v6  ;;  %v3897_v54 = vld [vmem:[%s5776_s19 + $0x1d8] sm:$0xf0] }
 0x2a1   : > { %v2974_v11 = vpop.f32.mrf.mxu1 }
 0x2a4   : > { %3168 = vmatmul.bf16.vlgmr.msrb.gmra.mxu0 %v1220_v63  ;;  %3181 = vmatmul.bf16.vlgmr.msrb.gmra.mxu1 %v1221_v3  ;;  %v3880_v63 = vor.u32 %v4778_v52, %v3879_v51  ;;  %v4656_v3 = vor.u32 %v4971_v56, %v4655_v55  ;;  %v4780_v51 = vld [vmem:[%s5776_s19 + $0x1d4] sm:$0xf0]  ;;  %v4671_v55 = vld [vmem:[%s5776_s19 + $0x6e0] sm:$0xf] }
 0x2a5   : > { %3216 = vmatpush.bf16.xpose.msra.mxu0 %v4640_v7  ;;  %3229 = vmatpush.bf16.xpose.msra.mxu1 %v4644_v8  ;;  %v2961_v7 = vpop.f32.mrf.mxu0  ;;  %v4399_v8 = vld [vmem:[%s5776_s19 + $0x4d0] sm:$0xf]  ;;  %v4973_v56 = vld [vmem:[%s5776_s19 + $0x7dc] sm:$0xf0] }
 0x2a6   : > { %3242 = vmatpush.bf16.xpose.msra.mxu2 %v4648_v9  ;;  %3207 = vmatmul.bf16.vlgmr.msrb.gmra.mxu3 %v1223_v4  ;;  %v4660_v4 = vor.u32 %v4939_v57, %v4657_v59  ;;  %v4907_v9 = vld [vmem:[%s5776_s19 + $0x5cc] sm:$0xf0]  ;;  %v4941_v57 = vld [vmem:[%s5776_s19 + $0x6e4] sm:$0xf]  ;;  %v4679_v59 = vld [vmem:[%s5776_s19 + $0x6e8] sm:$0xf] }
 0x2a7   : > { %3255 = vmatpush.bf16.xpose.msra.mxu3 %v4652_v10  ;;  %3194 = vmatmul.bf16.vlgmr.msrb.gmra.mxu2 %v1222_v0  ;;  %v4940_v0 = vld [vmem:[%s5776_s19 + $0x6dc] sm:$0xf]  ;;  %v2962_v10 = vadd.f32 %v2961_v7, %v2949_v35  ;;  %v3900_v7 = vor.u32 %v4748_v53, %v3897_v54  ;;  %v4782_v53 = vld [vmem:[%s5776_s19 + $0x1e4] sm:$0xf0]  ;;  %v4750_v54 = vld [vmem:[%s5776_s19 + $0xec] sm:$0xf] }
 0x2a8   : > { %v4668_v6 = vor.u32 %v4940_v0, %v4665_v1  ;;  %v1230_v0 = vld [vmem:[#allocation1 + $0x24] sm:$0xff]  ;;  %v1232_v1 = vld [vmem:[#allocation1 + $0x36] sm:$0xff] }
 0x2a9   : > { %v2975_v18 = vadd.f32 %v2974_v11, %v2962_v10  ;;  %v3000_v29 = vpop.f32.mrf.mxu3  ;;  %v2976_v34 = vpop.f32.mrf.mxu1  ;;  %v4680_v10 = vor.u32 %v4974_v60, %v4679_v59  ;;  %v4689_v60 = vld [vmem:[%s5776_s19 + $0x7f0] sm:$0xf0] }
 0x2aa   : > { %v2987_v27 = vpop.f32.mrf.mxu2  ;;  %v4813_v34 = vld [vmem:[%s5776_s19 + $0x2e4] sm:$0xf] }
 0x2ab   : > { %v2988_v28 = vadd.f32 %v2987_v27, %v2975_v18  ;;  %v4417_v18 = vld [vmem:[%s5776_s19 + $0x5e0] sm:$0xf0] }
 0x2ad   : > { %3217 = vmatpush.bf16.xpose.msra.mxu0 %v4384_v23  ;;  %3230 = vmatpush.bf16.xpose.msra.mxu1 %v4388_v24  ;;  %v4400_v23 = vor.u32 %v4907_v9, %v4399_v8  ;;  %v4404_v24 = vor.u32 %v4875_v12, %v4401_v13  ;;  %v2963_v30 = vpop.f32.mrf.mxu0  ;;  %v3001_v35 = vadd.f32 %v3000_v29, %v2988_v28 }
 0x2ae   : > { %3243 = vmatpush.bf16.xpose.msra.mxu2 %v4392_v25  ;;  %v4408_v25 = vor.u32 %v4908_v17, %v4407_v14  ;;  %v4672_v8 = vor.u32 %v4973_v56, %v4671_v55  ;;  %v4877_v17 = vld [vmem:[%s5776_s19 + $0x4e4] sm:$0xf]  ;;  %v3913_v55 = vld [vmem:[%s5776_s19 + $0x1e8] sm:$0xf0]  ;;  %v4687_v56 = vld [vmem:[%s5776_s19 + $0x6f0] sm:$0xf] }
 0x2af   : > { %3256 = vmatpush.bf16.xpose.msra.mxu3 %v4396_v26  ;;  %v4412_v26 = vor.u32 %v4876_v20, %v4409_v21  ;;  %v4910_v20 = vld [vmem:[%s5776_s19 + $0x5e4] sm:$0xf0] }
 0x2b1   : > { %v3002_v52 = vpop.f32.mrf.mxu3 }
 0x2b2   : > { %v2989_v47 = vpop.f32.mrf.mxu2  ;;  %v3911_v52 = vld [vmem:[%s5776_s19 + $0xe8] sm:$0xf] }
 0x2b3   : > { %v3903_v47 = vld [vmem:[%s5776_s19 + $0xe0] sm:$0xf] }
 0x2b5   : > { %3218 = vmatpush.bf16.xpose.msra.mxu0 %v4128_v41  ;;  %3231 = vmatpush.bf16.xpose.msra.mxu1 %v4132_v42  ;;  %v4144_v41 = vor.u32 %v4843_v32, %v4143_v31  ;;  %v4148_v42 = vor.u32 %v4811_v33, %v4145_v36  ;;  %v4159_v32 = vld [vmem:[%s5776_s19 + $0x2e0] sm:$0xf] }
 0x2b6   : > { %3244 = vmatpush.bf16.xpose.msra.mxu2 %v4136_v43  ;;  %v4152_v43 = vor.u32 %v4844_v38, %v4151_v37  ;;  %v4845_v33 = vld [vmem:[%s5776_s19 + $0x3dc] sm:$0xf0]  ;;  %v4161_v37 = vld [vmem:[%s5776_s19 + $0x3e0] sm:$0xf0]  ;;  %v4167_v38 = vld [vmem:[%s5776_s19 + $0x2e8] sm:$0xf] }
 0x2b7   : > { %3257 = vmatpush.bf16.xpose.msra.mxu3 %v4140_v44  ;;  %v4156_v44 = vor.u32 %v4812_v39, %v4153_v40  ;;  %v4846_v39 = vld [vmem:[%s5776_s19 + $0x3e4] sm:$0xf0]  ;;  %v4814_v40 = vld [vmem:[%s5776_s19 + $0x2ec] sm:$0xf] }
 0x2bd   : > { %3219 = vmatpush.bf16.xpose.msra.mxu0 %v3872_v58  ;;  %3232 = vmatpush.bf16.xpose.msra.mxu1 %v3876_v62  ;;  %v4673_v58 = vld [vmem:[%s5776_s19 + $0x7e0] sm:$0xf0]  ;;  %v3888_v62 = vor.u32 %v4779_v46, %v3887_v45 }
 0x2be   : > { %3245 = vmatpush.bf16.xpose.msra.mxu2 %v3880_v63  ;;  %v4681_v63 = vld [vmem:[%s5776_s19 + $0x7e8] sm:$0xf0]  ;;  %v4676_v9 = vor.u32 %v4941_v57, %v4673_v58  ;;  %v4975_v57 = vld [vmem:[%s5776_s19 + $0x7ec] sm:$0xf0]  ;;  %v4943_v58 = vld [vmem:[%s5776_s19 + $0x6f4] sm:$0xf] }
 0x2bf   : > { %3258 = vmatpush.bf16.xpose.msra.mxu3 %v3884_v2  ;;  %v3892_v2 = vor.u32 %v4747_v48, %v3889_v49  ;;  %v4684_v11 = vor.u32 %v4942_v61, %v4681_v63  ;;  %v4781_v48 = vld [vmem:[%s5776_s19 + $0x1dc] sm:$0xf0]  ;;  %v4695_v61 = vld [vmem:[%s5776_s19 + $0x6f8] sm:$0xf] }
 0x2c0   : > { %v3904_v59 = vor.u32 %v4781_v48, %v3903_v47  ;;  %v3919_v48 = vld [vmem:[%s5776_s19 + $0xf0] sm:$0xf] }
 0x2c1   : > { %v3013_v12 = vpop.f32.mrf.mxu0  ;;  %v3026_v14 = vpop.f32.mrf.mxu1 }
 0x2c2   : > { %v3014_v13 = vadd.f32 %v3013_v12, %v3001_v35 }
 0x2c4   : > { %3220 = vmatmul.bf16.vlgmr.msra.gmra.mxu0 %v1226_v15  ;;  %3233 = vmatmul.bf16.vlgmr.msra.gmra.mxu1 %v1227_v19  ;;  %v4415_v15 = vld [vmem:[%s5776_s19 + $0x4e0] sm:$0xf]  ;;  %v4423_v19 = vld [vmem:[%s5776_s19 + $0x4e8] sm:$0xf]  ;;  %v3027_v21 = vadd.f32 %v3026_v14, %v3014_v13  ;;  %v4879_v13 = vld [vmem:[%s5776_s19 + $0x4f4] sm:$0xf] }
 0x2c5   : > { %3268 = vmatpush.bf16.xpose.msrb.mxu0 %v4656_v3  ;;  %3281 = vmatpush.bf16.xpose.msrb.mxu1 %v4660_v4  ;;  %v3896_v3 = vor.u32 %v4780_v51, %v3895_v50  ;;  %v1231_v4 = vld [vmem:[#allocation1 + $0x2d] sm:$0xff]  ;;  %v4433_v14 = vld [vmem:[%s5776_s19 + $0x5f0] sm:$0xf0] }
 0x2c6   : > { %3294 = vmatpush.bf16.xpose.msrb.mxu2 %v4664_v5  ;;  %3259 = vmatmul.bf16.vlgmr.msra.gmra.mxu3 %v1229_v22  ;;  %v1233_v5 = vld [vmem:[#allocation1 + $0x3f] sm:$0xff]  ;;  %v4878_v22 = vld [vmem:[%s5776_s19 + $0x4ec] sm:$0xf]  ;;  %v4749_v50 = vld [vmem:[%s5776_s19 + $0xe4] sm:$0xf] }
 0x2c7   : > { %3307 = vmatpush.bf16.xpose.msrb.mxu3 %v4668_v6  ;;  %3246 = vmatmul.bf16.vlgmr.msra.gmra.mxu2 %v1228_v16  ;;  %v907_v6 = vld [vmem:[%s5774_s18 + $0x38] sm:$0xff]  ;;  %v4909_v16 = vld [vmem:[%s5776_s19 + $0x5dc] sm:$0xf0]  ;;  %v3905_v51 = vld [vmem:[%s5776_s19 + $0x1e0] sm:$0xf0] }
 0x2c8   : > { %1235 = vst [vmem:[#allocation1] ss:$9 sm:$0xff] %v907_v6  ;;  %v3908_v63 = vor.u32 %v4749_v50, %v3905_v51  ;;  %v4751_v50 = vld [vmem:[%s5776_s19 + $0xf4] sm:$0xf] }
 0x2c9   : > { %v3052_v30 = vpop.f32.mrf.mxu3  ;;  %v3015_v31 = vpop.f32.mrf.mxu0  ;;  %v3921_v51 = vld [vmem:[%s5776_s19 + $0x1f0] sm:$0xf0] }
 0x2ca   : > { %v3039_v28 = vpop.f32.mrf.mxu2  ;;  %v3028_v35 = vpop.f32.mrf.mxu1 }
 0x2cb   : > { %v3040_v29 = vadd.f32 %v3039_v28, %v3027_v21  ;;  %v4880_v21 = vld [vmem:[%s5776_s19 + $0x4fc] sm:$0xf] }
 0x2cd   : > { %3269 = vmatpush.bf16.xpose.msrb.mxu0 %v4400_v23  ;;  %3282 = vmatpush.bf16.xpose.msrb.mxu1 %v4404_v24  ;;  %v4425_v23 = vld [vmem:[%s5776_s19 + $0x5e8] sm:$0xf0]  ;;  %v4416_v24 = vor.u32 %v4909_v16, %v4415_v15  ;;  %v3053_v36 = vadd.f32 %v3052_v30, %v3040_v29  ;;  %v4439_v15 = vld [vmem:[%s5776_s19 + $0x4f8] sm:$0xf] }
 0x2ce   : > { %3295 = vmatpush.bf16.xpose.msrb.mxu2 %v4408_v25  ;;  %v4420_v25 = vor.u32 %v4877_v17, %v4417_v18  ;;  %v4428_v27 = vor.u32 %v4878_v22, %v4425_v23  ;;  %v4912_v18 = vld [vmem:[%s5776_s19 + $0x5f4] sm:$0xf0]  ;;  %v4441_v22 = vld [vmem:[%s5776_s19 + $0x5f8] sm:$0xf0] }
 0x2cf   : > { %3308 = vmatpush.bf16.xpose.msrb.mxu3 %v4412_v26  ;;  %v4424_v26 = vor.u32 %v4910_v20, %v4423_v19  ;;  %v1236_v16 = vld [vmem:[#allocation1] sm:$0xff]  ;;  %v1238_v17 = vld [vmem:[#allocation1 + $0x12] sm:$0xff]  ;;  %v1237_v20 = vld [vmem:[#allocation1 + $0x9] sm:$0xff] }
 0x2d0   : > { %v1239_v23 = vld [vmem:[#allocation1 + $0x1b] sm:$0xff] }
 0x2d1   : > { %v3054_v49 = vpop.f32.mrf.mxu3 }
 0x2d2   : > { %v3041_v46 = vpop.f32.mrf.mxu2  ;;  %v4783_v49 = vld [vmem:[%s5776_s19 + $0x1ec] sm:$0xf0] }
 0x2d5   : > { %3270 = vmatpush.bf16.xpose.msrb.mxu0 %v4144_v41  ;;  %3283 = vmatpush.bf16.xpose.msrb.mxu1 %v4148_v42  ;;  %v4169_v41 = vld [vmem:[%s5776_s19 + $0x3e8] sm:$0xf0]  ;;  %v4160_v42 = vor.u32 %v4845_v33, %v4159_v32  ;;  %v4175_v32 = vld [vmem:[%s5776_s19 + $0x2f0] sm:$0xf] }
 0x2d6   : > { %3296 = vmatpush.bf16.xpose.msrb.mxu2 %v4152_v43  ;;  %v4164_v43 = vor.u32 %v4813_v34, %v4161_v37  ;;  %v4172_v45 = vor.u32 %v4814_v40, %v4169_v41  ;;  %v4847_v33 = vld [vmem:[%s5776_s19 + $0x3ec] sm:$0xf0]  ;;  %v4815_v34 = vld [vmem:[%s5776_s19 + $0x2f4] sm:$0xf]  ;;  %v4816_v40 = vld [vmem:[%s5776_s19 + $0x2fc] sm:$0xf] }
 0x2d7   : > { %3309 = vmatpush.bf16.xpose.msrb.mxu3 %v4156_v44  ;;  %v4168_v44 = vor.u32 %v4846_v39, %v4167_v38  ;;  %v4177_v37 = vld [vmem:[%s5776_s19 + $0x3f0] sm:$0xf0]  ;;  %v4183_v38 = vld [vmem:[%s5776_s19 + $0x2f8] sm:$0xf]  ;;  %v4185_v41 = vld [vmem:[%s5776_s19 + $0x3f8] sm:$0xf0] }
 0x2d8   : > { %v4848_v39 = vld [vmem:[%s5776_s19 + $0x3f4] sm:$0xf0] }
 0x2dd   : > { %3271 = vmatpush.bf16.xpose.msrb.mxu0 %v3888_v62  ;;  %3284 = vmatpush.bf16.xpose.msrb.mxu1 %v3892_v2  ;;  %v4976_v62 = vld [vmem:[%s5776_s19 + $0x7f4] sm:$0xf0]  ;;  %v4697_v2 = vld [vmem:[%s5776_s19 + $0x7f8] sm:$0xf0] }
 0x2de   : > { %3297 = vmatpush.bf16.xpose.msrb.mxu2 %v3896_v3  ;;  %v3916_v3 = vor.u32 %v4750_v54, %v3913_v55  ;;  %v4696_v6 = vor.u32 %v4976_v62, %v4695_v61  ;;  %v4752_v54 = vld [vmem:[%s5776_s19 + $0xfc] sm:$0xf] }
 0x2df   : > { %3310 = vmatpush.bf16.xpose.msrb.mxu3 %v3900_v7  ;;  %v3929_v55 = vld [vmem:[%s5776_s19 + $0x1f8] sm:$0xf0] }
 0x2e1   : > { %v3078_v12 = vpop.f32.mrf.mxu1 }
 0x2e4   : > { %3272 = vmatmul.bf16.vlgmr.msrb.gmra.mxu0 %v1230_v0  ;;  %3285 = vmatmul.bf16.vlgmr.msrb.gmra.mxu1 %v1231_v4  ;;  %v3912_v0 = vor.u32 %v4782_v53, %v3911_v52  ;;  %v4688_v4 = vor.u32 %v4975_v57, %v4687_v56  ;;  %v3927_v52 = vld [vmem:[%s5776_s19 + $0xf8] sm:$0xf]  ;;  %v3920_v56 = vor.u32 %v4783_v49, %v3919_v48 }
 0x2e5   : > { %3320 = vmatpush.bf16.xpose.msra.mxu0 %v4672_v8  ;;  %3333 = vmatpush.bf16.xpose.msra.mxu1 %v4676_v9  ;;  %v3065_v8 = vpop.f32.mrf.mxu0  ;;  %v4431_v9 = vld [vmem:[%s5776_s19 + $0x4f0] sm:$0xf]  ;;  %v4784_v53 = vld [vmem:[%s5776_s19 + $0x1f4] sm:$0xf0]  ;;  %v3924_v57 = vor.u32 %v4751_v50, %v3921_v51 }
 0x2e6   : > { %3346 = vmatpush.bf16.xpose.msra.mxu2 %v4680_v10  ;;  %3311 = vmatmul.bf16.vlgmr.msrb.gmra.mxu3 %v1233_v5  ;;  %v4692_v5 = vor.u32 %v4943_v58, %v4689_v60  ;;  %v4911_v10 = vld [vmem:[%s5776_s19 + $0x5ec] sm:$0xf0]  ;;  %v3928_v58 = vor.u32 %v4784_v53, %v3927_v52 }
 0x2e7   : > { %3359 = vmatpush.bf16.xpose.msra.mxu3 %v4684_v11  ;;  %3298 = vmatmul.bf16.vlgmr.msrb.gmra.mxu2 %v1232_v1  ;;  %v4944_v1 = vld [vmem:[%s5776_s19 + $0x6fc] sm:$0xf]  ;;  %v3066_v11 = vadd.f32 %v3065_v8, %v3053_v36 }
 0x2e8   : > { %v4700_v7 = vor.u32 %v4944_v1, %v4697_v2  ;;  %v1242_v1 = vld [vmem:[#allocation1 + $0x36] sm:$0xff] }
 0x2e9   : > { %v3079_v19 = vadd.f32 %v3078_v12, %v3066_v11  ;;  %v3104_v30 = vpop.f32.mrf.mxu3  ;;  %v3080_v35 = vpop.f32.mrf.mxu1 }
 0x2ea   : > { %v3091_v28 = vpop.f32.mrf.mxu2 }
 0x2eb   : > { %v3092_v29 = vadd.f32 %v3091_v28, %v3079_v19 }
 0x2ed   : > { %3321 = vmatpush.bf16.xpose.msra.mxu0 %v4416_v24  ;;  %3334 = vmatpush.bf16.xpose.msra.mxu1 %v4420_v25  ;;  %v4432_v24 = vor.u32 %v4911_v10, %v4431_v9  ;;  %v4436_v25 = vor.u32 %v4879_v13, %v4433_v14  ;;  %v3067_v31 = vpop.f32.mrf.mxu0  ;;  %v3105_v36 = vadd.f32 %v3104_v30, %v3092_v29 }
 0x2ee   : > { %3347 = vmatpush.bf16.xpose.msra.mxu2 %v4424_v26  ;;  %v4440_v26 = vor.u32 %v4912_v18, %v4439_v15 }
 0x2ef   : > { %3360 = vmatpush.bf16.xpose.msra.mxu3 %v4428_v27  ;;  %v4444_v27 = vor.u32 %v4880_v21, %v4441_v22 }
 0x2f1   : > { %v3106_v47 = vpop.f32.mrf.mxu3 }
 0x2f2   : > { %v3093_v46 = vpop.f32.mrf.mxu2 }
 0x2f5   : > { %3322 = vmatpush.bf16.xpose.msra.mxu0 %v4160_v42  ;;  %3335 = vmatpush.bf16.xpose.msra.mxu1 %v4164_v43  ;;  %v4176_v42 = vor.u32 %v4847_v33, %v4175_v32  ;;  %v4180_v43 = vor.u32 %v4815_v34, %v4177_v37 }
 0x2f6   : > { %3348 = vmatpush.bf16.xpose.msra.mxu2 %v4168_v44  ;;  %v4184_v44 = vor.u32 %v4848_v39, %v4183_v38 }
 0x2f7   : > { %3361 = vmatpush.bf16.xpose.msra.mxu3 %v4172_v45  ;;  %v4188_v45 = vor.u32 %v4816_v40, %v4185_v41 }
 0x2fd   : > { %3323 = vmatpush.bf16.xpose.msra.mxu0 %v3904_v59  ;;  %3336 = vmatpush.bf16.xpose.msra.mxu1 %v3908_v63  ;;  %v3932_v59 = vor.u32 %v4752_v54, %v3929_v55  ;;  %v1240_v63 = vld [vmem:[#allocation1 + $0x24] sm:$0xff] }
 0x2fe   : > { %3349 = vmatpush.bf16.xpose.msra.mxu2 %v3912_v0  ;;  %v1241_v0 = vld [vmem:[#allocation1 + $0x2d] sm:$0xff] }
 0x2ff   : > { %3362 = vmatpush.bf16.xpose.msra.mxu3 %v3916_v3  ;;  %v1243_v3 = vld [vmem:[#allocation1 + $0x3f] sm:$0xff] }
 0x301   : > { %v3117_v60 = vpop.f32.mrf.mxu0  ;;  %v3130_v62 = vpop.f32.mrf.mxu1 }
 0x302   : > { %v3118_v61 = vadd.f32 %v3117_v60, %v3105_v36 }
 0x304   : > { %3324 = vmatmul.bf16.vlgmr.msra.gmra.mxu0 %v1236_v16  ;;  %3337 = vmatmul.bf16.vlgmr.msra.gmra.mxu1 %v1237_v20  ;;  %v3131_v2 = vadd.f32 %v3130_v62, %v3118_v61 }
 0x305   : > { %3372 = vmatpush.bf16.xpose.msrb.mxu0 %v4688_v4  ;;  %3385 = vmatpush.bf16.xpose.msrb.mxu1 %v4692_v5 }
 0x306   : > { %3398 = vmatpush.bf16.xpose.msrb.mxu2 %v4696_v6  ;;  %3363 = vmatmul.bf16.vlgmr.msra.gmra.mxu3 %v1239_v23 }
 0x307   : > { %3411 = vmatpush.bf16.xpose.msrb.mxu3 %v4700_v7  ;;  %3350 = vmatmul.bf16.vlgmr.msra.gmra.mxu2 %v1238_v17 }
 0x309   : > { %v3156_v6 = vpop.f32.mrf.mxu3  ;;  %v3119_v7 = vpop.f32.mrf.mxu0 }
 0x30a   : > { %v3143_v4 = vpop.f32.mrf.mxu2  ;;  %v3132_v8 = vpop.f32.mrf.mxu1 }
 0x30b   : > { %v3144_v5 = vadd.f32 %v3143_v4, %v3131_v2  ;;  %v899_v4 = vld [vmem:[#allocation2] sm:$0x3] }
 0x30d   : > { %3373 = vmatpush.bf16.xpose.msrb.mxu0 %v4432_v24  ;;  %3386 = vmatpush.bf16.xpose.msrb.mxu1 %v4436_v25  ;;  %v3157_v9 = vadd.f32 %v3156_v6, %v3144_v5 }
 0x30e   : > { %3399 = vmatpush.bf16.xpose.msrb.mxu2 %v4440_v26 }
 0x30f   : > { %3412 = vmatpush.bf16.xpose.msrb.mxu3 %v4444_v27 }
 0x311   : > { %v3158_v11 = vpop.f32.mrf.mxu3 }
 0x312   : > { %v3145_v10 = vpop.f32.mrf.mxu2 }
 0x315   : > { %3374 = vmatpush.bf16.xpose.msrb.mxu0 %v4176_v42  ;;  %3387 = vmatpush.bf16.xpose.msrb.mxu1 %v4180_v43 }
 0x316   : > { %3400 = vmatpush.bf16.xpose.msrb.mxu2 %v4184_v44 }
 0x317   : > { %3413 = vmatpush.bf16.xpose.msrb.mxu3 %v4188_v45 }
 0x31d   : > { %3375 = vmatpush.bf16.xpose.msrb.mxu0 %v3920_v56  ;;  %3388 = vmatpush.bf16.xpose.msrb.mxu1 %v3924_v57 }
 0x31e   : > { %3401 = vmatpush.bf16.xpose.msrb.mxu2 %v3928_v58 }
 0x31f   : > { %3414 = vmatpush.bf16.xpose.msrb.mxu3 %v3932_v59 }
 0x321   : > { %v3169_v12 = vpop.f32.mrf.mxu0  ;;  %v3182_v14 = vpop.f32.mrf.mxu1 }
 0x322   : > { %v3170_v13 = vadd.f32 %v3169_v12, %v3157_v9 }
 0x324   : > { %3376 = vmatmul.bf16.vlgmr.msrb.gmra.mxu0 %v1240_v63  ;;  %3389 = vmatmul.bf16.vlgmr.msrb.gmra.mxu1 %v1241_v0  ;;  %v3183_v15 = vadd.f32 %v3182_v14, %v3170_v13 }
 0x325   : > { %3402 = vmatmul.bf16.vlgmr.msrb.gmra.mxu2 %v1242_v1 }
 0x326   : > { %3415 = vmatmul.bf16.vlgmr.msrb.gmra.mxu3 %v1243_v3 }
 0x329   : > { %v3208_v18 = vpop.f32.mrf.mxu3  ;;  %v3171_v19 = vpop.f32.mrf.mxu0 }
 0x32a   : > { %v3195_v16 = vpop.f32.mrf.mxu2  ;;  %v3184_v20 = vpop.f32.mrf.mxu1 }
 0x32b   : > { %v3196_v17 = vadd.f32 %v3195_v16, %v3183_v15 }
 0x32d   : > { %v3209_v21 = vadd.f32 %v3208_v18, %v3196_v17 }
 0x331   : > { %v3210_v23 = vpop.f32.mrf.mxu3 }
 0x332   : > { %v3197_v22 = vpop.f32.mrf.mxu2 }
 0x341   : > { %v3221_v24 = vpop.f32.mrf.mxu0  ;;  %v3234_v25 = vpop.f32.mrf.mxu1 }
 0x342   : > { %v3222_v40 = vadd.f32 %v3221_v24, %v3209_v21 }
 0x344   : > { %v3235_v41 = vadd.f32 %v3234_v25, %v3222_v40 }
 0x349   : > { %v3260_v27 = vpop.f32.mrf.mxu3  ;;  %v3223_v28 = vpop.f32.mrf.mxu0 }
 0x34a   : > { %v3247_v26 = vpop.f32.mrf.mxu2  ;;  %v3236_v29 = vpop.f32.mrf.mxu1 }
 0x34b   : > { %v3248_v42 = vadd.f32 %v3247_v26, %v3235_v41 }
 0x34d   : > { %v3261_v45 = vadd.f32 %v3260_v27, %v3248_v42 }
 0x351   : > { %v3262_v31 = vpop.f32.mrf.mxu3 }
 0x352   : > { %v3249_v30 = vpop.f32.mrf.mxu2 }
 0x361   : > { %v3273_v32 = vpop.f32.mrf.mxu0  ;;  %v3286_v33 = vpop.f32.mrf.mxu1 }
 0x362   : > { %v3274_v46 = vadd.f32 %v3273_v32, %v3261_v45 }
 0x364   : > { %v3287_v48 = vadd.f32 %v3286_v33, %v3274_v46 }
 0x369   : > { %v3312_v35 = vpop.f32.mrf.mxu3  ;;  %v3275_v36 = vpop.f32.mrf.mxu0 }
 0x36a   : > { %v3299_v34 = vpop.f32.mrf.mxu2  ;;  %v3288_v37 = vpop.f32.mrf.mxu1 }
 0x36b   : > { %v3300_v52 = vadd.f32 %v3299_v34, %v3287_v48 }
 0x36d   : > { %v3313_v53 = vadd.f32 %v3312_v35, %v3300_v52 }
 0x371   : > { %v3314_v39 = vpop.f32.mrf.mxu3 }
 0x372   : > { %v3301_v38 = vpop.f32.mrf.mxu2 }
 0x381   : > { %v3325_v43 = vpop.f32.mrf.mxu0  ;;  %v3338_v44 = vpop.f32.mrf.mxu1 }
 0x382   : > { %v3326_v55 = vadd.f32 %v3325_v43, %v3313_v53 }
 0x384   : > { %v3339_v57 = vadd.f32 %v3338_v44, %v3326_v55 }
 0x389   : > { %v3364_v49 = vpop.f32.mrf.mxu3  ;;  %v3327_v50 = vpop.f32.mrf.mxu0 }
 0x38a   : > { %v3351_v47 = vpop.f32.mrf.mxu2  ;;  %v3340_v51 = vpop.f32.mrf.mxu1 }
 0x38b   : > { %v3352_v58 = vadd.f32 %v3351_v47, %v3339_v57 }
 0x38d   : > { %v3365_v59 = vadd.f32 %v3364_v49, %v3352_v58 }
 0x391   : > { %v3366_v56 = vpop.f32.mrf.mxu3 }
 0x392   : > { %v3353_v54 = vpop.f32.mrf.mxu2 }
 0x3a1   : > { %v3377_v60 = vpop.f32.mrf.mxu0  ;;  %v3390_v61 = vpop.f32.mrf.mxu1 }
 0x3a2   : > { %v3378_v62 = vadd.f32 %v3377_v60, %v3365_v59 }
 0x3a4   : > { %v3391_v63 = vadd.f32 %v3390_v61, %v3378_v62 }
 0x3a8   : > { %v3403_v0 = vpop.f32.mrf.mxu2 }
 0x3a9   : > { %v3404_v1 = vadd.f32 %v3403_v0, %v3391_v63  ;;  %v3416_v2 = vpop.f32.mrf.mxu3  ;;  %v3379_v3 = vpop.f32.mrf.mxu0 }
 0x3aa   : > { %v3392_v5 = vpop.f32.mrf.mxu1 }
 0x3ab   : > { %v3417_v6 = vadd.f32 %v3416_v2, %v3404_v1 }
 0x3ad   : > { %v3420_v7 = vadd.f32 %v3417_v6, %v899_v4  ;;  %3426 = sbr.rel (%p4701_p10) target bundleno = 1474 (0x5c2), region = 83 }
 0x3af   : > { %3422 = vst.msk [vmem:[#allocation2] sm:$0x3] %vm3421_vm1, %v3420_v7 }
 0x3b0   : > { %v3405_v8 = vpop.f32.mrf.mxu2 }
 0x3b1   : > { %v3418_v9 = vpop.f32.mrf.mxu3 }
 0x3b2   : > { %v3452_v10 = vld [vmem:[%s6370_s3] sm:$0x3]  ;;  %v4978_v28 = vld [vmem:[%s6371_s4 + $0x8] sm:$0xff]  ;;  %vm3484_vm6 = vcmask 261120   ;;  %vm3512_vm7 = vcmask 1043456   ;;  %vm3508_vm8 = vcmask 64512  }
 0x3b3   : > { %3454 = vrot.lane.b32.xlu0 %v3452_v10, %s5155_s21  ;;  %v5027_v11 = vld [vmem:[%s6369_s2] ss:$0 sm:$0xff]  ;;  %3494 = vmatpush.bf16.msra.mxu0 %v4978_v28  ;;  %vm3548_vm9 = vcmask 254976   ;;  %vm3555_vm13 = vcmask 58368  }
 0x3b4   : > { %v4977_v31 = vld [vmem:[%s6371_s4] sm:$0xff] }
 0x3b5   : > { %v3503_v35 = vld [vmem:[%s6373_s6] sm:$0xf] }
 0x3b6   : > { %v3427_v12 = vld [vmem:[#allocation2] sm:$0x3]  ;;  %v3514_v36 = vsel %vm3512_vm7, %v3503_v35, 0  ;;  %v5028_v37 = vld [vmem:[%s6372_s5] ss:$0 sm:$0xff] }
 0x3b7   : > { %v3432_v13 = vadd.f32 %v5027_v11, %v3427_v12  ;;  %3495 = vmatpush.bf16.msra.mxu0 %v4977_v31  ;;  %3523 = vmatpush.bf16.msra.mxu1 %v3514_v36  ;;  %v5029_v43 = vld [vmem:[%s6374_s7] ss:$0 sm:$0xff] }
 0x3b9   : > { %v3433_v14 = vsub.f32 0.0, %v3432_v13 }
 0x3bb   : > { %v3434_v15 = vmul.f32 1.442695, %v3433_v14 }
 0x3bd   : > { %5030 = vpow2.f32 %v3434_v15 }
 0x3c3   : > { %v5031_v16 = vpop.eup %5030 }
 0x3c4   : > { %v3436_v17 = vadd.f32 1.0, %v5031_v16 }
 0x3c6   : > { %5032 = vrcp.f32 %v3436_v17  ;;  %v3448_v22 = vand.u32 2147483648, %v3436_v17  ;;  %vm3442_vm2 = vweird.f32 %v3436_v17  ;;  %v3446_v24 = vand.u32 2147483647, %v3436_v17 }
 0x3c8   : > { %v3449_v25 = vor.u32 1.1754944e-38, %v3448_v22  ;;  %vm3447_vm5 = vcmp.eq.f32.partialorder %v3446_v24, 8.507059e+37 }
 0x3cc   : > { %v5033_v18 = vpop.eup %5032 }
 0x3cd   : > { %v3438_v19 = vmul.f32 %v5033_v18, %v3436_v17  ;;  %vm3443_vm3 = vweird.f32 %v5033_v18 }
 0x3ce   : > { %vm3444_vm4 = vmor %vm3442_vm2, %vm3443_vm3 }
 0x3cf   : > { %v3439_v20 = vsub.f32 1.0, %v3438_v19 }
 0x3d1   : > { %v3440_v21 = vmul.f32 %v5033_v18, %v3439_v20 }
 0x3d3   : > { %v3441_v23 = vadd.f32 %v5033_v18, %v3440_v21 }
 0x3d5   : > { %v3445_v26 = vsel %vm3444_vm4, %v5033_v18, %v3441_v23 }
 0x3d6   : > { %v3450_v27 = vsel %vm3447_vm5, %v3449_v25, %v3445_v26 }
 0x3d7   : > { %3551 = vrot.lane.b32.xlu1 %v3450_v27, %s5156_s24  ;;  %3549 = vst.msk [vmem:[#allocation4] sm:$0x3] %vm3548_vm9, %v3450_v27 }
 0x425   : > { %v3455_v29 = vpop.permute.xlu0 %3454 }
 0x426   : > { %v3457_v30 = vmul.f32 %v3455_v29, %v3450_v27 }
 0x428   : > { %3459 = vrot.lane.b32.xlu0 %v3457_v30, %s5156_s24 }
 0x449   : > { %v3552_v45 = vpop.permute.xlu1 %3551 }
 0x44a   : > { %3554 = vst.msk [vmem:[#allocation6] sm:$0x3] %vm3548_vm9, %v3552_v45 }
 0x49a   : > { %v3460_v32 = vpop.permute.xlu0 %3459 }
 0x49b   : > { %v3462_v33 = vadd.f32 %v3460_v32, %v3450_v27 }
 0x49d   : > { %v3463_v34 = vpack.c.bf16 %v3462_v33, %v3462_v33 }
 0x49f   : > { %4710 = vmatmul.msk.bf16.vlgmr.msra.gmra.mxu0 %vm3484_vm6, %v3463_v34 }
 0x51c   : > { %v3497_v38 = vpop.f32.mrf.mxu0 }
 0x51d   : > { %v3498_v39 = vadd.f32 %v5028_v37, %v3497_v38 }
 0x51f   : > { %v3501_v40 = vmax.f32 %v3498_v39, 0.0 }
 0x521   : > { %v3502_v41 = vpack.c.bf16 %v3501_v40, %v3501_v40 }
 0x523   : > { %4711 = vmatmul.msk.bf16.vlgmr.msra.gmra.mxu1 %vm3508_vm8, %v3502_v41 }
 0x524   : > { %v3499_v42 = vpop.f32.mrf.mxu0 }
 0x5a0   : > { %v3525_v44 = vpop.f32.mrf.mxu1 }
 0x5a1   : > { %v3526_v46 = vadd.f32 %v5029_v43, %v3525_v44 }
 0x5a3   : > { %v3529_v47 = vsub.f32 0.0, %v3526_v46 }
 0x5a5   : > { %v3530_v48 = vmul.f32 1.442695, %v3529_v47 }
 0x5a7   : > { %5034 = vpow2.f32 %v3530_v48 }
 0x5a8   : > { %v3527_v49 = vpop.f32.mrf.mxu1 }
 0x5ad   : > { %v5035_v50 = vpop.eup %5034 }
 0x5ae   : > { %v3532_v51 = vadd.f32 1.0, %v5035_v50 }
 0x5b0   : > { %5036 = vrcp.f32 %v3532_v51  ;;  %v3544_v55 = vand.u32 2147483648, %v3532_v51  ;;  %v3542_v57 = vand.u32 2147483647, %v3532_v51  ;;  %vm3538_vm11 = vweird.f32 %v3532_v51 }
 0x5b2   : > { %v3545_v59 = vor.u32 1.1754944e-38, %v3544_v55  ;;  %vm3543_vm14 = vcmp.eq.f32.partialorder %v3542_v57, 8.507059e+37 }
 0x5b6   : > { %v5037_v52 = vpop.eup %5036 }
 0x5b7   : > { %v3534_v53 = vmul.f32 %v5037_v52, %v3532_v51  ;;  %vm3539_vm10 = vweird.f32 %v5037_v52 }
 0x5b8   : > { %vm3540_vm12 = vmor %vm3538_vm11, %vm3539_vm10 }
 0x5b9   : > { %v3535_v54 = vsub.f32 1.0, %v3534_v53 }
 0x5bb   : > { %v3536_v56 = vmul.f32 %v5037_v52, %v3535_v54 }
 0x5bd   : > { %v3537_v58 = vadd.f32 %v5037_v52, %v3536_v56 }
 0x5bf   : > { %v3541_v60 = vsel %vm3540_vm12, %v5037_v52, %v3537_v58 }
 0x5c0   : > { %v3546_v61 = vsel %vm3543_vm14, %v3545_v59, %v3541_v60 }
 0x5c1   : > { %3556 = vst.msk [vmem:[#allocation8] sm:$0x3] %vm3555_vm13, %v3546_v61 }
 0x5c2 PF: > { %p4991_p11 = scmp.eq.s32.totalorder %s5231_s16, 3  ;;  %s5157_s13 = smov [#allocation6]  }
 0x5c3   : > { %s3575_s15 = sshll.u32 %s5157_s13, 4  ;;  %s3577_s23 = sshll.u32 %s6376_s9, 4  ;;  %s3576_s15 = int_to_ptr.vmem [resolvable:$true] %s3575_s15  ;;  %s3578_s23 = int_to_ptr.hbm [resolvable:$true] %s3577_s23 }
 0x5c4   : > { %4982 = dma.vmem_to_hbm [thread:$0]  (%p4991_p11), %s3576_s15, 32, %s3578_s23, [#allocation7]  }
 0x5c5   : > { %s3565_s26 = sshll.u32 %s6375_s8, 4  ;;  %s5158_s27 = smov [#allocation4]   ;;  %s3566_s26 = int_to_ptr.hbm [resolvable:$true] %s3565_s26 }
 0x5c6   : > { %s3563_s28 = sshll.u32 %s5158_s27, 4  ;;  %s5159_s29 = smov [#allocation8]   ;;  %s3564_s28 = int_to_ptr.vmem [resolvable:$true] %s3563_s28 }
 0x5c7   : > { %4980 = dma.vmem_to_hbm [thread:$0]  (%p4991_p11), %s3564_s28, 32, %s3566_s26, [#allocation5]  }
 0x5c8   : > { %s3587_s30 = sshll.u32 %s5159_s29, 4  ;;  %s3589_s18 = sshll.u32 %s6377_s10, 4  ;;  %s3588_s30 = int_to_ptr.vmem [resolvable:$true] %s3587_s30  ;;  %s3590_s18 = int_to_ptr.hbm [resolvable:$true] %s3589_s18 }
 0x5c9   : > { %4984 = dma.vmem_to_hbm [thread:$0]  (%p4991_p11), %s3588_s30, 32, %s3590_s18, [#allocation7]  }
 0x5ca   : > { %5135 = dma.done.wait (%p4991_p11), [#allocation5], 32  }
 0x5cb   : > { %5137 = vsyncadd (%p4991_p11), [#allocation5], 4294967264 }
 0x5cc   : > { %5139 = dma.done.wait (%p4991_p11), [#allocation7], 64  }
 0x5cd   : > { %5141 = vsyncadd (%p4991_p11), [#allocation7], 4294967232 }
 0x5ce PF: > { %p20_p12 = scmp.ge.s32.totalorder %s5234_s17, 6   ;;  %s6378_s13 = smov %s5148_s14 }
 0x5cf   : > { %s6379_s14 = smov %s5243_s20  ;;  %s6380_s15 = smov %s5234_s17 }
 0x5d0   :  { %22 = sbr.rel (!%p20_p12) target bundleno = 3 (0x3), region = 134 }
 0x5d5   :  { %3613 = vsyncpa [#allocation5], 1 }
 0x5d6   :  { %3615 = vsyncpa [#allocation5 + $0x1], 1 }
 0x5d7   :  { %3616 = vsyncpa [#allocation7], 1 }

</bundles_post_ra>
